<compile_context>
chip_gen: v7x
topology: tpu7x:2x2x1
jax: 0.10.0
libtpu: 0.0.40
codegen_flags: <defaults>
</compile_context>

<pallas_src>
import functools

import numpy as np

import jax
import jax.numpy as jnp
from jax import lax
from jax.experimental import pallas as pl
from jax.experimental.pallas import tpu as pltpu


# ---------------------------------------------------------------------------
# Kernel: one row-tile of one spatial scale.
#   depthwise 5x5 conv (stride 1, pad 2) + fused BN scale/shift + exact GELU
# ---------------------------------------------------------------------------
def _dwconv_bn_gelu_kernel(x_ref, top_ref, bot_ref, msk_ref, w_ref, scale_ref,
                           shift_ref, prev_ref, o_ref, buf_ref, *,
                           th, ws, pad, chunk_tok, mask_len):
    # x_ref   : (th*ws, cp)      current row-tile (flat tokens, lanes = channels)
    # top_ref : (2*ws, cp)       two rows above the tile (index-map clamped)
    # bot_ref : (2*ws, cp)       two rows below the tile (index-map clamped)
    # msk_ref : (5, mask_len, 1) per-kj column-validity masks (period ws)
    # w_ref   : (25, 1, cp)      unified 5x5 depthwise taps (row-major 5*ki+kj)
    # scale_ref, shift_ref : (1, cp)  folded BatchNorm scale / shift
    # prev_ref: HBM ref (unused; present only for output aliasing)
    # o_ref   : (th*ws, cp)
    # buf_ref : VMEM ((th+4)*ws + 2*pad, cp) f32 scratch (tile + row halo)
    del prev_ref
    f32 = jnp.float32
    ti = pl.program_id(1)
    nt = pl.num_programs(1)
    cp = o_ref.shape[-1]
    main_tok = th * ws
    halo_tok = 2 * ws
    body_tok = (th + 4) * ws
    top_lo = pad
    mid_lo = pad + halo_tok
    bot_lo = mid_lo + main_tok

    # --- assemble the row-halo'd tile into the f32 scratch ------------------
    buf_ref[0:pad, :] = jnp.zeros((pad, cp), f32)
    buf_ref[pad + body_tok:pad + body_tok + pad, :] = jnp.zeros((pad, cp), f32)
    buf_ref[mid_lo:mid_lo + main_tok, :] = x_ref[...].astype(f32)

    @pl.when(ti == 0)                       # image top: halo rows are zero pad
    def _():
        buf_ref[top_lo:top_lo + halo_tok, :] = jnp.zeros((halo_tok, cp), f32)

    @pl.when(ti > 0)
    def _():
        buf_ref[top_lo:top_lo + halo_tok, :] = top_ref[...].astype(f32)

    @pl.when(ti == nt - 1)                  # image bottom
    def _():
        buf_ref[bot_lo:bot_lo + halo_tok, :] = jnp.zeros((halo_tok, cp), f32)

    @pl.when(ti < nt - 1)
    def _():
        buf_ref[bot_lo:bot_lo + halo_tok, :] = bot_ref[...].astype(f32)

    scale = scale_ref[...].astype(f32)      # (1, cp)
    shift = shift_ref[...].astype(f32)      # (1, cp)

    # --- 5x5 depthwise conv with a register-resident chunked accumulator ----
    # Output chunk [q0, q0+chunk_tok): tap (ki, kj) reads the scratch window
    # starting at pad - 2 + kj + ki*ws + q0.  The kj column-validity mask is
    # identical for the 5 ki taps, so it is applied once to their partial sum.
    n_chunks = main_tok // chunk_tok
    for c in range(n_chunks):
        q0 = c * chunk_tok
        m0 = q0 % mask_len
        acc = jnp.zeros((chunk_tok, cp), f32)
        for kj in range(5):
            base = pad - 2 + kj + q0
            part = jnp.zeros((chunk_tok, cp), f32)
            for ki in range(5):
                lo = base + ki * ws
                part = part + buf_ref[lo:lo + chunk_tok, :] * w_ref[5 * ki + kj]
            if kj != 2:                     # center column tap is always valid
                part = part * msk_ref[kj, m0:m0 + chunk_tok, :]
            acc = acc + part
        # fused BatchNorm (eval) + exact (erf) GELU, matching torch.nn.GELU
        y = acc * scale + shift
        y = 0.5 * y * (1.0 + lax.erf(y * 0.7071067811865476))
        o_ref[q0:q0 + chunk_tok, :] = y.astype(o_ref.dtype)


# ---------------------------------------------------------------------------
# Tiling / chunking heuristics
# ---------------------------------------------------------------------------
def _choose_tile_rows(hs, ws, cp, esize, budget_bytes):
    """Largest even divisor of hs whose per-step VMEM footprint fits the budget."""
    # per image row: 2x input + 2x output (double-buffered) + f32 scratch
    row_bytes = ws * cp * (4 * esize + 4)
    best = None
    for cand in range(2, hs + 1, 2):
        if hs % cand:
            continue
        if best is None or cand * row_bytes <= budget_bytes:
            best = cand
    assert best is not None, "hs must be even"
    return best


def _choose_chunk_tokens(th, ws, cp, acc_budget_bytes=64 * 1024, max_chunks=64):
    """Tokens per register-resident accumulator chunk.

    chunk divides th*ws and either divides ws or is a multiple of ws, so the
    column-validity mask (period ws) lines up identically for every chunk.
    """
    main_tok = th * ws
    budget_tok = max(8, acc_budget_bytes // (cp * 4))
    cands = sorted({m * ws for m in range(1, th + 1) if th % m == 0}
                   | {d for d in range(1, ws + 1) if ws % d == 0})
    for align in (8, 4, 2, 1):              # prefer sublane-aligned chunks
        fit = [c for c in cands if c % align == 0]
        if not fit:
            continue
        within = [c for c in fit if c <= budget_tok]
        chunk = max(within) if within else min(fit)
        while main_tok // chunk > max_chunks:   # cap static unroll length
            bigger = [c for c in fit if c > chunk]
            if not bigger:
                break
            chunk = min(bigger)
        return chunk
    return main_tok


# ---------------------------------------------------------------------------
# One spatial scale over tokens [tok_off, tok_off + hs*ws) of xp (B, N, cp)
# ---------------------------------------------------------------------------
def _dwconv_scale_call(xp, prev, w55, scale, shift, *, tok_off, hs, ws, cp,
                       alias, footprint_budget=24 * 1024 * 1024,
                       vmem_limit=48 * 1024 * 1024):
    B, N, _ = xp.shape
    C = w55.shape[-1]
    esize = jnp.dtype(xp.dtype).itemsize
    th = _choose_tile_rows(hs, ws, cp, esize, footprint_budget)
    T = hs // th
    th2 = th // 2
    main_tok = th * ws
    halo_tok = 2 * ws
    PAD = 8                                  # sublane-aligned scratch end pads

    assert ws % 4 == 0 and hs % 2 == 0
    assert tok_off % main_tok == 0 and tok_off % halo_tok == 0
    main_blk0 = tok_off // main_tok
    halo_blk0 = tok_off // halo_tok
    halo_blk_last = halo_blk0 + hs // 2 - 1

    chunk_tok = _choose_chunk_tokens(th, ws, cp)
    mask_len = max(chunk_tok, ws)

    # Column-validity mask: output column c uses tap kj iff 0 <= c + kj - 2 < ws.
    col = np.arange(mask_len, dtype=np.int64) % ws
    msk = np.stack([((col + kj - 2 >= 0) & (col + kj - 2 < ws)).astype(np.float32)
                    for kj in range(5)], axis=0).reshape(5, mask_len, 1)
    msk = jnp.asarray(msk)

    # Lane-dense (channel-padded), f32 parameters.
    wk = jnp.pad(w55, ((0, 0), (0, 0), (0, cp - C))).reshape(25, 1, cp).astype(jnp.float32)
    sck = jnp.pad(scale, (0, cp - C)).reshape(1, cp).astype(jnp.float32)
    shk = jnp.pad(shift, (0, cp - C)).reshape(1, cp).astype(jnp.float32)

    def main_idx(b, t):
        return (b, main_blk0 + t, 0)

    def top_idx(b, t):                       # 2 rows above the tile, clamped
        return (b, jnp.maximum(halo_blk0 + t * th2 - 1, halo_blk0), 0)

    def bot_idx(b, t):                       # 2 rows below the tile, clamped
        return (b, jnp.minimum(halo_blk0 + t * th2 + th2, halo_blk_last), 0)

    kernel = functools.partial(_dwconv_bn_gelu_kernel, th=th, ws=ws, pad=PAD,
                               chunk_tok=chunk_tok, mask_len=mask_len)
    return pl.pallas_call(
        kernel,
        out_shape=jax.ShapeDtypeStruct((B, N, cp), xp.dtype),
        grid=(B, T),
        in_specs=[
            pl.BlockSpec((None, main_tok, cp), main_idx),
            pl.BlockSpec((None, halo_tok, cp), top_idx),
            pl.BlockSpec((None, halo_tok, cp), bot_idx),
            pl.BlockSpec((5, mask_len, 1), lambda b, t: (0, 0, 0)),
            pl.BlockSpec((25, 1, cp), lambda b, t: (0, 0, 0)),
            pl.BlockSpec((1, cp), lambda b, t: (0, 0)),
            pl.BlockSpec((1, cp), lambda b, t: (0, 0)),
            pl.BlockSpec(memory_space=pl.ANY),   # full token buffer (alias target)
        ],
        out_specs=pl.BlockSpec((None, main_tok, cp), main_idx),
        scratch_shapes=[pltpu.VMEM(((th + 4) * ws + 2 * PAD, cp), jnp.float32)],
        input_output_aliases={7: 0} if alias else {},
        compiler_params=pltpu.CompilerParams(
            dimension_semantics=("parallel", "parallel"),
            vmem_limit_bytes=vmem_limit),
    )(xp, xp, xp, msk, wk, sck, shk, prev)


# ---------------------------------------------------------------------------
# Parameter folding / synthetic init (shapes match the PyTorch __init__)
# ---------------------------------------------------------------------------
def _fold_scale_params(w3, w5, b3, b5, gamma, beta, mean, var, eps=1e-5):
    """Unified (5,5,C) depthwise weights + fused per-channel scale/shift."""
    w3_hw = jnp.transpose(w3[:, 0], (1, 2, 0))            # (3,3,half)
    w3_55 = jnp.pad(w3_hw, ((1, 1), (1, 1), (0, 0)))      # zero-padded to 5x5
    w5_hw = jnp.transpose(w5[:, 0], (1, 2, 0))            # (5,5,half)
    w55 = jnp.concatenate([w3_55, w5_hw], axis=-1)        # (5,5,C)
    bias = jnp.concatenate([b3, b5], axis=0)              # (C,)
    scale = gamma / jnp.sqrt(var + eps)
    shift = beta + scale * (bias - mean)
    return w55, scale, shift


def init_params(key, dim):
    half = dim // 2
    ks = jax.random.split(key, 16)
    p = {}
    p["w3_1"] = 0.1 * jax.random.normal(ks[0], (half, 1, 3, 3), jnp.float32)
    p["w5_1"] = 0.1 * jax.random.normal(ks[1], (half, 1, 5, 5), jnp.float32)
    p["w3_2"] = 0.1 * jax.random.normal(ks[2], (half, 1, 3, 3), jnp.float32)
    p["w5_2"] = 0.1 * jax.random.normal(ks[3], (half, 1, 5, 5), jnp.float32)
    p["w3_3"] = 0.1 * jax.random.normal(ks[4], (half, 1, 3, 3), jnp.float32)
    p["w5_3"] = 0.1 * jax.random.normal(ks[5], (half, 1, 5, 5), jnp.float32)
    p["b_1"] = 0.05 * jax.random.normal(ks[6], (half,), jnp.float32)
    p["b2_1"] = 0.05 * jax.random.normal(ks[7], (half,), jnp.float32)
    p["b_2"] = 0.05 * jax.random.normal(ks[8], (half,), jnp.float32)
    p["b2_2"] = 0.05 * jax.random.normal(ks[9], (half,), jnp.float32)
    p["b_3"] = 0.05 * jax.random.normal(ks[10], (half,), jnp.float32)
    p["b2_3"] = 0.05 * jax.random.normal(ks[11], (half,), jnp.float32)
    for i, k in zip((1, 2, 3), (ks[12], ks[13], ks[14])):
        g, b = jax.random.split(k)
        p[f"bn{i}_gamma"] = 1.0 + 0.1 * jax.random.normal(g, (dim,), jnp.float32)
        p[f"bn{i}_beta"] = 0.1 * jax.random.normal(b, (dim,), jnp.float32)
        p[f"bn{i}_mean"] = jnp.zeros((dim,), jnp.float32)
        p[f"bn{i}_var"] = jnp.ones((dim,), jnp.float32)
    return p


# ---------------------------------------------------------------------------
# Forward (Pallas)
# ---------------------------------------------------------------------------
def multi_dwconv_forward(x, H, W, params):
    B, N, C = x.shape
    n = N // 21
    assert 21 * n == N and n == (H // 2) * (W // 2)
    assert H % 4 == 0 and W % 8 == 0, "requires H % 4 == 0 and W % 8 == 0"
    # The three scales exactly tile [0, N): 16n + 4n + n == 21n == N, so the
    # aliased output buffer is fully written after the three calls.
    assert 16 * n + 4 * n + n == N

    cp = ((C + 127) // 128) * 128           # lane-dense channel count
    xp = x if cp == C else jnp.pad(x, ((0, 0), (0, 0), (0, cp - C)))

    scales = [
        (0, 2 * H, 2 * W, "1"),
        (16 * n, H, W, "2"),
        (20 * n, H // 2, W // 2, "3"),
    ]
    out = xp                                # dummy prev for the first (non-aliased) call
    for i, (off, hs, ws, tag) in enumerate(scales):
        w55, sc, sh = _fold_scale_params(
            params[f"w3_{tag}"], params[f"w5_{tag}"], params[f"b_{tag}"],
            params[f"b2_{tag}"], params[f"bn{tag}_gamma"], params[f"bn{tag}_beta"],
            params[f"bn{tag}_mean"], params[f"bn{tag}_var"])
        out = _dwconv_scale_call(xp, out, w55, sc, sh, tok_off=off, hs=hs,
                                 ws=ws, cp=cp, alias=(i > 0))
    return out[:, :, :C] if cp != C else out


# ---------------------------------------------------------------------------
# Pure-JAX reference (sanity check)
# ---------------------------------------------------------------------------
def _ref_scale(x_nhwc, w55, scale, shift):
    C = x_nhwc.shape[-1]
    y = lax.conv_general_dilated(
        x_nhwc, w55[:, :, None, :],
        window_strides=(1, 1), padding=((2, 2), (2, 2)),
        dimension_numbers=("NHWC", "HWIO", "NHWC"),
        feature_group_count=C)
    y = y * scale + shift
    return 0.5 * y * (1.0 + lax.erf(y * 0.7071067811865476))


def multi_dwconv_reference(x, H, W, params):
    B, N, C = x.shape
    n = N // 21
    x1 = x[:, :16 * n, :].reshape(B, 2 * H, 2 * W, C)
    x2 = x[:, 16 * n:20 * n, :].reshape(B, H, W, C)
    x3 = x[:, 20 * n:, :].reshape(B, H // 2, W // 2, C)
    outs = []
    for xi, tag in ((x1, "1"), (x2, "2"), (x3, "3")):
        w55, sc, sh = _fold_scale_params(
            params[f"w3_{tag}"], params[f"w5_{tag}"], params[f"b_{tag}"],
            params[f"b2_{tag}"], params[f"bn{tag}_gamma"], params[f"bn{tag}_beta"],
            params[f"bn{tag}_mean"], params[f"bn{tag}_var"])
        outs.append(_ref_scale(xi, w55, sc, sh).reshape(B, -1, C))
    return jnp.concatenate(outs, axis=1)


if __name__ == "__main__":
    key = jax.random.PRNGKey(0)
    k_x, k_p = jax.random.split(key)

    B, C, H, W = 2, 8, 8, 8                 # dim = C = 8 (half = 4 per conv)
    n = (H // 2) * (W // 2)
    N = 21 * n                              # 336 tokens
    x = jax.random.normal(k_x, (B, N, C), jnp.float32)
    params = init_params(k_p, C)

    fwd = jax.jit(multi_dwconv_forward, static_argnums=(1, 2))
    out = jax.block_until_ready(fwd(x, H, W, params))
    assert out.shape == (B, N, C), out.shape

    ref = jax.block_until_ready(multi_dwconv_reference(x, H, W, params))
    max_err = float(jnp.max(jnp.abs(out - ref)))
    assert jnp.allclose(out, ref, atol=1e-3, rtol=1e-3), max_err

    print("KERNEL_OK")
</pallas_src>

<mosaic_0001>
module attributes {stable_mosaic.version = 11 : i64} {
  func.func @_dwconv_bn_gelu_kernel(%arg0: i32, %arg1: i32, %arg2: memref<1x64x128xf32, #tpu.memory_space<vmem>>, %arg3: memref<1x16x128xf32, #tpu.memory_space<vmem>>, %arg4: memref<1x16x128xf32, #tpu.memory_space<vmem>>, %arg5: memref<5x64x1xf32, #tpu.memory_space<vmem>>, %arg6: memref<25x1x128xf32, #tpu.memory_space<vmem>>, %arg7: memref<1x128xf32, #tpu.memory_space<vmem>>, %arg8: memref<1x128xf32, #tpu.memory_space<vmem>>, %arg9: memref<2x336x128xf32, #tpu.memory_space<any>>, %arg10: memref<1x64x128xf32, #tpu.memory_space<vmem>>, %arg11: memref<112x128xf32, #tpu.memory_space<vmem>>) attributes {dimension_semantics = [#tpu.dimension_semantics<parallel>, #tpu.dimension_semantics<parallel>], iteration_bounds = array<i64: 2, 1>, scalar_prefetch = 0 : i64, scratch_operands = 1 : i64, tpu.core_type = #tpu.core_type<tc>, window_params = [{transform_indices = @transform_0, window_bounds = array<i64: 1, 64, 128>}, {transform_indices = @transform_1, window_bounds = array<i64: 1, 16, 128>}, {transform_indices = @transform_2, window_bounds = array<i64: 1, 16, 128>}, {pipeline_mode = #tpu.pipeline_mode<synchronous>, transform_indices = @transform_3, window_bounds = array<i64: 5, 64, 1>}, {pipeline_mode = #tpu.pipeline_mode<synchronous>, transform_indices = @transform_4, window_bounds = array<i64: 25, 1, 128>}, {pipeline_mode = #tpu.pipeline_mode<synchronous>, transform_indices = @transform_5, window_bounds = array<i64: 1, 128>}, {pipeline_mode = #tpu.pipeline_mode<synchronous>, transform_indices = @transform_6, window_bounds = array<i64: 1, 128>}, {}, {transform_indices = @transform_8, window_bounds = array<i64: 1, 64, 128>}]} {
    %cst = arith.constant 0.000000e+00 : f32
    %0 = vector.broadcast %cst : f32 to vector<8x128xf32>
    %c0 = arith.constant 0 : index
    %c0_0 = arith.constant 0 : index
    %1 = vector.load %arg11[%c0, %c0_0] : memref<112x128xf32, #tpu.memory_space<vmem>>, vector<8x128xf32>
    tpu.vector_store %arg11[%c0, %c0_0], %0 {strides = array<i32>} : memref<112x128xf32, #tpu.memory_space<vmem>>, vector<8x128xf32>,
    %cst_1 = arith.constant 0.000000e+00 : f32
    %2 = vector.broadcast %cst_1 : f32 to vector<8x128xf32>
    %c104 = arith.constant 104 : index
    %c0_2 = arith.constant 0 : index
    %3 = vector.load %arg11[%c104, %c0_2] : memref<112x128xf32, #tpu.memory_space<vmem>>, vector<8x128xf32>
    tpu.vector_store %arg11[%c104, %c0_2], %2 {strides = array<i32>} : memref<112x128xf32, #tpu.memory_space<vmem>>, vector<8x128xf32>,
    %c0_3 = arith.constant 0 : index
    %c0_4 = arith.constant 0 : index
    %c0_5 = arith.constant 0 : index
    %4 = vector.load %arg2[%c0_3, %c0_4, %c0_5] : memref<1x64x128xf32, #tpu.memory_space<vmem>>, vector<1x64x128xf32>
    %5 = vector.shape_cast %4 : vector<1x64x128xf32> to vector<64x128xf32>
    %c24 = arith.constant 24 : index
    %c0_6 = arith.constant 0 : index
    %6 = vector.load %arg11[%c24, %c0_6] : memref<112x128xf32, #tpu.memory_space<vmem>>, vector<64x128xf32>
    tpu.vector_store %arg11[%c24, %c0_6], %5 {strides = array<i32>} : memref<112x128xf32, #tpu.memory_space<vmem>>, vector<64x128xf32>,
    %c0_i32 = arith.constant 0 : i32
    %7 = arith.cmpi eq, %arg1, %c0_i32 : i32
    %8 = arith.extui %7 : i1 to i32
    %c0_i32_7 = arith.constant 0 : i32
    %9 = arith.cmpi ne, %8, %c0_i32_7 : i32
    scf.if %9 {
      %cst_132 = arith.constant 0.000000e+00 : f32
      %213 = vector.broadcast %cst_132 : f32 to vector<16x128xf32>
      %c8_133 = arith.constant 8 : index
      %c0_134 = arith.constant 0 : index
      %214 = vector.load %arg11[%c8_133, %c0_134] : memref<112x128xf32, #tpu.memory_space<vmem>>, vector<16x128xf32>
      tpu.vector_store %arg11[%c8_133, %c0_134], %213 {strides = array<i32>} : memref<112x128xf32, #tpu.memory_space<vmem>>, vector<16x128xf32>,
    } else {
    }
    %c0_i32_8 = arith.constant 0 : i32
    %10 = arith.cmpi sgt, %arg1, %c0_i32_8 : i32
    %11 = arith.extui %10 : i1 to i32
    %c0_i32_9 = arith.constant 0 : i32
    %12 = arith.cmpi ne, %11, %c0_i32_9 : i32
    scf.if %12 {
      %c0_132 = arith.constant 0 : index
      %c0_133 = arith.constant 0 : index
      %c0_134 = arith.constant 0 : index
      %213 = vector.load %arg3[%c0_132, %c0_133, %c0_134] : memref<1x16x128xf32, #tpu.memory_space<vmem>>, vector<1x16x128xf32>
      %214 = vector.shape_cast %213 : vector<1x16x128xf32> to vector<16x128xf32>
      %c8_135 = arith.constant 8 : index
      %c0_136 = arith.constant 0 : index
      %215 = vector.load %arg11[%c8_135, %c0_136] : memref<112x128xf32, #tpu.memory_space<vmem>>, vector<16x128xf32>
      tpu.vector_store %arg11[%c8_135, %c0_136], %214 {strides = array<i32>} : memref<112x128xf32, #tpu.memory_space<vmem>>, vector<16x128xf32>,
    } else {
    }
    %c0_i32_10 = arith.constant 0 : i32
    %13 = arith.cmpi eq, %arg1, %c0_i32_10 : i32
    %14 = arith.extui %13 : i1 to i32
    %c0_i32_11 = arith.constant 0 : i32
    %15 = arith.cmpi ne, %14, %c0_i32_11 : i32
    scf.if %15 {
      %cst_132 = arith.constant 0.000000e+00 : f32
      %213 = vector.broadcast %cst_132 : f32 to vector<16x128xf32>
      %c88 = arith.constant 88 : index
      %c0_133 = arith.constant 0 : index
      %214 = vector.load %arg11[%c88, %c0_133] : memref<112x128xf32, #tpu.memory_space<vmem>>, vector<16x128xf32>
      tpu.vector_store %arg11[%c88, %c0_133], %213 {strides = array<i32>} : memref<112x128xf32, #tpu.memory_space<vmem>>, vector<16x128xf32>,
    } else {
    }
    %c0_i32_12 = arith.constant 0 : i32
    %16 = arith.cmpi slt, %arg1, %c0_i32_12 : i32
    %17 = arith.extui %16 : i1 to i32
    %c0_i32_13 = arith.constant 0 : i32
    %18 = arith.cmpi ne, %17, %c0_i32_13 : i32
    scf.if %18 {
      %c0_132 = arith.constant 0 : index
      %c0_133 = arith.constant 0 : index
      %c0_134 = arith.constant 0 : index
      %213 = vector.load %arg4[%c0_132, %c0_133, %c0_134] : memref<1x16x128xf32, #tpu.memory_space<vmem>>, vector<1x16x128xf32>
      %214 = vector.shape_cast %213 : vector<1x16x128xf32> to vector<16x128xf32>
      %c88 = arith.constant 88 : index
      %c0_135 = arith.constant 0 : index
      %215 = vector.load %arg11[%c88, %c0_135] : memref<112x128xf32, #tpu.memory_space<vmem>>, vector<16x128xf32>
      tpu.vector_store %arg11[%c88, %c0_135], %214 {strides = array<i32>} : memref<112x128xf32, #tpu.memory_space<vmem>>, vector<16x128xf32>,
    } else {
    }
    %c0_14 = arith.constant 0 : index
    %c0_15 = arith.constant 0 : index
    %19 = vector.load %arg7[%c0_14, %c0_15] : memref<1x128xf32, #tpu.memory_space<vmem>>, vector<1x128xf32>
    %c0_16 = arith.constant 0 : index
    %c0_17 = arith.constant 0 : index
    %20 = vector.load %arg8[%c0_16, %c0_17] : memref<1x128xf32, #tpu.memory_space<vmem>>, vector<1x128xf32>
    %cst_18 = arith.constant 0.000000e+00 : f32
    %21 = vector.broadcast %cst_18 : f32 to vector<64x128xf32>
    %cst_19 = arith.constant 0.000000e+00 : f32
    %22 = vector.broadcast %cst_19 : f32 to vector<64x128xf32>
    %c6 = arith.constant 6 : index
    %c0_20 = arith.constant 0 : index
    %23 = vector.load %arg11[%c6, %c0_20] : memref<112x128xf32, #tpu.memory_space<vmem>>, vector<64x128xf32>
    %c0_21 = arith.constant 0 : index
    %c0_22 = arith.constant 0 : index
    %c0_23 = arith.constant 0 : index
    %24 = vector.load %arg6[%c0_21, %c0_22, %c0_23] : memref<25x1x128xf32, #tpu.memory_space<vmem>>, vector<1x1x128xf32>
    %25 = vector.shape_cast %24 : vector<1x1x128xf32> to vector<1x128xf32>
    %26 = vector.broadcast %25 : vector<1x128xf32> to vector<64x128xf32>
    %27 = arith.mulf %23, %26 : vector<64x128xf32>
    %28 = arith.addf %22, %27 : vector<64x128xf32>
    %c14 = arith.constant 14 : index
    %c0_24 = arith.constant 0 : index
    %29 = vector.load %arg11[%c14, %c0_24] : memref<112x128xf32, #tpu.memory_space<vmem>>, vector<64x128xf32>
    %c5 = arith.constant 5 : index
    %c0_25 = arith.constant 0 : index
    %c0_26 = arith.constant 0 : index
    %30 = vector.load %arg6[%c5, %c0_25, %c0_26] : memref<25x1x128xf32, #tpu.memory_space<vmem>>, vector<1x1x128xf32>
    %31 = vector.shape_cast %30 : vector<1x1x128xf32> to vector<1x128xf32>
    %32 = vector.broadcast %31 : vector<1x128xf32> to vector<64x128xf32>
    %33 = arith.mulf %29, %32 : vector<64x128xf32>
    %34 = arith.addf %28, %33 : vector<64x128xf32>
    %c22 = arith.constant 22 : index
    %c0_27 = arith.constant 0 : index
    %35 = vector.load %arg11[%c22, %c0_27] : memref<112x128xf32, #tpu.memory_space<vmem>>, vector<64x128xf32>
    %c10 = arith.constant 10 : index
    %c0_28 = arith.constant 0 : index
    %c0_29 = arith.constant 0 : index
    %36 = vector.load %arg6[%c10, %c0_28, %c0_29] : memref<25x1x128xf32, #tpu.memory_space<vmem>>, vector<1x1x128xf32>
    %37 = vector.shape_cast %36 : vector<1x1x128xf32> to vector<1x128xf32>
    %38 = vector.broadcast %37 : vector<1x128xf32> to vector<64x128xf32>
    %39 = arith.mulf %35, %38 : vector<64x128xf32>
    %40 = arith.addf %34, %39 : vector<64x128xf32>
    %c30 = arith.constant 30 : index
    %c0_30 = arith.constant 0 : index
    %41 = vector.load %arg11[%c30, %c0_30] : memref<112x128xf32, #tpu.memory_space<vmem>>, vector<64x128xf32>
    %c15 = arith.constant 15 : index
    %c0_31 = arith.constant 0 : index
    %c0_32 = arith.constant 0 : index
    %42 = vector.load %arg6[%c15, %c0_31, %c0_32] : memref<25x1x128xf32, #tpu.memory_space<vmem>>, vector<1x1x128xf32>
    %43 = vector.shape_cast %42 : vector<1x1x128xf32> to vector<1x128xf32>
    %44 = vector.broadcast %43 : vector<1x128xf32> to vector<64x128xf32>
    %45 = arith.mulf %41, %44 : vector<64x128xf32>
    %46 = arith.addf %40, %45 : vector<64x128xf32>
    %c38 = arith.constant 38 : index
    %c0_33 = arith.constant 0 : index
    %47 = vector.load %arg11[%c38, %c0_33] : memref<112x128xf32, #tpu.memory_space<vmem>>, vector<64x128xf32>
    %c20 = arith.constant 20 : index
    %c0_34 = arith.constant 0 : index
    %c0_35 = arith.constant 0 : index
    %48 = vector.load %arg6[%c20, %c0_34, %c0_35] : memref<25x1x128xf32, #tpu.memory_space<vmem>>, vector<1x1x128xf32>
    %49 = vector.shape_cast %48 : vector<1x1x128xf32> to vector<1x128xf32>
    %50 = vector.broadcast %49 : vector<1x128xf32> to vector<64x128xf32>
    %51 = arith.mulf %47, %50 : vector<64x128xf32>
    %52 = arith.addf %46, %51 : vector<64x128xf32>
    %c0_36 = arith.constant 0 : index
    %c0_37 = arith.constant 0 : index
    %c0_38 = arith.constant 0 : index
    %53 = vector.load %arg5[%c0_36, %c0_37, %c0_38] : memref<5x64x1xf32, #tpu.memory_space<vmem>>, vector<1x64x1xf32>
    %54 = vector.shape_cast %53 : vector<1x64x1xf32> to vector<64x1xf32>
    %55 = vector.broadcast %54 : vector<64x1xf32> to vector<64x128xf32>
    %56 = arith.mulf %52, %55 : vector<64x128xf32>
    %57 = arith.addf %21, %56 : vector<64x128xf32>
    %cst_39 = arith.constant 0.000000e+00 : f32
    %58 = vector.broadcast %cst_39 : f32 to vector<64x128xf32>
    %c7 = arith.constant 7 : index
    %c0_40 = arith.constant 0 : index
    %59 = vector.load %arg11[%c7, %c0_40] : memref<112x128xf32, #tpu.memory_space<vmem>>, vector<64x128xf32>
    %c1 = arith.constant 1 : index
    %c0_41 = arith.constant 0 : index
    %c0_42 = arith.constant 0 : index
    %60 = vector.load %arg6[%c1, %c0_41, %c0_42] : memref<25x1x128xf32, #tpu.memory_space<vmem>>, vector<1x1x128xf32>
    %61 = vector.shape_cast %60 : vector<1x1x128xf32> to vector<1x128xf32>
    %62 = vector.broadcast %61 : vector<1x128xf32> to vector<64x128xf32>
    %63 = arith.mulf %59, %62 : vector<64x128xf32>
    %64 = arith.addf %58, %63 : vector<64x128xf32>
    %c15_43 = arith.constant 15 : index
    %c0_44 = arith.constant 0 : index
    %65 = vector.load %arg11[%c15_43, %c0_44] : memref<112x128xf32, #tpu.memory_space<vmem>>, vector<64x128xf32>
    %c6_45 = arith.constant 6 : index
    %c0_46 = arith.constant 0 : index
    %c0_47 = arith.constant 0 : index
    %66 = vector.load %arg6[%c6_45, %c0_46, %c0_47] : memref<25x1x128xf32, #tpu.memory_space<vmem>>, vector<1x1x128xf32>
    %67 = vector.shape_cast %66 : vector<1x1x128xf32> to vector<1x128xf32>
    %68 = vector.broadcast %67 : vector<1x128xf32> to vector<64x128xf32>
    %69 = arith.mulf %65, %68 : vector<64x128xf32>
    %70 = arith.addf %64, %69 : vector<64x128xf32>
    %c23 = arith.constant 23 : index
    %c0_48 = arith.constant 0 : index
    %71 = vector.load %arg11[%c23, %c0_48] : memref<112x128xf32, #tpu.memory_space<vmem>>, vector<64x128xf32>
    %c11 = arith.constant 11 : index
    %c0_49 = arith.constant 0 : index
    %c0_50 = arith.constant 0 : index
    %72 = vector.load %arg6[%c11, %c0_49, %c0_50] : memref<25x1x128xf32, #tpu.memory_space<vmem>>, vector<1x1x128xf32>
    %73 = vector.shape_cast %72 : vector<1x1x128xf32> to vector<1x128xf32>
    %74 = vector.broadcast %73 : vector<1x128xf32> to vector<64x128xf32>
    %75 = arith.mulf %71, %74 : vector<64x128xf32>
    %76 = arith.addf %70, %75 : vector<64x128xf32>
    %c31 = arith.constant 31 : index
    %c0_51 = arith.constant 0 : index
    %77 = vector.load %arg11[%c31, %c0_51] : memref<112x128xf32, #tpu.memory_space<vmem>>, vector<64x128xf32>
    %c16 = arith.constant 16 : index
    %c0_52 = arith.constant 0 : index
    %c0_53 = arith.constant 0 : index
    %78 = vector.load %arg6[%c16, %c0_52, %c0_53] : memref<25x1x128xf32, #tpu.memory_space<vmem>>, vector<1x1x128xf32>
    %79 = vector.shape_cast %78 : vector<1x1x128xf32> to vector<1x128xf32>
    %80 = vector.broadcast %79 : vector<1x128xf32> to vector<64x128xf32>
    %81 = arith.mulf %77, %80 : vector<64x128xf32>
    %82 = arith.addf %76, %81 : vector<64x128xf32>
    %c39 = arith.constant 39 : index
    %c0_54 = arith.constant 0 : index
    %83 = vector.load %arg11[%c39, %c0_54] : memref<112x128xf32, #tpu.memory_space<vmem>>, vector<64x128xf32>
    %c21 = arith.constant 21 : index
    %c0_55 = arith.constant 0 : index
    %c0_56 = arith.constant 0 : index
    %84 = vector.load %arg6[%c21, %c0_55, %c0_56] : memref<25x1x128xf32, #tpu.memory_space<vmem>>, vector<1x1x128xf32>
    %85 = vector.shape_cast %84 : vector<1x1x128xf32> to vector<1x128xf32>
    %86 = vector.broadcast %85 : vector<1x128xf32> to vector<64x128xf32>
    %87 = arith.mulf %83, %86 : vector<64x128xf32>
    %88 = arith.addf %82, %87 : vector<64x128xf32>
    %c1_57 = arith.constant 1 : index
    %c0_58 = arith.constant 0 : index
    %c0_59 = arith.constant 0 : index
    %89 = vector.load %arg5[%c1_57, %c0_58, %c0_59] : memref<5x64x1xf32, #tpu.memory_space<vmem>>, vector<1x64x1xf32>
    %90 = vector.shape_cast %89 : vector<1x64x1xf32> to vector<64x1xf32>
    %91 = vector.broadcast %90 : vector<64x1xf32> to vector<64x128xf32>
    %92 = arith.mulf %88, %91 : vector<64x128xf32>
    %93 = arith.addf %57, %92 : vector<64x128xf32>
    %cst_60 = arith.constant 0.000000e+00 : f32
    %94 = vector.broadcast %cst_60 : f32 to vector<64x128xf32>
    %c8 = arith.constant 8 : index
    %c0_61 = arith.constant 0 : index
    %95 = vector.load %arg11[%c8, %c0_61] : memref<112x128xf32, #tpu.memory_space<vmem>>, vector<64x128xf32>
    %c2 = arith.constant 2 : index
    %c0_62 = arith.constant 0 : index
    %c0_63 = arith.constant 0 : index
    %96 = vector.load %arg6[%c2, %c0_62, %c0_63] : memref<25x1x128xf32, #tpu.memory_space<vmem>>, vector<1x1x128xf32>
    %97 = vector.shape_cast %96 : vector<1x1x128xf32> to vector<1x128xf32>
    %98 = vector.broadcast %97 : vector<1x128xf32> to vector<64x128xf32>
    %99 = arith.mulf %95, %98 : vector<64x128xf32>
    %100 = arith.addf %94, %99 : vector<64x128xf32>
    %c16_64 = arith.constant 16 : index
    %c0_65 = arith.constant 0 : index
    %101 = vector.load %arg11[%c16_64, %c0_65] : memref<112x128xf32, #tpu.memory_space<vmem>>, vector<64x128xf32>
    %c7_66 = arith.constant 7 : index
    %c0_67 = arith.constant 0 : index
    %c0_68 = arith.constant 0 : index
    %102 = vector.load %arg6[%c7_66, %c0_67, %c0_68] : memref<25x1x128xf32, #tpu.memory_space<vmem>>, vector<1x1x128xf32>
    %103 = vector.shape_cast %102 : vector<1x1x128xf32> to vector<1x128xf32>
    %104 = vector.broadcast %103 : vector<1x128xf32> to vector<64x128xf32>
    %105 = arith.mulf %101, %104 : vector<64x128xf32>
    %106 = arith.addf %100, %105 : vector<64x128xf32>
    %c24_69 = arith.constant 24 : index
    %c0_70 = arith.constant 0 : index
    %107 = vector.load %arg11[%c24_69, %c0_70] : memref<112x128xf32, #tpu.memory_space<vmem>>, vector<64x128xf32>
    %c12 = arith.constant 12 : index
    %c0_71 = arith.constant 0 : index
    %c0_72 = arith.constant 0 : index
    %108 = vector.load %arg6[%c12, %c0_71, %c0_72] : memref<25x1x128xf32, #tpu.memory_space<vmem>>, vector<1x1x128xf32>
    %109 = vector.shape_cast %108 : vector<1x1x128xf32> to vector<1x128xf32>
    %110 = vector.broadcast %109 : vector<1x128xf32> to vector<64x128xf32>
    %111 = arith.mulf %107, %110 : vector<64x128xf32>
    %112 = arith.addf %106, %111 : vector<64x128xf32>
    %c32 = arith.constant 32 : index
    %c0_73 = arith.constant 0 : index
    %113 = vector.load %arg11[%c32, %c0_73] : memref<112x128xf32, #tpu.memory_space<vmem>>, vector<64x128xf32>
    %c17 = arith.constant 17 : index
    %c0_74 = arith.constant 0 : index
    %c0_75 = arith.constant 0 : index
    %114 = vector.load %arg6[%c17, %c0_74, %c0_75] : memref<25x1x128xf32, #tpu.memory_space<vmem>>, vector<1x1x128xf32>
    %115 = vector.shape_cast %114 : vector<1x1x128xf32> to vector<1x128xf32>
    %116 = vector.broadcast %115 : vector<1x128xf32> to vector<64x128xf32>
    %117 = arith.mulf %113, %116 : vector<64x128xf32>
    %118 = arith.addf %112, %117 : vector<64x128xf32>
    %c40 = arith.constant 40 : index
    %c0_76 = arith.constant 0 : index
    %119 = vector.load %arg11[%c40, %c0_76] : memref<112x128xf32, #tpu.memory_space<vmem>>, vector<64x128xf32>
    %c22_77 = arith.constant 22 : index
    %c0_78 = arith.constant 0 : index
    %c0_79 = arith.constant 0 : index
    %120 = vector.load %arg6[%c22_77, %c0_78, %c0_79] : memref<25x1x128xf32, #tpu.memory_space<vmem>>, vector<1x1x128xf32>
    %121 = vector.shape_cast %120 : vector<1x1x128xf32> to vector<1x128xf32>
    %122 = vector.broadcast %121 : vector<1x128xf32> to vector<64x128xf32>
    %123 = arith.mulf %119, %122 : vector<64x128xf32>
    %124 = arith.addf %118, %123 : vector<64x128xf32>
    %125 = arith.addf %93, %124 : vector<64x128xf32>
    %cst_80 = arith.constant 0.000000e+00 : f32
    %126 = vector.broadcast %cst_80 : f32 to vector<64x128xf32>
    %c9 = arith.constant 9 : index
    %c0_81 = arith.constant 0 : index
    %127 = vector.load %arg11[%c9, %c0_81] : memref<112x128xf32, #tpu.memory_space<vmem>>, vector<64x128xf32>
    %c3 = arith.constant 3 : index
    %c0_82 = arith.constant 0 : index
    %c0_83 = arith.constant 0 : index
    %128 = vector.load %arg6[%c3, %c0_82, %c0_83] : memref<25x1x128xf32, #tpu.memory_space<vmem>>, vector<1x1x128xf32>
    %129 = vector.shape_cast %128 : vector<1x1x128xf32> to vector<1x128xf32>
    %130 = vector.broadcast %129 : vector<1x128xf32> to vector<64x128xf32>
    %131 = arith.mulf %127, %130 : vector<64x128xf32>
    %132 = arith.addf %126, %131 : vector<64x128xf32>
    %c17_84 = arith.constant 17 : index
    %c0_85 = arith.constant 0 : index
    %133 = vector.load %arg11[%c17_84, %c0_85] : memref<112x128xf32, #tpu.memory_space<vmem>>, vector<64x128xf32>
    %c8_86 = arith.constant 8 : index
    %c0_87 = arith.constant 0 : index
    %c0_88 = arith.constant 0 : index
    %134 = vector.load %arg6[%c8_86, %c0_87, %c0_88] : memref<25x1x128xf32, #tpu.memory_space<vmem>>, vector<1x1x128xf32>
    %135 = vector.shape_cast %134 : vector<1x1x128xf32> to vector<1x128xf32>
    %136 = vector.broadcast %135 : vector<1x128xf32> to vector<64x128xf32>
    %137 = arith.mulf %133, %136 : vector<64x128xf32>
    %138 = arith.addf %132, %137 : vector<64x128xf32>
    %c25 = arith.constant 25 : index
    %c0_89 = arith.constant 0 : index
    %139 = vector.load %arg11[%c25, %c0_89] : memref<112x128xf32, #tpu.memory_space<vmem>>, vector<64x128xf32>
    %c13 = arith.constant 13 : index
    %c0_90 = arith.constant 0 : index
    %c0_91 = arith.constant 0 : index
    %140 = vector.load %arg6[%c13, %c0_90, %c0_91] : memref<25x1x128xf32, #tpu.memory_space<vmem>>, vector<1x1x128xf32>
    %141 = vector.shape_cast %140 : vector<1x1x128xf32> to vector<1x128xf32>
    %142 = vector.broadcast %141 : vector<1x128xf32> to vector<64x128xf32>
    %143 = arith.mulf %139, %142 : vector<64x128xf32>
    %144 = arith.addf %138, %143 : vector<64x128xf32>
    %c33 = arith.constant 33 : index
    %c0_92 = arith.constant 0 : index
    %145 = vector.load %arg11[%c33, %c0_92] : memref<112x128xf32, #tpu.memory_space<vmem>>, vector<64x128xf32>
    %c18 = arith.constant 18 : index
    %c0_93 = arith.constant 0 : index
    %c0_94 = arith.constant 0 : index
    %146 = vector.load %arg6[%c18, %c0_93, %c0_94] : memref<25x1x128xf32, #tpu.memory_space<vmem>>, vector<1x1x128xf32>
    %147 = vector.shape_cast %146 : vector<1x1x128xf32> to vector<1x128xf32>
    %148 = vector.broadcast %147 : vector<1x128xf32> to vector<64x128xf32>
    %149 = arith.mulf %145, %148 : vector<64x128xf32>
    %150 = arith.addf %144, %149 : vector<64x128xf32>
    %c41 = arith.constant 41 : index
    %c0_95 = arith.constant 0 : index
    %151 = vector.load %arg11[%c41, %c0_95] : memref<112x128xf32, #tpu.memory_space<vmem>>, vector<64x128xf32>
    %c23_96 = arith.constant 23 : index
    %c0_97 = arith.constant 0 : index
    %c0_98 = arith.constant 0 : index
    %152 = vector.load %arg6[%c23_96, %c0_97, %c0_98] : memref<25x1x128xf32, #tpu.memory_space<vmem>>, vector<1x1x128xf32>
    %153 = vector.shape_cast %152 : vector<1x1x128xf32> to vector<1x128xf32>
    %154 = vector.broadcast %153 : vector<1x128xf32> to vector<64x128xf32>
    %155 = arith.mulf %151, %154 : vector<64x128xf32>
    %156 = arith.addf %150, %155 : vector<64x128xf32>
    %c3_99 = arith.constant 3 : index
    %c0_100 = arith.constant 0 : index
    %c0_101 = arith.constant 0 : index
    %157 = vector.load %arg5[%c3_99, %c0_100, %c0_101] : memref<5x64x1xf32, #tpu.memory_space<vmem>>, vector<1x64x1xf32>
    %158 = vector.shape_cast %157 : vector<1x64x1xf32> to vector<64x1xf32>
    %159 = vector.broadcast %158 : vector<64x1xf32> to vector<64x128xf32>
    %160 = arith.mulf %156, %159 : vector<64x128xf32>
    %161 = arith.addf %125, %160 : vector<64x128xf32>
    %cst_102 = arith.constant 0.000000e+00 : f32
    %162 = vector.broadcast %cst_102 : f32 to vector<64x128xf32>
    %c10_103 = arith.constant 10 : index
    %c0_104 = arith.constant 0 : index
    %163 = vector.load %arg11[%c10_103, %c0_104] : memref<112x128xf32, #tpu.memory_space<vmem>>, vector<64x128xf32>
    %c4 = arith.constant 4 : index
    %c0_105 = arith.constant 0 : index
    %c0_106 = arith.constant 0 : index
    %164 = vector.load %arg6[%c4, %c0_105, %c0_106] : memref<25x1x128xf32, #tpu.memory_space<vmem>>, vector<1x1x128xf32>
    %165 = vector.shape_cast %164 : vector<1x1x128xf32> to vector<1x128xf32>
    %166 = vector.broadcast %165 : vector<1x128xf32> to vector<64x128xf32>
    %167 = arith.mulf %163, %166 : vector<64x128xf32>
    %168 = arith.addf %162, %167 : vector<64x128xf32>
    %c18_107 = arith.constant 18 : index
    %c0_108 = arith.constant 0 : index
    %169 = vector.load %arg11[%c18_107, %c0_108] : memref<112x128xf32, #tpu.memory_space<vmem>>, vector<64x128xf32>
    %c9_109 = arith.constant 9 : index
    %c0_110 = arith.constant 0 : index
    %c0_111 = arith.constant 0 : index
    %170 = vector.load %arg6[%c9_109, %c0_110, %c0_111] : memref<25x1x128xf32, #tpu.memory_space<vmem>>, vector<1x1x128xf32>
    %171 = vector.shape_cast %170 : vector<1x1x128xf32> to vector<1x128xf32>
    %172 = vector.broadcast %171 : vector<1x128xf32> to vector<64x128xf32>
    %173 = arith.mulf %169, %172 : vector<64x128xf32>
    %174 = arith.addf %168, %173 : vector<64x128xf32>
    %c26 = arith.constant 26 : index
    %c0_112 = arith.constant 0 : index
    %175 = vector.load %arg11[%c26, %c0_112] : memref<112x128xf32, #tpu.memory_space<vmem>>, vector<64x128xf32>
    %c14_113 = arith.constant 14 : index
    %c0_114 = arith.constant 0 : index
    %c0_115 = arith.constant 0 : index
    %176 = vector.load %arg6[%c14_113, %c0_114, %c0_115] : memref<25x1x128xf32, #tpu.memory_space<vmem>>, vector<1x1x128xf32>
    %177 = vector.shape_cast %176 : vector<1x1x128xf32> to vector<1x128xf32>
    %178 = vector.broadcast %177 : vector<1x128xf32> to vector<64x128xf32>
    %179 = arith.mulf %175, %178 : vector<64x128xf32>
    %180 = arith.addf %174, %179 : vector<64x128xf32>
    %c34 = arith.constant 34 : index
    %c0_116 = arith.constant 0 : index
    %181 = vector.load %arg11[%c34, %c0_116] : memref<112x128xf32, #tpu.memory_space<vmem>>, vector<64x128xf32>
    %c19 = arith.constant 19 : index
    %c0_117 = arith.constant 0 : index
    %c0_118 = arith.constant 0 : index
    %182 = vector.load %arg6[%c19, %c0_117, %c0_118] : memref<25x1x128xf32, #tpu.memory_space<vmem>>, vector<1x1x128xf32>
    %183 = vector.shape_cast %182 : vector<1x1x128xf32> to vector<1x128xf32>
    %184 = vector.broadcast %183 : vector<1x128xf32> to vector<64x128xf32>
    %185 = arith.mulf %181, %184 : vector<64x128xf32>
    %186 = arith.addf %180, %185 : vector<64x128xf32>
    %c42 = arith.constant 42 : index
    %c0_119 = arith.constant 0 : index
    %187 = vector.load %arg11[%c42, %c0_119] : memref<112x128xf32, #tpu.memory_space<vmem>>, vector<64x128xf32>
    %c24_120 = arith.constant 24 : index
    %c0_121 = arith.constant 0 : index
    %c0_122 = arith.constant 0 : index
    %188 = vector.load %arg6[%c24_120, %c0_121, %c0_122] : memref<25x1x128xf32, #tpu.memory_space<vmem>>, vector<1x1x128xf32>
    %189 = vector.shape_cast %188 : vector<1x1x128xf32> to vector<1x128xf32>
    %190 = vector.broadcast %189 : vector<1x128xf32> to vector<64x128xf32>
    %191 = arith.mulf %187, %190 : vector<64x128xf32>
    %192 = arith.addf %186, %191 : vector<64x128xf32>
    %c4_123 = arith.constant 4 : index
    %c0_124 = arith.constant 0 : index
    %c0_125 = arith.constant 0 : index
    %193 = vector.load %arg5[%c4_123, %c0_124, %c0_125] : memref<5x64x1xf32, #tpu.memory_space<vmem>>, vector<1x64x1xf32>
    %194 = vector.shape_cast %193 : vector<1x64x1xf32> to vector<64x1xf32>
    %195 = vector.broadcast %194 : vector<64x1xf32> to vector<64x128xf32>
    %196 = arith.mulf %192, %195 : vector<64x128xf32>
    %197 = arith.addf %161, %196 : vector<64x128xf32>
    %198 = vector.broadcast %19 : vector<1x128xf32> to vector<64x128xf32>
    %199 = arith.mulf %197, %198 : vector<64x128xf32>
    %200 = vector.broadcast %20 : vector<1x128xf32> to vector<64x128xf32>
    %201 = arith.addf %199, %200 : vector<64x128xf32>
    %cst_126 = arith.constant 5.000000e-01 : f32
    %202 = vector.broadcast %cst_126 : f32 to vector<64x128xf32>
    %203 = arith.mulf %202, %201 : vector<64x128xf32>
    %cst_127 = arith.constant 0.707106769 : f32
    %204 = vector.broadcast %cst_127 : f32 to vector<64x128xf32>
    %205 = arith.mulf %201, %204 : vector<64x128xf32>
    %206 = math.erf %205 : vector<64x128xf32>
    %cst_128 = arith.constant 1.000000e+00 : f32
    %207 = vector.broadcast %cst_128 : f32 to vector<64x128xf32>
    %208 = arith.addf %207, %206 : vector<64x128xf32>
    %209 = arith.mulf %203, %208 : vector<64x128xf32>
    %c0_129 = arith.constant 0 : index
    %c0_130 = arith.constant 0 : index
    %c0_131 = arith.constant 0 : index
    %210 = vector.load %arg10[%c0_129, %c0_130, %c0_131] : memref<1x64x128xf32, #tpu.memory_space<vmem>>, vector<1x64x128xf32>
    %211 = vector.shape_cast %210 : vector<1x64x128xf32> to vector<64x128xf32>
    %212 = vector.shape_cast %209 : vector<64x128xf32> to vector<1x64x128xf32>
    tpu.vector_store %arg10[%c0_129, %c0_130, %c0_131], %212 {strides = array<i32>} : memref<1x64x128xf32, #tpu.memory_space<vmem>>, vector<1x64x128xf32>,
    return
  }
  func.func @transform_0(%arg0: i32, %arg1: i32) -> (i32, i32, i32) {
    %c4_i32 = arith.constant 4 : i32
    %0 = arith.addi %c4_i32, %arg1 : i32
    %c0_i32 = arith.constant 0 : i32
    %c0_i32_0 = arith.constant 0 : i32
    return %arg0, %0, %c0_i32 : i32, i32, i32
  }
  func.func @transform_1(%arg0: i32, %arg1: i32) -> (i32, i32, i32) {
    %c4_i32 = arith.constant 4 : i32
    %0 = arith.muli %arg1, %c4_i32 : i32
    %c16_i32 = arith.constant 16 : i32
    %1 = arith.addi %c16_i32, %0 : i32
    %c1_i32 = arith.constant 1 : i32
    %2 = arith.subi %1, %c1_i32 : i32
    %c16_i32_0 = arith.constant 16 : i32
    %3 = arith.maxsi %2, %c16_i32_0 : i32
    %c0_i32 = arith.constant 0 : i32
    %c0_i32_1 = arith.constant 0 : i32
    return %arg0, %3, %c0_i32 : i32, i32, i32
  }
  func.func @transform_2(%arg0: i32, %arg1: i32) -> (i32, i32, i32) {
    %c4_i32 = arith.constant 4 : i32
    %0 = arith.muli %arg1, %c4_i32 : i32
    %c16_i32 = arith.constant 16 : i32
    %1 = arith.addi %c16_i32, %0 : i32
    %c4_i32_0 = arith.constant 4 : i32
    %2 = arith.addi %1, %c4_i32_0 : i32
    %c19_i32 = arith.constant 19 : i32
    %3 = arith.minsi %2, %c19_i32 : i32
    %c0_i32 = arith.constant 0 : i32
    %c0_i32_1 = arith.constant 0 : i32
    return %arg0, %3, %c0_i32 : i32, i32, i32
  }
  func.func @transform_3(%arg0: i32, %arg1: i32) -> (i32, i32, i32) {
    %c0_i32 = arith.constant 0 : i32
    %c0_i32_0 = arith.constant 0 : i32
    %c0_i32_1 = arith.constant 0 : i32
    %c0_i32_2 = arith.constant 0 : i32
    return %c0_i32, %c0_i32_0, %c0_i32_1 : i32, i32, i32
  }
  func.func @transform_4(%arg0: i32, %arg1: i32) -> (i32, i32, i32) {
    %c0_i32 = arith.constant 0 : i32
    %c0_i32_0 = arith.constant 0 : i32
    %c0_i32_1 = arith.constant 0 : i32
    %c0_i32_2 = arith.constant 0 : i32
    return %c0_i32, %c0_i32_0, %c0_i32_1 : i32, i32, i32
  }
  func.func @transform_5(%arg0: i32, %arg1: i32) -> (i32, i32) {
    %c0_i32 = arith.constant 0 : i32
    %c0_i32_0 = arith.constant 0 : i32
    %c0_i32_1 = arith.constant 0 : i32
    return %c0_i32, %c0_i32_0 : i32, i32
  }
  func.func @transform_6(%arg0: i32, %arg1: i32) -> (i32, i32) {
    %c0_i32 = arith.constant 0 : i32
    %c0_i32_0 = arith.constant 0 : i32
    %c0_i32_1 = arith.constant 0 : i32
    return %c0_i32, %c0_i32_0 : i32, i32
  }
  func.func @transform_8(%arg0: i32, %arg1: i32) -> (i32, i32, i32) {
    %c4_i32 = arith.constant 4 : i32
    %0 = arith.addi %c4_i32, %arg1 : i32
    %c0_i32 = arith.constant 0 : i32
    %c0_i32_0 = arith.constant 0 : i32
    return %arg0, %0, %c0_i32 : i32, i32, i32
  }
}

module attributes {stable_mosaic.version = 11 : i64} {
  func.func @_dwconv_bn_gelu_kernel(%arg0: i32, %arg1: i32, %arg2: memref<1x16x128xf32, #tpu.memory_space<vmem>>, %arg3: memref<1x8x128xf32, #tpu.memory_space<vmem>>, %arg4: memref<1x8x128xf32, #tpu.memory_space<vmem>>, %arg5: memref<5x16x1xf32, #tpu.memory_space<vmem>>, %arg6: memref<25x1x128xf32, #tpu.memory_space<vmem>>, %arg7: memref<1x128xf32, #tpu.memory_space<vmem>>, %arg8: memref<1x128xf32, #tpu.memory_space<vmem>>, %arg9: memref<2x336x128xf32, #tpu.memory_space<any>>, %arg10: memref<1x16x128xf32, #tpu.memory_space<vmem>>, %arg11: memref<48x128xf32, #tpu.memory_space<vmem>>) attributes {dimension_semantics = [#tpu.dimension_semantics<parallel>, #tpu.dimension_semantics<parallel>], iteration_bounds = array<i64: 2, 1>, scalar_prefetch = 0 : i64, scratch_operands = 1 : i64, tpu.core_type = #tpu.core_type<tc>, window_params = [{transform_indices = @transform_0, window_bounds = array<i64: 1, 16, 128>}, {transform_indices = @transform_1, window_bounds = array<i64: 1, 8, 128>}, {transform_indices = @transform_2, window_bounds = array<i64: 1, 8, 128>}, {pipeline_mode = #tpu.pipeline_mode<synchronous>, transform_indices = @transform_3, window_bounds = array<i64: 5, 16, 1>}, {pipeline_mode = #tpu.pipeline_mode<synchronous>, transform_indices = @transform_4, window_bounds = array<i64: 25, 1, 128>}, {pipeline_mode = #tpu.pipeline_mode<synchronous>, transform_indices = @transform_5, window_bounds = array<i64: 1, 128>}, {pipeline_mode = #tpu.pipeline_mode<synchronous>, transform_indices = @transform_6, window_bounds = array<i64: 1, 128>}, {}, {transform_indices = @transform_8, window_bounds = array<i64: 1, 16, 128>}]} {
    %cst = arith.constant 0.000000e+00 : f32
    %0 = vector.broadcast %cst : f32 to vector<8x128xf32>
    %c0 = arith.constant 0 : index
    %c0_0 = arith.constant 0 : index
    %1 = vector.load %arg11[%c0, %c0_0] : memref<48x128xf32, #tpu.memory_space<vmem>>, vector<8x128xf32>
    tpu.vector_store %arg11[%c0, %c0_0], %0 {strides = array<i32>} : memref<48x128xf32, #tpu.memory_space<vmem>>, vector<8x128xf32>,
    %cst_1 = arith.constant 0.000000e+00 : f32
    %2 = vector.broadcast %cst_1 : f32 to vector<8x128xf32>
    %c40 = arith.constant 40 : index
    %c0_2 = arith.constant 0 : index
    %3 = vector.load %arg11[%c40, %c0_2] : memref<48x128xf32, #tpu.memory_space<vmem>>, vector<8x128xf32>
    tpu.vector_store %arg11[%c40, %c0_2], %2 {strides = array<i32>} : memref<48x128xf32, #tpu.memory_space<vmem>>, vector<8x128xf32>,
    %c0_3 = arith.constant 0 : index
    %c0_4 = arith.constant 0 : index
    %c0_5 = arith.constant 0 : index
    %4 = vector.load %arg2[%c0_3, %c0_4, %c0_5] : memref<1x16x128xf32, #tpu.memory_space<vmem>>, vector<1x16x128xf32>
    %5 = vector.shape_cast %4 : vector<1x16x128xf32> to vector<16x128xf32>
    %c16 = arith.constant 16 : index
    %c0_6 = arith.constant 0 : index
    %6 = vector.load %arg11[%c16, %c0_6] : memref<48x128xf32, #tpu.memory_space<vmem>>, vector<16x128xf32>
    tpu.vector_store %arg11[%c16, %c0_6], %5 {strides = array<i32>} : memref<48x128xf32, #tpu.memory_space<vmem>>, vector<16x128xf32>,
    %c0_i32 = arith.constant 0 : i32
    %7 = arith.cmpi eq, %arg1, %c0_i32 : i32
    %8 = arith.extui %7 : i1 to i32
    %c0_i32_7 = arith.constant 0 : i32
    %9 = arith.cmpi ne, %8, %c0_i32_7 : i32
    scf.if %9 {
      %cst_142 = arith.constant 0.000000e+00 : f32
      %213 = vector.broadcast %cst_142 : f32 to vector<8x128xf32>
      %c8_143 = arith.constant 8 : index
      %c0_144 = arith.constant 0 : index
      %214 = vector.load %arg11[%c8_143, %c0_144] : memref<48x128xf32, #tpu.memory_space<vmem>>, vector<8x128xf32>
      tpu.vector_store %arg11[%c8_143, %c0_144], %213 {strides = array<i32>} : memref<48x128xf32, #tpu.memory_space<vmem>>, vector<8x128xf32>,
    } else {
    }
    %c0_i32_8 = arith.constant 0 : i32
    %10 = arith.cmpi sgt, %arg1, %c0_i32_8 : i32
    %11 = arith.extui %10 : i1 to i32
    %c0_i32_9 = arith.constant 0 : i32
    %12 = arith.cmpi ne, %11, %c0_i32_9 : i32
    scf.if %12 {
      %c0_142 = arith.constant 0 : index
      %c0_143 = arith.constant 0 : index
      %c0_144 = arith.constant 0 : index
      %213 = vector.load %arg3[%c0_142, %c0_143, %c0_144] : memref<1x8x128xf32, #tpu.memory_space<vmem>>, vector<1x8x128xf32>
      %214 = vector.shape_cast %213 : vector<1x8x128xf32> to vector<8x128xf32>
      %c8_145 = arith.constant 8 : index
      %c0_146 = arith.constant 0 : index
      %215 = vector.load %arg11[%c8_145, %c0_146] : memref<48x128xf32, #tpu.memory_space<vmem>>, vector<8x128xf32>
      tpu.vector_store %arg11[%c8_145, %c0_146], %214 {strides = array<i32>} : memref<48x128xf32, #tpu.memory_space<vmem>>, vector<8x128xf32>,
    } else {
    }
    %c0_i32_10 = arith.constant 0 : i32
    %13 = arith.cmpi eq, %arg1, %c0_i32_10 : i32
    %14 = arith.extui %13 : i1 to i32
    %c0_i32_11 = arith.constant 0 : i32
    %15 = arith.cmpi ne, %14, %c0_i32_11 : i32
    scf.if %15 {
      %cst_142 = arith.constant 0.000000e+00 : f32
      %213 = vector.broadcast %cst_142 : f32 to vector<8x128xf32>
      %c32 = arith.constant 32 : index
      %c0_143 = arith.constant 0 : index
      %214 = vector.load %arg11[%c32, %c0_143] : memref<48x128xf32, #tpu.memory_space<vmem>>, vector<8x128xf32>
      tpu.vector_store %arg11[%c32, %c0_143], %213 {strides = array<i32>} : memref<48x128xf32, #tpu.memory_space<vmem>>, vector<8x128xf32>,
    } else {
    }
    %c0_i32_12 = arith.constant 0 : i32
    %16 = arith.cmpi slt, %arg1, %c0_i32_12 : i32
    %17 = arith.extui %16 : i1 to i32
    %c0_i32_13 = arith.constant 0 : i32
    %18 = arith.cmpi ne, %17, %c0_i32_13 : i32
    scf.if %18 {
      %c0_142 = arith.constant 0 : index
      %c0_143 = arith.constant 0 : index
      %c0_144 = arith.constant 0 : index
      %213 = vector.load %arg4[%c0_142, %c0_143, %c0_144] : memref<1x8x128xf32, #tpu.memory_space<vmem>>, vector<1x8x128xf32>
      %214 = vector.shape_cast %213 : vector<1x8x128xf32> to vector<8x128xf32>
      %c32 = arith.constant 32 : index
      %c0_145 = arith.constant 0 : index
      %215 = vector.load %arg11[%c32, %c0_145] : memref<48x128xf32, #tpu.memory_space<vmem>>, vector<8x128xf32>
      tpu.vector_store %arg11[%c32, %c0_145], %214 {strides = array<i32>} : memref<48x128xf32, #tpu.memory_space<vmem>>, vector<8x128xf32>,
    } else {
    }
    %c0_14 = arith.constant 0 : index
    %c0_15 = arith.constant 0 : index
    %19 = vector.load %arg7[%c0_14, %c0_15] : memref<1x128xf32, #tpu.memory_space<vmem>>, vector<1x128xf32>
    %c0_16 = arith.constant 0 : index
    %c0_17 = arith.constant 0 : index
    %20 = vector.load %arg8[%c0_16, %c0_17] : memref<1x128xf32, #tpu.memory_space<vmem>>, vector<1x128xf32>
    %cst_18 = arith.constant 0.000000e+00 : f32
    %21 = vector.broadcast %cst_18 : f32 to vector<16x128xf32>
    %cst_19 = arith.constant 0.000000e+00 : f32
    %22 = vector.broadcast %cst_19 : f32 to vector<16x128xf32>
    %c6 = arith.constant 6 : index
    %c0_20 = arith.constant 0 : index
    %23 = vector.load %arg11[%c6, %c0_20] : memref<48x128xf32, #tpu.memory_space<vmem>>, vector<16x128xf32>
    %c0_21 = arith.constant 0 : index
    %c0_22 = arith.constant 0 : index
    %c0_23 = arith.constant 0 : index
    %24 = vector.load %arg6[%c0_21, %c0_22, %c0_23] : memref<25x1x128xf32, #tpu.memory_space<vmem>>, vector<1x1x128xf32>
    %25 = vector.shape_cast %24 : vector<1x1x128xf32> to vector<1x128xf32>
    %26 = vector.broadcast %25 : vector<1x128xf32> to vector<16x128xf32>
    %27 = arith.mulf %23, %26 : vector<16x128xf32>
    %28 = arith.addf %22, %27 : vector<16x128xf32>
    %c10 = arith.constant 10 : index
    %c0_24 = arith.constant 0 : index
    %29 = vector.load %arg11[%c10, %c0_24] : memref<48x128xf32, #tpu.memory_space<vmem>>, vector<16x128xf32>
    %c5 = arith.constant 5 : index
    %c0_25 = arith.constant 0 : index
    %c0_26 = arith.constant 0 : index
    %30 = vector.load %arg6[%c5, %c0_25, %c0_26] : memref<25x1x128xf32, #tpu.memory_space<vmem>>, vector<1x1x128xf32>
    %31 = vector.shape_cast %30 : vector<1x1x128xf32> to vector<1x128xf32>
    %32 = vector.broadcast %31 : vector<1x128xf32> to vector<16x128xf32>
    %33 = arith.mulf %29, %32 : vector<16x128xf32>
    %34 = arith.addf %28, %33 : vector<16x128xf32>
    %c14 = arith.constant 14 : index
    %c0_27 = arith.constant 0 : index
    %35 = vector.load %arg11[%c14, %c0_27] : memref<48x128xf32, #tpu.memory_space<vmem>>, vector<16x128xf32>
    %c10_28 = arith.constant 10 : index
    %c0_29 = arith.constant 0 : index
    %c0_30 = arith.constant 0 : index
    %36 = vector.load %arg6[%c10_28, %c0_29, %c0_30] : memref<25x1x128xf32, #tpu.memory_space<vmem>>, vector<1x1x128xf32>
    %37 = vector.shape_cast %36 : vector<1x1x128xf32> to vector<1x128xf32>
    %38 = vector.broadcast %37 : vector<1x128xf32> to vector<16x128xf32>
    %39 = arith.mulf %35, %38 : vector<16x128xf32>
    %40 = arith.addf %34, %39 : vector<16x128xf32>
    %c18 = arith.constant 18 : index
    %c0_31 = arith.constant 0 : index
    %41 = vector.load %arg11[%c18, %c0_31] : memref<48x128xf32, #tpu.memory_space<vmem>>, vector<16x128xf32>
    %c15 = arith.constant 15 : index
    %c0_32 = arith.constant 0 : index
    %c0_33 = arith.constant 0 : index
    %42 = vector.load %arg6[%c15, %c0_32, %c0_33] : memref<25x1x128xf32, #tpu.memory_space<vmem>>, vector<1x1x128xf32>
    %43 = vector.shape_cast %42 : vector<1x1x128xf32> to vector<1x128xf32>
    %44 = vector.broadcast %43 : vector<1x128xf32> to vector<16x128xf32>
    %45 = arith.mulf %41, %44 : vector<16x128xf32>
    %46 = arith.addf %40, %45 : vector<16x128xf32>
    %c22 = arith.constant 22 : index
    %c0_34 = arith.constant 0 : index
    %47 = vector.load %arg11[%c22, %c0_34] : memref<48x128xf32, #tpu.memory_space<vmem>>, vector<16x128xf32>
    %c20 = arith.constant 20 : index
    %c0_35 = arith.constant 0 : index
    %c0_36 = arith.constant 0 : index
    %48 = vector.load %arg6[%c20, %c0_35, %c0_36] : memref<25x1x128xf32, #tpu.memory_space<vmem>>, vector<1x1x128xf32>
    %49 = vector.shape_cast %48 : vector<1x1x128xf32> to vector<1x128xf32>
    %50 = vector.broadcast %49 : vector<1x128xf32> to vector<16x128xf32>
    %51 = arith.mulf %47, %50 : vector<16x128xf32>
    %52 = arith.addf %46, %51 : vector<16x128xf32>
    %c0_37 = arith.constant 0 : index
    %c0_38 = arith.constant 0 : index
    %c0_39 = arith.constant 0 : index
    %53 = vector.load %arg5[%c0_37, %c0_38, %c0_39] : memref<5x16x1xf32, #tpu.memory_space<vmem>>, vector<1x16x1xf32>
    %54 = vector.shape_cast %53 : vector<1x16x1xf32> to vector<16x1xf32>
    %55 = vector.broadcast %54 : vector<16x1xf32> to vector<16x128xf32>
    %56 = arith.mulf %52, %55 : vector<16x128xf32>
    %57 = arith.addf %21, %56 : vector<16x128xf32>
    %cst_40 = arith.constant 0.000000e+00 : f32
    %58 = vector.broadcast %cst_40 : f32 to vector<16x128xf32>
    %c7 = arith.constant 7 : index
    %c0_41 = arith.constant 0 : index
    %59 = vector.load %arg11[%c7, %c0_41] : memref<48x128xf32, #tpu.memory_space<vmem>>, vector<16x128xf32>
    %c1 = arith.constant 1 : index
    %c0_42 = arith.constant 0 : index
    %c0_43 = arith.constant 0 : index
    %60 = vector.load %arg6[%c1, %c0_42, %c0_43] : memref<25x1x128xf32, #tpu.memory_space<vmem>>, vector<1x1x128xf32>
    %61 = vector.shape_cast %60 : vector<1x1x128xf32> to vector<1x128xf32>
    %62 = vector.broadcast %61 : vector<1x128xf32> to vector<16x128xf32>
    %63 = arith.mulf %59, %62 : vector<16x128xf32>
    %64 = arith.addf %58, %63 : vector<16x128xf32>
    %c11 = arith.constant 11 : index
    %c0_44 = arith.constant 0 : index
    %65 = vector.load %arg11[%c11, %c0_44] : memref<48x128xf32, #tpu.memory_space<vmem>>, vector<16x128xf32>
    %c6_45 = arith.constant 6 : index
    %c0_46 = arith.constant 0 : index
    %c0_47 = arith.constant 0 : index
    %66 = vector.load %arg6[%c6_45, %c0_46, %c0_47] : memref<25x1x128xf32, #tpu.memory_space<vmem>>, vector<1x1x128xf32>
    %67 = vector.shape_cast %66 : vector<1x1x128xf32> to vector<1x128xf32>
    %68 = vector.broadcast %67 : vector<1x128xf32> to vector<16x128xf32>
    %69 = arith.mulf %65, %68 : vector<16x128xf32>
    %70 = arith.addf %64, %69 : vector<16x128xf32>
    %c15_48 = arith.constant 15 : index
    %c0_49 = arith.constant 0 : index
    %71 = vector.load %arg11[%c15_48, %c0_49] : memref<48x128xf32, #tpu.memory_space<vmem>>, vector<16x128xf32>
    %c11_50 = arith.constant 11 : index
    %c0_51 = arith.constant 0 : index
    %c0_52 = arith.constant 0 : index
    %72 = vector.load %arg6[%c11_50, %c0_51, %c0_52] : memref<25x1x128xf32, #tpu.memory_space<vmem>>, vector<1x1x128xf32>
    %73 = vector.shape_cast %72 : vector<1x1x128xf32> to vector<1x128xf32>
    %74 = vector.broadcast %73 : vector<1x128xf32> to vector<16x128xf32>
    %75 = arith.mulf %71, %74 : vector<16x128xf32>
    %76 = arith.addf %70, %75 : vector<16x128xf32>
    %c19 = arith.constant 19 : index
    %c0_53 = arith.constant 0 : index
    %77 = vector.load %arg11[%c19, %c0_53] : memref<48x128xf32, #tpu.memory_space<vmem>>, vector<16x128xf32>
    %c16_54 = arith.constant 16 : index
    %c0_55 = arith.constant 0 : index
    %c0_56 = arith.constant 0 : index
    %78 = vector.load %arg6[%c16_54, %c0_55, %c0_56] : memref<25x1x128xf32, #tpu.memory_space<vmem>>, vector<1x1x128xf32>
    %79 = vector.shape_cast %78 : vector<1x1x128xf32> to vector<1x128xf32>
    %80 = vector.broadcast %79 : vector<1x128xf32> to vector<16x128xf32>
    %81 = arith.mulf %77, %80 : vector<16x128xf32>
    %82 = arith.addf %76, %81 : vector<16x128xf32>
    %c23 = arith.constant 23 : index
    %c0_57 = arith.constant 0 : index
    %83 = vector.load %arg11[%c23, %c0_57] : memref<48x128xf32, #tpu.memory_space<vmem>>, vector<16x128xf32>
    %c21 = arith.constant 21 : index
    %c0_58 = arith.constant 0 : index
    %c0_59 = arith.constant 0 : index
    %84 = vector.load %arg6[%c21, %c0_58, %c0_59] : memref<25x1x128xf32, #tpu.memory_space<vmem>>, vector<1x1x128xf32>
    %85 = vector.shape_cast %84 : vector<1x1x128xf32> to vector<1x128xf32>
    %86 = vector.broadcast %85 : vector<1x128xf32> to vector<16x128xf32>
    %87 = arith.mulf %83, %86 : vector<16x128xf32>
    %88 = arith.addf %82, %87 : vector<16x128xf32>
    %c1_60 = arith.constant 1 : index
    %c0_61 = arith.constant 0 : index
    %c0_62 = arith.constant 0 : index
    %89 = vector.load %arg5[%c1_60, %c0_61, %c0_62] : memref<5x16x1xf32, #tpu.memory_space<vmem>>, vector<1x16x1xf32>
    %90 = vector.shape_cast %89 : vector<1x16x1xf32> to vector<16x1xf32>
    %91 = vector.broadcast %90 : vector<16x1xf32> to vector<16x128xf32>
    %92 = arith.mulf %88, %91 : vector<16x128xf32>
    %93 = arith.addf %57, %92 : vector<16x128xf32>
    %cst_63 = arith.constant 0.000000e+00 : f32
    %94 = vector.broadcast %cst_63 : f32 to vector<16x128xf32>
    %c8 = arith.constant 8 : index
    %c0_64 = arith.constant 0 : index
    %95 = vector.load %arg11[%c8, %c0_64] : memref<48x128xf32, #tpu.memory_space<vmem>>, vector<16x128xf32>
    %c2 = arith.constant 2 : index
    %c0_65 = arith.constant 0 : index
    %c0_66 = arith.constant 0 : index
    %96 = vector.load %arg6[%c2, %c0_65, %c0_66] : memref<25x1x128xf32, #tpu.memory_space<vmem>>, vector<1x1x128xf32>
    %97 = vector.shape_cast %96 : vector<1x1x128xf32> to vector<1x128xf32>
    %98 = vector.broadcast %97 : vector<1x128xf32> to vector<16x128xf32>
    %99 = arith.mulf %95, %98 : vector<16x128xf32>
    %100 = arith.addf %94, %99 : vector<16x128xf32>
    %c12 = arith.constant 12 : index
    %c0_67 = arith.constant 0 : index
    %101 = vector.load %arg11[%c12, %c0_67] : memref<48x128xf32, #tpu.memory_space<vmem>>, vector<16x128xf32>
    %c7_68 = arith.constant 7 : index
    %c0_69 = arith.constant 0 : index
    %c0_70 = arith.constant 0 : index
    %102 = vector.load %arg6[%c7_68, %c0_69, %c0_70] : memref<25x1x128xf32, #tpu.memory_space<vmem>>, vector<1x1x128xf32>
    %103 = vector.shape_cast %102 : vector<1x1x128xf32> to vector<1x128xf32>
    %104 = vector.broadcast %103 : vector<1x128xf32> to vector<16x128xf32>
    %105 = arith.mulf %101, %104 : vector<16x128xf32>
    %106 = arith.addf %100, %105 : vector<16x128xf32>
    %c16_71 = arith.constant 16 : index
    %c0_72 = arith.constant 0 : index
    %107 = vector.load %arg11[%c16_71, %c0_72] : memref<48x128xf32, #tpu.memory_space<vmem>>, vector<16x128xf32>
    %c12_73 = arith.constant 12 : index
    %c0_74 = arith.constant 0 : index
    %c0_75 = arith.constant 0 : index
    %108 = vector.load %arg6[%c12_73, %c0_74, %c0_75] : memref<25x1x128xf32, #tpu.memory_space<vmem>>, vector<1x1x128xf32>
    %109 = vector.shape_cast %108 : vector<1x1x128xf32> to vector<1x128xf32>
    %110 = vector.broadcast %109 : vector<1x128xf32> to vector<16x128xf32>
    %111 = arith.mulf %107, %110 : vector<16x128xf32>
    %112 = arith.addf %106, %111 : vector<16x128xf32>
    %c20_76 = arith.constant 20 : index
    %c0_77 = arith.constant 0 : index
    %113 = vector.load %arg11[%c20_76, %c0_77] : memref<48x128xf32, #tpu.memory_space<vmem>>, vector<16x128xf32>
    %c17 = arith.constant 17 : index
    %c0_78 = arith.constant 0 : index
    %c0_79 = arith.constant 0 : index
    %114 = vector.load %arg6[%c17, %c0_78, %c0_79] : memref<25x1x128xf32, #tpu.memory_space<vmem>>, vector<1x1x128xf32>
    %115 = vector.shape_cast %114 : vector<1x1x128xf32> to vector<1x128xf32>
    %116 = vector.broadcast %115 : vector<1x128xf32> to vector<16x128xf32>
    %117 = arith.mulf %113, %116 : vector<16x128xf32>
    %118 = arith.addf %112, %117 : vector<16x128xf32>
    %c24 = arith.constant 24 : index
    %c0_80 = arith.constant 0 : index
    %119 = vector.load %arg11[%c24, %c0_80] : memref<48x128xf32, #tpu.memory_space<vmem>>, vector<16x128xf32>
    %c22_81 = arith.constant 22 : index
    %c0_82 = arith.constant 0 : index
    %c0_83 = arith.constant 0 : index
    %120 = vector.load %arg6[%c22_81, %c0_82, %c0_83] : memref<25x1x128xf32, #tpu.memory_space<vmem>>, vector<1x1x128xf32>
    %121 = vector.shape_cast %120 : vector<1x1x128xf32> to vector<1x128xf32>
    %122 = vector.broadcast %121 : vector<1x128xf32> to vector<16x128xf32>
    %123 = arith.mulf %119, %122 : vector<16x128xf32>
    %124 = arith.addf %118, %123 : vector<16x128xf32>
    %125 = arith.addf %93, %124 : vector<16x128xf32>
    %cst_84 = arith.constant 0.000000e+00 : f32
    %126 = vector.broadcast %cst_84 : f32 to vector<16x128xf32>
    %c9 = arith.constant 9 : index
    %c0_85 = arith.constant 0 : index
    %127 = vector.load %arg11[%c9, %c0_85] : memref<48x128xf32, #tpu.memory_space<vmem>>, vector<16x128xf32>
    %c3 = arith.constant 3 : index
    %c0_86 = arith.constant 0 : index
    %c0_87 = arith.constant 0 : index
    %128 = vector.load %arg6[%c3, %c0_86, %c0_87] : memref<25x1x128xf32, #tpu.memory_space<vmem>>, vector<1x1x128xf32>
    %129 = vector.shape_cast %128 : vector<1x1x128xf32> to vector<1x128xf32>
    %130 = vector.broadcast %129 : vector<1x128xf32> to vector<16x128xf32>
    %131 = arith.mulf %127, %130 : vector<16x128xf32>
    %132 = arith.addf %126, %131 : vector<16x128xf32>
    %c13 = arith.constant 13 : index
    %c0_88 = arith.constant 0 : index
    %133 = vector.load %arg11[%c13, %c0_88] : memref<48x128xf32, #tpu.memory_space<vmem>>, vector<16x128xf32>
    %c8_89 = arith.constant 8 : index
    %c0_90 = arith.constant 0 : index
    %c0_91 = arith.constant 0 : index
    %134 = vector.load %arg6[%c8_89, %c0_90, %c0_91] : memref<25x1x128xf32, #tpu.memory_space<vmem>>, vector<1x1x128xf32>
    %135 = vector.shape_cast %134 : vector<1x1x128xf32> to vector<1x128xf32>
    %136 = vector.broadcast %135 : vector<1x128xf32> to vector<16x128xf32>
    %137 = arith.mulf %133, %136 : vector<16x128xf32>
    %138 = arith.addf %132, %137 : vector<16x128xf32>
    %c17_92 = arith.constant 17 : index
    %c0_93 = arith.constant 0 : index
    %139 = vector.load %arg11[%c17_92, %c0_93] : memref<48x128xf32, #tpu.memory_space<vmem>>, vector<16x128xf32>
    %c13_94 = arith.constant 13 : index
    %c0_95 = arith.constant 0 : index
    %c0_96 = arith.constant 0 : index
    %140 = vector.load %arg6[%c13_94, %c0_95, %c0_96] : memref<25x1x128xf32, #tpu.memory_space<vmem>>, vector<1x1x128xf32>
    %141 = vector.shape_cast %140 : vector<1x1x128xf32> to vector<1x128xf32>
    %142 = vector.broadcast %141 : vector<1x128xf32> to vector<16x128xf32>
    %143 = arith.mulf %139, %142 : vector<16x128xf32>
    %144 = arith.addf %138, %143 : vector<16x128xf32>
    %c21_97 = arith.constant 21 : index
    %c0_98 = arith.constant 0 : index
    %145 = vector.load %arg11[%c21_97, %c0_98] : memref<48x128xf32, #tpu.memory_space<vmem>>, vector<16x128xf32>
    %c18_99 = arith.constant 18 : index
    %c0_100 = arith.constant 0 : index
    %c0_101 = arith.constant 0 : index
    %146 = vector.load %arg6[%c18_99, %c0_100, %c0_101] : memref<25x1x128xf32, #tpu.memory_space<vmem>>, vector<1x1x128xf32>
    %147 = vector.shape_cast %146 : vector<1x1x128xf32> to vector<1x128xf32>
    %148 = vector.broadcast %147 : vector<1x128xf32> to vector<16x128xf32>
    %149 = arith.mulf %145, %148 : vector<16x128xf32>
    %150 = arith.addf %144, %149 : vector<16x128xf32>
    %c25 = arith.constant 25 : index
    %c0_102 = arith.constant 0 : index
    %151 = vector.load %arg11[%c25, %c0_102] : memref<48x128xf32, #tpu.memory_space<vmem>>, vector<16x128xf32>
    %c23_103 = arith.constant 23 : index
    %c0_104 = arith.constant 0 : index
    %c0_105 = arith.constant 0 : index
    %152 = vector.load %arg6[%c23_103, %c0_104, %c0_105] : memref<25x1x128xf32, #tpu.memory_space<vmem>>, vector<1x1x128xf32>
    %153 = vector.shape_cast %152 : vector<1x1x128xf32> to vector<1x128xf32>
    %154 = vector.broadcast %153 : vector<1x128xf32> to vector<16x128xf32>
    %155 = arith.mulf %151, %154 : vector<16x128xf32>
    %156 = arith.addf %150, %155 : vector<16x128xf32>
    %c3_106 = arith.constant 3 : index
    %c0_107 = arith.constant 0 : index
    %c0_108 = arith.constant 0 : index
    %157 = vector.load %arg5[%c3_106, %c0_107, %c0_108] : memref<5x16x1xf32, #tpu.memory_space<vmem>>, vector<1x16x1xf32>
    %158 = vector.shape_cast %157 : vector<1x16x1xf32> to vector<16x1xf32>
    %159 = vector.broadcast %158 : vector<16x1xf32> to vector<16x128xf32>
    %160 = arith.mulf %156, %159 : vector<16x128xf32>
    %161 = arith.addf %125, %160 : vector<16x128xf32>
    %cst_109 = arith.constant 0.000000e+00 : f32
    %162 = vector.broadcast %cst_109 : f32 to vector<16x128xf32>
    %c10_110 = arith.constant 10 : index
    %c0_111 = arith.constant 0 : index
    %163 = vector.load %arg11[%c10_110, %c0_111] : memref<48x128xf32, #tpu.memory_space<vmem>>, vector<16x128xf32>
    %c4 = arith.constant 4 : index
    %c0_112 = arith.constant 0 : index
    %c0_113 = arith.constant 0 : index
    %164 = vector.load %arg6[%c4, %c0_112, %c0_113] : memref<25x1x128xf32, #tpu.memory_space<vmem>>, vector<1x1x128xf32>
    %165 = vector.shape_cast %164 : vector<1x1x128xf32> to vector<1x128xf32>
    %166 = vector.broadcast %165 : vector<1x128xf32> to vector<16x128xf32>
    %167 = arith.mulf %163, %166 : vector<16x128xf32>
    %168 = arith.addf %162, %167 : vector<16x128xf32>
    %c14_114 = arith.constant 14 : index
    %c0_115 = arith.constant 0 : index
    %169 = vector.load %arg11[%c14_114, %c0_115] : memref<48x128xf32, #tpu.memory_space<vmem>>, vector<16x128xf32>
    %c9_116 = arith.constant 9 : index
    %c0_117 = arith.constant 0 : index
    %c0_118 = arith.constant 0 : index
    %170 = vector.load %arg6[%c9_116, %c0_117, %c0_118] : memref<25x1x128xf32, #tpu.memory_space<vmem>>, vector<1x1x128xf32>
    %171 = vector.shape_cast %170 : vector<1x1x128xf32> to vector<1x128xf32>
    %172 = vector.broadcast %171 : vector<1x128xf32> to vector<16x128xf32>
    %173 = arith.mulf %169, %172 : vector<16x128xf32>
    %174 = arith.addf %168, %173 : vector<16x128xf32>
    %c18_119 = arith.constant 18 : index
    %c0_120 = arith.constant 0 : index
    %175 = vector.load %arg11[%c18_119, %c0_120] : memref<48x128xf32, #tpu.memory_space<vmem>>, vector<16x128xf32>
    %c14_121 = arith.constant 14 : index
    %c0_122 = arith.constant 0 : index
    %c0_123 = arith.constant 0 : index
    %176 = vector.load %arg6[%c14_121, %c0_122, %c0_123] : memref<25x1x128xf32, #tpu.memory_space<vmem>>, vector<1x1x128xf32>
    %177 = vector.shape_cast %176 : vector<1x1x128xf32> to vector<1x128xf32>
    %178 = vector.broadcast %177 : vector<1x128xf32> to vector<16x128xf32>
    %179 = arith.mulf %175, %178 : vector<16x128xf32>
    %180 = arith.addf %174, %179 : vector<16x128xf32>
    %c22_124 = arith.constant 22 : index
    %c0_125 = arith.constant 0 : index
    %181 = vector.load %arg11[%c22_124, %c0_125] : memref<48x128xf32, #tpu.memory_space<vmem>>, vector<16x128xf32>
    %c19_126 = arith.constant 19 : index
    %c0_127 = arith.constant 0 : index
    %c0_128 = arith.constant 0 : index
    %182 = vector.load %arg6[%c19_126, %c0_127, %c0_128] : memref<25x1x128xf32, #tpu.memory_space<vmem>>, vector<1x1x128xf32>
    %183 = vector.shape_cast %182 : vector<1x1x128xf32> to vector<1x128xf32>
    %184 = vector.broadcast %183 : vector<1x128xf32> to vector<16x128xf32>
    %185 = arith.mulf %181, %184 : vector<16x128xf32>
    %186 = arith.addf %180, %185 : vector<16x128xf32>
    %c26 = arith.constant 26 : index
    %c0_129 = arith.constant 0 : index
    %187 = vector.load %arg11[%c26, %c0_129] : memref<48x128xf32, #tpu.memory_space<vmem>>, vector<16x128xf32>
    %c24_130 = arith.constant 24 : index
    %c0_131 = arith.constant 0 : index
    %c0_132 = arith.constant 0 : index
    %188 = vector.load %arg6[%c24_130, %c0_131, %c0_132] : memref<25x1x128xf32, #tpu.memory_space<vmem>>, vector<1x1x128xf32>
    %189 = vector.shape_cast %188 : vector<1x1x128xf32> to vector<1x128xf32>
    %190 = vector.broadcast %189 : vector<1x128xf32> to vector<16x128xf32>
    %191 = arith.mulf %187, %190 : vector<16x128xf32>
    %192 = arith.addf %186, %191 : vector<16x128xf32>
    %c4_133 = arith.constant 4 : index
    %c0_134 = arith.constant 0 : index
    %c0_135 = arith.constant 0 : index
    %193 = vector.load %arg5[%c4_133, %c0_134, %c0_135] : memref<5x16x1xf32, #tpu.memory_space<vmem>>, vector<1x16x1xf32>
    %194 = vector.shape_cast %193 : vector<1x16x1xf32> to vector<16x1xf32>
    %195 = vector.broadcast %194 : vector<16x1xf32> to vector<16x128xf32>
    %196 = arith.mulf %192, %195 : vector<16x128xf32>
    %197 = arith.addf %161, %196 : vector<16x128xf32>
    %198 = vector.broadcast %19 : vector<1x128xf32> to vector<16x128xf32>
    %199 = arith.mulf %197, %198 : vector<16x128xf32>
    %200 = vector.broadcast %20 : vector<1x128xf32> to vector<16x128xf32>
    %201 = arith.addf %199, %200 : vector<16x128xf32>
    %cst_136 = arith.constant 5.000000e-01 : f32
    %202 = vector.broadcast %cst_136 : f32 to vector<16x128xf32>
    %203 = arith.mulf %202, %201 : vector<16x128xf32>
    %cst_137 = arith.constant 0.707106769 : f32
    %204 = vector.broadcast %cst_137 : f32 to vector<16x128xf32>
    %205 = arith.mulf %201, %204 : vector<16x128xf32>
    %206 = math.erf %205 : vector<16x128xf32>
    %cst_138 = arith.constant 1.000000e+00 : f32
    %207 = vector.broadcast %cst_138 : f32 to vector<16x128xf32>
    %208 = arith.addf %207, %206 : vector<16x128xf32>
    %209 = arith.mulf %203, %208 : vector<16x128xf32>
    %c0_139 = arith.constant 0 : index
    %c0_140 = arith.constant 0 : index
    %c0_141 = arith.constant 0 : index
    %210 = vector.load %arg10[%c0_139, %c0_140, %c0_141] : memref<1x16x128xf32, #tpu.memory_space<vmem>>, vector<1x16x128xf32>
    %211 = vector.shape_cast %210 : vector<1x16x128xf32> to vector<16x128xf32>
    %212 = vector.shape_cast %209 : vector<16x128xf32> to vector<1x16x128xf32>
    tpu.vector_store %arg10[%c0_139, %c0_140, %c0_141], %212 {strides = array<i32>} : memref<1x16x128xf32, #tpu.memory_space<vmem>>, vector<1x16x128xf32>,
    return
  }
  func.func @transform_0(%arg0: i32, %arg1: i32) -> (i32, i32, i32) {
    %c20_i32 = arith.constant 20 : i32
    %0 = arith.addi %c20_i32, %arg1 : i32
    %c0_i32 = arith.constant 0 : i32
    %c0_i32_0 = arith.constant 0 : i32
    return %arg0, %0, %c0_i32 : i32, i32, i32
  }
  func.func @transform_1(%arg0: i32, %arg1: i32) -> (i32, i32, i32) {
    %c2_i32 = arith.constant 2 : i32
    %0 = arith.muli %arg1, %c2_i32 : i32
    %c40_i32 = arith.constant 40 : i32
    %1 = arith.addi %c40_i32, %0 : i32
    %c1_i32 = arith.constant 1 : i32
    %2 = arith.subi %1, %c1_i32 : i32
    %c40_i32_0 = arith.constant 40 : i32
    %3 = arith.maxsi %2, %c40_i32_0 : i32
    %c0_i32 = arith.constant 0 : i32
    %c0_i32_1 = arith.constant 0 : i32
    return %arg0, %3, %c0_i32 : i32, i32, i32
  }
  func.func @transform_2(%arg0: i32, %arg1: i32) -> (i32, i32, i32) {
    %c2_i32 = arith.constant 2 : i32
    %0 = arith.muli %arg1, %c2_i32 : i32
    %c40_i32 = arith.constant 40 : i32
    %1 = arith.addi %c40_i32, %0 : i32
    %c2_i32_0 = arith.constant 2 : i32
    %2 = arith.addi %1, %c2_i32_0 : i32
    %c41_i32 = arith.constant 41 : i32
    %3 = arith.minsi %2, %c41_i32 : i32
    %c0_i32 = arith.constant 0 : i32
    %c0_i32_1 = arith.constant 0 : i32
    return %arg0, %3, %c0_i32 : i32, i32, i32
  }
  func.func @transform_3(%arg0: i32, %arg1: i32) -> (i32, i32, i32) {
    %c0_i32 = arith.constant 0 : i32
    %c0_i32_0 = arith.constant 0 : i32
    %c0_i32_1 = arith.constant 0 : i32
    %c0_i32_2 = arith.constant 0 : i32
    return %c0_i32, %c0_i32_0, %c0_i32_1 : i32, i32, i32
  }
  func.func @transform_4(%arg0: i32, %arg1: i32) -> (i32, i32, i32) {
    %c0_i32 = arith.constant 0 : i32
    %c0_i32_0 = arith.constant 0 : i32
    %c0_i32_1 = arith.constant 0 : i32
    %c0_i32_2 = arith.constant 0 : i32
    return %c0_i32, %c0_i32_0, %c0_i32_1 : i32, i32, i32
  }
  func.func @transform_5(%arg0: i32, %arg1: i32) -> (i32, i32) {
    %c0_i32 = arith.constant 0 : i32
    %c0_i32_0 = arith.constant 0 : i32
    %c0_i32_1 = arith.constant 0 : i32
    return %c0_i32, %c0_i32_0 : i32, i32
  }
  func.func @transform_6(%arg0: i32, %arg1: i32) -> (i32, i32) {
    %c0_i32 = arith.constant 0 : i32
    %c0_i32_0 = arith.constant 0 : i32
    %c0_i32_1 = arith.constant 0 : i32
    return %c0_i32, %c0_i32_0 : i32, i32
  }
  func.func @transform_8(%arg0: i32, %arg1: i32) -> (i32, i32, i32) {
    %c20_i32 = arith.constant 20 : i32
    %0 = arith.addi %c20_i32, %arg1 : i32
    %c0_i32 = arith.constant 0 : i32
    %c0_i32_0 = arith.constant 0 : i32
    return %arg0, %0, %c0_i32 : i32, i32, i32
  }
}

module attributes {stable_mosaic.version = 11 : i64} {
  func.func @_dwconv_bn_gelu_kernel(%arg0: i32, %arg1: i32, %arg2: memref<1x256x128xf32, #tpu.memory_space<vmem>>, %arg3: memref<1x32x128xf32, #tpu.memory_space<vmem>>, %arg4: memref<1x32x128xf32, #tpu.memory_space<vmem>>, %arg5: memref<5x128x1xf32, #tpu.memory_space<vmem>>, %arg6: memref<25x1x128xf32, #tpu.memory_space<vmem>>, %arg7: memref<1x128xf32, #tpu.memory_space<vmem>>, %arg8: memref<1x128xf32, #tpu.memory_space<vmem>>, %arg9: memref<2x336x128xf32, #tpu.memory_space<any>>, %arg10: memref<1x256x128xf32, #tpu.memory_space<vmem>>, %arg11: memref<336x128xf32, #tpu.memory_space<vmem>>) attributes {dimension_semantics = [#tpu.dimension_semantics<parallel>, #tpu.dimension_semantics<parallel>], iteration_bounds = array<i64: 2, 1>, scalar_prefetch = 0 : i64, scratch_operands = 1 : i64, tpu.core_type = #tpu.core_type<tc>, window_params = [{transform_indices = @transform_0, window_bounds = array<i64: 1, 256, 128>}, {transform_indices = @transform_1, window_bounds = array<i64: 1, 32, 128>}, {transform_indices = @transform_2, window_bounds = array<i64: 1, 32, 128>}, {pipeline_mode = #tpu.pipeline_mode<synchronous>, transform_indices = @transform_3, window_bounds = array<i64: 5, 128, 1>}, {pipeline_mode = #tpu.pipeline_mode<synchronous>, transform_indices = @transform_4, window_bounds = array<i64: 25, 1, 128>}, {pipeline_mode = #tpu.pipeline_mode<synchronous>, transform_indices = @transform_5, window_bounds = array<i64: 1, 128>}, {pipeline_mode = #tpu.pipeline_mode<synchronous>, transform_indices = @transform_6, window_bounds = array<i64: 1, 128>}, {}, {transform_indices = @transform_8, window_bounds = array<i64: 1, 256, 128>}]} {
    %cst = arith.constant 0.000000e+00 : f32
    %0 = vector.broadcast %cst : f32 to vector<8x128xf32>
    %c0 = arith.constant 0 : index
    %c0_0 = arith.constant 0 : index
    %1 = vector.load %arg11[%c0, %c0_0] : memref<336x128xf32, #tpu.memory_space<vmem>>, vector<8x128xf32>
    tpu.vector_store %arg11[%c0, %c0_0], %0 {strides = array<i32>} : memref<336x128xf32, #tpu.memory_space<vmem>>, vector<8x128xf32>,
    %cst_1 = arith.constant 0.000000e+00 : f32
    %2 = vector.broadcast %cst_1 : f32 to vector<8x128xf32>
    %c328 = arith.constant 328 : index
    %c0_2 = arith.constant 0 : index
    %3 = vector.load %arg11[%c328, %c0_2] : memref<336x128xf32, #tpu.memory_space<vmem>>, vector<8x128xf32>
    tpu.vector_store %arg11[%c328, %c0_2], %2 {strides = array<i32>} : memref<336x128xf32, #tpu.memory_space<vmem>>, vector<8x128xf32>,
    %c0_3 = arith.constant 0 : index
    %c0_4 = arith.constant 0 : index
    %c0_5 = arith.constant 0 : index
    %4 = vector.load %arg2[%c0_3, %c0_4, %c0_5] : memref<1x256x128xf32, #tpu.memory_space<vmem>>, vector<1x256x128xf32>
    %5 = vector.shape_cast %4 : vector<1x256x128xf32> to vector<256x128xf32>
    %c40 = arith.constant 40 : index
    %c0_6 = arith.constant 0 : index
    %6 = vector.load %arg11[%c40, %c0_6] : memref<336x128xf32, #tpu.memory_space<vmem>>, vector<256x128xf32>
    tpu.vector_store %arg11[%c40, %c0_6], %5 {strides = array<i32>} : memref<336x128xf32, #tpu.memory_space<vmem>>, vector<256x128xf32>,
    %c0_i32 = arith.constant 0 : i32
    %7 = arith.cmpi eq, %arg1, %c0_i32 : i32
    %8 = arith.extui %7 : i1 to i32
    %c0_i32_7 = arith.constant 0 : i32
    %9 = arith.cmpi ne, %8, %c0_i32_7 : i32
    scf.if %9 {
      %cst_250 = arith.constant 0.000000e+00 : f32
      %405 = vector.broadcast %cst_250 : f32 to vector<32x128xf32>
      %c8_251 = arith.constant 8 : index
      %c0_252 = arith.constant 0 : index
      %406 = vector.load %arg11[%c8_251, %c0_252] : memref<336x128xf32, #tpu.memory_space<vmem>>, vector<32x128xf32>
      tpu.vector_store %arg11[%c8_251, %c0_252], %405 {strides = array<i32>} : memref<336x128xf32, #tpu.memory_space<vmem>>, vector<32x128xf32>,
    } else {
    }
    %c0_i32_8 = arith.constant 0 : i32
    %10 = arith.cmpi sgt, %arg1, %c0_i32_8 : i32
    %11 = arith.extui %10 : i1 to i32
    %c0_i32_9 = arith.constant 0 : i32
    %12 = arith.cmpi ne, %11, %c0_i32_9 : i32
    scf.if %12 {
      %c0_250 = arith.constant 0 : index
      %c0_251 = arith.constant 0 : index
      %c0_252 = arith.constant 0 : index
      %405 = vector.load %arg3[%c0_250, %c0_251, %c0_252] : memref<1x32x128xf32, #tpu.memory_space<vmem>>, vector<1x32x128xf32>
      %406 = vector.shape_cast %405 : vector<1x32x128xf32> to vector<32x128xf32>
      %c8_253 = arith.constant 8 : index
      %c0_254 = arith.constant 0 : index
      %407 = vector.load %arg11[%c8_253, %c0_254] : memref<336x128xf32, #tpu.memory_space<vmem>>, vector<32x128xf32>
      tpu.vector_store %arg11[%c8_253, %c0_254], %406 {strides = array<i32>} : memref<336x128xf32, #tpu.memory_space<vmem>>, vector<32x128xf32>,
    } else {
    }
    %c0_i32_10 = arith.constant 0 : i32
    %13 = arith.cmpi eq, %arg1, %c0_i32_10 : i32
    %14 = arith.extui %13 : i1 to i32
    %c0_i32_11 = arith.constant 0 : i32
    %15 = arith.cmpi ne, %14, %c0_i32_11 : i32
    scf.if %15 {
      %cst_250 = arith.constant 0.000000e+00 : f32
      %405 = vector.broadcast %cst_250 : f32 to vector<32x128xf32>
      %c296 = arith.constant 296 : index
      %c0_251 = arith.constant 0 : index
      %406 = vector.load %arg11[%c296, %c0_251] : memref<336x128xf32, #tpu.memory_space<vmem>>, vector<32x128xf32>
      tpu.vector_store %arg11[%c296, %c0_251], %405 {strides = array<i32>} : memref<336x128xf32, #tpu.memory_space<vmem>>, vector<32x128xf32>,
    } else {
    }
    %c0_i32_12 = arith.constant 0 : i32
    %16 = arith.cmpi slt, %arg1, %c0_i32_12 : i32
    %17 = arith.extui %16 : i1 to i32
    %c0_i32_13 = arith.constant 0 : i32
    %18 = arith.cmpi ne, %17, %c0_i32_13 : i32
    scf.if %18 {
      %c0_250 = arith.constant 0 : index
      %c0_251 = arith.constant 0 : index
      %c0_252 = arith.constant 0 : index
      %405 = vector.load %arg4[%c0_250, %c0_251, %c0_252] : memref<1x32x128xf32, #tpu.memory_space<vmem>>, vector<1x32x128xf32>
      %406 = vector.shape_cast %405 : vector<1x32x128xf32> to vector<32x128xf32>
      %c296 = arith.constant 296 : index
      %c0_253 = arith.constant 0 : index
      %407 = vector.load %arg11[%c296, %c0_253] : memref<336x128xf32, #tpu.memory_space<vmem>>, vector<32x128xf32>
      tpu.vector_store %arg11[%c296, %c0_253], %406 {strides = array<i32>} : memref<336x128xf32, #tpu.memory_space<vmem>>, vector<32x128xf32>,
    } else {
    }
    %c0_14 = arith.constant 0 : index
    %c0_15 = arith.constant 0 : index
    %19 = vector.load %arg7[%c0_14, %c0_15] : memref<1x128xf32, #tpu.memory_space<vmem>>, vector<1x128xf32>
    %c0_16 = arith.constant 0 : index
    %c0_17 = arith.constant 0 : index
    %20 = vector.load %arg8[%c0_16, %c0_17] : memref<1x128xf32, #tpu.memory_space<vmem>>, vector<1x128xf32>
    %cst_18 = arith.constant 0.000000e+00 : f32
    %21 = vector.broadcast %cst_18 : f32 to vector<128x128xf32>
    %cst_19 = arith.constant 0.000000e+00 : f32
    %22 = vector.broadcast %cst_19 : f32 to vector<128x128xf32>
    %c6 = arith.constant 6 : index
    %c0_20 = arith.constant 0 : index
    %23 = vector.load %arg11[%c6, %c0_20] : memref<336x128xf32, #tpu.memory_space<vmem>>, vector<128x128xf32>
    %c0_21 = arith.constant 0 : index
    %c0_22 = arith.constant 0 : index
    %c0_23 = arith.constant 0 : index
    %24 = vector.load %arg6[%c0_21, %c0_22, %c0_23] : memref<25x1x128xf32, #tpu.memory_space<vmem>>, vector<1x1x128xf32>
    %25 = vector.shape_cast %24 : vector<1x1x128xf32> to vector<1x128xf32>
    %26 = vector.broadcast %25 : vector<1x128xf32> to vector<128x128xf32>
    %27 = arith.mulf %23, %26 : vector<128x128xf32>
    %28 = arith.addf %22, %27 : vector<128x128xf32>
    %c22 = arith.constant 22 : index
    %c0_24 = arith.constant 0 : index
    %29 = vector.load %arg11[%c22, %c0_24] : memref<336x128xf32, #tpu.memory_space<vmem>>, vector<128x128xf32>
    %c5 = arith.constant 5 : index
    %c0_25 = arith.constant 0 : index
    %c0_26 = arith.constant 0 : index
    %30 = vector.load %arg6[%c5, %c0_25, %c0_26] : memref<25x1x128xf32, #tpu.memory_space<vmem>>, vector<1x1x128xf32>
    %31 = vector.shape_cast %30 : vector<1x1x128xf32> to vector<1x128xf32>
    %32 = vector.broadcast %31 : vector<1x128xf32> to vector<128x128xf32>
    %33 = arith.mulf %29, %32 : vector<128x128xf32>
    %34 = arith.addf %28, %33 : vector<128x128xf32>
    %c38 = arith.constant 38 : index
    %c0_27 = arith.constant 0 : index
    %35 = vector.load %arg11[%c38, %c0_27] : memref<336x128xf32, #tpu.memory_space<vmem>>, vector<128x128xf32>
    %c10 = arith.constant 10 : index
    %c0_28 = arith.constant 0 : index
    %c0_29 = arith.constant 0 : index
    %36 = vector.load %arg6[%c10, %c0_28, %c0_29] : memref<25x1x128xf32, #tpu.memory_space<vmem>>, vector<1x1x128xf32>
    %37 = vector.shape_cast %36 : vector<1x1x128xf32> to vector<1x128xf32>
    %38 = vector.broadcast %37 : vector<1x128xf32> to vector<128x128xf32>
    %39 = arith.mulf %35, %38 : vector<128x128xf32>
    %40 = arith.addf %34, %39 : vector<128x128xf32>
    %c54 = arith.constant 54 : index
    %c0_30 = arith.constant 0 : index
    %41 = vector.load %arg11[%c54, %c0_30] : memref<336x128xf32, #tpu.memory_space<vmem>>, vector<128x128xf32>
    %c15 = arith.constant 15 : index
    %c0_31 = arith.constant 0 : index
    %c0_32 = arith.constant 0 : index
    %42 = vector.load %arg6[%c15, %c0_31, %c0_32] : memref<25x1x128xf32, #tpu.memory_space<vmem>>, vector<1x1x128xf32>
    %43 = vector.shape_cast %42 : vector<1x1x128xf32> to vector<1x128xf32>
    %44 = vector.broadcast %43 : vector<1x128xf32> to vector<128x128xf32>
    %45 = arith.mulf %41, %44 : vector<128x128xf32>
    %46 = arith.addf %40, %45 : vector<128x128xf32>
    %c70 = arith.constant 70 : index
    %c0_33 = arith.constant 0 : index
    %47 = vector.load %arg11[%c70, %c0_33] : memref<336x128xf32, #tpu.memory_space<vmem>>, vector<128x128xf32>
    %c20 = arith.constant 20 : index
    %c0_34 = arith.constant 0 : index
    %c0_35 = arith.constant 0 : index
    %48 = vector.load %arg6[%c20, %c0_34, %c0_35] : memref<25x1x128xf32, #tpu.memory_space<vmem>>, vector<1x1x128xf32>
    %49 = vector.shape_cast %48 : vector<1x1x128xf32> to vector<1x128xf32>
    %50 = vector.broadcast %49 : vector<1x128xf32> to vector<128x128xf32>
    %51 = arith.mulf %47, %50 : vector<128x128xf32>
    %52 = arith.addf %46, %51 : vector<128x128xf32>
    %c0_36 = arith.constant 0 : index
    %c0_37 = arith.constant 0 : index
    %c0_38 = arith.constant 0 : index
    %53 = vector.load %arg5[%c0_36, %c0_37, %c0_38] : memref<5x128x1xf32, #tpu.memory_space<vmem>>, vector<1x128x1xf32>
    %54 = vector.shape_cast %53 : vector<1x128x1xf32> to vector<128x1xf32>
    %55 = vector.broadcast %54 : vector<128x1xf32> to vector<128x128xf32>
    %56 = arith.mulf %52, %55 : vector<128x128xf32>
    %57 = arith.addf %21, %56 : vector<128x128xf32>
    %cst_39 = arith.constant 0.000000e+00 : f32
    %58 = vector.broadcast %cst_39 : f32 to vector<128x128xf32>
    %c7 = arith.constant 7 : index
    %c0_40 = arith.constant 0 : index
    %59 = vector.load %arg11[%c7, %c0_40] : memref<336x128xf32, #tpu.memory_space<vmem>>, vector<128x128xf32>
    %c1 = arith.constant 1 : index
    %c0_41 = arith.constant 0 : index
    %c0_42 = arith.constant 0 : index
    %60 = vector.load %arg6[%c1, %c0_41, %c0_42] : memref<25x1x128xf32, #tpu.memory_space<vmem>>, vector<1x1x128xf32>
    %61 = vector.shape_cast %60 : vector<1x1x128xf32> to vector<1x128xf32>
    %62 = vector.broadcast %61 : vector<1x128xf32> to vector<128x128xf32>
    %63 = arith.mulf %59, %62 : vector<128x128xf32>
    %64 = arith.addf %58, %63 : vector<128x128xf32>
    %c23 = arith.constant 23 : index
    %c0_43 = arith.constant 0 : index
    %65 = vector.load %arg11[%c23, %c0_43] : memref<336x128xf32, #tpu.memory_space<vmem>>, vector<128x128xf32>
    %c6_44 = arith.constant 6 : index
    %c0_45 = arith.constant 0 : index
    %c0_46 = arith.constant 0 : index
    %66 = vector.load %arg6[%c6_44, %c0_45, %c0_46] : memref<25x1x128xf32, #tpu.memory_space<vmem>>, vector<1x1x128xf32>
    %67 = vector.shape_cast %66 : vector<1x1x128xf32> to vector<1x128xf32>
    %68 = vector.broadcast %67 : vector<1x128xf32> to vector<128x128xf32>
    %69 = arith.mulf %65, %68 : vector<128x128xf32>
    %70 = arith.addf %64, %69 : vector<128x128xf32>
    %c39 = arith.constant 39 : index
    %c0_47 = arith.constant 0 : index
    %71 = vector.load %arg11[%c39, %c0_47] : memref<336x128xf32, #tpu.memory_space<vmem>>, vector<128x128xf32>
    %c11 = arith.constant 11 : index
    %c0_48 = arith.constant 0 : index
    %c0_49 = arith.constant 0 : index
    %72 = vector.load %arg6[%c11, %c0_48, %c0_49] : memref<25x1x128xf32, #tpu.memory_space<vmem>>, vector<1x1x128xf32>
    %73 = vector.shape_cast %72 : vector<1x1x128xf32> to vector<1x128xf32>
    %74 = vector.broadcast %73 : vector<1x128xf32> to vector<128x128xf32>
    %75 = arith.mulf %71, %74 : vector<128x128xf32>
    %76 = arith.addf %70, %75 : vector<128x128xf32>
    %c55 = arith.constant 55 : index
    %c0_50 = arith.constant 0 : index
    %77 = vector.load %arg11[%c55, %c0_50] : memref<336x128xf32, #tpu.memory_space<vmem>>, vector<128x128xf32>
    %c16 = arith.constant 16 : index
    %c0_51 = arith.constant 0 : index
    %c0_52 = arith.constant 0 : index
    %78 = vector.load %arg6[%c16, %c0_51, %c0_52] : memref<25x1x128xf32, #tpu.memory_space<vmem>>, vector<1x1x128xf32>
    %79 = vector.shape_cast %78 : vector<1x1x128xf32> to vector<1x128xf32>
    %80 = vector.broadcast %79 : vector<1x128xf32> to vector<128x128xf32>
    %81 = arith.mulf %77, %80 : vector<128x128xf32>
    %82 = arith.addf %76, %81 : vector<128x128xf32>
    %c71 = arith.constant 71 : index
    %c0_53 = arith.constant 0 : index
    %83 = vector.load %arg11[%c71, %c0_53] : memref<336x128xf32, #tpu.memory_space<vmem>>, vector<128x128xf32>
    %c21 = arith.constant 21 : index
    %c0_54 = arith.constant 0 : index
    %c0_55 = arith.constant 0 : index
    %84 = vector.load %arg6[%c21, %c0_54, %c0_55] : memref<25x1x128xf32, #tpu.memory_space<vmem>>, vector<1x1x128xf32>
    %85 = vector.shape_cast %84 : vector<1x1x128xf32> to vector<1x128xf32>
    %86 = vector.broadcast %85 : vector<1x128xf32> to vector<128x128xf32>
    %87 = arith.mulf %83, %86 : vector<128x128xf32>
    %88 = arith.addf %82, %87 : vector<128x128xf32>
    %c1_56 = arith.constant 1 : index
    %c0_57 = arith.constant 0 : index
    %c0_58 = arith.constant 0 : index
    %89 = vector.load %arg5[%c1_56, %c0_57, %c0_58] : memref<5x128x1xf32, #tpu.memory_space<vmem>>, vector<1x128x1xf32>
    %90 = vector.shape_cast %89 : vector<1x128x1xf32> to vector<128x1xf32>
    %91 = vector.broadcast %90 : vector<128x1xf32> to vector<128x128xf32>
    %92 = arith.mulf %88, %91 : vector<128x128xf32>
    %93 = arith.addf %57, %92 : vector<128x128xf32>
    %cst_59 = arith.constant 0.000000e+00 : f32
    %94 = vector.broadcast %cst_59 : f32 to vector<128x128xf32>
    %c8 = arith.constant 8 : index
    %c0_60 = arith.constant 0 : index
    %95 = vector.load %arg11[%c8, %c0_60] : memref<336x128xf32, #tpu.memory_space<vmem>>, vector<128x128xf32>
    %c2 = arith.constant 2 : index
    %c0_61 = arith.constant 0 : index
    %c0_62 = arith.constant 0 : index
    %96 = vector.load %arg6[%c2, %c0_61, %c0_62] : memref<25x1x128xf32, #tpu.memory_space<vmem>>, vector<1x1x128xf32>
    %97 = vector.shape_cast %96 : vector<1x1x128xf32> to vector<1x128xf32>
    %98 = vector.broadcast %97 : vector<1x128xf32> to vector<128x128xf32>
    %99 = arith.mulf %95, %98 : vector<128x128xf32>
    %100 = arith.addf %94, %99 : vector<128x128xf32>
    %c24 = arith.constant 24 : index
    %c0_63 = arith.constant 0 : index
    %101 = vector.load %arg11[%c24, %c0_63] : memref<336x128xf32, #tpu.memory_space<vmem>>, vector<128x128xf32>
    %c7_64 = arith.constant 7 : index
    %c0_65 = arith.constant 0 : index
    %c0_66 = arith.constant 0 : index
    %102 = vector.load %arg6[%c7_64, %c0_65, %c0_66] : memref<25x1x128xf32, #tpu.memory_space<vmem>>, vector<1x1x128xf32>
    %103 = vector.shape_cast %102 : vector<1x1x128xf32> to vector<1x128xf32>
    %104 = vector.broadcast %103 : vector<1x128xf32> to vector<128x128xf32>
    %105 = arith.mulf %101, %104 : vector<128x128xf32>
    %106 = arith.addf %100, %105 : vector<128x128xf32>
    %c40_67 = arith.constant 40 : index
    %c0_68 = arith.constant 0 : index
    %107 = vector.load %arg11[%c40_67, %c0_68] : memref<336x128xf32, #tpu.memory_space<vmem>>, vector<128x128xf32>
    %c12 = arith.constant 12 : index
    %c0_69 = arith.constant 0 : index
    %c0_70 = arith.constant 0 : index
    %108 = vector.load %arg6[%c12, %c0_69, %c0_70] : memref<25x1x128xf32, #tpu.memory_space<vmem>>, vector<1x1x128xf32>
    %109 = vector.shape_cast %108 : vector<1x1x128xf32> to vector<1x128xf32>
    %110 = vector.broadcast %109 : vector<1x128xf32> to vector<128x128xf32>
    %111 = arith.mulf %107, %110 : vector<128x128xf32>
    %112 = arith.addf %106, %111 : vector<128x128xf32>
    %c56 = arith.constant 56 : index
    %c0_71 = arith.constant 0 : index
    %113 = vector.load %arg11[%c56, %c0_71] : memref<336x128xf32, #tpu.memory_space<vmem>>, vector<128x128xf32>
    %c17 = arith.constant 17 : index
    %c0_72 = arith.constant 0 : index
    %c0_73 = arith.constant 0 : index
    %114 = vector.load %arg6[%c17, %c0_72, %c0_73] : memref<25x1x128xf32, #tpu.memory_space<vmem>>, vector<1x1x128xf32>
    %115 = vector.shape_cast %114 : vector<1x1x128xf32> to vector<1x128xf32>
    %116 = vector.broadcast %115 : vector<1x128xf32> to vector<128x128xf32>
    %117 = arith.mulf %113, %116 : vector<128x128xf32>
    %118 = arith.addf %112, %117 : vector<128x128xf32>
    %c72 = arith.constant 72 : index
    %c0_74 = arith.constant 0 : index
    %119 = vector.load %arg11[%c72, %c0_74] : memref<336x128xf32, #tpu.memory_space<vmem>>, vector<128x128xf32>
    %c22_75 = arith.constant 22 : index
    %c0_76 = arith.constant 0 : index
    %c0_77 = arith.constant 0 : index
    %120 = vector.load %arg6[%c22_75, %c0_76, %c0_77] : memref<25x1x128xf32, #tpu.memory_space<vmem>>, vector<1x1x128xf32>
    %121 = vector.shape_cast %120 : vector<1x1x128xf32> to vector<1x128xf32>
    %122 = vector.broadcast %121 : vector<1x128xf32> to vector<128x128xf32>
    %123 = arith.mulf %119, %122 : vector<128x128xf32>
    %124 = arith.addf %118, %123 : vector<128x128xf32>
    %125 = arith.addf %93, %124 : vector<128x128xf32>
    %cst_78 = arith.constant 0.000000e+00 : f32
    %126 = vector.broadcast %cst_78 : f32 to vector<128x128xf32>
    %c9 = arith.constant 9 : index
    %c0_79 = arith.constant 0 : index
    %127 = vector.load %arg11[%c9, %c0_79] : memref<336x128xf32, #tpu.memory_space<vmem>>, vector<128x128xf32>
    %c3 = arith.constant 3 : index
    %c0_80 = arith.constant 0 : index
    %c0_81 = arith.constant 0 : index
    %128 = vector.load %arg6[%c3, %c0_80, %c0_81] : memref<25x1x128xf32, #tpu.memory_space<vmem>>, vector<1x1x128xf32>
    %129 = vector.shape_cast %128 : vector<1x1x128xf32> to vector<1x128xf32>
    %130 = vector.broadcast %129 : vector<1x128xf32> to vector<128x128xf32>
    %131 = arith.mulf %127, %130 : vector<128x128xf32>
    %132 = arith.addf %126, %131 : vector<128x128xf32>
    %c25 = arith.constant 25 : index
    %c0_82 = arith.constant 0 : index
    %133 = vector.load %arg11[%c25, %c0_82] : memref<336x128xf32, #tpu.memory_space<vmem>>, vector<128x128xf32>
    %c8_83 = arith.constant 8 : index
    %c0_84 = arith.constant 0 : index
    %c0_85 = arith.constant 0 : index
    %134 = vector.load %arg6[%c8_83, %c0_84, %c0_85] : memref<25x1x128xf32, #tpu.memory_space<vmem>>, vector<1x1x128xf32>
    %135 = vector.shape_cast %134 : vector<1x1x128xf32> to vector<1x128xf32>
    %136 = vector.broadcast %135 : vector<1x128xf32> to vector<128x128xf32>
    %137 = arith.mulf %133, %136 : vector<128x128xf32>
    %138 = arith.addf %132, %137 : vector<128x128xf32>
    %c41 = arith.constant 41 : index
    %c0_86 = arith.constant 0 : index
    %139 = vector.load %arg11[%c41, %c0_86] : memref<336x128xf32, #tpu.memory_space<vmem>>, vector<128x128xf32>
    %c13 = arith.constant 13 : index
    %c0_87 = arith.constant 0 : index
    %c0_88 = arith.constant 0 : index
    %140 = vector.load %arg6[%c13, %c0_87, %c0_88] : memref<25x1x128xf32, #tpu.memory_space<vmem>>, vector<1x1x128xf32>
    %141 = vector.shape_cast %140 : vector<1x1x128xf32> to vector<1x128xf32>
    %142 = vector.broadcast %141 : vector<1x128xf32> to vector<128x128xf32>
    %143 = arith.mulf %139, %142 : vector<128x128xf32>
    %144 = arith.addf %138, %143 : vector<128x128xf32>
    %c57 = arith.constant 57 : index
    %c0_89 = arith.constant 0 : index
    %145 = vector.load %arg11[%c57, %c0_89] : memref<336x128xf32, #tpu.memory_space<vmem>>, vector<128x128xf32>
    %c18 = arith.constant 18 : index
    %c0_90 = arith.constant 0 : index
    %c0_91 = arith.constant 0 : index
    %146 = vector.load %arg6[%c18, %c0_90, %c0_91] : memref<25x1x128xf32, #tpu.memory_space<vmem>>, vector<1x1x128xf32>
    %147 = vector.shape_cast %146 : vector<1x1x128xf32> to vector<1x128xf32>
    %148 = vector.broadcast %147 : vector<1x128xf32> to vector<128x128xf32>
    %149 = arith.mulf %145, %148 : vector<128x128xf32>
    %150 = arith.addf %144, %149 : vector<128x128xf32>
    %c73 = arith.constant 73 : index
    %c0_92 = arith.constant 0 : index
    %151 = vector.load %arg11[%c73, %c0_92] : memref<336x128xf32, #tpu.memory_space<vmem>>, vector<128x128xf32>
    %c23_93 = arith.constant 23 : index
    %c0_94 = arith.constant 0 : index
    %c0_95 = arith.constant 0 : index
    %152 = vector.load %arg6[%c23_93, %c0_94, %c0_95] : memref<25x1x128xf32, #tpu.memory_space<vmem>>, vector<1x1x128xf32>
    %153 = vector.shape_cast %152 : vector<1x1x128xf32> to vector<1x128xf32>
    %154 = vector.broadcast %153 : vector<1x128xf32> to vector<128x128xf32>
    %155 = arith.mulf %151, %154 : vector<128x128xf32>
    %156 = arith.addf %150, %155 : vector<128x128xf32>
    %c3_96 = arith.constant 3 : index
    %c0_97 = arith.constant 0 : index
    %c0_98 = arith.constant 0 : index
    %157 = vector.load %arg5[%c3_96, %c0_97, %c0_98] : memref<5x128x1xf32, #tpu.memory_space<vmem>>, vector<1x128x1xf32>
    %158 = vector.shape_cast %157 : vector<1x128x1xf32> to vector<128x1xf32>
    %159 = vector.broadcast %158 : vector<128x1xf32> to vector<128x128xf32>
    %160 = arith.mulf %156, %159 : vector<128x128xf32>
    %161 = arith.addf %125, %160 : vector<128x128xf32>
    %cst_99 = arith.constant 0.000000e+00 : f32
    %162 = vector.broadcast %cst_99 : f32 to vector<128x128xf32>
    %c10_100 = arith.constant 10 : index
    %c0_101 = arith.constant 0 : index
    %163 = vector.load %arg11[%c10_100, %c0_101] : memref<336x128xf32, #tpu.memory_space<vmem>>, vector<128x128xf32>
    %c4 = arith.constant 4 : index
    %c0_102 = arith.constant 0 : index
    %c0_103 = arith.constant 0 : index
    %164 = vector.load %arg6[%c4, %c0_102, %c0_103] : memref<25x1x128xf32, #tpu.memory_space<vmem>>, vector<1x1x128xf32>
    %165 = vector.shape_cast %164 : vector<1x1x128xf32> to vector<1x128xf32>
    %166 = vector.broadcast %165 : vector<1x128xf32> to vector<128x128xf32>
    %167 = arith.mulf %163, %166 : vector<128x128xf32>
    %168 = arith.addf %162, %167 : vector<128x128xf32>
    %c26 = arith.constant 26 : index
    %c0_104 = arith.constant 0 : index
    %169 = vector.load %arg11[%c26, %c0_104] : memref<336x128xf32, #tpu.memory_space<vmem>>, vector<128x128xf32>
    %c9_105 = arith.constant 9 : index
    %c0_106 = arith.constant 0 : index
    %c0_107 = arith.constant 0 : index
    %170 = vector.load %arg6[%c9_105, %c0_106, %c0_107] : memref<25x1x128xf32, #tpu.memory_space<vmem>>, vector<1x1x128xf32>
    %171 = vector.shape_cast %170 : vector<1x1x128xf32> to vector<1x128xf32>
    %172 = vector.broadcast %171 : vector<1x128xf32> to vector<128x128xf32>
    %173 = arith.mulf %169, %172 : vector<128x128xf32>
    %174 = arith.addf %168, %173 : vector<128x128xf32>
    %c42 = arith.constant 42 : index
    %c0_108 = arith.constant 0 : index
    %175 = vector.load %arg11[%c42, %c0_108] : memref<336x128xf32, #tpu.memory_space<vmem>>, vector<128x128xf32>
    %c14 = arith.constant 14 : index
    %c0_109 = arith.constant 0 : index
    %c0_110 = arith.constant 0 : index
    %176 = vector.load %arg6[%c14, %c0_109, %c0_110] : memref<25x1x128xf32, #tpu.memory_space<vmem>>, vector<1x1x128xf32>
    %177 = vector.shape_cast %176 : vector<1x1x128xf32> to vector<1x128xf32>
    %178 = vector.broadcast %177 : vector<1x128xf32> to vector<128x128xf32>
    %179 = arith.mulf %175, %178 : vector<128x128xf32>
    %180 = arith.addf %174, %179 : vector<128x128xf32>
    %c58 = arith.constant 58 : index
    %c0_111 = arith.constant 0 : index
    %181 = vector.load %arg11[%c58, %c0_111] : memref<336x128xf32, #tpu.memory_space<vmem>>, vector<128x128xf32>
    %c19 = arith.constant 19 : index
    %c0_112 = arith.constant 0 : index
    %c0_113 = arith.constant 0 : index
    %182 = vector.load %arg6[%c19, %c0_112, %c0_113] : memref<25x1x128xf32, #tpu.memory_space<vmem>>, vector<1x1x128xf32>
    %183 = vector.shape_cast %182 : vector<1x1x128xf32> to vector<1x128xf32>
    %184 = vector.broadcast %183 : vector<1x128xf32> to vector<128x128xf32>
    %185 = arith.mulf %181, %184 : vector<128x128xf32>
    %186 = arith.addf %180, %185 : vector<128x128xf32>
    %c74 = arith.constant 74 : index
    %c0_114 = arith.constant 0 : index
    %187 = vector.load %arg11[%c74, %c0_114] : memref<336x128xf32, #tpu.memory_space<vmem>>, vector<128x128xf32>
    %c24_115 = arith.constant 24 : index
    %c0_116 = arith.constant 0 : index
    %c0_117 = arith.constant 0 : index
    %188 = vector.load %arg6[%c24_115, %c0_116, %c0_117] : memref<25x1x128xf32, #tpu.memory_space<vmem>>, vector<1x1x128xf32>
    %189 = vector.shape_cast %188 : vector<1x1x128xf32> to vector<1x128xf32>
    %190 = vector.broadcast %189 : vector<1x128xf32> to vector<128x128xf32>
    %191 = arith.mulf %187, %190 : vector<128x128xf32>
    %192 = arith.addf %186, %191 : vector<128x128xf32>
    %c4_118 = arith.constant 4 : index
    %c0_119 = arith.constant 0 : index
    %c0_120 = arith.constant 0 : index
    %193 = vector.load %arg5[%c4_118, %c0_119, %c0_120] : memref<5x128x1xf32, #tpu.memory_space<vmem>>, vector<1x128x1xf32>
    %194 = vector.shape_cast %193 : vector<1x128x1xf32> to vector<128x1xf32>
    %195 = vector.broadcast %194 : vector<128x1xf32> to vector<128x128xf32>
    %196 = arith.mulf %192, %195 : vector<128x128xf32>
    %197 = arith.addf %161, %196 : vector<128x128xf32>
    %198 = vector.broadcast %19 : vector<1x128xf32> to vector<128x128xf32>
    %199 = arith.mulf %197, %198 : vector<128x128xf32>
    %200 = vector.broadcast %20 : vector<1x128xf32> to vector<128x128xf32>
    %201 = arith.addf %199, %200 : vector<128x128xf32>
    %cst_121 = arith.constant 5.000000e-01 : f32
    %202 = vector.broadcast %cst_121 : f32 to vector<128x128xf32>
    %203 = arith.mulf %202, %201 : vector<128x128xf32>
    %cst_122 = arith.constant 0.707106769 : f32
    %204 = vector.broadcast %cst_122 : f32 to vector<128x128xf32>
    %205 = arith.mulf %201, %204 : vector<128x128xf32>
    %206 = math.erf %205 : vector<128x128xf32>
    %cst_123 = arith.constant 1.000000e+00 : f32
    %207 = vector.broadcast %cst_123 : f32 to vector<128x128xf32>
    %208 = arith.addf %207, %206 : vector<128x128xf32>
    %209 = arith.mulf %203, %208 : vector<128x128xf32>
    %c0_124 = arith.constant 0 : index
    %c0_125 = arith.constant 0 : index
    %c0_126 = arith.constant 0 : index
    %210 = vector.load %arg10[%c0_124, %c0_125, %c0_126] : memref<1x256x128xf32, #tpu.memory_space<vmem>>, vector<1x128x128xf32>
    %211 = vector.shape_cast %210 : vector<1x128x128xf32> to vector<128x128xf32>
    %212 = vector.shape_cast %209 : vector<128x128xf32> to vector<1x128x128xf32>
    tpu.vector_store %arg10[%c0_124, %c0_125, %c0_126], %212 {strides = array<i32>} : memref<1x256x128xf32, #tpu.memory_space<vmem>>, vector<1x128x128xf32>,
    %cst_127 = arith.constant 0.000000e+00 : f32
    %213 = vector.broadcast %cst_127 : f32 to vector<128x128xf32>
    %cst_128 = arith.constant 0.000000e+00 : f32
    %214 = vector.broadcast %cst_128 : f32 to vector<128x128xf32>
    %c134 = arith.constant 134 : index
    %c0_129 = arith.constant 0 : index
    %215 = vector.load %arg11[%c134, %c0_129] : memref<336x128xf32, #tpu.memory_space<vmem>>, vector<128x128xf32>
    %c0_130 = arith.constant 0 : index
    %c0_131 = arith.constant 0 : index
    %c0_132 = arith.constant 0 : index
    %216 = vector.load %arg6[%c0_130, %c0_131, %c0_132] : memref<25x1x128xf32, #tpu.memory_space<vmem>>, vector<1x1x128xf32>
    %217 = vector.shape_cast %216 : vector<1x1x128xf32> to vector<1x128xf32>
    %218 = vector.broadcast %217 : vector<1x128xf32> to vector<128x128xf32>
    %219 = arith.mulf %215, %218 : vector<128x128xf32>
    %220 = arith.addf %214, %219 : vector<128x128xf32>
    %c150 = arith.constant 150 : index
    %c0_133 = arith.constant 0 : index
    %221 = vector.load %arg11[%c150, %c0_133] : memref<336x128xf32, #tpu.memory_space<vmem>>, vector<128x128xf32>
    %c5_134 = arith.constant 5 : index
    %c0_135 = arith.constant 0 : index
    %c0_136 = arith.constant 0 : index
    %222 = vector.load %arg6[%c5_134, %c0_135, %c0_136] : memref<25x1x128xf32, #tpu.memory_space<vmem>>, vector<1x1x128xf32>
    %223 = vector.shape_cast %222 : vector<1x1x128xf32> to vector<1x128xf32>
    %224 = vector.broadcast %223 : vector<1x128xf32> to vector<128x128xf32>
    %225 = arith.mulf %221, %224 : vector<128x128xf32>
    %226 = arith.addf %220, %225 : vector<128x128xf32>
    %c166 = arith.constant 166 : index
    %c0_137 = arith.constant 0 : index
    %227 = vector.load %arg11[%c166, %c0_137] : memref<336x128xf32, #tpu.memory_space<vmem>>, vector<128x128xf32>
    %c10_138 = arith.constant 10 : index
    %c0_139 = arith.constant 0 : index
    %c0_140 = arith.constant 0 : index
    %228 = vector.load %arg6[%c10_138, %c0_139, %c0_140] : memref<25x1x128xf32, #tpu.memory_space<vmem>>, vector<1x1x128xf32>
    %229 = vector.shape_cast %228 : vector<1x1x128xf32> to vector<1x128xf32>
    %230 = vector.broadcast %229 : vector<1x128xf32> to vector<128x128xf32>
    %231 = arith.mulf %227, %230 : vector<128x128xf32>
    %232 = arith.addf %226, %231 : vector<128x128xf32>
    %c182 = arith.constant 182 : index
    %c0_141 = arith.constant 0 : index
    %233 = vector.load %arg11[%c182, %c0_141] : memref<336x128xf32, #tpu.memory_space<vmem>>, vector<128x128xf32>
    %c15_142 = arith.constant 15 : index
    %c0_143 = arith.constant 0 : index
    %c0_144 = arith.constant 0 : index
    %234 = vector.load %arg6[%c15_142, %c0_143, %c0_144] : memref<25x1x128xf32, #tpu.memory_space<vmem>>, vector<1x1x128xf32>
    %235 = vector.shape_cast %234 : vector<1x1x128xf32> to vector<1x128xf32>
    %236 = vector.broadcast %235 : vector<1x128xf32> to vector<128x128xf32>
    %237 = arith.mulf %233, %236 : vector<128x128xf32>
    %238 = arith.addf %232, %237 : vector<128x128xf32>
    %c198 = arith.constant 198 : index
    %c0_145 = arith.constant 0 : index
    %239 = vector.load %arg11[%c198, %c0_145] : memref<336x128xf32, #tpu.memory_space<vmem>>, vector<128x128xf32>
    %c20_146 = arith.constant 20 : index
    %c0_147 = arith.constant 0 : index
    %c0_148 = arith.constant 0 : index
    %240 = vector.load %arg6[%c20_146, %c0_147, %c0_148] : memref<25x1x128xf32, #tpu.memory_space<vmem>>, vector<1x1x128xf32>
    %241 = vector.shape_cast %240 : vector<1x1x128xf32> to vector<1x128xf32>
    %242 = vector.broadcast %241 : vector<1x128xf32> to vector<128x128xf32>
    %243 = arith.mulf %239, %242 : vector<128x128xf32>
    %244 = arith.addf %238, %243 : vector<128x128xf32>
    %c0_149 = arith.constant 0 : index
    %c0_150 = arith.constant 0 : index
    %c0_151 = arith.constant 0 : index
    %245 = vector.load %arg5[%c0_149, %c0_150, %c0_151] : memref<5x128x1xf32, #tpu.memory_space<vmem>>, vector<1x128x1xf32>
    %246 = vector.shape_cast %245 : vector<1x128x1xf32> to vector<128x1xf32>
    %247 = vector.broadcast %246 : vector<128x1xf32> to vector<128x128xf32>
    %248 = arith.mulf %244, %247 : vector<128x128xf32>
    %249 = arith.addf %213, %248 : vector<128x128xf32>
    %cst_152 = arith.constant 0.000000e+00 : f32
    %250 = vector.broadcast %cst_152 : f32 to vector<128x128xf32>
    %c135 = arith.constant 135 : index
    %c0_153 = arith.constant 0 : index
    %251 = vector.load %arg11[%c135, %c0_153] : memref<336x128xf32, #tpu.memory_space<vmem>>, vector<128x128xf32>
    %c1_154 = arith.constant 1 : index
    %c0_155 = arith.constant 0 : index
    %c0_156 = arith.constant 0 : index
    %252 = vector.load %arg6[%c1_154, %c0_155, %c0_156] : memref<25x1x128xf32, #tpu.memory_space<vmem>>, vector<1x1x128xf32>
    %253 = vector.shape_cast %252 : vector<1x1x128xf32> to vector<1x128xf32>
    %254 = vector.broadcast %253 : vector<1x128xf32> to vector<128x128xf32>
    %255 = arith.mulf %251, %254 : vector<128x128xf32>
    %256 = arith.addf %250, %255 : vector<128x128xf32>
    %c151 = arith.constant 151 : index
    %c0_157 = arith.constant 0 : index
    %257 = vector.load %arg11[%c151, %c0_157] : memref<336x128xf32, #tpu.memory_space<vmem>>, vector<128x128xf32>
    %c6_158 = arith.constant 6 : index
    %c0_159 = arith.constant 0 : index
    %c0_160 = arith.constant 0 : index
    %258 = vector.load %arg6[%c6_158, %c0_159, %c0_160] : memref<25x1x128xf32, #tpu.memory_space<vmem>>, vector<1x1x128xf32>
    %259 = vector.shape_cast %258 : vector<1x1x128xf32> to vector<1x128xf32>
    %260 = vector.broadcast %259 : vector<1x128xf32> to vector<128x128xf32>
    %261 = arith.mulf %257, %260 : vector<128x128xf32>
    %262 = arith.addf %256, %261 : vector<128x128xf32>
    %c167 = arith.constant 167 : index
    %c0_161 = arith.constant 0 : index
    %263 = vector.load %arg11[%c167, %c0_161] : memref<336x128xf32, #tpu.memory_space<vmem>>, vector<128x128xf32>
    %c11_162 = arith.constant 11 : index
    %c0_163 = arith.constant 0 : index
    %c0_164 = arith.constant 0 : index
    %264 = vector.load %arg6[%c11_162, %c0_163, %c0_164] : memref<25x1x128xf32, #tpu.memory_space<vmem>>, vector<1x1x128xf32>
    %265 = vector.shape_cast %264 : vector<1x1x128xf32> to vector<1x128xf32>
    %266 = vector.broadcast %265 : vector<1x128xf32> to vector<128x128xf32>
    %267 = arith.mulf %263, %266 : vector<128x128xf32>
    %268 = arith.addf %262, %267 : vector<128x128xf32>
    %c183 = arith.constant 183 : index
    %c0_165 = arith.constant 0 : index
    %269 = vector.load %arg11[%c183, %c0_165] : memref<336x128xf32, #tpu.memory_space<vmem>>, vector<128x128xf32>
    %c16_166 = arith.constant 16 : index
    %c0_167 = arith.constant 0 : index
    %c0_168 = arith.constant 0 : index
    %270 = vector.load %arg6[%c16_166, %c0_167, %c0_168] : memref<25x1x128xf32, #tpu.memory_space<vmem>>, vector<1x1x128xf32>
    %271 = vector.shape_cast %270 : vector<1x1x128xf32> to vector<1x128xf32>
    %272 = vector.broadcast %271 : vector<1x128xf32> to vector<128x128xf32>
    %273 = arith.mulf %269, %272 : vector<128x128xf32>
    %274 = arith.addf %268, %273 : vector<128x128xf32>
    %c199 = arith.constant 199 : index
    %c0_169 = arith.constant 0 : index
    %275 = vector.load %arg11[%c199, %c0_169] : memref<336x128xf32, #tpu.memory_space<vmem>>, vector<128x128xf32>
    %c21_170 = arith.constant 21 : index
    %c0_171 = arith.constant 0 : index
    %c0_172 = arith.constant 0 : index
    %276 = vector.load %arg6[%c21_170, %c0_171, %c0_172] : memref<25x1x128xf32, #tpu.memory_space<vmem>>, vector<1x1x128xf32>
    %277 = vector.shape_cast %276 : vector<1x1x128xf32> to vector<1x128xf32>
    %278 = vector.broadcast %277 : vector<1x128xf32> to vector<128x128xf32>
    %279 = arith.mulf %275, %278 : vector<128x128xf32>
    %280 = arith.addf %274, %279 : vector<128x128xf32>
    %c1_173 = arith.constant 1 : index
    %c0_174 = arith.constant 0 : index
    %c0_175 = arith.constant 0 : index
    %281 = vector.load %arg5[%c1_173, %c0_174, %c0_175] : memref<5x128x1xf32, #tpu.memory_space<vmem>>, vector<1x128x1xf32>
    %282 = vector.shape_cast %281 : vector<1x128x1xf32> to vector<128x1xf32>
    %283 = vector.broadcast %282 : vector<128x1xf32> to vector<128x128xf32>
    %284 = arith.mulf %280, %283 : vector<128x128xf32>
    %285 = arith.addf %249, %284 : vector<128x128xf32>
    %cst_176 = arith.constant 0.000000e+00 : f32
    %286 = vector.broadcast %cst_176 : f32 to vector<128x128xf32>
    %c136 = arith.constant 136 : index
    %c0_177 = arith.constant 0 : index
    %287 = vector.load %arg11[%c136, %c0_177] : memref<336x128xf32, #tpu.memory_space<vmem>>, vector<128x128xf32>
    %c2_178 = arith.constant 2 : index
    %c0_179 = arith.constant 0 : index
    %c0_180 = arith.constant 0 : index
    %288 = vector.load %arg6[%c2_178, %c0_179, %c0_180] : memref<25x1x128xf32, #tpu.memory_space<vmem>>, vector<1x1x128xf32>
    %289 = vector.shape_cast %288 : vector<1x1x128xf32> to vector<1x128xf32>
    %290 = vector.broadcast %289 : vector<1x128xf32> to vector<128x128xf32>
    %291 = arith.mulf %287, %290 : vector<128x128xf32>
    %292 = arith.addf %286, %291 : vector<128x128xf32>
    %c152 = arith.constant 152 : index
    %c0_181 = arith.constant 0 : index
    %293 = vector.load %arg11[%c152, %c0_181] : memref<336x128xf32, #tpu.memory_space<vmem>>, vector<128x128xf32>
    %c7_182 = arith.constant 7 : index
    %c0_183 = arith.constant 0 : index
    %c0_184 = arith.constant 0 : index
    %294 = vector.load %arg6[%c7_182, %c0_183, %c0_184] : memref<25x1x128xf32, #tpu.memory_space<vmem>>, vector<1x1x128xf32>
    %295 = vector.shape_cast %294 : vector<1x1x128xf32> to vector<1x128xf32>
    %296 = vector.broadcast %295 : vector<1x128xf32> to vector<128x128xf32>
    %297 = arith.mulf %293, %296 : vector<128x128xf32>
    %298 = arith.addf %292, %297 : vector<128x128xf32>
    %c168 = arith.constant 168 : index
    %c0_185 = arith.constant 0 : index
    %299 = vector.load %arg11[%c168, %c0_185] : memref<336x128xf32, #tpu.memory_space<vmem>>, vector<128x128xf32>
    %c12_186 = arith.constant 12 : index
    %c0_187 = arith.constant 0 : index
    %c0_188 = arith.constant 0 : index
    %300 = vector.load %arg6[%c12_186, %c0_187, %c0_188] : memref<25x1x128xf32, #tpu.memory_space<vmem>>, vector<1x1x128xf32>
    %301 = vector.shape_cast %300 : vector<1x1x128xf32> to vector<1x128xf32>
    %302 = vector.broadcast %301 : vector<1x128xf32> to vector<128x128xf32>
    %303 = arith.mulf %299, %302 : vector<128x128xf32>
    %304 = arith.addf %298, %303 : vector<128x128xf32>
    %c184 = arith.constant 184 : index
    %c0_189 = arith.constant 0 : index
    %305 = vector.load %arg11[%c184, %c0_189] : memref<336x128xf32, #tpu.memory_space<vmem>>, vector<128x128xf32>
    %c17_190 = arith.constant 17 : index
    %c0_191 = arith.constant 0 : index
    %c0_192 = arith.constant 0 : index
    %306 = vector.load %arg6[%c17_190, %c0_191, %c0_192] : memref<25x1x128xf32, #tpu.memory_space<vmem>>, vector<1x1x128xf32>
    %307 = vector.shape_cast %306 : vector<1x1x128xf32> to vector<1x128xf32>
    %308 = vector.broadcast %307 : vector<1x128xf32> to vector<128x128xf32>
    %309 = arith.mulf %305, %308 : vector<128x128xf32>
    %310 = arith.addf %304, %309 : vector<128x128xf32>
    %c200 = arith.constant 200 : index
    %c0_193 = arith.constant 0 : index
    %311 = vector.load %arg11[%c200, %c0_193] : memref<336x128xf32, #tpu.memory_space<vmem>>, vector<128x128xf32>
    %c22_194 = arith.constant 22 : index
    %c0_195 = arith.constant 0 : index
    %c0_196 = arith.constant 0 : index
    %312 = vector.load %arg6[%c22_194, %c0_195, %c0_196] : memref<25x1x128xf32, #tpu.memory_space<vmem>>, vector<1x1x128xf32>
    %313 = vector.shape_cast %312 : vector<1x1x128xf32> to vector<1x128xf32>
    %314 = vector.broadcast %313 : vector<1x128xf32> to vector<128x128xf32>
    %315 = arith.mulf %311, %314 : vector<128x128xf32>
    %316 = arith.addf %310, %315 : vector<128x128xf32>
    %317 = arith.addf %285, %316 : vector<128x128xf32>
    %cst_197 = arith.constant 0.000000e+00 : f32
    %318 = vector.broadcast %cst_197 : f32 to vector<128x128xf32>
    %c137 = arith.constant 137 : index
    %c0_198 = arith.constant 0 : index
    %319 = vector.load %arg11[%c137, %c0_198] : memref<336x128xf32, #tpu.memory_space<vmem>>, vector<128x128xf32>
    %c3_199 = arith.constant 3 : index
    %c0_200 = arith.constant 0 : index
    %c0_201 = arith.constant 0 : index
    %320 = vector.load %arg6[%c3_199, %c0_200, %c0_201] : memref<25x1x128xf32, #tpu.memory_space<vmem>>, vector<1x1x128xf32>
    %321 = vector.shape_cast %320 : vector<1x1x128xf32> to vector<1x128xf32>
    %322 = vector.broadcast %321 : vector<1x128xf32> to vector<128x128xf32>
    %323 = arith.mulf %319, %322 : vector<128x128xf32>
    %324 = arith.addf %318, %323 : vector<128x128xf32>
    %c153 = arith.constant 153 : index
    %c0_202 = arith.constant 0 : index
    %325 = vector.load %arg11[%c153, %c0_202] : memref<336x128xf32, #tpu.memory_space<vmem>>, vector<128x128xf32>
    %c8_203 = arith.constant 8 : index
    %c0_204 = arith.constant 0 : index
    %c0_205 = arith.constant 0 : index
    %326 = vector.load %arg6[%c8_203, %c0_204, %c0_205] : memref<25x1x128xf32, #tpu.memory_space<vmem>>, vector<1x1x128xf32>
    %327 = vector.shape_cast %326 : vector<1x1x128xf32> to vector<1x128xf32>
    %328 = vector.broadcast %327 : vector<1x128xf32> to vector<128x128xf32>
    %329 = arith.mulf %325, %328 : vector<128x128xf32>
    %330 = arith.addf %324, %329 : vector<128x128xf32>
    %c169 = arith.constant 169 : index
    %c0_206 = arith.constant 0 : index
    %331 = vector.load %arg11[%c169, %c0_206] : memref<336x128xf32, #tpu.memory_space<vmem>>, vector<128x128xf32>
    %c13_207 = arith.constant 13 : index
    %c0_208 = arith.constant 0 : index
    %c0_209 = arith.constant 0 : index
    %332 = vector.load %arg6[%c13_207, %c0_208, %c0_209] : memref<25x1x128xf32, #tpu.memory_space<vmem>>, vector<1x1x128xf32>
    %333 = vector.shape_cast %332 : vector<1x1x128xf32> to vector<1x128xf32>
    %334 = vector.broadcast %333 : vector<1x128xf32> to vector<128x128xf32>
    %335 = arith.mulf %331, %334 : vector<128x128xf32>
    %336 = arith.addf %330, %335 : vector<128x128xf32>
    %c185 = arith.constant 185 : index
    %c0_210 = arith.constant 0 : index
    %337 = vector.load %arg11[%c185, %c0_210] : memref<336x128xf32, #tpu.memory_space<vmem>>, vector<128x128xf32>
    %c18_211 = arith.constant 18 : index
    %c0_212 = arith.constant 0 : index
    %c0_213 = arith.constant 0 : index
    %338 = vector.load %arg6[%c18_211, %c0_212, %c0_213] : memref<25x1x128xf32, #tpu.memory_space<vmem>>, vector<1x1x128xf32>
    %339 = vector.shape_cast %338 : vector<1x1x128xf32> to vector<1x128xf32>
    %340 = vector.broadcast %339 : vector<1x128xf32> to vector<128x128xf32>
    %341 = arith.mulf %337, %340 : vector<128x128xf32>
    %342 = arith.addf %336, %341 : vector<128x128xf32>
    %c201 = arith.constant 201 : index
    %c0_214 = arith.constant 0 : index
    %343 = vector.load %arg11[%c201, %c0_214] : memref<336x128xf32, #tpu.memory_space<vmem>>, vector<128x128xf32>
    %c23_215 = arith.constant 23 : index
    %c0_216 = arith.constant 0 : index
    %c0_217 = arith.constant 0 : index
    %344 = vector.load %arg6[%c23_215, %c0_216, %c0_217] : memref<25x1x128xf32, #tpu.memory_space<vmem>>, vector<1x1x128xf32>
    %345 = vector.shape_cast %344 : vector<1x1x128xf32> to vector<1x128xf32>
    %346 = vector.broadcast %345 : vector<1x128xf32> to vector<128x128xf32>
    %347 = arith.mulf %343, %346 : vector<128x128xf32>
    %348 = arith.addf %342, %347 : vector<128x128xf32>
    %c3_218 = arith.constant 3 : index
    %c0_219 = arith.constant 0 : index
    %c0_220 = arith.constant 0 : index
    %349 = vector.load %arg5[%c3_218, %c0_219, %c0_220] : memref<5x128x1xf32, #tpu.memory_space<vmem>>, vector<1x128x1xf32>
    %350 = vector.shape_cast %349 : vector<1x128x1xf32> to vector<128x1xf32>
    %351 = vector.broadcast %350 : vector<128x1xf32> to vector<128x128xf32>
    %352 = arith.mulf %348, %351 : vector<128x128xf32>
    %353 = arith.addf %317, %352 : vector<128x128xf32>
    %cst_221 = arith.constant 0.000000e+00 : f32
    %354 = vector.broadcast %cst_221 : f32 to vector<128x128xf32>
    %c138 = arith.constant 138 : index
    %c0_222 = arith.constant 0 : index
    %355 = vector.load %arg11[%c138, %c0_222] : memref<336x128xf32, #tpu.memory_space<vmem>>, vector<128x128xf32>
    %c4_223 = arith.constant 4 : index
    %c0_224 = arith.constant 0 : index
    %c0_225 = arith.constant 0 : index
    %356 = vector.load %arg6[%c4_223, %c0_224, %c0_225] : memref<25x1x128xf32, #tpu.memory_space<vmem>>, vector<1x1x128xf32>
    %357 = vector.shape_cast %356 : vector<1x1x128xf32> to vector<1x128xf32>
    %358 = vector.broadcast %357 : vector<1x128xf32> to vector<128x128xf32>
    %359 = arith.mulf %355, %358 : vector<128x128xf32>
    %360 = arith.addf %354, %359 : vector<128x128xf32>
    %c154 = arith.constant 154 : index
    %c0_226 = arith.constant 0 : index
    %361 = vector.load %arg11[%c154, %c0_226] : memref<336x128xf32, #tpu.memory_space<vmem>>, vector<128x128xf32>
    %c9_227 = arith.constant 9 : index
    %c0_228 = arith.constant 0 : index
    %c0_229 = arith.constant 0 : index
    %362 = vector.load %arg6[%c9_227, %c0_228, %c0_229] : memref<25x1x128xf32, #tpu.memory_space<vmem>>, vector<1x1x128xf32>
    %363 = vector.shape_cast %362 : vector<1x1x128xf32> to vector<1x128xf32>
    %364 = vector.broadcast %363 : vector<1x128xf32> to vector<128x128xf32>
    %365 = arith.mulf %361, %364 : vector<128x128xf32>
    %366 = arith.addf %360, %365 : vector<128x128xf32>
    %c170 = arith.constant 170 : index
    %c0_230 = arith.constant 0 : index
    %367 = vector.load %arg11[%c170, %c0_230] : memref<336x128xf32, #tpu.memory_space<vmem>>, vector<128x128xf32>
    %c14_231 = arith.constant 14 : index
    %c0_232 = arith.constant 0 : index
    %c0_233 = arith.constant 0 : index
    %368 = vector.load %arg6[%c14_231, %c0_232, %c0_233] : memref<25x1x128xf32, #tpu.memory_space<vmem>>, vector<1x1x128xf32>
    %369 = vector.shape_cast %368 : vector<1x1x128xf32> to vector<1x128xf32>
    %370 = vector.broadcast %369 : vector<1x128xf32> to vector<128x128xf32>
    %371 = arith.mulf %367, %370 : vector<128x128xf32>
    %372 = arith.addf %366, %371 : vector<128x128xf32>
    %c186 = arith.constant 186 : index
    %c0_234 = arith.constant 0 : index
    %373 = vector.load %arg11[%c186, %c0_234] : memref<336x128xf32, #tpu.memory_space<vmem>>, vector<128x128xf32>
    %c19_235 = arith.constant 19 : index
    %c0_236 = arith.constant 0 : index
    %c0_237 = arith.constant 0 : index
    %374 = vector.load %arg6[%c19_235, %c0_236, %c0_237] : memref<25x1x128xf32, #tpu.memory_space<vmem>>, vector<1x1x128xf32>
    %375 = vector.shape_cast %374 : vector<1x1x128xf32> to vector<1x128xf32>
    %376 = vector.broadcast %375 : vector<1x128xf32> to vector<128x128xf32>
    %377 = arith.mulf %373, %376 : vector<128x128xf32>
    %378 = arith.addf %372, %377 : vector<128x128xf32>
    %c202 = arith.constant 202 : index
    %c0_238 = arith.constant 0 : index
    %379 = vector.load %arg11[%c202, %c0_238] : memref<336x128xf32, #tpu.memory_space<vmem>>, vector<128x128xf32>
    %c24_239 = arith.constant 24 : index
    %c0_240 = arith.constant 0 : index
    %c0_241 = arith.constant 0 : index
    %380 = vector.load %arg6[%c24_239, %c0_240, %c0_241] : memref<25x1x128xf32, #tpu.memory_space<vmem>>, vector<1x1x128xf32>
    %381 = vector.shape_cast %380 : vector<1x1x128xf32> to vector<1x128xf32>
    %382 = vector.broadcast %381 : vector<1x128xf32> to vector<128x128xf32>
    %383 = arith.mulf %379, %382 : vector<128x128xf32>
    %384 = arith.addf %378, %383 : vector<128x128xf32>
    %c4_242 = arith.constant 4 : index
    %c0_243 = arith.constant 0 : index
    %c0_244 = arith.constant 0 : index
    %385 = vector.load %arg5[%c4_242, %c0_243, %c0_244] : memref<5x128x1xf32, #tpu.memory_space<vmem>>, vector<1x128x1xf32>
    %386 = vector.shape_cast %385 : vector<1x128x1xf32> to vector<128x1xf32>
    %387 = vector.broadcast %386 : vector<128x1xf32> to vector<128x128xf32>
    %388 = arith.mulf %384, %387 : vector<128x128xf32>
    %389 = arith.addf %353, %388 : vector<128x128xf32>
    %390 = vector.broadcast %19 : vector<1x128xf32> to vector<128x128xf32>
    %391 = arith.mulf %389, %390 : vector<128x128xf32>
    %392 = vector.broadcast %20 : vector<1x128xf32> to vector<128x128xf32>
    %393 = arith.addf %391, %392 : vector<128x128xf32>
    %cst_245 = arith.constant 5.000000e-01 : f32
    %394 = vector.broadcast %cst_245 : f32 to vector<128x128xf32>
    %395 = arith.mulf %394, %393 : vector<128x128xf32>
    %cst_246 = arith.constant 0.707106769 : f32
    %396 = vector.broadcast %cst_246 : f32 to vector<128x128xf32>
    %397 = arith.mulf %393, %396 : vector<128x128xf32>
    %398 = math.erf %397 : vector<128x128xf32>
    %cst_247 = arith.constant 1.000000e+00 : f32
    %399 = vector.broadcast %cst_247 : f32 to vector<128x128xf32>
    %400 = arith.addf %399, %398 : vector<128x128xf32>
    %401 = arith.mulf %395, %400 : vector<128x128xf32>
    %c0_248 = arith.constant 0 : index
    %c128 = arith.constant 128 : index
    %c0_249 = arith.constant 0 : index
    %402 = vector.load %arg10[%c0_248, %c128, %c0_249] : memref<1x256x128xf32, #tpu.memory_space<vmem>>, vector<1x128x128xf32>
    %403 = vector.shape_cast %402 : vector<1x128x128xf32> to vector<128x128xf32>
    %404 = vector.shape_cast %401 : vector<128x128xf32> to vector<1x128x128xf32>
    tpu.vector_store %arg10[%c0_248, %c128, %c0_249], %404 {strides = array<i32>} : memref<1x256x128xf32, #tpu.memory_space<vmem>>, vector<1x128x128xf32>,
    return
  }
  func.func @transform_0(%arg0: i32, %arg1: i32) -> (i32, i32, i32) {
    %c0_i32 = arith.constant 0 : i32
    %0 = arith.addi %c0_i32, %arg1 : i32
    %c0_i32_0 = arith.constant 0 : i32
    %c0_i32_1 = arith.constant 0 : i32
    return %arg0, %0, %c0_i32_0 : i32, i32, i32
  }
  func.func @transform_1(%arg0: i32, %arg1: i32) -> (i32, i32, i32) {
    %c8_i32 = arith.constant 8 : i32
    %0 = arith.muli %arg1, %c8_i32 : i32
    %c0_i32 = arith.constant 0 : i32
    %1 = arith.addi %c0_i32, %0 : i32
    %c1_i32 = arith.constant 1 : i32
    %2 = arith.subi %1, %c1_i32 : i32
    %c0_i32_0 = arith.constant 0 : i32
    %3 = arith.maxsi %2, %c0_i32_0 : i32
    %c0_i32_1 = arith.constant 0 : i32
    %c0_i32_2 = arith.constant 0 : i32
    return %arg0, %3, %c0_i32_1 : i32, i32, i32
  }
  func.func @transform_2(%arg0: i32, %arg1: i32) -> (i32, i32, i32) {
    %c8_i32 = arith.constant 8 : i32
    %0 = arith.muli %arg1, %c8_i32 : i32
    %c0_i32 = arith.constant 0 : i32
    %1 = arith.addi %c0_i32, %0 : i32
    %c8_i32_0 = arith.constant 8 : i32
    %2 = arith.addi %1, %c8_i32_0 : i32
    %c7_i32 = arith.constant 7 : i32
    %3 = arith.minsi %2, %c7_i32 : i32
    %c0_i32_1 = arith.constant 0 : i32
    %c0_i32_2 = arith.constant 0 : i32
    return %arg0, %3, %c0_i32_1 : i32, i32, i32
  }
  func.func @transform_3(%arg0: i32, %arg1: i32) -> (i32, i32, i32) {
    %c0_i32 = arith.constant 0 : i32
    %c0_i32_0 = arith.constant 0 : i32
    %c0_i32_1 = arith.constant 0 : i32
    %c0_i32_2 = arith.constant 0 : i32
    return %c0_i32, %c0_i32_0, %c0_i32_1 : i32, i32, i32
  }
  func.func @transform_4(%arg0: i32, %arg1: i32) -> (i32, i32, i32) {
    %c0_i32 = arith.constant 0 : i32
    %c0_i32_0 = arith.constant 0 : i32
    %c0_i32_1 = arith.constant 0 : i32
    %c0_i32_2 = arith.constant 0 : i32
    return %c0_i32, %c0_i32_0, %c0_i32_1 : i32, i32, i32
  }
  func.func @transform_5(%arg0: i32, %arg1: i32) -> (i32, i32) {
    %c0_i32 = arith.constant 0 : i32
    %c0_i32_0 = arith.constant 0 : i32
    %c0_i32_1 = arith.constant 0 : i32
    return %c0_i32, %c0_i32_0 : i32, i32
  }
  func.func @transform_6(%arg0: i32, %arg1: i32) -> (i32, i32) {
    %c0_i32 = arith.constant 0 : i32
    %c0_i32_0 = arith.constant 0 : i32
    %c0_i32_1 = arith.constant 0 : i32
    return %c0_i32, %c0_i32_0 : i32, i32
  }
  func.func @transform_8(%arg0: i32, %arg1: i32) -> (i32, i32, i32) {
    %c0_i32 = arith.constant 0 : i32
    %0 = arith.addi %c0_i32, %arg1 : i32
    %c0_i32_0 = arith.constant 0 : i32
    %c0_i32_1 = arith.constant 0 : i32
    return %arg0, %0, %c0_i32_0 : i32, i32, i32
  }
}

</mosaic_0001>

<bundles_post_ra>
// kernel: multi_dwconv_forward.5
= control target key start
LH: loop header
LB: loop body
LE: loop exit
PB: predicated region body
PF: predicated region fallthrough
CT: control target
= control target key end

     0   :  { %s1211_s26 = smov 0   ;;  %s1213_s2 = smov 0   ;;  %s1380_s0 = inlined_call_operand.vmem [shape: f32[2,336,128], index: 0, kind: input, shape index: {}, may-alias: {0,1,2}]   ;;  %s1381_s1 = inlined_call_operand.vmem [shape: f32[2,336,128], index: 1, kind: input, shape index: {}, may-alias: {0,1,2}]   ;;  %s1382_s2 = inlined_call_operand.vmem [shape: f32[2,336,128], index: 2, kind: input, shape index: {}, may-alias: {0,1,2}]   ;;  %s1383_s3 = inlined_call_operand.vmem [shape: f32[5,16,1], index: 3, kind: input, shape index: {}]   ;;  %s1384_s4 = inlined_call_operand.vmem [shape: f32[25,1,128], index: 4, kind: input, shape index: {}]   ;;  %s1385_s5 = inlined_call_operand.vmem [shape: f32[1,128], index: 5, kind: input, shape index: {}]   ;;  %s1386_s6 = inlined_call_operand.vmem [shape: f32[1,128], index: 6, kind: input, shape index: {}]   ;;  %s1387_s7 = inlined_call_operand.vmem [shape: f32[2,336,128], index: 7, kind: input, shape index: {}, may-alias: {7,8}]   ;;  %s1388_s8 = inlined_call_operand.vmem [shape: f32[2,336,128], index: 8, kind: output, shape index: {}, may-alias: {7,8}]  }
   0x1   :  { %s1215_s27 = smov 0  }
   0x2 LB: > { %s30_s7 = sadd.s32 1, %s1158_s2  ;;  %p1034_p0 = scmp.ge.s32.totalorder %s1162_s27, 1  ;;  %s1162_s27 = sphi %s1215_s27, %s18_s27   ;;  %s1158_s2 = sphi %s1213_s2, %s1390_s2   ;;  %s1154_s26 = sphi %s1211_s26, %s1389_s26  }
   0x3   : > { %p32_p1 = scmp.ge.s32.totalorder %s30_s7, 2  ;;  %p327_p2 = scmp.lt.s32.totalorder %s1162_s27, 3 }
   0x5   : > { %s1392_s7 = smov (%p32_p1, %s30_s7), 0  ;;  %p328_p3 = pnand %p1034_p0, %p327_p2 }
   0x6   : > { %v1058_v0 = vld [vmem:[%s1383_s3 + $0x10] sm:$0xff] (!%p328_p3)  ;;  %v544_v1 = vld [vmem:[%s1383_s3] sm:$0xff] (!%p328_p3)  ;;  %p395_p4 = scmp.lt.s32.totalorder (!%p328_p3), %s1154_s26, 1  ;;  %v1164_v2 = vmov (!%p328_p3), 0   ;;  %v1165_v3 = vmov (!%p328_p3), 0.0   ;;  %v1059_v4 = vld [vmem:[%s1383_s3 + $0x18] sm:$0xff] (!%p328_p3) }
   0x7   : > { %331 = sbr.rel (%p328_p3) target bundleno = 175 (0xaf), region = 48  ;;  %1135 = vset.pattern.permute.xlu1 (!%p328_p3), %v1164_v2  ;;  %1134 = vset.pattern.permute.xlu0 (!%p328_p3), %v1164_v2  ;;  %449 = vst [vmem:[#allocation2] sm:$0xff] (!%p328_p3), %v1165_v3  ;;  %459 = vst [vmem:[#allocation2 + $0x8] sm:$0xff] (!%p328_p3), %v1165_v3  ;;  %v545_v5 = vld [vmem:[%s1383_s3 + $0x8] sm:$0xff] (!%p328_p3)  ;;  %v1081_v6 = vld [vmem:[%s1383_s3 + $0x38] sm:$0xff] (!%p328_p3) }
   0x8   : > { %450 = vst [vmem:[#allocation2 + $0x28] sm:$0xff] (!%p328_p3), %v1165_v3  ;;  %469 = vst [vmem:[#allocation2 + $0x20] sm:$0xff] (!%p328_p3), %v1165_v3  ;;  %632 = vperm.xlu1 (!%p328_p3), %1135, %v1058_v0   ;;  %548 = vperm.xlu0 (!%p328_p3), %1134, %v544_v1   ;;  %v1080_v7 = vld [vmem:[%s1383_s3 + $0x30] sm:$0xff] (!%p328_p3)  ;;  %v1093_v10 = vld [vmem:[%s1383_s3 + $0x48] sm:$0xff] (!%p328_p3) }
   0x9   : > { %v1092_v11 = vld [vmem:[%s1383_s3 + $0x40] sm:$0xff] (!%p328_p3)  ;;  %v1065_v16 = vld [vmem:[%s1384_s4 + $0xc] ss:$0 sm:$0xff] (!%p328_p3)  ;;  %v1067_v20 = vld [vmem:[%s1384_s4 + $0x11] ss:$0 sm:$0xff] (!%p328_p3) }
   0xa   : > { %v1061_v12 = vld [vmem:[%s1384_s4 + $0x2] ss:$0 sm:$0xff] (!%p328_p3)  ;;  %v1063_v15 = vld [vmem:[%s1384_s4 + $0x7] ss:$0 sm:$0xff] (!%p328_p3)  ;;  %v1069_v24 = vld [vmem:[%s1384_s4 + $0x16] ss:$0 sm:$0xff] (!%p328_p3) }
   0xb   : > { %v654_v25 = vmul.f32 (!%p328_p3), 0.0, %v1061_v12  ;;  %v708_v27 = vmul.f32 (!%p328_p3), 0.0, %v1069_v24  ;;  %v1049_v38 = vld [vmem:[%s1384_s4 + $0x1] ss:$0 sm:$0xff] (!%p328_p3)  ;;  %v1051_v39 = vld [vmem:[%s1384_s4 + $0x6] ss:$0 sm:$0xff] (!%p328_p3) }
   0xc   : > { %637 = vperm.xlu1 (!%p328_p3), %1135, %v1059_v4   ;;  %553 = vperm.xlu0 (!%p328_p3), %1134, %v545_v5   ;;  %v1039_v41 = vld [vmem:[%s1384_s4] ss:$0 sm:$0xff] (!%p328_p3)  ;;  %v1041_v47 = vld [vmem:[%s1384_s4 + $0x5] ss:$0 sm:$0xff] (!%p328_p3)  ;;  %v1053_v54 = vld [vmem:[%s1384_s4 + $0xb] ss:$0 sm:$0xff] (!%p328_p3) }
   0xd   : > { %v1043_v57 = vld [vmem:[%s1384_s4 + $0xa] ss:$0 sm:$0xff] (!%p328_p3)  ;;  %v1071_v62 = vld [vmem:[%s1384_s4 + $0x3] ss:$0 sm:$0xff] (!%p328_p3)  ;;  %v1073_v63 = vld [vmem:[%s1384_s4 + $0x8] ss:$0 sm:$0xff] (!%p328_p3) }
   0xe   : > { %s1394_s26 = smov (!%p395_p4, %s1154_s26), 1  ;;  %v560_v40 = vld [vmem:[#allocation2 + $0x7] sm:$0xff] }
   0xf   : > { %s1107_s14 = smul.u32 336, %s1394_s26  ;;  %v478_v44 = vld [vmem:[#allocation2 + $0x6] sm:$0xff]  ;;  %v570_v49 = vmul.f32 %v1049_v38, %v560_v40 }
  0x10   : > { %790 = vperm.xlu1 %1135, %v1081_v6   ;;  %785 = vperm.xlu0 %1134, %v1080_v7   ;;  %v487_v53 = vmul.f32 %v1039_v41, %v478_v44 }
  0x11   : > { %s1247_s19 = sadd.s32 320, %s1107_s14 }
  0x12   : > { %s402_s22 = scalar_lea.vmem %s1380_s0, %s1247_s19  ;;  %s446_s20 = scalar_lea.vmem %s1388_s8, %s1247_s19 }
  0x13   : > { %v451_v8 = vld [vmem:[%s402_s22] sm:$0xff]  ;;  %v452_v9 = vld [vmem:[%s402_s22 + $0x8] sm:$0xff] }
  0x14   : > { %453 = vst [vmem:[#allocation2 + $0x10] sm:$0xff] %v451_v8  ;;  %454 = vst [vmem:[#allocation2 + $0x18] sm:$0xff] %v452_v9  ;;  %869 = vperm.xlu1 %1135, %v1093_v10   ;;  %864 = vperm.xlu0 %1134, %v1092_v11   ;;  %v655_v13 = vmul.f32 %v1061_v12, %v451_v8  ;;  %v682_v19 = vmul.f32 %v1065_v16, %v452_v9  ;;  %v1045_v10 = vld [vmem:[%s1384_s4 + $0xf] ss:$0 sm:$0xff] }
  0x15   : > { %v681_v29 = vmul.f32 %v1065_v16, %v451_v8  ;;  %v707_v35 = vmul.f32 %v1069_v24, %v452_v9  ;;  %v1055_v8 = vld [vmem:[%s1384_s4 + $0x10] ss:$0 sm:$0xff]  ;;  %v1075_v16 = vld [vmem:[%s1384_s4 + $0xd] ss:$0 sm:$0xff]  ;;  %v1057_v24 = vld [vmem:[%s1384_s4 + $0x15] ss:$0 sm:$0xff] }
  0x1b   : > { %v659_v14 = vld [vmem:[#allocation2 + $0x14] sm:$0xff]  ;;  %v685_v17 = vld [vmem:[#allocation2 + $0x1c] sm:$0xff]  ;;  %v658_v23 = vld [vmem:[#allocation2 + $0xc] sm:$0xff] }
  0x1c   : > { %v669_v18 = vmul.f32 %v1063_v15, %v659_v14  ;;  %v695_v22 = vmul.f32 %v1067_v20, %v685_v17  ;;  %v668_v28 = vmul.f32 %v1063_v15, %v658_v23  ;;  %v694_v32 = vmul.f32 %v1067_v20, %v659_v14  ;;  %v574_v42 = vld [vmem:[#allocation2 + $0xb] sm:$0xff]  ;;  %v575_v43 = vld [vmem:[#allocation2 + $0x13] sm:$0xff]  ;;  %v601_v12 = vld [vmem:[#allocation2 + $0x1b] sm:$0xff] }
  0x1d   : > { %v1287_v45 = vld [vmem:[#allocation2 + $0xa] sm:$0xff]  ;;  %v1289_v46 = vld [vmem:[#allocation2 + $0x12] sm:$0xff]  ;;  %v584_v50 = vmul.f32 %v1051_v39, %v574_v42  ;;  %v585_v51 = vmul.f32 %v1051_v39, %v575_v43  ;;  %v1317_v15 = vld [vmem:[#allocation2 + $0x1a] sm:$0xff] }
  0x1e   : > { %v671_v21 = vadd.f32 %v669_v18, %v655_v13  ;;  %v670_v31 = vadd.f32 %v668_v28, %v654_v25  ;;  %v561_v48 = vld [vmem:[#allocation2 + $0xf] sm:$0xff]  ;;  %v588_v55 = vld [vmem:[#allocation2 + $0x17] sm:$0xff]  ;;  %v501_v56 = vmul.f32 %v1041_v47, %v1287_v45  ;;  %v502_v60 = vmul.f32 %v1041_v47, %v1289_v46  ;;  %v1085_v23 = vld [vmem:[%s1384_s4 + $0x9] ss:$0 sm:$0xff] }
  0x1f   : > { %v479_v52 = vld [vmem:[#allocation2 + $0xe] sm:$0xff]  ;;  %v571_v58 = vmul.f32 %v1049_v38, %v561_v48  ;;  %v1302_v61 = vld [vmem:[#allocation2 + $0x16] sm:$0xff]  ;;  %v586_v2 = vadd.f32 %v584_v50, %v570_v49  ;;  %v597_v3 = vmul.f32 %v1053_v54, %v561_v48  ;;  %v598_v4 = vmul.f32 %v1053_v54, %v588_v55 }
  0x20   : > { %v684_v26 = vadd.f32 %v682_v19, %v671_v21  ;;  %v683_v34 = vadd.f32 %v681_v29, %v670_v31  ;;  %v488_v59 = vmul.f32 %v1039_v41, %v479_v52  ;;  %v714_v0 = vld [vmem:[#allocation2 + $0x11] sm:$0xff]  ;;  %v514_v5 = vmul.f32 %v1043_v57, %v479_v52  ;;  %v713_v6 = vld [vmem:[#allocation2 + $0x9] sm:$0xff]  ;;  %v741_v19 = vld [vmem:[#allocation2 + $0x19] sm:$0xff] }
  0x21   : > { %v728_v1 = vld [vmem:[#allocation2 + $0x15] sm:$0xff]  ;;  %v727_v7 = vld [vmem:[#allocation2 + $0xd] sm:$0xff]  ;;  %v503_v9 = vadd.f32 %v501_v56, %v487_v53  ;;  %v587_v11 = vadd.f32 %v585_v51, %v571_v58  ;;  %v515_v14 = vmul.f32 %v1043_v57, %v1302_v61  ;;  %v724_v17 = vmul.f32 %v1071_v62, %v714_v0  ;;  %v754_v41 = vld [vmem:[#allocation2 + $0x1d] sm:$0xff] }
  0x22   : > { %v697_v30 = vadd.f32 %v695_v22, %v684_v26  ;;  %v696_v36 = vadd.f32 %v694_v32, %v683_v34  ;;  %v504_v13 = vadd.f32 %v502_v60, %v488_v59  ;;  %v738_v18 = vmul.f32 %v1073_v63, %v728_v1  ;;  %v1083_v22 = vld [vmem:[%s1384_s4 + $0x4] ss:$0 sm:$0xff]  ;;  %v1077_v38 = vld [vmem:[%s1384_s4 + $0x12] ss:$0 sm:$0xff]  ;;  %v1087_v48 = vld [vmem:[%s1384_s4 + $0xe] ss:$0 sm:$0xff] }
  0x23   : > { %v723_v20 = vmul.f32 %v1071_v62, %v713_v6  ;;  %v737_v21 = vmul.f32 %v1073_v63, %v727_v7  ;;  %v599_v25 = vadd.f32 %v597_v3, %v586_v2  ;;  %v610_v26 = vmul.f32 %v1055_v8, %v575_v43  ;;  %v614_v32 = vld [vmem:[#allocation2 + $0x1f] sm:$0xff]  ;;  %v1079_v63 = vld [vmem:[%s1384_s4 + $0x17] ss:$0 sm:$0xff] }
  0x24   : > { %v1274_v33 = vadd.f32 %v708_v27, %v697_v30  ;;  %v1276_v37 = vadd.f32 %v707_v35, %v696_v36  ;;  %v527_v27 = vmul.f32 %v1045_v10, %v1289_v46  ;;  %v611_v28 = vmul.f32 %v1055_v8, %v601_v12  ;;  %v1047_v30 = vld [vmem:[%s1384_s4 + $0x14] ss:$0 sm:$0xff]  ;;  %v531_v36 = vld [vmem:[#allocation2 + $0x1e] sm:$0xff] }
  0x25   : > { %v516_v29 = vadd.f32 %v514_v5, %v503_v9  ;;  %v600_v31 = vadd.f32 %v598_v4, %v587_v11  ;;  %v517_v34 = vadd.f32 %v515_v14, %v504_v13  ;;  %v528_v35 = vmul.f32 %v1045_v10, %v1317_v15  ;;  %v767_v2 = vld [vmem:[#allocation2 + $0x21] sm:$0xff]  ;;  %v1089_v4 = vld [vmem:[%s1384_s4 + $0x13] ss:$0 sm:$0xff] }
  0x26   : > { %v740_v39 = vadd.f32 %v738_v18, %v724_v17  ;;  %v751_v40 = vmul.f32 %v1075_v16, %v741_v19  ;;  %v806_v42 = vmul.f32 %v1083_v22, %v1289_v46  ;;  %v818_v43 = vmul.f32 %v1085_v23, %v1302_v61 }
  0x27   : > { %v739_v44 = vadd.f32 %v737_v21, %v723_v20  ;;  %v750_v47 = vmul.f32 %v1075_v16, %v714_v0  ;;  %v805_v49 = vmul.f32 %v1083_v22, %v1287_v45  ;;  %v817_v50 = vmul.f32 %v1085_v23, %v479_v52  ;;  %v846_v21 = vld [vmem:[#allocation2 + $0x22] sm:$0xff] }
  0x28   : > { %v623_v51 = vmul.f32 %v1057_v24, %v588_v55  ;;  %v540_v53 = vmul.f32 %v1047_v30, %v1302_v61  ;;  %v624_v54 = vmul.f32 %v1057_v24, %v614_v32  ;;  %v541_v56 = vmul.f32 %v1047_v30, %v531_v36 }
  0x29   : > { %v612_v57 = vadd.f32 %v610_v26, %v599_v25  ;;  %v529_v58 = vadd.f32 %v527_v27, %v516_v29  ;;  %v613_v59 = vadd.f32 %v611_v28, %v600_v31  ;;  %v764_v60 = vmul.f32 %v1077_v38, %v754_v41 }
  0x2a   : > { %v530_v62 = vadd.f32 %v528_v35, %v517_v34  ;;  %v753_v0 = vadd.f32 %v751_v40, %v740_v39  ;;  %v820_v3 = vadd.f32 %v818_v43, %v806_v42  ;;  %v830_v45 = vmul.f32 %v1087_v48, %v1317_v15 }
  0x2b   : > { %v752_v52 = vadd.f32 %v750_v47, %v739_v44  ;;  %v763_v55 = vmul.f32 %v1077_v38, %v728_v1  ;;  %v819_v5 = vadd.f32 %v817_v50, %v805_v49  ;;  %v829_v6 = vmul.f32 %v1087_v48, %v1289_v46  ;;  %v1091_v1 = vld [vmem:[%s1384_s4 + $0x18] ss:$0 sm:$0xff] }
  0x2c   : > { %v625_v7 = vadd.f32 %v623_v51, %v612_v57  ;;  %v542_v8 = vadd.f32 %v540_v53, %v529_v58  ;;  %v626_v9 = vadd.f32 %v624_v54, %v613_v59  ;;  %v777_v10 = vmul.f32 %v1079_v63, %v767_v2  ;;  %v1094_v53 = vld [vmem:[%s1385_s5] ss:$0 sm:$0xff] }
  0x2d   : > { %v543_v13 = vadd.f32 %v541_v56, %v530_v62  ;;  %v766_v14 = vadd.f32 %v764_v60, %v753_v0  ;;  %v832_v16 = vadd.f32 %v830_v45, %v820_v3  ;;  %v842_v17 = vmul.f32 %v1089_v4, %v531_v36 }
  0x2e   : > { %v765_v18 = vadd.f32 %v763_v55, %v752_v52  ;;  %v776_v20 = vmul.f32 %v1079_v63, %v741_v19  ;;  %v831_v22 = vadd.f32 %v829_v6, %v819_v5  ;;  %v841_v46 = vmul.f32 %v1089_v4, %v1302_v61 }
  0x2f   : > { %v779_v27 = vadd.f32 %v777_v10, %v766_v14  ;;  %v844_v28 = vadd.f32 %v842_v17, %v832_v16  ;;  %v856_v29 = vmul.f32 %v1091_v1, %v846_v21  ;;  %v855_v30 = vmul.f32 %v1091_v1, %v1317_v15 }
  0x30   : > { %v778_v19 = vadd.f32 %v776_v20, %v765_v18  ;;  %v843_v34 = vadd.f32 %v841_v46, %v831_v22 }
  0x31   : > { %v858_v40 = vadd.f32 %v856_v29, %v844_v28 }
  0x32   : > { %v857_v43 = vadd.f32 %v855_v30, %v843_v34 }
  0x87   : > { %v633_v11 = vpop.permute.xlu1 %632  ;;  %v549_v12 = vpop.permute.xlu0 %548 }
  0x88   : > { %v640_v23 = vmul.f32 %v633_v11, %v625_v7  ;;  %v556_v24 = vmul.f32 %v549_v12, %v542_v8 }
  0x8a   : > { %v642_v35 = vadd.f32 %v640_v23, %v556_v24 }
  0x8b   : > { %v638_v25 = vpop.permute.xlu1 %637  ;;  %v554_v26 = vpop.permute.xlu0 %553 }
  0x8c   : > { %v641_v31 = vmul.f32 %v638_v25, %v626_v9  ;;  %v557_v32 = vmul.f32 %v554_v26, %v543_v13  ;;  %v711_v44 = vadd.f32 %v1276_v37, %v642_v35 }
  0x8e   : > { %v643_v36 = vadd.f32 %v641_v31, %v557_v32 }
  0x8f   : > { %v791_v38 = vpop.permute.xlu1 %790  ;;  %v786_v39 = vpop.permute.xlu0 %785 }
  0x90   : > { %v712_v61 = vadd.f32 %v1274_v33, %v643_v36  ;;  %v794_v41 = vmul.f32 %v791_v38, %v779_v27  ;;  %v793_v42 = vmul.f32 %v786_v39, %v778_v19  ;;  %v1095_v33 = vld [vmem:[%s1386_s6] ss:$0 sm:$0xff] }
  0x92   : > { %v796_v49 = vadd.f32 %v794_v41, %v712_v61  ;;  %v795_v15 = vadd.f32 %v793_v42, %v711_v44 }
  0x93   : > { %v870_v47 = vpop.permute.xlu1 %869  ;;  %v865_v48 = vpop.permute.xlu0 %864 }
  0x94   : > { %v873_v50 = vmul.f32 %v870_v47, %v858_v40  ;;  %v872_v51 = vmul.f32 %v865_v48, %v857_v43 }
  0x96   : > { %v875_v54 = vadd.f32 %v873_v50, %v796_v49  ;;  %v874_v56 = vadd.f32 %v872_v51, %v795_v15 }
  0x98   : > { %v883_v57 = vmul.f32 %v1094_v53, %v875_v54  ;;  %v882_v58 = vmul.f32 %v1094_v53, %v874_v56 }
  0x9a   : > { %v891_v37 = vadd.f32 %v1095_v33, %v883_v57  ;;  %v890_v59 = vadd.f32 %v1095_v33, %v882_v58 }
  0x9c   : > { %v895_v60 = vmul.f32 0.70710677, %v891_v37  ;;  %v894_v62 = vmul.f32 0.70710677, %v890_v59  ;;  %v893_v2 = vmul.f32 0.5, %v891_v37  ;;  %v892_v45 = vmul.f32 0.5, %v890_v59 }
  0x9e   : > { %1136 = verf.f32 %v895_v60 }
  0x9f   : > { %1138 = verf.f32 %v894_v62 }
  0xa8   : > { %v1137_v63 = vpop.eup %1136 }
  0xa9   : > { %v1139_v0 = vpop.eup %1138  ;;  %v899_v3 = vadd.f32 1.0, %v1137_v63 }
  0xaa   : > { %v898_v52 = vadd.f32 1.0, %v1139_v0 }
  0xab   : > { %v901_v55 = vmul.f32 %v899_v3, %v893_v2 }
  0xac   : > { %v900_v4 = vmul.f32 %v898_v52, %v892_v45 }
  0xad   : > { %903 = vst [vmem:[%s446_s20 + $0x8] sm:$0xff] %v901_v55 }
  0xae   : > { %902 = vst [vmem:[%s446_s20] sm:$0xff] %v900_v4 }
  0xaf PF: > { %s18_s27 = sadd.s32 1, %s1162_s27   ;;  %s1389_s26 = smov %s1158_s2 }
  0xb0   : > { %p15_p5 = scmp.ge.s32.totalorder %s18_s27, 4   ;;  %s1390_s2 = smov %s1392_s7 }
  0xb2   :  { %17 = sbr.rel (!%p15_p5) target bundleno = 2 (0x2), region = 127 }

// kernel: multi_dwconv_forward.4
= control target key start
LH: loop header
LB: loop body
LE: loop exit
PB: predicated region body
PF: predicated region fallthrough
CT: control target
= control target key end

     0   :  { %s2131_s26 = smov 0   ;;  %s2133_s2 = smov 0   ;;  %s2918_s0 = inlined_call_operand.vmem [shape: f32[2,336,128], index: 0, kind: input, shape index: {}, may-alias: {0,1,2}]   ;;  %s2919_s1 = inlined_call_operand.vmem [shape: f32[2,336,128], index: 1, kind: input, shape index: {}, may-alias: {0,1,2}]   ;;  %s2920_s2 = inlined_call_operand.vmem [shape: f32[2,336,128], index: 2, kind: input, shape index: {}, may-alias: {0,1,2}]   ;;  %s2921_s3 = inlined_call_operand.vmem [shape: f32[5,64,1], index: 3, kind: input, shape index: {}]   ;;  %s2922_s4 = inlined_call_operand.vmem [shape: f32[25,1,128], index: 4, kind: input, shape index: {}]   ;;  %s2923_s5 = inlined_call_operand.vmem [shape: f32[1,128], index: 5, kind: input, shape index: {}]   ;;  %s2924_s6 = inlined_call_operand.vmem [shape: f32[1,128], index: 6, kind: input, shape index: {}]   ;;  %s2925_s7 = inlined_call_operand.vmem [shape: f32[2,336,128], index: 7, kind: input, shape index: {}, may-alias: {7,8}]   ;;  %s2926_s8 = inlined_call_operand.vmem [shape: f32[2,336,128], index: 8, kind: output, shape index: {}, may-alias: {7,8}]  }
   0x1   :  { %s2135_s27 = smov 0   ;;  %s2137_s28 = smov 0  }
   0x2   :  { %s2139_s29 = smov 0  }
   0x3 LB: > { %s1822_s7 = sadd.s32 4294967295, %s2074_s29   ;;  %s30_s30 = sadd.s32 1, %s2070_s28  ;;  %s2074_s29 = sphi %s2139_s29, %s18_s29   ;;  %s2070_s28 = sphi %s2137_s28, %s2993_s28   ;;  %s2066_s27 = sphi %s2135_s27, %s2992_s27   ;;  %s2062_s2 = sphi %s2133_s2, %s2991_s2   ;;  %s2058_s26 = sphi %s2131_s26, %s2990_s26  }
   0x4   : > { %p32_p0 = scmp.ge.s32.totalorder %s30_s30, 2  ;;  %s227_s9 = sadd.s32 1, %s2062_s2 }
   0x5   : > { %p237_p1 = scmp.ne.s32.totalorder %s2062_s2, %s2058_s26  ;;  %p238_p2 = scmp.eq.s32.totalorder %s1822_s7, 1 }
   0x6   : > { %s2995_s30 = smov (%p32_p0, %s30_s30), 0  ;;  %p1826_p4 = scmp.ge.s32.totalorder %s2074_s29, 1 }
   0x7   : > { %p2163_p3 = por %p238_p2, %p237_p1  ;;  %s222_s11 = ssub.s32 %s2070_s28, %s2995_s30 }
   0x8   : > { %p339_p5 = scmp.lt.s32.totalorder %s2074_s29, 3  ;;  %p225_p6 = scmp.eq.s32.totalorder %s222_s11, 0 }
   0xa   : > { %p340_p7 = pnand %p1826_p4, %p339_p5 }
   0xb   : > { %s2172_s12 = scalar_select %p225_p6, %s2062_s2, %s227_s9  }
   0xc   : > { %343 = sbr.rel (%p340_p7) target bundleno = 246 (0xf6), region = 48 }
  0x13   : > { %v647_v0 = vld [vmem:[%s2921_s3 + $0x10] sm:$0xff]  ;;  %v645_v1 = vld [vmem:[%s2921_s3] sm:$0xff]  ;;  %p411_p8 = scmp.lt.s32.totalorder %s2066_s27, 1  ;;  %v2084_v2 = vmov 0   ;;  %v2085_v3 = vmov 0.0   ;;  %v648_v4 = vld [vmem:[%s2921_s3 + $0x18] sm:$0xff] }
  0x14   : > { %2003 = vset.pattern.permute.xlu1 %v2084_v2  ;;  %2002 = vset.pattern.permute.xlu0 %v2084_v2  ;;  %490 = vst [vmem:[#allocation2 + $0x10] sm:$0xff] %v2085_v3  ;;  %467 = vst [vmem:[#allocation2] sm:$0xff] %v2085_v3  ;;  %v646_v5 = vld [vmem:[%s2921_s3 + $0x8] sm:$0xff]  ;;  %v649_v7 = vld [vmem:[%s2921_s3 + $0x20] sm:$0xff]  ;;  %s402_s18 = sand.u32 1, %s2058_s26   ;;  %s1907_s20 = smul.u32 (%p2163_p3), 336, %s2066_s27 }
  0x15   : > { %468 = vst [vmem:[#allocation2 + $0x68] sm:$0xff] %v2085_v3  ;;  %489 = vst [vmem:[#allocation2 + $0x8] sm:$0xff] %v2085_v3  ;;  %665 = vperm.xlu1 %2003, %v647_v0   ;;  %655 = vperm.xlu0 %2002, %v645_v1   ;;  %s412_s17 = scalar_select %p411_p8, %s2066_s27, 1  ;;  %v650_v6 = vld [vmem:[%s2921_s3 + $0x28] sm:$0xff]  ;;  %v652_v8 = vld [vmem:[%s2921_s3 + $0x38] sm:$0xff] }
  0x16   : > { %502 = vst [vmem:[#allocation2 + $0x58] sm:$0xff] %v2085_v3  ;;  %503 = vst [vmem:[#allocation2 + $0x60] sm:$0xff] %v2085_v3  ;;  %v651_v9 = vld [vmem:[%s2921_s3 + $0x30] sm:$0xff]  ;;  %v1851_v15 = vld [vmem:[%s2921_s3 + $0x48] sm:$0xff]  ;;  %s1827_s19 = sshll.u32 %s402_s18, 6  ;;  %s2080_s1 = smov (%p2163_p3), 0  }
  0x17   : > { %s1927_s22 = smul.u32 336, %s412_s17  ;;  %v1850_v17 = vld [vmem:[%s2921_s3 + $0x40] sm:$0xff]  ;;  %v1853_v20 = vld [vmem:[%s2921_s3 + $0x58] sm:$0xff]  ;;  %v1852_v21 = vld [vmem:[%s2921_s3 + $0x50] sm:$0xff]  ;;  %s2879_s26 = scalar_lea.vmem [#allocation3], %s1827_s19  }
  0x18   : > { %v1855_v22 = vld [vmem:[%s2921_s3 + $0x68] sm:$0xff]  ;;  %v1854_v23 = vld [vmem:[%s2921_s3 + $0x60] sm:$0xff]  ;;  %v1857_v24 = vld [vmem:[%s2921_s3 + $0x78] sm:$0xff] }
  0x19   : > { %670 = vperm.xlu1 %2003, %v648_v4   ;;  %660 = vperm.xlu0 %2002, %v646_v5   ;;  %s1921_s23 = sadd.s32 256, %s1927_s22  ;;  %v1856_v25 = vld [vmem:[%s2921_s3 + $0x70] sm:$0xff]  ;;  %v1879_v26 = vld [vmem:[%s2921_s3 + $0xc8] sm:$0xff]  ;;  %v1878_v27 = vld [vmem:[%s2921_s3 + $0xc0] sm:$0xff] }
  0x1a   : > { %s418_s13 = scalar_lea.vmem %s2918_s0, %s1921_s23  ;;  %v1881_v28 = vld [vmem:[%s2921_s3 + $0xd8] sm:$0xff]  ;;  %v1880_v29 = vld [vmem:[%s2921_s3 + $0xd0] sm:$0xff]  ;;  %v1883_v30 = vld [vmem:[%s2921_s3 + $0xe8] sm:$0xff]  ;;  %s1719_s23 = scalar_lea.vmem (%p2163_p3), %s2926_s8, %s1907_s20 }
  0x1b   : > { %v2203_v10 = vld [vmem:[%s418_s13] sm:$0xff]  ;;  %v2205_v11 = vld [vmem:[%s418_s13 + $0x8] sm:$0xff]  ;;  %v2207_v12 = vld [vmem:[%s418_s13 + $0x10] sm:$0xff]  ;;  %s1720_s24 = scalar_lea.vmem (%p2163_p3), %s1719_s23, 256  }
  0x1c   : > { %v2209_v13 = vld [vmem:[%s418_s13 + $0x18] sm:$0xff]  ;;  %477 = vst [vmem:[#allocation2 + $0x18] sm:$0xff] %v2203_v10  ;;  %v2212_v14 = vld [vmem:[%s418_s13 + $0x20] sm:$0xff]  ;;  %478 = vst [vmem:[#allocation2 + $0x20] sm:$0xff] %v2205_v11  ;;  %s2076_s25 = smov (%p2163_p3), %s1720_s24  }
  0x1d   : > { %680 = vperm.xlu1 %2003, %v650_v6   ;;  %675 = vperm.xlu0 %2002, %v649_v7   ;;  %479 = vst [vmem:[#allocation2 + $0x28] sm:$0xff] %v2207_v12  ;;  %480 = vst [vmem:[#allocation2 + $0x30] sm:$0xff] %v2209_v13  ;;  %v2221_v16 = vld [vmem:[%s418_s13 + $0x28] sm:$0xff]  ;;  %v2227_v18 = vld [vmem:[%s418_s13 + $0x30] sm:$0xff] }
  0x1e   : > { %481 = vst [vmem:[#allocation2 + $0x38] sm:$0xff] %v2212_v14  ;;  %482 = vst [vmem:[#allocation2 + $0x40] sm:$0xff] %v2221_v16  ;;  %v2229_v19 = vld [vmem:[%s418_s13 + $0x38] sm:$0xff]  ;;  %v1882_v31 = vld [vmem:[%s2921_s3 + $0xe0] sm:$0xff] }
  0x1f   : > { %2932 = vst [vmem:[#allocation4_spill] sm:$0xff] %v2227_v18  ;;  %2933 = vst [vmem:[#allocation5_spill] sm:$0xff] %v2229_v19  ;;  %v1885_v32 = vld [vmem:[%s2921_s3 + $0xf8] sm:$0xff]  ;;  %v1884_v33 = vld [vmem:[%s2921_s3 + $0xf0] sm:$0xff] }
  0x20   : > { %483 = vst [vmem:[#allocation2 + $0x48] sm:$0xff] %v2227_v18  ;;  %484 = vst [vmem:[#allocation2 + $0x50] sm:$0xff] %v2229_v19  ;;  %v1897_v34 = vld [vmem:[%s2921_s3 + $0x108] sm:$0xff]  ;;  %v1896_v35 = vld [vmem:[%s2921_s3 + $0x100] sm:$0xff] }
  0x21   : > { %690 = vperm.xlu1 %2003, %v652_v8   ;;  %685 = vperm.xlu0 %2002, %v651_v9   ;;  %v1899_v36 = vld [vmem:[%s2921_s3 + $0x118] sm:$0xff]  ;;  %v2287_v37 = vld [vmem:[%s2922_s4 + $0x2] ss:$0 sm:$0xff]  ;;  %v1898_v38 = vld [vmem:[%s2921_s3 + $0x110] sm:$0xff] }
  0x22   : > { %v2295_v39 = vld [vmem:[%s2922_s4 + $0x7] ss:$0 sm:$0xff]  ;;  %v2300_v40 = vld [vmem:[%s2922_s4 + $0xc] ss:$0 sm:$0xff]  ;;  %v2305_v41 = vld [vmem:[%s2922_s4 + $0x11] ss:$0 sm:$0xff]  ;;  %v925_v60 = vmul.f32 %v2287_v37, %v2205_v11  ;;  %v924_v1 = vmul.f32 %v2287_v37, %v2203_v10 }
  0x23   : > { %v923_v42 = vmul.f32 0.0, %v2287_v37  ;;  %v948_v43 = vmul.f32 %v2295_v39, %v2203_v10  ;;  %v973_v44 = vmul.f32 %v2300_v40, %v2205_v11  ;;  %v1901_v45 = vld [vmem:[%s2921_s3 + $0x128] sm:$0xff]  ;;  %v1900_v46 = vld [vmem:[%s2921_s3 + $0x120] sm:$0xff]  ;;  %v998_v48 = vmul.f32 %v2305_v41, %v2207_v12  ;;  %v1903_v51 = vld [vmem:[%s2921_s3 + $0x138] sm:$0xff] }
  0x24   : > { %v947_v50 = vmul.f32 0.0, %v2295_v39  ;;  %v1902_v52 = vld [vmem:[%s2921_s3 + $0x130] sm:$0xff]  ;;  %v972_v54 = vmul.f32 %v2300_v40, %v2203_v10  ;;  %v997_v57 = vmul.f32 %v2305_v41, %v2205_v11  ;;  %v950_v61 = vmul.f32 %v2295_v39, %v2207_v12  ;;  %v1831_v6 = vld [vmem:[%s2922_s4] ss:$0 sm:$0xff]  ;;  %v1833_v7 = vld [vmem:[%s2922_s4 + $0x5] ss:$0 sm:$0xff] }
  0x25   : > { %857 = vperm.xlu1 %2003, %v1851_v15   ;;  %852 = vperm.xlu0 %2002, %v1850_v17   ;;  %v956_v47 = vadd.f32 %v948_v43, %v923_v42  ;;  %v2330_v53 = vld [vmem:[%s2922_s4 + $0x16] ss:$0 sm:$0xff]  ;;  %v949_v2 = vmul.f32 %v2295_v39, %v2205_v11  ;;  %v974_v3 = vmul.f32 %v2300_v40, %v2207_v12  ;;  %v514_v8 = vld [vmem:[#allocation2 + $0x6] sm:$0xff]  ;;  %v515_v9 = vld [vmem:[#allocation2 + $0xe] sm:$0xff] }
  0x26   : > { %v955_v56 = vadd.f32 %v947_v50, %v923_v42  ;;  %v1022_v59 = vmul.f32 %v2330_v53, %v2207_v12  ;;  %v2344_v63 = vadd.f32 %v950_v61, %v925_v60  ;;  %v529_v10 = vmul.f32 %v1831_v6, %v514_v8  ;;  %v1835_v11 = vld [vmem:[%s2922_s4 + $0xa] ss:$0 sm:$0xff]  ;;  %v620_v17 = vld [vmem:[#allocation2 + $0x5e] sm:$0xff] }
  0x27   : > { %v981_v49 = vadd.f32 %v973_v44, %v956_v47  ;;  %v957_v4 = vadd.f32 %v949_v2, %v924_v1  ;;  %v554_v15 = vmul.f32 %v1833_v7, %v515_v9  ;;  %v570_v2 = vld [vmem:[#allocation2 + $0x4e] sm:$0xff]  ;;  %v595_v19 = vld [vmem:[#allocation2 + $0x56] sm:$0xff] }
  0x28   : > { %v980_v58 = vadd.f32 %v972_v54, %v955_v56 }
  0x29   : > { %867 = vperm.xlu1 %2003, %v1853_v20   ;;  %862 = vperm.xlu0 %2002, %v1852_v21   ;;  %v2334_v55 = vadd.f32 %v998_v48, %v981_v49  ;;  %v2354_v5 = vadd.f32 %v974_v3, %v957_v4  ;;  %v2368_v20 = vld [vmem:[%s2922_s4 + $0x1] ss:$0 sm:$0xff]  ;;  %v516_v21 = vld [vmem:[#allocation2 + $0x16] sm:$0xff] }
  0x2a   : > { %v1005_v62 = vadd.f32 %v997_v57, %v980_v58  ;;  %v555_v44 = vmul.f32 %v1833_v7, %v516_v21 }
  0x2b   : > { %2935 = vst [vmem:[#allocation7_spill] sm:$0xff] %v2354_v5 }
  0x2c   : > { %v2346_v0 = vadd.f32 %v1022_v59, %v1005_v62 }
  0x2d   : > { %877 = vperm.xlu1 %2003, %v1855_v22   ;;  %872 = vperm.xlu0 %2002, %v1854_v23   ;;  %v2373_v22 = vld [vmem:[%s2922_s4 + $0xf] ss:$0 sm:$0xff]  ;;  %v2378_v23 = vld [vmem:[%s2922_s4 + $0x6] ss:$0 sm:$0xff] }
  0x2e   : > { %2934 = vst [vmem:[#allocation6_spill] sm:$0xff] %v2346_v0 }
  0x31   : > { %887 = vperm.xlu1 %2003, %v1857_v24   ;;  %882 = vperm.xlu0 %2002, %v1856_v25   ;;  %v710_v24 = vld [vmem:[#allocation2 + $0xf] sm:$0xff]  ;;  %v517_v25 = vld [vmem:[#allocation2 + $0x1e] sm:$0xff] }
  0x32   : > { %v556_v42 = vmul.f32 %v1833_v7, %v517_v25  ;;  %v604_v50 = vmul.f32 %v2373_v22, %v517_v25 }
  0x35   : > { %1194 = vperm.xlu1 %2003, %v1879_v26   ;;  %1189 = vperm.xlu0 %2002, %v1878_v27   ;;  %v518_v26 = vld [vmem:[#allocation2 + $0x26] sm:$0xff]  ;;  %v562_v27 = vadd.f32 %v554_v15, %v529_v10 }
  0x36   : > { %v581_v43 = vmul.f32 %v1835_v11, %v518_v26  ;;  %v557_v54 = vmul.f32 %v1833_v7, %v518_v26  ;;  %v533_v58 = vmul.f32 %v1831_v6, %v518_v26 }
  0x39   : > { %1204 = vperm.xlu1 %2003, %v1881_v28   ;;  %1199 = vperm.xlu0 %2002, %v1880_v29   ;;  %v579_v28 = vmul.f32 %v1835_v11, %v516_v21  ;;  %v2380_v29 = vld [vmem:[#allocation2 + $0x17] sm:$0xff] }
  0x3b   : > { %v587_v49 = vadd.f32 %v579_v28, %v562_v27  ;;  %v2415_v28 = vld [vmem:[%s2922_s4 + $0xb] ss:$0 sm:$0xff] }
  0x3d   : > { %1214 = vperm.xlu1 %2003, %v1883_v30   ;;  %1209 = vperm.xlu0 %2002, %v1882_v31   ;;  %v2382_v30 = vld [vmem:[#allocation2 + $0x2e] sm:$0xff]  ;;  %v520_v31 = vld [vmem:[#allocation2 + $0x36] sm:$0xff]  ;;  %v612_v8 = vadd.f32 %v604_v50, %v587_v49  ;;  %v586_v49 = vmul.f32 %v1835_v11, %v570_v2 }
  0x3e   : > { %v606_v47 = vmul.f32 %v2373_v22, %v2382_v30  ;;  %v534_v56 = vmul.f32 %v1831_v6, %v2382_v30  ;;  %v559_v57 = vmul.f32 %v1833_v7, %v520_v31  ;;  %v558_v59 = vmul.f32 %v1833_v7, %v2382_v30 }
  0x3f   : > { %v535_v3 = vmul.f32 %v1831_v6, %v520_v31  ;;  %v607_v10 = vmul.f32 %v2373_v22, %v520_v31 }
  0x40   : > { %v566_v0 = vadd.f32 %v558_v59, %v533_v58  ;;  %v713_v59 = vld [vmem:[#allocation2 + $0x27] sm:$0xff] }
  0x41   : > { %1224 = vperm.xlu1 %2003, %v1885_v32   ;;  %1219 = vperm.xlu0 %2002, %v1884_v33   ;;  %v2387_v32 = vld [vmem:[%s2922_s4 + $0x14] ss:$0 sm:$0xff]  ;;  %v530_v33 = vmul.f32 %v1831_v6, %v515_v9  ;;  %v582_v9 = vmul.f32 %v1835_v11, %v2382_v30 }
  0x42   : > { %v2403_v48 = vmul.f32 %v2387_v32, %v520_v31  ;;  %v629_v1 = vmul.f32 %v2387_v32, %v518_v26 }
  0x43   : > { %v563_v15 = vadd.f32 %v555_v44, %v530_v33  ;;  %v605_v44 = vmul.f32 %v2373_v22, %v518_v26 }
  0x45   : > { %1391 = vperm.xlu1 %2003, %v1897_v34   ;;  %1386 = vperm.xlu0 %2002, %v1896_v35   ;;  %v531_v34 = vmul.f32 %v1831_v6, %v516_v21  ;;  %v2390_v35 = vmul.f32 %v2387_v32, %v620_v17  ;;  %v580_v21 = vmul.f32 %v1835_v11, %v517_v25 }
  0x47   : > { %v564_v62 = vadd.f32 %v556_v42, %v531_v34  ;;  %v712_v34 = vld [vmem:[#allocation2 + $0x1f] sm:$0xff]  ;;  %v709_v42 = vld [vmem:[#allocation2 + $0x7] sm:$0xff]  ;;  %v588_v18 = vadd.f32 %v580_v21, %v563_v15  ;;  %v634_v21 = vmul.f32 %v2387_v32, %v570_v2 }
  0x49   : > { %1401 = vperm.xlu1 %2003, %v1899_v36   ;;  %1396 = vperm.xlu0 %2002, %v1898_v38   ;;  %v726_v36 = vmul.f32 %v2368_v20, %v710_v24  ;;  %v2394_v38 = vmul.f32 %v2378_v23, %v710_v24  ;;  %v567_v24 = vadd.f32 %v559_v57, %v534_v56 }
  0x4a   : > { %v589_v50 = vadd.f32 %v581_v43, %v564_v62  ;;  %v725_v56 = vmul.f32 %v2368_v20, %v709_v42  ;;  %v2427_v43 = vld [vmem:[%s2922_s4 + $0x10] ss:$0 sm:$0xff] }
  0x4c   : > { %v758_v15 = vadd.f32 %v2394_v38, %v725_v56  ;;  %v800_v38 = vmul.f32 %v2427_v43, %v712_v34  ;;  %v716_v56 = vld [vmem:[#allocation2 + $0x3f] sm:$0xff] }
  0x4d   : > { %1411 = vperm.xlu1 %2003, %v1901_v45   ;;  %1406 = vperm.xlu0 %2002, %v1900_v46   ;;  %v2396_v45 = vld [vmem:[#allocation2 + $0x46] sm:$0xff]  ;;  %v751_v46 = vmul.f32 %v2378_v23, %v2380_v29 }
  0x4e   : > { %v561_v61 = vmul.f32 %v1833_v7, %v2396_v45 }
  0x51   : > { %1421 = vperm.xlu1 %2003, %v1903_v51   ;;  %1416 = vperm.xlu0 %2002, %v1902_v52   ;;  %v521_v51 = vld [vmem:[#allocation2 + $0x3e] sm:$0xff]  ;;  %v532_v52 = vmul.f32 %v1831_v6, %v517_v25  ;;  %v585_v25 = vmul.f32 %v1835_v11, %v2396_v45 }
  0x52   : > { %v536_v60 = vmul.f32 %v1831_v6, %v521_v51  ;;  %v560_v4 = vmul.f32 %v1833_v7, %v521_v51  ;;  %v584_v27 = vmul.f32 %v1835_v11, %v521_v51  ;;  %v583_v6 = vmul.f32 %v1835_v11, %v520_v31 }
  0x53   : > { %v565_v17 = vadd.f32 %v557_v54, %v532_v52  ;;  %v632_v5 = vmul.f32 %v2387_v32, %v521_v51  ;;  %v759_v52 = vadd.f32 %v751_v46, %v726_v36  ;;  %v776_v54 = vmul.f32 %v2415_v28, %v712_v34 }
  0x54   : > { %v569_v7 = vadd.f32 %v561_v61, %v536_v60  ;;  %v568_v33 = vadd.f32 %v560_v4, %v535_v3  ;;  %v592_v58 = vadd.f32 %v584_v27, %v567_v24  ;;  %v609_v31 = vmul.f32 %v2373_v22, %v2396_v45  ;;  %v2439_v4 = vld [vmem:[%s2922_s4 + $0x15] ss:$0 sm:$0xff] }
  0x55   : > { %v590_v57 = vadd.f32 %v582_v9, %v565_v17  ;;  %v591_v11 = vadd.f32 %v583_v6, %v566_v0  ;;  %v608_v26 = vmul.f32 %v2373_v22, %v521_v51  ;;  %v611_v46 = vmul.f32 %v2373_v22, %v595_v19  ;;  %v714_v9 = vld [vmem:[#allocation2 + $0x2f] sm:$0xff] }
  0x56   : > { %v594_v36 = vadd.f32 %v586_v49, %v569_v7  ;;  %v2431_v60 = vadd.f32 %v629_v1, %v612_v8  ;;  %v630_v61 = vmul.f32 %v2387_v32, %v2382_v30  ;;  %v593_v62 = vadd.f32 %v585_v25, %v568_v33 }
  0x57   : > { %v610_v3 = vmul.f32 %v2373_v22, %v570_v2  ;;  %v784_v0 = vadd.f32 %v776_v54, %v759_v52  ;;  %v801_v51 = vmul.f32 %v2427_v43, %v713_v59  ;;  %v775_v1 = vmul.f32 %v2415_v28, %v2380_v29 }
  0x58   : > { %v614_v8 = vadd.f32 %v606_v47, %v589_v50  ;;  %v615_v17 = vadd.f32 %v607_v10, %v590_v57  ;;  %v613_v30 = vadd.f32 %v605_v44, %v588_v18  ;;  %v617_v22 = vadd.f32 %v609_v31, %v592_v58  ;;  %v715_v47 = vld [vmem:[#allocation2 + $0x37] sm:$0xff] }
  0x59   : > { %v616_v24 = vadd.f32 %v608_v26, %v591_v11  ;;  %v633_v27 = vmul.f32 %v2387_v32, %v2396_v45  ;;  %v619_v42 = vadd.f32 %v611_v46, %v594_v36  ;;  %v618_v6 = vadd.f32 %v610_v3, %v593_v62  ;;  %v741_v26 = vld [vmem:[#allocation2 + $0x47] sm:$0xff]  ;;  %v2484_v62 = vld [vmem:[%s2922_s4 + $0x3] ss:$0 sm:$0xff] }
  0x5a   : > { %v635_v7 = vmul.f32 %v2387_v32, %v595_v19  ;;  %v826_v49 = vmul.f32 %v2439_v4, %v714_v9  ;;  %v809_v33 = vadd.f32 %v801_v51, %v784_v0  ;;  %v783_v25 = vadd.f32 %v775_v1, %v758_v15  ;;  %v2493_v1 = vld [vmem:[%s2922_s4 + $0x8] ss:$0 sm:$0xff] }
  0x5b   : > { %v728_v18 = vmul.f32 %v2368_v20, %v712_v34  ;;  %v753_v2 = vmul.f32 %v2378_v23, %v713_v59  ;;  %v2454_v10 = vadd.f32 %v2403_v48, %v614_v8  ;;  %v2456_v50 = vadd.f32 %v632_v5, %v615_v17  ;;  %v1047_v8 = vld [vmem:[#allocation2 + $0x11] sm:$0xff]  ;;  %v2495_v17 = vld [vmem:[#allocation2 + $0x19] sm:$0xff] }
  0x5c   : > { %v727_v45 = vmul.f32 %v2368_v20, %v2380_v29  ;;  %v752_v19 = vmul.f32 %v2378_v23, %v712_v34  ;;  %v2461_v32 = vadd.f32 %v630_v61, %v613_v30  ;;  %v2463_v44 = vadd.f32 %v634_v21, %v617_v22  ;;  %v766_v21 = vld [vmem:[#allocation2 + $0x4f] sm:$0xff] }
  0x5d   : > { %v2465_v52 = vadd.f32 %v633_v27, %v616_v24  ;;  %v2468_v54 = vadd.f32 %v2390_v35, %v619_v42  ;;  %v2470_v57 = vadd.f32 %v635_v7, %v618_v6  ;;  %v825_v5 = vmul.f32 %v2439_v4, %v713_v59  ;;  %v1046_v42 = vld [vmem:[#allocation2 + $0x9] sm:$0xff] }
  0x5e   : > { %v730_v48 = vmul.f32 %v2368_v20, %v714_v9  ;;  %v755_v29 = vmul.f32 %v2378_v23, %v715_v47  ;;  %v2475_v58 = vadd.f32 %v826_v49, %v809_v33  ;;  %v808_v34 = vadd.f32 %v800_v38, %v783_v25 }
  0x5f   : > { %2936 = vst [vmem:[#allocation8_spill] sm:$0xff] %v2465_v52  ;;  %2937 = vst [vmem:[#allocation9_spill] sm:$0xff] %v2468_v54  ;;  %v761_v31 = vadd.f32 %v753_v2, %v728_v18  ;;  %v778_v11 = vmul.f32 %v2415_v28, %v714_v9  ;;  %v803_v36 = vmul.f32 %v2427_v43, %v715_v47 }
  0x60   : > { %2938 = vst [vmem:[#allocation10_spill] sm:$0xff] %v2470_v57  ;;  %v828_v35 = vmul.f32 %v2439_v4, %v716_v56  ;;  %v760_v46 = vadd.f32 %v752_v19, %v727_v45  ;;  %v777_v61 = vmul.f32 %v2415_v28, %v713_v59  ;;  %v802_v3 = vmul.f32 %v2427_v43, %v714_v9  ;;  %v2513_v45 = vld [vmem:[%s2922_s4 + $0xd] ss:$0 sm:$0xff] }
  0x61   : > { %v827_v0 = vmul.f32 %v2439_v4, %v715_v47  ;;  %v780_v51 = vmul.f32 %v2415_v28, %v716_v56  ;;  %v729_v15 = vmul.f32 %v2368_v20, %v713_v59  ;;  %v763_v30 = vadd.f32 %v755_v29, %v730_v48 }
  0x62   : > { %v754_v22 = vmul.f32 %v2378_v23, %v714_v9  ;;  %v732_v24 = vmul.f32 %v2368_v20, %v716_v56  ;;  %v757_v27 = vmul.f32 %v2378_v23, %v741_v26  ;;  %v2500_v6 = vadd.f32 %v825_v5, %v808_v34 }
  0x63   : > { %v786_v59 = vadd.f32 %v778_v11, %v761_v31  ;;  %v731_v7 = vmul.f32 %v2368_v20, %v715_v47  ;;  %v756_v49 = vmul.f32 %v2378_v23, %v716_v56  ;;  %v785_v38 = vadd.f32 %v777_v61, %v760_v46  ;;  %v1049_v20 = vld [vmem:[#allocation2 + $0x21] sm:$0xff]  ;;  %v2518_v31 = vld [vmem:[#allocation2 + $0x29] sm:$0xff]  ;;  %v791_v46 = vld [vmem:[#allocation2 + $0x57] sm:$0xff] }
  0x64   : > { %v805_v33 = vmul.f32 %v2427_v43, %v741_v26  ;;  %v1063_v25 = vmul.f32 %v2484_v62, %v1047_v8  ;;  %v1088_v9 = vmul.f32 %v2493_v1, %v2495_v17  ;;  %v830_v18 = vmul.f32 %v2439_v4, %v766_v21 }
  0x65   : > { %v779_v2 = vmul.f32 %v2415_v28, %v715_v47  ;;  %v1062_v23 = vmul.f32 %v2484_v62, %v1046_v42  ;;  %v1087_v19 = vmul.f32 %v2493_v1, %v1047_v8  ;;  %v788_v5 = vadd.f32 %v780_v51, %v763_v30  ;;  %v816_v51 = vld [vmem:[#allocation2 + $0x5f] sm:$0xff] }
  0x66   : > { %v762_v48 = vadd.f32 %v754_v22, %v729_v15  ;;  %v765_v29 = vadd.f32 %v757_v27, %v732_v24  ;;  %v782_v34 = vmul.f32 %v2415_v28, %v766_v21  ;;  %v811_v11 = vadd.f32 %v803_v36, %v786_v59  ;;  %v2527_v15 = vld [vmem:[%s2922_s4 + $0x12] ss:$0 sm:$0xff] }
  0x67   : > { %v804_v47 = vmul.f32 %v2427_v43, %v716_v56  ;;  %v764_v61 = vadd.f32 %v756_v49, %v731_v7  ;;  %v781_v57 = vmul.f32 %v2415_v28, %v741_v26  ;;  %v810_v54 = vadd.f32 %v802_v3, %v785_v38  ;;  %v2535_v27 = vld [vmem:[#allocation2 + $0x31] sm:$0xff] }
  0x68   : > { %v829_v52 = vmul.f32 %v2439_v4, %v741_v26  ;;  %v1096_v42 = vadd.f32 %v1088_v9, %v1063_v25  ;;  %v1113_v8 = vmul.f32 %v2513_v45, %v1049_v20  ;;  %v1095_v30 = vadd.f32 %v1087_v19, %v1062_v23 }
  0x69   : > { %v1112_v56 = vmul.f32 %v2513_v45, %v2495_v17  ;;  %v1065_v36 = vmul.f32 %v2484_v62, %v1049_v20  ;;  %v1090_v28 = vmul.f32 %v2493_v1, %v2518_v31  ;;  %v813_v3 = vadd.f32 %v805_v33, %v788_v5 }
  0x6a   : > { %v787_v26 = vadd.f32 %v779_v2, %v762_v48  ;;  %v790_v22 = vadd.f32 %v782_v34, %v765_v29  ;;  %v807_v24 = vmul.f32 %v2427_v43, %v791_v46  ;;  %v2537_v59 = vadd.f32 %v828_v35, %v811_v11  ;;  %v2550_v2 = vld [vmem:[%s2922_s4 + $0x17] ss:$0 sm:$0xff] }
  0x6b   : > { %v789_v7 = vadd.f32 %v781_v57, %v764_v61  ;;  %v806_v49 = vmul.f32 %v2427_v43, %v766_v21  ;;  %v975_v38 = vmul.f32 %v2300_v40, %v2209_v13  ;;  %v2542_v25 = vadd.f32 %v827_v0, %v810_v54  ;;  %v2553_v43 = vld [vmem:[#allocation2 + $0x39] sm:$0xff] }
  0x6c   : > { %v832_v9 = vmul.f32 %v2439_v4, %v816_v51  ;;  %v1121_v23 = vadd.f32 %v1113_v8, %v1096_v42  ;;  %v1138_v33 = vmul.f32 %v2527_v15, %v2518_v31  ;;  %v1120_v35 = vadd.f32 %v1112_v56, %v1095_v30  ;;  %v2575_v30 = vld [vmem:[#allocation2 + $0x41] sm:$0xff] }
  0x6d   : > { %v1137_v57 = vmul.f32 %v2527_v15, %v1049_v20  ;;  %v1098_v21 = vadd.f32 %v1090_v28, %v1065_v36  ;;  %v1115_v54 = vmul.f32 %v2513_v45, %v2535_v27  ;;  %v2557_v0 = vadd.f32 %v830_v18, %v813_v3 }
  0x6e   : > { %v812_v19 = vadd.f32 %v804_v47, %v787_v26  ;;  %v815_v5 = vadd.f32 %v807_v24, %v790_v22  ;;  %v831_v48 = vmul.f32 %v2439_v4, %v791_v46  ;;  %v814_v29 = vadd.f32 %v806_v49, %v789_v7 }
  0x6f   : > { %2939 = vst [vmem:[#allocation11_spill] sm:$0xff] %v2557_v0  ;;  %v1023_v34 = vmul.f32 %v2330_v53, %v2209_v13  ;;  %v983_v11 = vadd.f32 %v975_v38, %v2344_v63  ;;  %v1000_v61 = vmul.f32 %v2305_v41, %v2212_v14  ;;  %v1146_v51 = vadd.f32 %v1138_v33, %v1121_v23 }
  0x70   : > { %v1163_v18 = vmul.f32 %v2550_v2, %v2535_v27  ;;  %v1162_v4 = vmul.f32 %v2550_v2, %v2518_v31  ;;  %v1140_v47 = vmul.f32 %v2527_v15, %v2553_v43  ;;  %v1145_v46 = vadd.f32 %v1137_v57, %v1120_v35 }
  0x71   : > { %v1123_v63 = vadd.f32 %v1115_v54, %v1098_v21  ;;  %v1064_v56 = vmul.f32 %v2484_v62, %v2495_v17  ;;  %v1089_v36 = vmul.f32 %v2493_v1, %v1049_v20  ;;  %v2580_v28 = vadd.f32 %v829_v52, %v812_v19 }
  0x72   : > { %v2582_v3 = vadd.f32 %v832_v9, %v815_v5  ;;  %v927_v26 = vmul.f32 %v2287_v37, %v2209_v13  ;;  %v952_v22 = vmul.f32 %v2295_v39, %v2212_v14  ;;  %v2588_v24 = vadd.f32 %v831_v48, %v814_v29 }
  0x73   : > { %2940 = vst [vmem:[#allocation12_spill] sm:$0xff] %v2580_v28  ;;  %v2591_v7 = vadd.f32 %v1023_v34, %v2334_v55  ;;  %v1008_v49 = vadd.f32 %v1000_v61, %v983_v11  ;;  %v1025_v17 = vmul.f32 %v2330_v53, %v2221_v16  ;;  %v2599_v38 = vadd.f32 %v1163_v18, %v1146_v51 }
  0x74   : > { %2941 = vst [vmem:[#allocation13_spill] sm:$0xff] %v2582_v3  ;;  %2942 = vst [vmem:[#allocation14_spill] sm:$0xff] %v2588_v24  ;;  %v1165_v9 = vmul.f32 %v2550_v2, %v2575_v30  ;;  %v999_v23 = vmul.f32 %v2305_v41, %v2209_v13  ;;  %v1024_v55 = vmul.f32 %v2330_v53, %v2212_v14  ;;  %v2949_v3 = vld [vmem:[#allocation7_spill] sm:$0xff] }
  0x75   : > { %2943 = vst [vmem:[#allocation15_spill] sm:$0xff] %v2591_v7  ;;  %v2607_v33 = vadd.f32 %v1162_v4, %v1145_v46  ;;  %v1148_v35 = vadd.f32 %v1140_v47, %v1123_v63  ;;  %v1097_v57 = vadd.f32 %v1089_v36, %v1064_v56  ;;  %v1114_v21 = vmul.f32 %v2513_v45, %v2518_v31  ;;  %v1078_v4 = vld [vmem:[#allocation2 + $0x49] sm:$0xff] }
  0x76   : > { %v960_v54 = vadd.f32 %v952_v22, %v927_v26  ;;  %v977_v19 = vmul.f32 %v2300_v40, %v2221_v16  ;;  %v1067_v5 = vmul.f32 %v2484_v62, %v2535_v27  ;;  %v1092_v48 = vmul.f32 %v2493_v1, %v2553_v43  ;;  %v2946_v56 = vld [vmem:[#allocation4_spill] sm:$0xff] }
  0x77   : > { %v2617_v29 = vadd.f32 %v1025_v17, %v1008_v49  ;;  %v1139_v34 = vmul.f32 %v2527_v15, %v2535_v27  ;;  %v926_v11 = vmul.f32 %v2287_v37, %v2207_v12  ;;  %v951_v61 = vmul.f32 %v2295_v39, %v2209_v13 }
  0x78   : > { %v1066_v47 = vmul.f32 %v2484_v62, %v2518_v31  ;;  %v1091_v46 = vmul.f32 %v2493_v1, %v2535_v27  ;;  %v929_v63 = vmul.f32 %v2287_v37, %v2221_v16  ;;  %v954_v12 = vmul.f32 %v2295_v39, %v2946_v56  ;;  %v2948_v31 = vld [vmem:[#allocation5_spill] sm:$0xff] }
  0x79   : > { %2944 = vst [vmem:[#allocation16_spill] sm:$0xff] %v2617_v29  ;;  %v2637_v36 = vadd.f32 %v1165_v9, %v1148_v35  ;;  %v1122_v13 = vadd.f32 %v1114_v21, %v1097_v57  ;;  %v1164_v26 = vmul.f32 %v2550_v2, %v2553_v43  ;;  %v1002_v22 = vmul.f32 %v2305_v41, %v2946_v56  ;;  %v2645_v29 = vld [vmem:[#allocation2 + $0x51] sm:$0xff] }
  0x7a   : > { %v985_v49 = vadd.f32 %v977_v19, %v960_v54  ;;  %v1027_v17 = vmul.f32 %v2330_v53, %v2948_v31  ;;  %v1100_v27 = vadd.f32 %v1092_v48, %v1067_v5  ;;  %v1117_v24 = vmul.f32 %v2513_v45, %v2575_v30 }
  0x7b   : > { %2947 = vst [vmem:[#allocation4_spill] sm:$0xff] %v2637_v36  ;;  %v1007_v9 = vadd.f32 %v999_v23, %v2949_v3  ;;  %v1142_v35 = vmul.f32 %v2527_v15, %v1078_v4  ;;  %v959_v57 = vadd.f32 %v951_v61, %v926_v11  ;;  %v976_v21 = vmul.f32 %v2300_v40, %v2212_v14 }
  0x7c   : > { %v1099_v19 = vadd.f32 %v1091_v46, %v1066_v47  ;;  %v1116_v5 = vmul.f32 %v2513_v45, %v2553_v43  ;;  %v962_v48 = vadd.f32 %v954_v12, %v929_v63  ;;  %v979_v7 = vmul.f32 %v2300_v40, %v2948_v31 }
  0x7d   : > { %v1147_v28 = vadd.f32 %v1139_v34, %v1122_v13  ;;  %v1167_v3 = vmul.f32 %v2550_v2, %v2645_v29  ;;  %v1069_v23 = vmul.f32 %v2484_v62, %v2575_v30  ;;  %v1094_v11 = vmul.f32 %v2493_v1, %v1078_v4 }
  0x7e   : > { %v1010_v61 = vadd.f32 %v1002_v22, %v985_v49  ;;  %v1001_v47 = vmul.f32 %v2305_v41, %v2221_v16  ;;  %v1141_v46 = vmul.f32 %v2527_v15, %v2575_v30  ;;  %v928_v63 = vmul.f32 %v2287_v37, %v2212_v14 }
  0x7f   : > { %v953_v34 = vmul.f32 %v2295_v39, %v2221_v16  ;;  %v1068_v12 = vmul.f32 %v2484_v62, %v2553_v43  ;;  %v1093_v13 = vmul.f32 %v2493_v1, %v2575_v30  ;;  %v984_v49 = vadd.f32 %v976_v21, %v959_v57  ;;  %v1128_v39 = vld [vmem:[#allocation2 + $0x59] sm:$0xff]  ;;  %v2692_v62 = vld [vmem:[%s2922_s4 + $0x4] ss:$0 sm:$0xff] }
  0x80   : > { %v2683_v0 = vadd.f32 %v1024_v55, %v1007_v9  ;;  %v1026_v14 = vmul.f32 %v2330_v53, %v2946_v56  ;;  %v1102_v16 = vadd.f32 %v1094_v11, %v1069_v23  ;;  %v1119_v37 = vmul.f32 %v2513_v45, %v2645_v29  ;;  %v2702_v55 = vld [vmem:[%s2922_s4 + $0x9] ss:$0 sm:$0xff]  ;;  %v1244_v9 = vld [vmem:[#allocation2 + $0x12] sm:$0xff]  ;;  %v1245_v57 = vld [vmem:[#allocation2 + $0x1a] sm:$0xff] }
  0x81   : > { %v2694_v1 = vadd.f32 %v1164_v26, %v1147_v28  ;;  %v2696_v43 = vadd.f32 %v1027_v17, %v1010_v61  ;;  %v1153_v21 = vld [vmem:[#allocation2 + $0x61] sm:$0xff]  ;;  %v1118_v28 = vmul.f32 %v2513_v45, %v1078_v4  ;;  %v1243_v26 = vld [vmem:[#allocation2 + $0xa] sm:$0xff]  ;;  %v1029_v61 = vmul.f32 0.0, %v2330_v53  ;;  %v2726_v53 = vld [vmem:[%s2922_s4 + $0x13] ss:$0 sm:$0xff] }
  0x82   : > { %2952 = vst [vmem:[#allocation18_spill] sm:$0xff] %v2683_v0  ;;  %v1144_v0 = vmul.f32 %v2527_v15, %v1128_v39  ;;  %v1260_v45 = vmul.f32 %v2692_v62, %v1244_v9 }
  0x83   : > { %2953 = vst [vmem:[#allocation19_spill] sm:$0xff] %v2694_v1  ;;  %2954 = vst [vmem:[#allocation20_spill] sm:$0xff] %v2696_v43  ;;  %v1127_v43 = vadd.f32 %v1119_v37, %v1102_v16 }
  0x94   : > { %v2565_v42 = vpop.permute.xlu1 %665  ;;  %v2567_v8 = vpop.permute.xlu0 %655 }
  0x98   : > { %v2595_v20 = vpop.permute.xlu1 %670  ;;  %v2597_v52 = vpop.permute.xlu0 %660 }
  0x9c   : > { %v2625_v51 = vpop.permute.xlu1 %680  ;;  %v2627_v18 = vpop.permute.xlu0 %675 }
  0x9d   : > { %2945 = vst [vmem:[#allocation17_spill] sm:$0xff] %v2627_v18  ;;  %v1004_v18 = vmul.f32 0.0, %v2305_v41 }
  0xa0   : > { %v2653_v36 = vpop.permute.xlu1 %690  ;;  %v2655_v54 = vpop.permute.xlu0 %685 }
  0xa1   : > { %2950 = vst [vmem:[#allocation5_spill] sm:$0xff] %v2653_v36  ;;  %2951 = vst [vmem:[#allocation7_spill] sm:$0xff] %v2655_v54  ;;  %v1125_v36 = vadd.f32 %v1117_v24, %v1100_v27  ;;  %v1124_v27 = vadd.f32 %v1116_v5, %v1099_v19  ;;  %v987_v54 = vadd.f32 %v979_v7, %v962_v48 }
  0xa2   : > { %v1166_v7 = vmul.f32 %v2550_v2, %v1078_v4  ;;  %v961_v19 = vadd.f32 %v953_v34, %v928_v63  ;;  %v978_v5 = vmul.f32 %v2300_v40, %v2946_v56  ;;  %v1101_v48 = vadd.f32 %v1093_v13, %v1068_v12  ;;  %v2716_v40 = vld [vmem:[%s2922_s4 + $0xe] ss:$0 sm:$0xff] }
  0xa3   : > { %v1150_v30 = vadd.f32 %v1142_v35, %v1125_v36  ;;  %v1009_v35 = vadd.f32 %v1001_v47, %v984_v49  ;;  %v1149_v23 = vadd.f32 %v1141_v46, %v1124_v27  ;;  %v1012_v11 = vadd.f32 %v1004_v18, %v987_v54  ;;  %v1246_v18 = vld [vmem:[#allocation2 + $0x22] sm:$0xff]  ;;  %v1247_v54 = vld [vmem:[#allocation2 + $0x2a] sm:$0xff] }
  0xa4   : > { %v2678_v22 = vpop.permute.xlu1 %857  ;;  %v2680_v24 = vpop.permute.xlu0 %852  ;;  %v1285_v4 = vmul.f32 %v2702_v55, %v1245_v57  ;;  %v1169_v47 = vmul.f32 %v2550_v2, %v1153_v21  ;;  %v1259_v46 = vmul.f32 %v2692_v62, %v1243_v26  ;;  %v1284_v63 = vmul.f32 %v2702_v55, %v1244_v9 }
  0xa5   : > { %v2720_v56 = vadd.f32 %v1167_v3, %v1150_v30  ;;  %v986_v34 = vadd.f32 %v978_v5, %v961_v19  ;;  %v1003_v12 = vmul.f32 %v2305_v41, %v2948_v31  ;;  %v1126_v13 = vadd.f32 %v1118_v28, %v1101_v48  ;;  %v1249_v5 = vld [vmem:[#allocation2 + $0x3a] sm:$0xff] }
  0xa6   : > { %v1143_v3 = vmul.f32 %v2527_v15, %v2645_v29  ;;  %v2738_v16 = vadd.f32 %v1026_v14, %v1009_v35  ;;  %v2740_v37 = vadd.f32 %v1166_v7, %v1149_v23  ;;  %v2742_v30 = vadd.f32 %v1029_v61, %v1012_v11  ;;  %v2750_v15 = vld [vmem:[%s2922_s4 + $0x18] ss:$0 sm:$0xff] }
  0xa7   : > { %2955 = vst [vmem:[#allocation21_spill] sm:$0xff] %v2720_v56  ;;  %v1168_v9 = vmul.f32 %v2550_v2, %v1128_v39  ;;  %v1152_v21 = vadd.f32 %v1144_v0, %v1127_v43  ;;  %v1293_v19 = vadd.f32 %v1285_v4, %v1260_v45  ;;  %v1310_v41 = vmul.f32 %v2716_v40, %v1246_v18  ;;  %v1248_v29 = vld [vmem:[#allocation2 + $0x32] sm:$0xff] }
  0xa8   : > { %v2707_v17 = vpop.permute.xlu1 %867  ;;  %v2709_v36 = vpop.permute.xlu0 %862  ;;  %2956 = vst [vmem:[#allocation22_spill] sm:$0xff] %v2738_v16  ;;  %2957 = vst [vmem:[#allocation23_spill] sm:$0xff] %v2740_v37  ;;  %v1335_v31 = vmul.f32 %v2726_v53, %v1247_v54  ;;  %v1292_v14 = vadd.f32 %v1284_v63, %v1259_v46  ;;  %v1309_v7 = vmul.f32 %v2716_v40, %v1245_v57  ;;  %v1275_v37 = vld [vmem:[#allocation2 + $0x4a] sm:$0xff] }
  0xa9   : > { %2958 = vst [vmem:[#allocation24_spill] sm:$0xff] %v2742_v30  ;;  %v1262_v48 = vmul.f32 %v2692_v62, %v1246_v18  ;;  %v1287_v2 = vmul.f32 %v2702_v55, %v1247_v54  ;;  %v1011_v0 = vadd.f32 %v1003_v12, %v986_v34  ;;  %v1151_v39 = vadd.f32 %v1143_v3, %v1126_v13  ;;  %v1250_v12 = vld [vmem:[#allocation2 + $0x42] sm:$0xff] }
  0xaa   : > { %v1261_v43 = vmul.f32 %v2692_v62, %v1245_v57  ;;  %v1286_v28 = vmul.f32 %v2702_v55, %v1246_v18  ;;  %v1264_v23 = vmul.f32 %v2692_v62, %v1248_v29  ;;  %v1289_v11 = vmul.f32 %v2702_v55, %v1249_v5 }
  0xab   : > { %v1263_v45 = vmul.f32 %v2692_v62, %v1247_v54  ;;  %v1288_v4 = vmul.f32 %v2702_v55, %v1248_v29  ;;  %v2765_v46 = vadd.f32 %v1169_v47, %v1152_v21  ;;  %v1360_v63 = vmul.f32 %v2750_v15, %v1248_v29 }
  0xac   : > { %v2734_v49 = vpop.permute.xlu1 %877  ;;  %v2736_v27 = vpop.permute.xlu0 %872  ;;  %v1334_v57 = vmul.f32 %v2726_v53, %v1246_v18  ;;  %v1359_v34 = vmul.f32 %v2750_v15, %v1247_v54  ;;  %v1318_v13 = vadd.f32 %v1310_v41, %v1293_v19  ;;  %v1317_v3 = vadd.f32 %v1309_v7, %v1292_v14 }
  0xad   : > { %2961 = vst [vmem:[#allocation27_spill] sm:$0xff] %v2765_v46  ;;  %v1295_v30 = vadd.f32 %v1287_v2, %v1262_v48  ;;  %v1312_v16 = vmul.f32 %v2716_v40, %v1248_v29  ;;  %v2771_v56 = vadd.f32 %v1029_v61, %v1011_v0  ;;  %v1294_v1 = vadd.f32 %v1286_v28, %v1261_v43 }
  0xae   : > { %v1311_v47 = vmul.f32 %v2716_v40, %v1247_v54  ;;  %v1297_v18 = vadd.f32 %v1289_v11, %v1264_v23  ;;  %v1296_v19 = vadd.f32 %v1288_v4, %v1263_v45  ;;  %v1313_v41 = vmul.f32 %v2716_v40, %v1249_v5 }
  0xaf   : > { %2962 = vst [vmem:[#allocation28_spill] sm:$0xff] %v2771_v56  ;;  %v1266_v14 = vmul.f32 %v2692_v62, %v1250_v12  ;;  %v1291_v61 = vmul.f32 %v2702_v55, %v1275_v37  ;;  %v1290_v7 = vmul.f32 %v2702_v55, %v1250_v12  ;;  %v1343_v48 = vadd.f32 %v1335_v31, %v1318_v13 }
  0xb0   : > { %v2757_v26 = vpop.permute.xlu1 %887  ;;  %v2759_v35 = vpop.permute.xlu0 %882  ;;  %v1342_v54 = vadd.f32 %v1334_v57, %v1317_v3  ;;  %v1320_v2 = vadd.f32 %v1312_v16, %v1295_v30  ;;  %v1337_v0 = vmul.f32 %v2726_v53, %v1249_v5  ;;  %v1362_v43 = vmul.f32 %v2750_v15, %v1250_v12  ;;  %v1325_v30 = vld [vmem:[#allocation2 + $0x5a] sm:$0xff] }
  0xb1   : > { %2959 = vst [vmem:[#allocation25_spill] sm:$0xff] %v2757_v26  ;;  %2960 = vst [vmem:[#allocation26_spill] sm:$0xff] %v2759_v35  ;;  %v2773_v35 = vadd.f32 %v1168_v9, %v1151_v39  ;;  %v1314_v26 = vmul.f32 %v2716_v40, %v1250_v12  ;;  %v1265_v9 = vmul.f32 %v2692_v62, %v1249_v5  ;;  %v1300_v39 = vld [vmem:[#allocation2 + $0x52] sm:$0xff] }
  0xb2   : > { %v1319_v28 = vadd.f32 %v1311_v47, %v1294_v1  ;;  %v1336_v23 = vmul.f32 %v2726_v53, %v1248_v29  ;;  %v1361_v11 = vmul.f32 %v2750_v15, %v1249_v5  ;;  %v1339_v62 = vmul.f32 %v2726_v53, %v1275_v37 }
  0xb3   : > { %2963 = vst [vmem:[#allocation29_spill] sm:$0xff] %v2773_v35  ;;  %v1322_v56 = vadd.f32 %v1314_v26, %v1297_v18  ;;  %v1321_v35 = vadd.f32 %v1313_v41, %v1296_v19  ;;  %v1338_v55 = vmul.f32 %v2726_v53, %v1250_v12  ;;  %v1299_v31 = vadd.f32 %v1291_v61, %v1266_v14  ;;  %v1350_v19 = vld [vmem:[#allocation2 + $0x62] sm:$0xff] }
  0xb4   : > { %v2776_v21 = vpop.permute.xlu1 %1194  ;;  %v2778_v46 = vpop.permute.xlu0 %1189  ;;  %v1316_v16 = vmul.f32 %v2716_v40, %v1300_v39  ;;  %v1298_v57 = vadd.f32 %v1290_v7, %v1265_v9  ;;  %v1315_v13 = vmul.f32 %v2716_v40, %v1275_v37  ;;  %v1368_v1 = vadd.f32 %v1360_v63, %v1343_v48 }
  0xb5   : > { %v1367_v3 = vadd.f32 %v1359_v34, %v1342_v54  ;;  %v1345_v29 = vadd.f32 %v1337_v0, %v1320_v2  ;;  %v1364_v5 = vmul.f32 %v2750_v15, %v1300_v39  ;;  %v891_v26 = vmul.f32 %v2678_v22, %v2475_v58 }
  0xb6   : > { %v890_v47 = vmul.f32 %v2680_v24, %v2500_v6  ;;  %v1344_v18 = vadd.f32 %v1336_v23, %v1319_v28  ;;  %v1363_v12 = vmul.f32 %v2750_v15, %v1275_v37  ;;  %v1347_v61 = vadd.f32 %v1339_v62, %v1322_v56  ;;  %v2967_v23 = vld [vmem:[#allocation12_spill] sm:$0xff]  ;;  %v2969_v62 = vld [vmem:[#allocation6_spill] sm:$0xff] }
  0xb7   : > { %v1346_v40 = vadd.f32 %v1338_v55, %v1321_v35  ;;  %v1341_v63 = vmul.f32 %v2726_v53, %v1325_v30  ;;  %v1340_v34 = vmul.f32 %v2726_v53, %v1300_v39  ;;  %v693_v9 = vmul.f32 %v2567_v8, %v2431_v60  ;;  %v2965_v39 = vld [vmem:[#allocation8_spill] sm:$0xff]  ;;  %v2971_v55 = vld [vmem:[#allocation5_spill] sm:$0xff] }
  0xb8   : > { %v1205_v45 = vpop.permute.xlu1 %1204  ;;  %v1200_v4 = vpop.permute.xlu0 %1199  ;;  %v694_v58 = vmul.f32 %v2597_v52, %v2461_v32  ;;  %v1324_v6 = vadd.f32 %v1316_v16, %v1299_v31  ;;  %v1323_v22 = vadd.f32 %v1315_v13, %v1298_v57  ;;  %v893_v24 = vmul.f32 %v2707_v17, %v2537_v59  ;;  %v2972_v16 = vld [vmem:[#allocation13_spill] sm:$0xff]  ;;  %v2975_v13 = vld [vmem:[#allocation19_spill] sm:$0xff] }
  0xb9   : > { %v892_v37 = vmul.f32 %v2709_v36, %v2542_v25  ;;  %v1370_v56 = vadd.f32 %v1362_v43, %v1345_v29  ;;  %v2813_v35 = vmul.f32 %v2750_v15, %v1350_v19  ;;  %v898_v53 = vadd.f32 %v890_v47, %v693_v9  ;;  %v2966_v43 = vld [vmem:[#allocation17_spill] sm:$0xff]  ;;  %v2976_v19 = vld [vmem:[#allocation14_spill] sm:$0xff] }
  0xba   : > { %v899_v7 = vadd.f32 %v891_v26, %v694_v58  ;;  %v1369_v48 = vadd.f32 %v1361_v11, %v1344_v18  ;;  %v1365_v60 = vmul.f32 %v2750_v15, %v1325_v30  ;;  %v695_v32 = vmul.f32 %v2565_v42, %v2454_v10  ;;  %v2974_v30 = vld [vmem:[#allocation4_spill] sm:$0xff]  ;;  %v2979_v9 = vld [vmem:[#allocation18_spill] sm:$0xff] }
  0xbb   : > { %v696_v8 = vmul.f32 %v2595_v20, %v2456_v50  ;;  %v2820_v17 = vadd.f32 %v1364_v5, %v1347_v61  ;;  %v2822_v25 = vadd.f32 %v1363_v12, %v1346_v40  ;;  %v1228_v36 = vmul.f32 %v2776_v21, %v2599_v38  ;;  %v2964_v50 = vld [vmem:[#allocation11_spill] sm:$0xff]  ;;  %v2977_v61 = vld [vmem:[#allocation26_spill] sm:$0xff] }
  0xbc   : > { %v1215_v41 = vpop.permute.xlu1 %1214  ;;  %v2800_v14 = vpop.permute.xlu0 %1209  ;;  %v1227_v54 = vmul.f32 %v2778_v46, %v2607_v33  ;;  %v1349_v2 = vadd.f32 %v1341_v63, %v1324_v6  ;;  %v1348_v15 = vadd.f32 %v1340_v34, %v1323_v22  ;;  %v698_v10 = vmul.f32 %v2625_v51, %v2463_v44  ;;  %v2968_v38 = vld [vmem:[#allocation15_spill] sm:$0xff]  ;;  %v2970_v46 = vld [vmem:[#allocation9_spill] sm:$0xff]  ;;  %v2978_v63 = vld [vmem:[#allocation16_spill] sm:$0xff] }
  0xbd   : > { %v901_v42 = vadd.f32 %v893_v24, %v696_v8  ;;  %v900_v0 = vadd.f32 %v892_v37, %v695_v32  ;;  %v895_v20 = vmul.f32 %v2734_v49, %v2964_v50  ;;  %v697_v28 = vmul.f32 %v2966_v43, %v2965_v39  ;;  %v2973_v44 = vld [vmem:[#allocation25_spill] sm:$0xff]  ;;  %v2981_v6 = vld [vmem:[#allocation7_spill] sm:$0xff]  ;;  %v2983_v43 = vld [vmem:[#allocation20_spill] sm:$0xff] }
  0xbe   : > { %v894_v11 = vmul.f32 %v2736_v27, %v2967_v23  ;;  %v1039_v21 = vadd.f32 %v2968_v38, %v899_v7  ;;  %v1038_v33 = vadd.f32 %v2969_v62, %v898_v53  ;;  %v700_v31 = vmul.f32 %v2971_v55, %v2970_v46  ;;  %v2982_v32 = vld [vmem:[#allocation21_spill] sm:$0xff]  ;;  %v2984_v23 = vld [vmem:[#allocation23_spill] sm:$0xff]  ;;  %v2986_v55 = vld [vmem:[#allocation22_spill] sm:$0xff] }
  0xbf   : > { %v897_v51 = vmul.f32 %v2973_v44, %v2972_v16  ;;  %v1230_v57 = vmul.f32 %v1205_v45, %v2974_v30  ;;  %v1229_v49 = vmul.f32 %v1200_v4, %v2975_v13  ;;  %v903_v12 = vadd.f32 %v895_v20, %v698_v10  ;;  %v2851_v45 = vld [vmem:[%s2923_s5] ss:$0 sm:$0xff]  ;;  %v2985_v38 = vld [vmem:[#allocation27_spill] sm:$0xff]  ;;  %v2987_v16 = vld [vmem:[#allocation24_spill] sm:$0xff] }
  0xc0   : > { %v1225_v52 = vpop.permute.xlu1 %1224  ;;  %v1220_v59 = vpop.permute.xlu0 %1219  ;;  %v1236_v26 = vadd.f32 %v1228_v36, %v1039_v21  ;;  %v1235_v47 = vadd.f32 %v1227_v54, %v1038_v33  ;;  %v896_v40 = vmul.f32 %v2977_v61, %v2976_v19  ;;  %v1041_v34 = vadd.f32 %v2978_v63, %v901_v42  ;;  %v2980_v4 = vld [vmem:[#allocation10_spill] sm:$0xff]  ;;  %v2988_v13 = vld [vmem:[#allocation29_spill] sm:$0xff] }
  0xc1   : > { %v1040_v58 = vadd.f32 %v2979_v9, %v900_v0  ;;  %v699_v22 = vmul.f32 %v2981_v6, %v2980_v4  ;;  %v902_v24 = vadd.f32 %v894_v11, %v697_v28  ;;  %v1232_v8 = vmul.f32 %v1215_v41, %v2982_v32  ;;  %v1905_v36 = vld [vmem:[%s2924_s6] ss:$0 sm:$0xff] }
  0xc2   : > { %v1238_v7 = vadd.f32 %v1230_v57, %v1041_v34  ;;  %v1043_v28 = vadd.f32 %v2983_v43, %v903_v12  ;;  %v1231_v11 = vmul.f32 %v2800_v14, %v2984_v23  ;;  %v1234_v41 = vmul.f32 %v1225_v52, %v2985_v38  ;;  %v2989_v12 = vld [vmem:[#allocation28_spill] sm:$0xff] }
  0xc3   : > { %v1237_v53 = vadd.f32 %v1229_v49, %v1040_v58  ;;  %v904_v39 = vadd.f32 %v896_v40, %v699_v22  ;;  %v1233_v49 = vmul.f32 %v1220_v59, %v2988_v13 }
  0xc4   : > { %v1392_v29 = vpop.permute.xlu1 %1391  ;;  %v1387_v5 = vpop.permute.xlu0 %1386  ;;  %v1240_v57 = vadd.f32 %v1232_v8, %v1043_v28 }
  0xc5   : > { %v1425_v18 = vmul.f32 %v1392_v29, %v1368_v1  ;;  %v1424_v27 = vmul.f32 %v1387_v5, %v1367_v3  ;;  %v905_v3 = vadd.f32 %v897_v51, %v700_v31  ;;  %v1042_v31 = vadd.f32 %v2986_v55, %v902_v24 }
  0xc6   : > { %v1044_v19 = vadd.f32 %v2989_v12, %v904_v39 }
  0xc7   : > { %v1433_v37 = vadd.f32 %v1425_v18, %v1236_v26  ;;  %v1432_v1 = vadd.f32 %v1424_v27, %v1235_v47  ;;  %v1045_v44 = vadd.f32 %v2987_v16, %v905_v3  ;;  %v1239_v18 = vadd.f32 %v1231_v11, %v1042_v31 }
  0xc8   : > { %v1402_v54 = vpop.permute.xlu1 %1401  ;;  %v1397_v10 = vpop.permute.xlu0 %1396  ;;  %v1241_v61 = vadd.f32 %v1233_v49, %v1044_v19 }
  0xc9   : > { %v1447_v42 = vmul.f32 %v2851_v45, %v1433_v37  ;;  %v1446_v0 = vmul.f32 %v2851_v45, %v1432_v1  ;;  %v1427_v50 = vmul.f32 %v1402_v54, %v1370_v56  ;;  %v1426_v20 = vmul.f32 %v1397_v10, %v1369_v48 }
  0xca   : > { %v1374_v56 = vadd.f32 %v2813_v35, %v1349_v2  ;;  %v1373_v48 = vadd.f32 %v1365_v60, %v1348_v15  ;;  %v1242_v27 = vadd.f32 %v1234_v41, %v1045_v44 }
  0xcb   : > { %v1461_v21 = vadd.f32 %v1905_v36, %v1447_v42  ;;  %v1460_v62 = vadd.f32 %v1905_v36, %v1446_v0  ;;  %v1435_v33 = vadd.f32 %v1427_v50, %v1238_v7  ;;  %v1434_v46 = vadd.f32 %v1426_v20, %v1237_v53 }
  0xcc   : > { %v1412_v51 = vpop.permute.xlu1 %1411  ;;  %v1407_v30 = vpop.permute.xlu0 %1406 }
  0xcd   : > { %v1477_v29 = vmul.f32 0.70710677, %v1461_v21  ;;  %v1476_v14 = vmul.f32 0.70710677, %v1460_v62  ;;  %v1449_v52 = vmul.f32 %v2851_v45, %v1435_v33  ;;  %v1448_v5 = vmul.f32 %v2851_v45, %v1434_v46 }
  0xce   : > { %v1429_v26 = vmul.f32 %v1412_v51, %v2820_v17  ;;  %v1428_v47 = vmul.f32 %v1407_v30, %v2822_v25  ;;  %v1469_v10 = vmul.f32 0.5, %v1461_v21  ;;  %v1468_v50 = vmul.f32 0.5, %v1460_v62 }
  0xcf   : > { %2004 = verf.f32 %v1477_v29  ;;  %v1463_v35 = vadd.f32 %v1905_v36, %v1449_v52  ;;  %v1462_v60 = vadd.f32 %v1905_v36, %v1448_v5 }
  0xd0   : > { %2006 = verf.f32 %v1476_v14  ;;  %v1437_v59 = vadd.f32 %v1429_v26, %v1240_v57  ;;  %v1422_v2 = vpop.permute.xlu1 %1421  ;;  %v1417_v15 = vpop.permute.xlu0 %1416  ;;  %v1436_v40 = vadd.f32 %v1428_v47, %v1239_v18 }
  0xd1   : > { %v1431_v63 = vmul.f32 %v1422_v2, %v1374_v56  ;;  %v1430_v34 = vmul.f32 %v1417_v15, %v1373_v48  ;;  %v1479_v9 = vmul.f32 0.70710677, %v1463_v35  ;;  %v1478_v17 = vmul.f32 0.70710677, %v1462_v60 }
  0xd2   : > { %v1451_v25 = vmul.f32 %v2851_v45, %v1437_v59  ;;  %v1450_v58 = vmul.f32 %v2851_v45, %v1436_v40  ;;  %v1471_v23 = vmul.f32 0.5, %v1463_v35  ;;  %v1470_v38 = vmul.f32 0.5, %v1462_v60 }
  0xd3   : > { %v1439_v4 = vadd.f32 %v1431_v63, %v1242_v27  ;;  %v1438_v6 = vadd.f32 %v1430_v34, %v1241_v61  ;;  %2008 = verf.f32 %v1479_v9 }
  0xd4   : > { %2010 = verf.f32 %v1478_v17  ;;  %v1465_v22 = vadd.f32 %v1905_v36, %v1451_v25  ;;  %v1464_v24 = vadd.f32 %v1905_v36, %v1450_v58 }
  0xd5   : > { %v1453_v37 = vmul.f32 %v2851_v45, %v1439_v4  ;;  %v1452_v1 = vmul.f32 %v2851_v45, %v1438_v6 }
  0xd6   : > { %v1481_v3 = vmul.f32 0.70710677, %v1465_v22  ;;  %v1480_v7 = vmul.f32 0.70710677, %v1464_v24  ;;  %v1473_v55 = vmul.f32 0.5, %v1465_v22  ;;  %v1472_v16 = vmul.f32 0.5, %v1464_v24 }
  0xd7   : > { %v1467_v53 = vadd.f32 %v1905_v36, %v1453_v37  ;;  %v1466_v32 = vadd.f32 %v1905_v36, %v1452_v1 }
  0xd8   : > { %2012 = verf.f32 %v1481_v3 }
  0xd9   : > { %v2005_v8 = vpop.eup %2004  ;;  %2014 = verf.f32 %v1480_v7  ;;  %v1483_v0 = vmul.f32 0.70710677, %v1467_v53  ;;  %v1482_v39 = vmul.f32 0.70710677, %v1466_v32  ;;  %v1475_v57 = vmul.f32 0.5, %v1467_v53 }
  0xda   : > { %v2007_v54 = vpop.eup %2006  ;;  %v1493_v42 = vadd.f32 1.0, %v2005_v8  ;;  %v1474_v49 = vmul.f32 0.5, %v1466_v32 }
  0xdb   : > { %v1492_v20 = vadd.f32 1.0, %v2007_v54  ;;  %2016 = verf.f32 %v1483_v0 }
  0xdc   : > { %v1501_v43 = vmul.f32 %v1493_v42, %v1469_v10  ;;  %2018 = verf.f32 %v1482_v39 }
  0xdd   : > { %v1500_v28 = vmul.f32 %v1492_v20, %v1468_v50  ;;  %v2009_v45 = vpop.eup %2008 }
  0xde   : > { %1509 = vst [vmem:[%s2879_s26 + $0x8] sm:$0xff] %v1501_v43  ;;  %v2011_v36 = vpop.eup %2010  ;;  %v1495_v11 = vadd.f32 1.0, %v2009_v45 }
  0xdf   : > { %1508 = vst [vmem:[%s2879_s26] sm:$0xff] %v1500_v28  ;;  %v1494_v41 = vadd.f32 1.0, %v2011_v36 }
  0xe0   : > { %v1503_v21 = vmul.f32 %v1495_v11, %v1471_v23 }
  0xe1   : > { %v1502_v62 = vmul.f32 %v1494_v41, %v1470_v38 }
  0xe2   : > { %v2013_v33 = vpop.eup %2012  ;;  %1511 = vst [vmem:[%s2879_s26 + $0x18] sm:$0xff] %v1503_v21 }
  0xe3   : > { %v2015_v46 = vpop.eup %2014  ;;  %1510 = vst [vmem:[%s2879_s26 + $0x10] sm:$0xff] %v1502_v62  ;;  %v1497_v31 = vadd.f32 1.0, %v2013_v33 }
  0xe4   : > { %v1496_v44 = vadd.f32 1.0, %v2015_v46 }
  0xe5   : > { %v2017_v51 = vpop.eup %2016  ;;  %v1505_v30 = vmul.f32 %v1497_v31, %v1473_v55  ;;  %1522 = sbr.rel (!%p2163_p3) target bundleno = 246 (0xf6), region = 68 }
  0xe6   : > { %v2019_v56 = vpop.eup %2018  ;;  %v1504_v48 = vmul.f32 %v1496_v44, %v1472_v16  ;;  %v1499_v13 = vadd.f32 1.0, %v2017_v51 }
  0xe7   : > { %1513 = vst [vmem:[%s2879_s26 + $0x28] sm:$0xff] %v1505_v30  ;;  %v1498_v29 = vadd.f32 1.0, %v2019_v56 }
  0xe8   : > { %1512 = vst [vmem:[%s2879_s26 + $0x20] sm:$0xff] %v1504_v48  ;;  %v1507_v14 = vmul.f32 %v1499_v13, %v1475_v57 }
  0xe9   : > { %v1506_v52 = vmul.f32 %v1498_v29, %v1474_v49 }
  0xea   : > { %1515 = vst [vmem:[%s2879_s26 + $0x38] sm:$0xff] %v1507_v14 }
  0xeb   : > { %1514 = vst [vmem:[%s2879_s26 + $0x30] sm:$0xff] %v1506_v52 }
  0xec LB: >> { %v1612_v5 = vld [vmem:[%s2879_s26] sm:$0xff]  ;;  %v1614_v26 = vld [vmem:[%s2879_s26 + $0x8] sm:$0xff]  ;;  %v1616_v47 = vld [vmem:[%s2879_s26 + $0x10] sm:$0xff]  ;;  %s1606_s1 = sadd.s32 1, %s2082_s1   ;;  %s2082_s1 = sphi %s2080_s1, %s1606_s1   ;;  %s2078_s25 = sphi %s2076_s25, %s2077_s25  }
  0xed   : >> { %1613 = vst [vmem:[%s2078_s25] sm:$0xff] %v1612_v5  ;;  %1615 = vst [vmem:[%s2078_s25 + $0x8] sm:$0xff] %v1614_v26  ;;  %v1618_v18 = vld [vmem:[%s2879_s26 + $0x18] sm:$0xff]  ;;  %p1605_p9 = scmp.ge.s32.totalorder %s1606_s1, 1 }
  0xee   : >> { %1617 = vst [vmem:[%s2078_s25 + $0x10] sm:$0xff] %v1616_v47  ;;  %v1622_v12 = vld [vmem:[%s2879_s26 + $0x28] sm:$0xff]  ;;  %1619 = vst [vmem:[%s2078_s25 + $0x18] sm:$0xff] %v1618_v18 }
  0xef   : >> { %v1620_v27 = vld [vmem:[%s2879_s26 + $0x20] sm:$0xff]  ;;  %1623 = vst [vmem:[%s2078_s25 + $0x28] sm:$0xff] %v1622_v12  ;;  %1608 = sbr.rel (!%p1605_p9) target bundleno = 236 (0xec), region = 187 }
  0xf0   : >> { %1621 = vst [vmem:[%s2078_s25 + $0x20] sm:$0xff] %v1620_v27 }
  0xf1   : >> { %v1626_v35 = vld [vmem:[%s2879_s26 + $0x38] sm:$0xff] }
  0xf2   : >> { %v1624_v19 = vld [vmem:[%s2879_s26 + $0x30] sm:$0xff]  ;;  %1627 = vst [vmem:[%s2078_s25 + $0x38] sm:$0xff] %v1626_v35 }
  0xf3   : >> { %1625 = vst [vmem:[%s2078_s25 + $0x30] sm:$0xff] %v1624_v19  ;;  %s2077_s25 = smov %s1720_s24  }
  0xf6 PF: > { %s18_s29 = sadd.s32 1, %s2074_s29   ;;  %s2990_s26 = smov %s2062_s2 }
  0xf7   : > { %p15_p10 = scmp.ge.s32.totalorder %s18_s29, 4   ;;  %s2991_s2 = smov %s2172_s12 }
  0xf8   : > { %s2992_s27 = smov %s2070_s28  ;;  %s2993_s28 = smov %s2995_s30 }
  0xf9   :  { %17 = sbr.rel (!%p15_p10) target bundleno = 3 (0x3), region = 209 }

// kernel: multi_dwconv_forward.3
= control target key start
LH: loop header
LB: loop body
LE: loop exit
PB: predicated region body
PF: predicated region fallthrough
CT: control target
= control target key end

     0   :  { %s5045_s26 = smov 0   ;;  %s5047_s2 = smov 0   ;;  %s8394_s0 = inlined_call_operand.vmem [shape: f32[2,336,128], index: 0, kind: input, shape index: {}, may-alias: {0,1,2,7}]   ;;  %s8395_s1 = inlined_call_operand.vmem [shape: f32[2,336,128], index: 1, kind: input, shape index: {}, may-alias: {0,1,2,7}]   ;;  %s8396_s2 = inlined_call_operand.vmem [shape: f32[2,336,128], index: 2, kind: input, shape index: {}, may-alias: {0,1,2,7}]   ;;  %s8397_s3 = inlined_call_operand.vmem [shape: f32[5,128,1], index: 3, kind: input, shape index: {}]   ;;  %s8398_s4 = inlined_call_operand.vmem [shape: f32[25,1,128], index: 4, kind: input, shape index: {}]   ;;  %s8399_s5 = inlined_call_operand.vmem [shape: f32[1,128], index: 5, kind: input, shape index: {}]   ;;  %s8400_s6 = inlined_call_operand.vmem [shape: f32[1,128], index: 6, kind: input, shape index: {}]   ;;  %s8401_s7 = inlined_call_operand.vmem [shape: f32[2,336,128], index: 7, kind: input, shape index: {}, may-alias: {0,1,2,7}]   ;;  %s8402_s8 = inlined_call_operand.vmem [shape: f32[2,336,128], index: 8, kind: output, shape index: {}]  }
   0x1   :  { %s5049_s27 = smov 0   ;;  %s5051_s28 = smov 0  }
   0x2   :  { %s5053_s29 = smov 0  }
   0x3 LB: > { %s4539_s7 = sadd.s32 4294967295, %s4992_s29   ;;  %s30_s30 = sadd.s32 1, %s4988_s28  ;;  %s4992_s29 = sphi %s5053_s29, %s18_s29   ;;  %s4988_s28 = sphi %s5051_s28, %s8507_s28   ;;  %s4984_s27 = sphi %s5049_s27, %s8506_s27   ;;  %s4980_s2 = sphi %s5047_s2, %s8505_s2   ;;  %s4976_s26 = sphi %s5045_s26, %s8504_s26  }
   0x4   : > { %p32_p0 = scmp.ge.s32.totalorder %s30_s30, 2  ;;  %s223_s9 = sadd.s32 1, %s4980_s2 }
   0x5   : > { %p233_p1 = scmp.ne.s32.totalorder %s4980_s2, %s4976_s26  ;;  %p234_p2 = scmp.eq.s32.totalorder %s4539_s7, 1 }
   0x6   : > { %s8509_s30 = smov (%p32_p0, %s30_s30), 0  ;;  %p4543_p4 = scmp.ge.s32.totalorder %s4992_s29, 1 }
   0x7   : > { %p5077_p3 = por %p234_p2, %p233_p1  ;;  %s218_s11 = ssub.s32 %s4988_s28, %s8509_s30 }
   0x8   : > { %p349_p5 = scmp.lt.s32.totalorder %s4992_s29, 3  ;;  %p221_p6 = scmp.eq.s32.totalorder %s218_s11, 0 }
   0xa   : > { %p350_p7 = pnand %p4543_p4, %p349_p5 }
   0xb   : > { %s5086_s12 = scalar_select %p221_p6, %s4980_s2, %s223_s9  }
   0xc   : > { %353 = sbr.rel (%p350_p7) target bundleno = 575 (0x23f), region = 48 }
  0x13   : > { %v829_v0 = vld [vmem:[%s8397_s3 + $0x10] sm:$0xff]  ;;  %v827_v1 = vld [vmem:[%s8397_s3] sm:$0xff]  ;;  %v4998_v2 = vmov 0   ;;  %v4999_v3 = vmov 0.0   ;;  %v830_v4 = vld [vmem:[%s8397_s3 + $0x18] sm:$0xff]  ;;  %p427_p8 = scmp.lt.s32.totalorder %s4984_s27, 1 }
  0x14   : > { %4835 = vset.pattern.permute.xlu1 %v4998_v2  ;;  %4834 = vset.pattern.permute.xlu0 %v4998_v2  ;;  %568 = vst [vmem:[#allocation2 + $0x10] sm:$0xff] %v4999_v3  ;;  %569 = vst [vmem:[#allocation2 + $0x18] sm:$0xff] %v4999_v3  ;;  %v828_v5 = vld [vmem:[%s8397_s3 + $0x8] sm:$0xff]  ;;  %v831_v7 = vld [vmem:[%s8397_s3 + $0x20] sm:$0xff]  ;;  %s419_s16 = sand.u32 1, %s4976_s26   ;;  %s4759_s18 = smul.u32 (%p5077_p3), 336, %s4984_s27 }
  0x15   : > { %570 = vst [vmem:[#allocation2 + $0x20] sm:$0xff] %v4999_v3  ;;  %497 = vst [vmem:[#allocation2] sm:$0xff] %v4999_v3  ;;  %855 = vperm.xlu1 %4835, %v829_v0   ;;  %845 = vperm.xlu0 %4834, %v827_v1   ;;  %v832_v6 = vld [vmem:[%s8397_s3 + $0x28] sm:$0xff]  ;;  %s428_s25 = scalar_select %p427_p8, %s4984_s27, 1  ;;  %v834_v8 = vld [vmem:[%s8397_s3 + $0x38] sm:$0xff] }
  0x16   : > { %498 = vst [vmem:[#allocation2 + $0x148] sm:$0xff] %v4999_v3  ;;  %567 = vst [vmem:[#allocation2 + $0x8] sm:$0xff] %v4999_v3  ;;  %v833_v9 = vld [vmem:[%s8397_s3 + $0x30] sm:$0xff]  ;;  %v836_v10 = vld [vmem:[%s8397_s3 + $0x48] sm:$0xff]  ;;  %s6854_s26 = sshll.u32 %s419_s16, 8  ;;  %s8305_s21 = scalar_lea.vmem (%p5077_p3), %s8402_s8, %s4759_s18  }
  0x17   : > { %586 = vst [vmem:[#allocation2 + $0x128] sm:$0xff] %v4999_v3  ;;  %587 = vst [vmem:[#allocation2 + $0x130] sm:$0xff] %v4999_v3  ;;  %s4758_s13 = smul.u32 336, %s428_s25  ;;  %v835_v11 = vld [vmem:[%s8397_s3 + $0x40] sm:$0xff]  ;;  %v838_v12 = vld [vmem:[%s8397_s3 + $0x58] sm:$0xff]  ;;  %s6892_s7 = scalar_lea.vmem [#allocation3], %s6854_s26  }
  0x18   : > { %588 = vst [vmem:[#allocation2 + $0x138] sm:$0xff] %v4999_v3  ;;  %589 = vst [vmem:[#allocation2 + $0x140] sm:$0xff] %v4999_v3  ;;  %v837_v13 = vld [vmem:[%s8397_s3 + $0x50] sm:$0xff]  ;;  %v840_v14 = vld [vmem:[%s8397_s3 + $0x68] sm:$0xff]  ;;  %s8307_s22 = smov (%p5077_p3), 0  }
  0x19   : > { %860 = vperm.xlu1 %4835, %v830_v4   ;;  %850 = vperm.xlu0 %4834, %v828_v5   ;;  %s5123_s20 = scalar_lea.vmem %s8394_s0, %s4758_s13  ;;  %v839_v15 = vld [vmem:[%s8397_s3 + $0x60] sm:$0xff]  ;;  %v842_v26 = vld [vmem:[%s8397_s3 + $0x78] sm:$0xff]  ;;  %v841_v27 = vld [vmem:[%s8397_s3 + $0x70] sm:$0xff] }
  0x1a   : > { %v499_v16 = vld [vmem:[%s5123_s20] sm:$0xff]  ;;  %v500_v17 = vld [vmem:[%s5123_s20 + $0x8] sm:$0xff]  ;;  %v501_v18 = vld [vmem:[%s5123_s20 + $0x10] sm:$0xff] }
  0x1b   : > { %v502_v19 = vld [vmem:[%s5123_s20 + $0x18] sm:$0xff]  ;;  %v503_v20 = vld [vmem:[%s5123_s20 + $0x20] sm:$0xff]  ;;  %531 = vst [vmem:[#allocation2 + $0x28] sm:$0xff] %v499_v16  ;;  %532 = vst [vmem:[#allocation2 + $0x30] sm:$0xff] %v500_v17 }
  0x1c   : > { %v504_v21 = vld [vmem:[%s5123_s20 + $0x28] sm:$0xff]  ;;  %v505_v22 = vld [vmem:[%s5123_s20 + $0x30] sm:$0xff]  ;;  %533 = vst [vmem:[#allocation2 + $0x38] sm:$0xff] %v501_v18  ;;  %534 = vst [vmem:[#allocation2 + $0x40] sm:$0xff] %v502_v19 }
  0x1d   : > { %870 = vperm.xlu1 %4835, %v832_v6   ;;  %865 = vperm.xlu0 %4834, %v831_v7   ;;  %535 = vst [vmem:[#allocation2 + $0x48] sm:$0xff] %v503_v20  ;;  %v606_v23 = vld [vmem:[#allocation2 + $0x16] sm:$0xff]  ;;  %536 = vst [vmem:[#allocation2 + $0x50] sm:$0xff] %v504_v21  ;;  %v5147_v24 = vld [vmem:[%s8398_s4] ss:$0 sm:$0xff] }
  0x1e   : > { %537 = vst [vmem:[#allocation2 + $0x58] sm:$0xff] %v505_v22  ;;  %v5152_v25 = vld [vmem:[%s8398_s4 + $0x5] ss:$0 sm:$0xff]  ;;  %v5163_v28 = vld [vmem:[%s8398_s4 + $0xa] ss:$0 sm:$0xff]  ;;  %v506_v33 = vld [vmem:[%s5123_s20 + $0x38] sm:$0xff]  ;;  %v629_v41 = vmul.f32 %v5147_v24, %v606_v23 }
  0x1f   : > { %v604_v29 = vld [vmem:[#allocation2 + $0x6] sm:$0xff]  ;;  %v669_v30 = vmul.f32 %v5152_v25, %v606_v23  ;;  %v5169_v31 = vld [vmem:[%s8398_s4 + $0xf] ss:$0 sm:$0xff]  ;;  %v607_v34 = vld [vmem:[#allocation2 + $0x1e] sm:$0xff]  ;;  %538 = vst [vmem:[#allocation2 + $0x60] sm:$0xff] %v506_v33 }
  0x20   : > { %v627_v32 = vmul.f32 %v5147_v24, %v604_v29  ;;  %v605_v35 = vld [vmem:[#allocation2 + $0xe] sm:$0xff]  ;;  %v670_v37 = vmul.f32 %v5152_v25, %v607_v34  ;;  %v507_v38 = vld [vmem:[%s5123_s20 + $0x40] sm:$0xff]  ;;  %v630_v44 = vmul.f32 %v5147_v24, %v607_v34  ;;  %v510_v45 = vld [vmem:[%s5123_s20 + $0x58] sm:$0xff] }
  0x21   : > { %880 = vperm.xlu1 %4835, %v834_v8   ;;  %875 = vperm.xlu0 %4834, %v833_v9   ;;  %v628_v36 = vmul.f32 %v5147_v24, %v605_v35  ;;  %v508_v39 = vld [vmem:[%s5123_s20 + $0x48] sm:$0xff]  ;;  %v509_v40 = vld [vmem:[%s5123_s20 + $0x50] sm:$0xff]  ;;  %539 = vst [vmem:[#allocation2 + $0x68] sm:$0xff] %v507_v38  ;;  %v511_v46 = vld [vmem:[%s5123_s20 + $0x60] sm:$0xff] }
  0x22   : > { %v5182_v42 = vld [vmem:[%s8398_s4 + $0x14] ss:$0 sm:$0xff]  ;;  %v685_v43 = vadd.f32 %v669_v30, %v627_v32  ;;  %540 = vst [vmem:[#allocation2 + $0x70] sm:$0xff] %v508_v39  ;;  %541 = vst [vmem:[#allocation2 + $0x78] sm:$0xff] %v509_v40  ;;  %v512_v47 = vld [vmem:[%s5123_s20 + $0x68] sm:$0xff] }
  0x23   : > { %v4568_v48 = vld [vmem:[%s8397_s3 + $0x88] sm:$0xff]  ;;  %542 = vst [vmem:[#allocation2 + $0x80] sm:$0xff] %v510_v45  ;;  %543 = vst [vmem:[#allocation2 + $0x88] sm:$0xff] %v511_v46  ;;  %v513_v51 = vld [vmem:[%s5123_s20 + $0x70] sm:$0xff]  ;;  %v686_v62 = vadd.f32 %v670_v37, %v628_v36 }
  0x24   : > { %v608_v49 = vld [vmem:[#allocation2 + $0x26] sm:$0xff]  ;;  %v609_v50 = vld [vmem:[#allocation2 + $0x2e] sm:$0xff]  ;;  %544 = vst [vmem:[#allocation2 + $0x90] sm:$0xff] %v512_v47  ;;  %v5192_v52 = vld [vmem:[#allocation2 + $0x36] sm:$0xff] }
  0x25   : > { %890 = vperm.xlu1 %4835, %v836_v10   ;;  %885 = vperm.xlu0 %4834, %v835_v11   ;;  %v5194_v53 = vld [vmem:[#allocation2 + $0x46] sm:$0xff]  ;;  %v671_v54 = vmul.f32 %v5152_v25, %v608_v49  ;;  %v711_v55 = vmul.f32 %v5163_v28, %v608_v49  ;;  %v611_v56 = vld [vmem:[#allocation2 + $0x3e] sm:$0xff]  ;;  %v672_v57 = vmul.f32 %v5152_v25, %v609_v50  ;;  %v5206_v61 = vld [vmem:[#allocation2 + $0x4e] sm:$0xff] }
  0x26   : > { %545 = vst [vmem:[#allocation2 + $0x98] sm:$0xff] %v513_v51  ;;  %v4567_v58 = vld [vmem:[%s8397_s3 + $0x80] sm:$0xff]  ;;  %v713_v59 = vmul.f32 %v5163_v28, %v5192_v52  ;;  %v753_v60 = vmul.f32 %v5169_v31, %v5192_v52  ;;  %v514_v63 = vld [vmem:[%s5123_s20 + $0x78] sm:$0xff]  ;;  %v755_v1 = vmul.f32 %v5169_v31, %v5194_v53  ;;  %v516_v5 = vld [vmem:[%s5123_s20 + $0x88] sm:$0xff]  ;;  %v795_v8 = vmul.f32 %v5182_v42, %v5194_v53 }
  0x27   : > { %v687_v0 = vadd.f32 %v671_v54, %v629_v41  ;;  %v727_v2 = vadd.f32 %v711_v55, %v685_v43  ;;  %v688_v3 = vadd.f32 %v672_v57, %v630_v44  ;;  %546 = vst [vmem:[#allocation2 + $0xa0] sm:$0xff] %v514_v63  ;;  %v515_v4 = vld [vmem:[%s5123_s20 + $0x80] sm:$0xff]  ;;  %v517_v6 = vld [vmem:[%s5123_s20 + $0x90] sm:$0xff]  ;;  %v714_v9 = vmul.f32 %v5163_v28, %v611_v56  ;;  %v518_v11 = vld [vmem:[%s5123_s20 + $0x98] sm:$0xff] }
  0x28   : > { %v5214_v7 = vld [vmem:[#allocation2 + $0x56] sm:$0xff]  ;;  %v712_v10 = vmul.f32 %v5163_v28, %v609_v50  ;;  %547 = vst [vmem:[#allocation2 + $0xa8] sm:$0xff] %v515_v4  ;;  %548 = vst [vmem:[#allocation2 + $0xb0] sm:$0xff] %v516_v5  ;;  %v754_v20 = vmul.f32 %v5169_v31, %v611_v56  ;;  %v632_v21 = vmul.f32 %v5147_v24, %v609_v50  ;;  %v4572_v37 = vld [vmem:[%s8397_s3 + $0xa8] sm:$0xff] }
  0x29   : > { %900 = vperm.xlu1 %4835, %v838_v12   ;;  %895 = vperm.xlu0 %4834, %v837_v13   ;;  %549 = vst [vmem:[#allocation2 + $0xb8] sm:$0xff] %v517_v6  ;;  %v729_v12 = vadd.f32 %v713_v59, %v687_v0  ;;  %v769_v13 = vadd.f32 %v753_v60, %v727_v2  ;;  %550 = vst [vmem:[#allocation2 + $0xc0] sm:$0xff] %v518_v11  ;;  %v4570_v16 = vld [vmem:[%s8397_s3 + $0x98] sm:$0xff]  ;;  %v4569_v17 = vld [vmem:[%s8397_s3 + $0x90] sm:$0xff] }
  0x2a   : > { %v730_v18 = vadd.f32 %v714_v9, %v688_v3  ;;  %v728_v19 = vadd.f32 %v712_v10, %v686_v62  ;;  %v797_v23 = vmul.f32 %v5182_v42, %v5214_v7  ;;  %v796_v32 = vmul.f32 %v5182_v42, %v5206_v61  ;;  %v5244_v33 = vld [vmem:[#allocation2 + $0x6e] sm:$0xff]  ;;  %v4571_v38 = vld [vmem:[%s8397_s3 + $0xa0] sm:$0xff] }
  0x2b   : > { %v771_v22 = vadd.f32 %v755_v1, %v729_v12  ;;  %v5238_v29 = vadd.f32 %v795_v8, %v769_v13  ;;  %v631_v36 = vmul.f32 %v5147_v24, %v608_v49  ;;  %v673_v41 = vmul.f32 %v5152_v25, %v5192_v52  ;;  %v4573_v59 = vld [vmem:[%s8397_s3 + $0xb0] sm:$0xff]  ;;  %v5282_v62 = vld [vmem:[#allocation2 + $0x7e] sm:$0xff]  ;;  %v4576_v13 = vld [vmem:[%s8397_s3 + $0xc8] sm:$0xff] }
  0x2c   : > { %v770_v40 = vadd.f32 %v754_v20, %v728_v19  ;;  %v715_v43 = vmul.f32 %v5163_v28, %v5194_v53  ;;  %v800_v46 = vmul.f32 %v5182_v42, %v5244_v33  ;;  %v634_v47 = vmul.f32 %v5147_v24, %v611_v56  ;;  %v5304_v12 = vld [vmem:[#allocation2 + $0x76] sm:$0xff]  ;;  %v5314_v20 = vld [vmem:[#allocation2 + $0x8e] sm:$0xff] }
  0x2d   : > { %910 = vperm.xlu1 %4835, %v840_v14   ;;  %905 = vperm.xlu0 %4834, %v839_v15   ;;  %v5221_v14 = vld [vmem:[#allocation2 + $0x5e] sm:$0xff]  ;;  %v756_v15 = vmul.f32 %v5169_v31, %v5206_v61  ;;  %v5259_v44 = vadd.f32 %v797_v23, %v771_v22  ;;  %v689_v49 = vadd.f32 %v673_v41, %v631_v36 }
  0x2e   : > { %v798_v30 = vmul.f32 %v5182_v42, %v5221_v14  ;;  %v758_v35 = vmul.f32 %v5169_v31, %v5221_v14  ;;  %v757_v50 = vmul.f32 %v5169_v31, %v5214_v7  ;;  %v676_v51 = vmul.f32 %v5152_v25, %v5206_v61 }
  0x2f   : > { %v772_v39 = vadd.f32 %v756_v15, %v730_v18  ;;  %v718_v54 = vmul.f32 %v5163_v28, %v5221_v14  ;;  %v760_v57 = vmul.f32 %v5169_v31, %v5244_v33  ;;  %v731_v60 = vadd.f32 %v715_v43, %v689_v49  ;;  %v4575_v15 = vld [vmem:[%s8397_s3 + $0xc0] sm:$0xff] }
  0x30   : > { %v692_v63 = vadd.f32 %v676_v51, %v634_v47  ;;  %v675_v0 = vmul.f32 %v5152_v25, %v5194_v53  ;;  %v717_v1 = vmul.f32 %v5163_v28, %v5214_v7  ;;  %v636_v4 = vmul.f32 %v5147_v24, %v5206_v61 }
  0x31   : > { %920 = vperm.xlu1 %4835, %v842_v26   ;;  %915 = vperm.xlu0 %4834, %v841_v27   ;;  %v674_v26 = vmul.f32 %v5152_v25, %v611_v56  ;;  %v716_v27 = vmul.f32 %v5163_v28, %v5206_v61  ;;  %v633_v56 = vmul.f32 %v5147_v24, %v5192_v52 }
  0x32   : > { %v5288_v2 = vadd.f32 %v798_v30, %v772_v39  ;;  %v5290_v52 = vadd.f32 %v796_v32, %v770_v40  ;;  %v734_v5 = vadd.f32 %v718_v54, %v692_v63  ;;  %v678_v9 = vmul.f32 %v5152_v25, %v5221_v14  ;;  %v4577_v39 = vld [vmem:[%s8397_s3 + $0xd0] sm:$0xff]  ;;  %v702_v54 = vld [vmem:[#allocation2 + $0x9e] sm:$0xff] }
  0x33   : > { %v690_v34 = vadd.f32 %v674_v26, %v632_v21  ;;  %v691_v6 = vadd.f32 %v675_v0, %v633_v56  ;;  %v802_v11 = vmul.f32 %v5182_v42, %v5282_v62  ;;  %v720_v61 = vmul.f32 %v5163_v28, %v5244_v33  ;;  %v701_v0 = vld [vmem:[#allocation2 + $0x96] sm:$0xff] }
  0x34   : > { %v694_v19 = vadd.f32 %v678_v9, %v636_v4  ;;  %v762_v21 = vmul.f32 %v5169_v31, %v5282_v62  ;;  %v635_v22 = vmul.f32 %v5147_v24, %v5194_v53  ;;  %v677_v23 = vmul.f32 %v5152_v25, %v5214_v7 }
  0x35   : > { %1203 = vperm.xlu1 %4835, %v4568_v48   ;;  %1198 = vperm.xlu0 %4834, %v4567_v58   ;;  %v732_v45 = vadd.f32 %v716_v27, %v690_v34  ;;  %v5264_v48 = vld [vmem:[#allocation2 + $0x66] sm:$0xff]  ;;  %v4574_v58 = vld [vmem:[%s8397_s3 + $0xb8] sm:$0xff]  ;;  %v733_v18 = vadd.f32 %v717_v1, %v691_v6  ;;  %v801_v30 = vmul.f32 %v5182_v42, %v5304_v12 }
  0x36   : > { %v799_v3 = vmul.f32 %v5182_v42, %v5264_v48  ;;  %v759_v8 = vmul.f32 %v5169_v31, %v5264_v48  ;;  %v719_v26 = vmul.f32 %v5163_v28, %v5264_v48  ;;  %v736_v32 = vadd.f32 %v720_v61, %v694_v19  ;;  %v4582_v19 = vld [vmem:[%s8397_s3 + $0xf8] sm:$0xff] }
  0x37   : > { %v774_v55 = vadd.f32 %v758_v35, %v732_v45  ;;  %v761_v34 = vmul.f32 %v5169_v31, %v5304_v12  ;;  %v5328_v35 = vld [vmem:[#allocation2 + $0x86] sm:$0xff]  ;;  %v693_v36 = vadd.f32 %v677_v23, %v635_v22  ;;  %v638_v53 = vmul.f32 %v5147_v24, %v5221_v14 }
  0x38   : > { %v775_v27 = vadd.f32 %v759_v8, %v733_v18  ;;  %v804_v43 = vmul.f32 %v5182_v42, %v5314_v20  ;;  %v722_v14 = vmul.f32 %v5163_v28, %v5282_v62  ;;  %v778_v45 = vadd.f32 %v762_v21, %v736_v32 }
  0x39   : > { %1213 = vperm.xlu1 %4835, %v4570_v16   ;;  %1208 = vperm.xlu0 %4834, %v4569_v17   ;;  %v5300_v10 = vadd.f32 %v800_v46, %v774_v55  ;;  %v773_v16 = vadd.f32 %v757_v50, %v731_v60  ;;  %v776_v17 = vadd.f32 %v760_v57, %v734_v5  ;;  %v4579_v60 = vld [vmem:[%s8397_s3 + $0xe0] sm:$0xff] }
  0x3a   : > { %v735_v46 = vadd.f32 %v719_v26, %v693_v36  ;;  %v637_v49 = vmul.f32 %v5147_v24, %v5214_v7  ;;  %v5350_v50 = vadd.f32 %v801_v30, %v775_v27  ;;  %v803_v51 = vmul.f32 %v5182_v42, %v5328_v35  ;;  %v4580_v7 = vld [vmem:[%s8397_s3 + $0xe8] sm:$0xff] }
  0x3b   : > { %v5340_v40 = vadd.f32 %v799_v3, %v773_v16  ;;  %v5342_v41 = vadd.f32 %v802_v11, %v776_v17  ;;  %v679_v55 = vmul.f32 %v5152_v25, %v5264_v48  ;;  %v721_v57 = vmul.f32 %v5163_v28, %v5304_v12  ;;  %v743_v30 = vld [vmem:[#allocation2 + $0xa6] sm:$0xff] }
  0x3c   : > { %v777_v56 = vadd.f32 %v761_v34, %v735_v46  ;;  %v640_v1 = vmul.f32 %v5147_v24, %v5244_v33  ;;  %v682_v3 = vmul.f32 %v5152_v25, %v5282_v62  ;;  %v724_v4 = vmul.f32 %v5163_v28, %v5314_v20  ;;  %v786_v46 = vld [vmem:[#allocation2 + $0xbe] sm:$0xff] }
  0x3d   : > { %1223 = vperm.xlu1 %4835, %v4572_v37   ;;  %1218 = vperm.xlu0 %4834, %v4571_v38   ;;  %v680_v37 = vmul.f32 %v5152_v25, %v5244_v33  ;;  %v4578_v38 = vld [vmem:[%s8397_s3 + $0xd8] sm:$0xff]  ;;  %v695_v63 = vadd.f32 %v679_v55, %v637_v49  ;;  %v5372_v5 = vadd.f32 %v804_v43, %v778_v45  ;;  %v4604_v55 = vld [vmem:[%s8397_s3 + $0x188] sm:$0xff] }
  0x3e   : > { %v806_v6 = vmul.f32 %v5182_v42, %v702_v54  ;;  %v763_v8 = vmul.f32 %v5169_v31, %v5328_v35  ;;  %v766_v9 = vmul.f32 %v5169_v31, %v702_v54  ;;  %v698_v61 = vadd.f32 %v682_v3, %v640_v1  ;;  %v5434_v1 = vld [vmem:[#allocation2 + $0x27] sm:$0xff] }
  0x3f   : > { %v696_v47 = vadd.f32 %v680_v37, %v638_v53  ;;  %v737_v11 = vadd.f32 %v721_v57, %v695_v63  ;;  %v639_v33 = vmul.f32 %v5147_v24, %v5264_v48  ;;  %v5382_v16 = vadd.f32 %v803_v51, %v777_v56  ;;  %v4581_v48 = vld [vmem:[%s8397_s3 + $0xf0] sm:$0xff]  ;;  %v5403_v53 = vld [vmem:[%s8398_s4 + $0x1] ss:$0 sm:$0xff] }
  0x40   : > { %v805_v17 = vmul.f32 %v5182_v42, %v701_v0  ;;  %v723_v18 = vmul.f32 %v5163_v28, %v5328_v35  ;;  %v740_v22 = vadd.f32 %v724_v4, %v698_v61  ;;  %v765_v26 = vmul.f32 %v5169_v31, %v701_v0  ;;  %v958_v51 = vld [vmem:[#allocation2 + $0x1f] sm:$0xff]  ;;  %v957_v63 = vld [vmem:[#allocation2 + $0x17] sm:$0xff] }
  0x41   : > { %1233 = vperm.xlu1 %4835, %v4574_v58   ;;  %1228 = vperm.xlu0 %4834, %v4573_v59   ;;  %v738_v58 = vadd.f32 %v722_v14, %v696_v47  ;;  %v764_v59 = vmul.f32 %v5169_v31, %v5314_v20  ;;  %v642_v32 = vmul.f32 %v5147_v24, %v5282_v62  ;;  %v5409_v14 = vld [vmem:[%s8398_s4 + $0x6] ss:$0 sm:$0xff]  ;;  %v5414_v62 = vld [vmem:[%s8398_s4 + $0xb] ss:$0 sm:$0xff] }
  0x42   : > { %v684_v34 = vmul.f32 %v5152_v25, %v5314_v20  ;;  %v726_v36 = vmul.f32 %v5163_v28, %v702_v54  ;;  %v779_v37 = vadd.f32 %v763_v8, %v737_v11  ;;  %v956_v20 = vld [vmem:[#allocation2 + $0xf] sm:$0xff]  ;;  %v641_v47 = vmul.f32 %v5147_v24, %v5304_v12  ;;  %v4603_v57 = vld [vmem:[%s8397_s3 + $0x180] sm:$0xff] }
  0x43   : > { %v780_v21 = vadd.f32 %v764_v59, %v738_v58  ;;  %v683_v49 = vmul.f32 %v5152_v25, %v5328_v35  ;;  %v5420_v54 = vld [vmem:[#allocation2 + $0x2f] sm:$0xff]  ;;  %v807_v59 = vmul.f32 %v5182_v42, %v743_v30  ;;  %v725_v24 = vmul.f32 %v5163_v28, %v701_v0  ;;  %v5444_v28 = vld [vmem:[#allocation2 + $0x3f] sm:$0xff] }
  0x44   : > { %v700_v45 = vadd.f32 %v684_v34, %v642_v32  ;;  %v767_v35 = vmul.f32 %v5169_v31, %v743_v30  ;;  %v5436_v3 = vadd.f32 %v805_v17, %v779_v37  ;;  %v810_v4 = vmul.f32 %v5182_v42, %v786_v46  ;;  %v5442_v8 = vld [vmem:[%s8398_s4 + $0x10] ss:$0 sm:$0xff]  ;;  %v5473_v30 = vld [vmem:[#allocation2 + $0x37] sm:$0xff]  ;;  %v5475_v34 = vld [vmem:[#allocation2 + $0x47] sm:$0xff] }
  0x45   : > { %1243 = vperm.xlu1 %4835, %v4576_v13   ;;  %1238 = vperm.xlu0 %4834, %v4575_v15   ;;  %v744_v13 = vld [vmem:[#allocation2 + $0xae] sm:$0xff]  ;;  %v681_v15 = vmul.f32 %v5152_v25, %v5304_v12  ;;  %v5428_v56 = vadd.f32 %v806_v6, %v780_v21  ;;  %v699_v25 = vadd.f32 %v683_v49, %v641_v47  ;;  %v785_v6 = vld [vmem:[#allocation2 + $0xb6] sm:$0xff] }
  0x46   : > { %v808_v27 = vmul.f32 %v5182_v42, %v744_v13  ;;  %v768_v43 = vmul.f32 %v5169_v31, %v744_v13  ;;  %v742_v12 = vadd.f32 %v726_v36, %v700_v45  ;;  %v1022_v31 = vmul.f32 %v5409_v14, %v958_v51  ;;  %v5462_v17 = vld [vmem:[#allocation2 + $0x4f] sm:$0xff]  ;;  %v4607_v45 = vld [vmem:[%s8397_s3 + $0x1a0] sm:$0xff] }
  0x47   : > { %v697_v23 = vadd.f32 %v681_v15, %v639_v33  ;;  %v1064_v0 = vmul.f32 %v5414_v62, %v5420_v54  ;;  %v741_v13 = vadd.f32 %v725_v24, %v699_v25  ;;  %v4605_v33 = vld [vmem:[%s8397_s3 + $0x190] sm:$0xff]  ;;  %v1063_v21 = vmul.f32 %v5414_v62, %v5434_v1 }
  0x48   : > { %v784_v61 = vadd.f32 %v768_v43, %v742_v12  ;;  %v5460_v15 = vld [vmem:[%s8398_s4 + $0x15] ss:$0 sm:$0xff]  ;;  %v982_v37 = vmul.f32 %v5403_v53, %v958_v51  ;;  %v1066_v43 = vmul.f32 %v5414_v62, %v5444_v28  ;;  %v1105_v47 = vmul.f32 %v5442_v8, %v5473_v30 }
  0x49   : > { %1253 = vperm.xlu1 %4835, %v4578_v38   ;;  %1248 = vperm.xlu0 %4834, %v4577_v39   ;;  %v782_v38 = vadd.f32 %v766_v9, %v740_v22  ;;  %v739_v39 = vadd.f32 %v723_v18, %v697_v23  ;;  %v4606_v9 = vld [vmem:[%s8397_s3 + $0x198] sm:$0xff]  ;;  %v783_v23 = vadd.f32 %v767_v35, %v741_v13 }
  0x4a   : > { %v1108_v51 = vmul.f32 %v5442_v8, %v5462_v17  ;;  %v1065_v24 = vmul.f32 %v5414_v62, %v5473_v30 }
  0x4b   : > { %v781_v58 = vadd.f32 %v765_v26, %v739_v39  ;;  %v5452_v11 = vadd.f32 %v808_v27, %v782_v38  ;;  %v809_v26 = vmul.f32 %v5182_v42, %v785_v6  ;;  %v1106_v27 = vmul.f32 %v5442_v8, %v5444_v28 }
  0x4c   : > { %v1024_v38 = vmul.f32 %v5409_v14, %v5420_v54  ;;  %v5480_v39 = vadd.f32 %v810_v4, %v784_v61  ;;  %v1148_v42 = vmul.f32 %v5460_v15, %v5462_v17  ;;  %v1026_v6 = vmul.f32 %v5409_v14, %v5444_v28 }
  0x4d   : > { %1263 = vperm.xlu1 %4835, %v4580_v7   ;;  %1258 = vperm.xlu0 %4834, %v4579_v60   ;;  %v980_v7 = vmul.f32 %v5403_v53, %v956_v20  ;;  %v955_v60 = vld [vmem:[#allocation2 + $0x7] sm:$0xff]  ;;  %8404 = vst [vmem:[#allocation4_spill] sm:$0xff] %v5452_v11  ;;  %v5468_v22 = vadd.f32 %v807_v59, %v781_v58 }
  0x4e   : > { %8406 = vst [vmem:[#allocation6_spill] sm:$0xff] %v5480_v39  ;;  %v4608_v20 = vld [vmem:[%s8397_s3 + $0x1a8] sm:$0xff]  ;;  %v1040_v49 = vadd.f32 %v1024_v38, %v982_v37  ;;  %v981_v58 = vmul.f32 %v5403_v53, %v957_v63  ;;  %v1023_v59 = vmul.f32 %v5409_v14, %v5434_v1  ;;  %v5505_v12 = vadd.f32 %v809_v26, %v783_v23 }
  0x4f   : > { %v1038_v18 = vadd.f32 %v1022_v31, %v980_v7  ;;  %8405 = vst [vmem:[#allocation5_spill] sm:$0xff] %v5468_v22  ;;  %v1107_v7 = vmul.f32 %v5442_v8, %v5475_v34  ;;  %v4610_v31 = vld [vmem:[%s8397_s3 + $0x1b8] sm:$0xff]  ;;  %v5533_v26 = vld [vmem:[#allocation2 + $0x6f] sm:$0xff] }
  0x50   : > { %8407 = vst [vmem:[#allocation7_spill] sm:$0xff] %v5505_v12  ;;  %v1082_v35 = vadd.f32 %v1066_v43, %v1040_v49  ;;  %v1039_v4 = vadd.f32 %v1023_v59, %v981_v58  ;;  %v4612_v38 = vld [vmem:[%s8397_s3 + $0x1c8] sm:$0xff]  ;;  %v1152_v59 = vmul.f32 %v5460_v15, %v5533_v26 }
  0x51   : > { %1273 = vperm.xlu1 %4835, %v4582_v19   ;;  %1268 = vperm.xlu0 %4834, %v4581_v48   ;;  %v979_v19 = vmul.f32 %v5403_v53, %v955_v60  ;;  %v1021_v48 = vmul.f32 %v5409_v14, %v957_v63  ;;  %v1080_v32 = vadd.f32 %v1064_v0, %v1038_v18  ;;  %v5509_v60 = vld [vmem:[#allocation2 + $0x57] sm:$0xff]  ;;  %v5547_v43 = vld [vmem:[#allocation2 + $0x67] sm:$0xff] }
  0x52   : > { %v984_v63 = vmul.f32 %v5403_v53, %v5420_v54  ;;  %v4609_v0 = vld [vmem:[%s8397_s3 + $0x1b0] sm:$0xff]  ;;  %v1124_v61 = vadd.f32 %v1108_v51, %v1082_v35  ;;  %v1081_v54 = vadd.f32 %v1065_v24, %v1039_v4  ;;  %v1149_v23 = vmul.f32 %v5460_v15, %v5509_v60  ;;  %v5569_v4 = vld [vmem:[#allocation2 + $0x7f] sm:$0xff] }
  0x53   : > { %v1037_v36 = vadd.f32 %v1021_v48, %v979_v19  ;;  %v1122_v25 = vadd.f32 %v1106_v27, %v1080_v32  ;;  %v983_v48 = vmul.f32 %v5403_v53, %v5434_v1  ;;  %v1025_v27 = vmul.f32 %v5409_v14, %v5473_v30 }
  0x54   : > { %v1042_v18 = vadd.f32 %v1026_v6, %v984_v63  ;;  %v1067_v32 = vmul.f32 %v5414_v62, %v5475_v34  ;;  %v1109_v1 = vmul.f32 %v5442_v8, %v5509_v60  ;;  %v1027_v35 = vmul.f32 %v5409_v14, %v5475_v34  ;;  %v4614_v6 = vld [vmem:[%s8397_s3 + $0x1d8] sm:$0xff] }
  0x55   : > { %1796 = vperm.xlu1 %4835, %v4604_v55   ;;  %1791 = vperm.xlu0 %4834, %v4603_v57   ;;  %v1079_v46 = vadd.f32 %v1063_v21, %v1037_v36  ;;  %v1147_v55 = vmul.f32 %v5460_v15, %v5475_v34  ;;  %v5498_v57 = vld [vmem:[#allocation2 + $0x5f] sm:$0xff]  ;;  %v5529_v21 = vadd.f32 %v1148_v42, %v1122_v25 }
  0x56   : > { %v1150_v13 = vmul.f32 %v5460_v15, %v5498_v57  ;;  %v1110_v19 = vmul.f32 %v5442_v8, %v5498_v57  ;;  %v1123_v36 = vadd.f32 %v1107_v7, %v1081_v54  ;;  %v4611_v42 = vld [vmem:[%s8397_s3 + $0x1c0] sm:$0xff]  ;;  %v1069_v63 = vmul.f32 %v5414_v62, %v5509_v60 }
  0x57   : > { %8408 = vst [vmem:[#allocation8_spill] sm:$0xff] %v5529_v21  ;;  %v1111_v54 = vmul.f32 %v5442_v8, %v5547_v43 }
  0x58   : > { %v5557_v51 = vadd.f32 %v1150_v13, %v1124_v61  ;;  %v5565_v7 = vadd.f32 %v1149_v23, %v1123_v36  ;;  %v519_v13 = vld [vmem:[%s5123_s20 + $0xa0] sm:$0xff]  ;;  %v1114_v36 = vmul.f32 %v5442_v8, %v5569_v4 }
  0x59   : > { %1806 = vperm.xlu1 %4835, %v4606_v9   ;;  %1801 = vperm.xlu0 %4834, %v4605_v33   ;;  %v1121_v9 = vadd.f32 %v1105_v47, %v1079_v46  ;;  %v1068_v33 = vmul.f32 %v5414_v62, %v5462_v17  ;;  %v1028_v46 = vmul.f32 %v5409_v14, %v5462_v17 }
  0x5a   : > { %v1070_v47 = vmul.f32 %v5414_v62, %v5498_v57  ;;  %8410 = vst [vmem:[#allocation10_spill] sm:$0xff] %v5557_v51  ;;  %8411 = vst [vmem:[#allocation11_spill] sm:$0xff] %v5565_v7 }
  0x5b   : > { %v1084_v37 = vadd.f32 %v1068_v33, %v1042_v18  ;;  %v5555_v49 = vadd.f32 %v1147_v55, %v1121_v9  ;;  %v1151_v55 = vmul.f32 %v5460_v15, %v5547_v43  ;;  %v1112_v9 = vmul.f32 %v5442_v8, %v5533_v26  ;;  %v5582_v33 = vld [vmem:[#allocation2 + $0x77] sm:$0xff]  ;;  %551 = vst [vmem:[#allocation2 + $0xc8] sm:$0xff] %v519_v13  ;;  %v1054_v13 = vld [vmem:[#allocation2 + $0x9f] sm:$0xff] }
  0x5c   : > { %v988_v18 = vmul.f32 %v5403_v53, %v5462_v17 }
  0x5d   : > { %1816 = vperm.xlu1 %4835, %v4608_v20   ;;  %1811 = vperm.xlu0 %4834, %v4607_v45   ;;  %v1041_v20 = vadd.f32 %v1025_v27, %v983_v48  ;;  %v986_v45 = vmul.f32 %v5403_v53, %v5444_v28  ;;  %8409 = vst [vmem:[#allocation9_spill] sm:$0xff] %v5555_v49 }
  0x5e   : > { %v1126_v58 = vadd.f32 %v1110_v19, %v1084_v37  ;;  %v985_v28 = vmul.f32 %v5403_v53, %v5473_v30  ;;  %v4613_v30 = vld [vmem:[%s8397_s3 + $0x1d0] sm:$0xff]  ;;  %v1030_v19 = vmul.f32 %v5409_v14, %v5498_v57  ;;  %v1072_v48 = vmul.f32 %v5414_v62, %v5533_v26 }
  0x5f   : > { %v1083_v24 = vadd.f32 %v1067_v32, %v1041_v20  ;;  %v1044_v25 = vadd.f32 %v1028_v46, %v986_v45  ;;  %v1154_v27 = vmul.f32 %v5460_v15, %v5569_v4  ;;  %v5598_v37 = vld [vmem:[#allocation2 + $0x8f] sm:$0xff]  ;;  %v4615_v20 = vld [vmem:[%s8397_s3 + $0x1e0] sm:$0xff] }
  0x60   : > { %v1043_v61 = vadd.f32 %v1027_v35, %v985_v28  ;;  %v5592_v23 = vadd.f32 %v1152_v59, %v1126_v58  ;;  %v1046_v17 = vadd.f32 %v1030_v19, %v988_v18  ;;  %v1156_v28 = vmul.f32 %v5460_v15, %v5598_v37  ;;  %v5620_v35 = vld [vmem:[#allocation2 + $0x87] sm:$0xff] }
  0x61   : > { %1826 = vperm.xlu1 %4835, %v4610_v31   ;;  %1821 = vperm.xlu0 %4834, %v4609_v0   ;;  %v1125_v31 = vadd.f32 %v1109_v1, %v1083_v24  ;;  %v1086_v0 = vadd.f32 %v1070_v47, %v1044_v25  ;;  %v987_v1 = vmul.f32 %v5403_v53, %v5475_v34 }
  0x62   : > { %8412 = vst [vmem:[#allocation12_spill] sm:$0xff] %v5592_v23  ;;  %v1085_v32 = vadd.f32 %v1069_v63, %v1043_v61  ;;  %v1153_v47 = vmul.f32 %v5460_v15, %v5582_v33  ;;  %v1071_v34 = vmul.f32 %v5414_v62, %v5547_v43  ;;  %v1088_v59 = vadd.f32 %v1072_v48, %v1046_v17  ;;  %v5804_v23 = vld [vmem:[#allocation2 + $0x51] sm:$0xff] }
  0x63   : > { %v5610_v45 = vadd.f32 %v1151_v55, %v1125_v31  ;;  %v1128_v46 = vadd.f32 %v1112_v9, %v1086_v0  ;;  %v990_v25 = vmul.f32 %v5403_v53, %v5498_v57  ;;  %v1113_v55 = vmul.f32 %v5442_v8, %v5582_v33  ;;  %v4618_v0 = vld [vmem:[%s8397_s3 + $0x1f8] sm:$0xff]  ;;  %v4617_v9 = vld [vmem:[%s8397_s3 + $0x1f0] sm:$0xff] }
  0x64   : > { %v1127_v58 = vadd.f32 %v1111_v54, %v1085_v32  ;;  %v1032_v63 = vmul.f32 %v5409_v14, %v5533_v26  ;;  %v1116_v57 = vmul.f32 %v5442_v8, %v5598_v37  ;;  %v989_v54 = vmul.f32 %v5403_v53, %v5509_v60 }
  0x65   : > { %1836 = vperm.xlu1 %4835, %v4612_v38   ;;  %1831 = vperm.xlu0 %4834, %v4611_v42   ;;  %v1029_v38 = vmul.f32 %v5409_v14, %v5509_v60  ;;  %v4616_v42 = vld [vmem:[%s8397_s3 + $0x1e8] sm:$0xff]  ;;  %8413 = vst [vmem:[#allocation13_spill] sm:$0xff] %v5610_v45  ;;  %v1031_v18 = vmul.f32 %v5409_v14, %v5547_v43 }
  0x66   : > { %v1048_v61 = vadd.f32 %v1032_v63, %v990_v25  ;;  %v1073_v19 = vmul.f32 %v5414_v62, %v5582_v33  ;;  %v5642_v48 = vadd.f32 %v1154_v27, %v1128_v46  ;;  %v5644_v32 = vadd.f32 %v1153_v47, %v1127_v58  ;;  %v1053_v46 = vld [vmem:[#allocation2 + $0x97] sm:$0xff] }
  0x67   : > { %v1045_v24 = vadd.f32 %v1029_v38, %v987_v1  ;;  %v1115_v17 = vmul.f32 %v5442_v8, %v5620_v35  ;;  %v1047_v38 = vadd.f32 %v1031_v18, %v989_v54  ;;  %v992_v60 = vmul.f32 %v5403_v53, %v5533_v26  ;;  %v4629_v26 = vld [vmem:[%s8397_s3 + $0x200] sm:$0xff] }
  0x68   : > { %8414 = vst [vmem:[#allocation14_spill] sm:$0xff] %v5642_v48  ;;  %8415 = vst [vmem:[#allocation15_spill] sm:$0xff] %v5644_v32  ;;  %v1076_v47 = vmul.f32 %v5414_v62, %v5598_v37  ;;  %v1118_v63 = vmul.f32 %v5442_v8, %v1054_v13  ;;  %v994_v18 = vmul.f32 %v5403_v53, %v5569_v4  ;;  %v1550_v32 = vld [vmem:[#allocation2 + $0x19] sm:$0xff] }
  0x69   : > { %1846 = vperm.xlu1 %4835, %v4614_v6   ;;  %1841 = vperm.xlu0 %4834, %v4613_v30   ;;  %v1074_v6 = vmul.f32 %v5414_v62, %v5569_v4  ;;  %v1130_v30 = vadd.f32 %v1114_v36, %v1088_v59  ;;  %v1087_v31 = vadd.f32 %v1071_v34, %v1045_v24  ;;  %v4630_v34 = vld [vmem:[%s8397_s3 + $0x208] sm:$0xff] }
  0x6a   : > { %v1155_v36 = vmul.f32 %v5460_v15, %v5620_v35  ;;  %v1089_v24 = vadd.f32 %v1073_v19, %v1047_v38  ;;  %v1036_v19 = vmul.f32 %v5409_v14, %v5598_v37 }
  0x6b   : > { %v1090_v1 = vadd.f32 %v1074_v6, %v1048_v61  ;;  %v5654_v27 = vadd.f32 %v1156_v28, %v1130_v30  ;;  %v1129_v58 = vadd.f32 %v1113_v55, %v1087_v31  ;;  %v1096_v28 = vld [vmem:[#allocation2 + $0xaf] sm:$0xff]  ;;  %v991_v6 = vmul.f32 %v5403_v53, %v5547_v43  ;;  %v4632_v31 = vld [vmem:[%s8397_s3 + $0x218] sm:$0xff]  ;;  %v1095_v43 = vld [vmem:[#allocation2 + $0xa7] sm:$0xff] }
  0x6c   : > { %v1033_v30 = vmul.f32 %v5409_v14, %v5582_v33  ;;  %v1157_v61 = vmul.f32 %v5460_v15, %v1053_v46  ;;  %v1117_v55 = vmul.f32 %v5442_v8, %v1053_v46 }
  0x6d   : > { %1856 = vperm.xlu1 %4835, %v4616_v42   ;;  %1851 = vperm.xlu0 %4834, %v4615_v20   ;;  %v1034_v42 = vmul.f32 %v5409_v14, %v5569_v4  ;;  %8416 = vst [vmem:[#allocation16_spill] sm:$0xff] %v5654_v27  ;;  %v1158_v20 = vmul.f32 %v5460_v15, %v1054_v13  ;;  %v5698_v4 = vld [vmem:[%s8398_s4 + $0x7] ss:$0 sm:$0xff] }
  0x6e   : > { %v1132_v59 = vadd.f32 %v1116_v57, %v1090_v1  ;;  %v1049_v57 = vadd.f32 %v1033_v30, %v991_v6  ;;  %v5684_v1 = vadd.f32 %v1155_v36, %v1129_v58  ;;  %v1052_v36 = vadd.f32 %v1036_v19, %v994_v18  ;;  %v5712_v58 = vld [vmem:[#allocation2 + $0x30] sm:$0xff]  ;;  %v5729_v30 = vld [vmem:[%s8398_s4 + $0x3] ss:$0 sm:$0xff]  ;;  %v5744_v18 = vld [vmem:[%s8398_s4 + $0xd] ss:$0 sm:$0xff] }
  0x6f   : > { %v1050_v25 = vadd.f32 %v1034_v42, %v992_v60  ;;  %v1160_v60 = vmul.f32 %v5460_v15, %v1096_v28  ;;  %v1078_v42 = vmul.f32 %v5414_v62, %v1054_v13  ;;  %v5705_v13 = vld [vmem:[%s8398_s4 + $0xc] ss:$0 sm:$0xff]  ;;  %v1077_v6 = vmul.f32 %v5414_v62, %v1053_v46  ;;  %v1137_v46 = vld [vmem:[#allocation2 + $0xb7] sm:$0xff] }
  0x70   : > { %8417 = vst [vmem:[#allocation17_spill] sm:$0xff] %v5684_v1  ;;  %v5686_v38 = vadd.f32 %v1158_v20, %v1132_v59  ;;  %v993_v20 = vmul.f32 %v5403_v53, %v5582_v33  ;;  %v4634_v59 = vld [vmem:[%s8397_s3 + $0x228] sm:$0xff]  ;;  %v4633_v53 = vld [vmem:[%s8397_s3 + $0x220] sm:$0xff]  ;;  %v5752_v19 = vld [vmem:[#allocation2 + $0x31] sm:$0xff]  ;;  %v1161_v27 = vmul.f32 %v5460_v15, %v1137_v46 }
  0x71   : > { %1866 = vperm.xlu1 %4835, %v4618_v0   ;;  %1861 = vperm.xlu0 %4834, %v4617_v9   ;;  %v1075_v0 = vmul.f32 %v5414_v62, %v5620_v35  ;;  %v1131_v9 = vadd.f32 %v1115_v17, %v1089_v24  ;;  %v1092_v54 = vadd.f32 %v1076_v47, %v1050_v25  ;;  %v4631_v17 = vld [vmem:[%s8397_s3 + $0x210] sm:$0xff]  ;;  %v5693_v47 = vld [vmem:[%s8398_s4 + $0x2] ss:$0 sm:$0xff] }
  0x72   : > { %8418 = vst [vmem:[#allocation18_spill] sm:$0xff] %v5686_v38  ;;  %v1159_v24 = vmul.f32 %v5460_v15, %v1095_v43  ;;  %v1138_v25 = vld [vmem:[#allocation2 + $0xbf] sm:$0xff]  ;;  %v1548_v38 = vld [vmem:[#allocation2 + $0x9] sm:$0xff]  ;;  %v5800_v46 = vld [vmem:[%s8398_s4 + $0x17] ss:$0 sm:$0xff]  ;;  %v1577_v39 = vmul.f32 %v5729_v30, %v5752_v19 }
  0x73   : > { %v1134_v37 = vadd.f32 %v1118_v63, %v1092_v54  ;;  %v5720_v33 = vadd.f32 %v1157_v61, %v1131_v9  ;;  %v1035_v63 = vmul.f32 %v5409_v14, %v5620_v35  ;;  %v1094_v9 = vadd.f32 %v1078_v42, %v1052_v36  ;;  %v1549_v14 = vld [vmem:[#allocation2 + $0x11] sm:$0xff]  ;;  %v5739_v62 = vld [vmem:[#allocation2 + $0x21] sm:$0xff] }
  0x74   : > { %v1120_v61 = vmul.f32 %v5442_v8, %v1096_v28  ;;  %v1375_v28 = vmul.f32 0.0, %v5698_v4  ;;  %v1162_v42 = vmul.f32 %v5460_v15, %v1138_v25  ;;  %v5761_v36 = vld [vmem:[%s8398_s4 + $0x16] ss:$0 sm:$0xff] }
  0x75   : > { %2149 = vperm.xlu1 %4835, %v4630_v34   ;;  %2144 = vperm.xlu0 %4834, %v4629_v26   ;;  %v1091_v34 = vadd.f32 %v1075_v0, %v1049_v57  ;;  %v5710_v26 = vld [vmem:[%s8398_s4 + $0x11] ss:$0 sm:$0xff]  ;;  %8419 = vst [vmem:[#allocation19_spill] sm:$0xff] %v5720_v33  ;;  %v5731_v0 = vld [vmem:[#allocation2 + $0x40] sm:$0xff]  ;;  %v5737_v57 = vld [vmem:[%s8398_s4 + $0x8] ss:$0 sm:$0xff]  ;;  %v1051_v35 = vadd.f32 %v1035_v63, %v993_v20 }
  0x76   : > { %v5766_v20 = vld [vmem:[%s8398_s4 + $0x12] ss:$0 sm:$0xff]  ;;  %v1459_v63 = vmul.f32 %v5710_v26, %v5731_v0  ;;  %v5770_v33 = vld [vmem:[#allocation2 + $0x41] sm:$0xff]  ;;  %v1615_v25 = vmul.f32 %v5737_v57, %v5739_v62  ;;  %v1136_v1 = vadd.f32 %v1120_v61, %v1094_v9  ;;  %v5795_v9 = vld [vmem:[#allocation2 + $0x29] sm:$0xff] }
  0x77   : > { %v1133_v54 = vadd.f32 %v1117_v55, %v1091_v34  ;;  %v5747_v55 = vmul.f32 0.0, %v5693_v47  ;;  %v1119_v34 = vmul.f32 %v5442_v8, %v1095_v43  ;;  %v1573_v43 = vmul.f32 %v5729_v30, %v1549_v14  ;;  %v4636_v14 = vld [vmem:[%s8397_s3 + $0x238] sm:$0xff] }
  0x78   : > { %v1699_v15 = vmul.f32 %v5766_v20, %v5770_v33  ;;  %v5816_v7 = vadd.f32 %v1162_v42, %v1136_v1  ;;  %v1656_v49 = vmul.f32 %v5744_v18, %v5795_v9 }
  0x79   : > { %2159 = vperm.xlu1 %4835, %v4632_v31   ;;  %2154 = vperm.xlu0 %4834, %v4631_v17   ;;  %v1417_v31 = vmul.f32 %v5705_v13, %v5712_v58  ;;  %v5754_v17 = vadd.f32 %v1160_v60, %v1134_v37  ;;  %v1093_v60 = vadd.f32 %v1077_v6, %v1051_v35  ;;  %v5772_v37 = vld [vmem:[#allocation2 + $0x50] sm:$0xff]  ;;  %v5783_v35 = vld [vmem:[#allocation2 + $0x38] sm:$0xff] }
  0x7a   : > { %v1391_v8 = vadd.f32 %v1375_v28, %v5747_v55  ;;  %v1657_v6 = vmul.f32 %v5744_v18, %v5752_v19  ;;  %v4635_v28 = vld [vmem:[%s8397_s3 + $0x230] sm:$0xff]  ;;  %v5791_v48 = vadd.f32 %v1159_v24, %v1133_v54  ;;  %v1501_v45 = vmul.f32 %v5761_v36, %v5772_v37  ;;  %v5808_v54 = vld [vmem:[#allocation2 + $0x39] sm:$0xff]  ;;  %8422 = vst [vmem:[#allocation22_spill] sm:$0xff] %v5816_v7 }
  0x7b   : > { %8420 = vst [vmem:[#allocation20_spill] sm:$0xff] %v5754_v17  ;;  %v5778_v17 = vld [vmem:[#allocation2 + $0x28] sm:$0xff]  ;;  %v1135_v61 = vadd.f32 %v1119_v34, %v1093_v60  ;;  %v1458_v60 = vmul.f32 %v5710_v26, %v5783_v35  ;;  %v1698_v42 = vmul.f32 %v5766_v20, %v5808_v54 }
  0x7c   : > { %8421 = vst [vmem:[#allocation21_spill] sm:$0xff] %v5791_v48  ;;  %v1416_v24 = vmul.f32 %v5705_v13, %v5778_v17  ;;  %v5811_v34 = vld [vmem:[#allocation2 + $0x48] sm:$0xff]  ;;  %v1614_v48 = vmul.f32 %v5737_v57, %v1550_v32 }
  0x7d   : > { %2169 = vperm.xlu1 %4835, %v4634_v59   ;;  %2164 = vperm.xlu0 %4834, %v4633_v53   ;;  %v1433_v59 = vadd.f32 %v1417_v31, %v1391_v8  ;;  %v1631_v53 = vadd.f32 %v1615_v25, %v1573_v43  ;;  %v1572_v31 = vmul.f32 %v5729_v30, %v1548_v38  ;;  %v4638_v38 = vld [vmem:[%s8397_s3 + $0x248] sm:$0xff] }
  0x7e   : > { %v1432_v51 = vadd.f32 %v1416_v24, %v1391_v8  ;;  %v5832_v8 = vadd.f32 %v1161_v27, %v1135_v61  ;;  %v5846_v61 = vld [vmem:[#allocation2 + $0x60] sm:$0xff] }
  0x7f   : > { %v1475_v43 = vadd.f32 %v1459_v63, %v1433_v59  ;;  %v1673_v25 = vadd.f32 %v1657_v6, %v1631_v53  ;;  %v4637_v63 = vld [vmem:[%s8397_s3 + $0x240] sm:$0xff]  ;;  %v1741_v59 = vmul.f32 %v5800_v46, %v5804_v23  ;;  %v1630_v1 = vadd.f32 %v1614_v48, %v1572_v31 }
  0x80   : > { %8423 = vst [vmem:[#allocation23_spill] sm:$0xff] %v5832_v8  ;;  %v1377_v53 = vmul.f32 %v5698_v4, %v5712_v58  ;;  %v1575_v48 = vmul.f32 %v5729_v30, %v5739_v62  ;;  %v1617_v8 = vmul.f32 %v5737_v57, %v5752_v19  ;;  %v1336_v19 = vmul.f32 %v5693_v47, %v5778_v17 }
  0x81   : > { %2179 = vperm.xlu1 %4835, %v4636_v14   ;;  %2174 = vperm.xlu0 %4834, %v4635_v28   ;;  %v1715_v6 = vadd.f32 %v1699_v15, %v1673_v25  ;;  %v5828_v14 = vld [vmem:[#allocation2 + $0x49] sm:$0xff]  ;;  %v1500_v28 = vmul.f32 %v5761_v36, %v5811_v34  ;;  %v1419_v15 = vmul.f32 %v5705_v13, %v5731_v0 }
  0x82   : > { %v5840_v24 = vadd.f32 %v1501_v45, %v1475_v43  ;;  %v1474_v25 = vadd.f32 %v1458_v60, %v1432_v51  ;;  %v1672_v7 = vadd.f32 %v1656_v49, %v1630_v1  ;;  %v1740_v27 = vmul.f32 %v5800_v46, %v5828_v14  ;;  %v4640_v51 = vld [vmem:[%s8397_s3 + $0x258] sm:$0xff]  ;;  %v4639_v49 = vld [vmem:[%s8397_s3 + $0x250] sm:$0xff] }
  0x83   : > { %v1393_v31 = vadd.f32 %v1377_v53, %v5747_v55  ;;  %v5857_v45 = vadd.f32 %v1741_v59, %v1715_v6  ;;  %v1461_v43 = vmul.f32 %v5710_v26, %v5772_v37  ;;  %v1659_v60 = vmul.f32 %v5744_v18, %v5770_v33  ;;  %v5875_v59 = vld [vmem:[#allocation2 + $0x58] sm:$0xff] }
  0x84   : > { %8424 = vst [vmem:[#allocation24_spill] sm:$0xff] %v5840_v24  ;;  %v1714_v62 = vadd.f32 %v1698_v42, %v1672_v7  ;;  %v1633_v1 = vadd.f32 %v1617_v8, %v1575_v48  ;;  %v1376_v53 = vmul.f32 %v5698_v4, %v5778_v17  ;;  %v1418_v24 = vmul.f32 %v5705_v13, %v5783_v35 }
  0x85   : > { %2189 = vperm.xlu1 %4835, %v4638_v38   ;;  %2184 = vperm.xlu0 %4834, %v4637_v63   ;;  %8425 = vst [vmem:[#allocation25_spill] sm:$0xff] %v5857_v45  ;;  %v1435_v38 = vadd.f32 %v1419_v15, %v1393_v31  ;;  %v5863_v63 = vld [vmem:[#allocation2 + $0x61] sm:$0xff]  ;;  %v5869_v21 = vadd.f32 %v1500_v28, %v1474_v25  ;;  %v5899_v45 = vld [vmem:[#allocation2 + $0x59] sm:$0xff] }
  0x86   : > { %v1503_v7 = vmul.f32 %v5761_v36, %v5846_v61  ;;  %v1701_v6 = vmul.f32 %v5766_v20, %v5804_v23  ;;  %v1574_v42 = vmul.f32 %v5729_v30, %v1550_v32  ;;  %v1675_v8 = vadd.f32 %v1659_v60, %v1633_v1  ;;  %v4642_v28 = vld [vmem:[%s8397_s3 + $0x268] sm:$0xff]  ;;  %v4641_v25 = vld [vmem:[%s8397_s3 + $0x260] sm:$0xff] }
  0x87   : > { %8426 = vst [vmem:[#allocation26_spill] sm:$0xff] %v5869_v21  ;;  %v1392_v15 = vadd.f32 %v1376_v53, %v5747_v55  ;;  %v1460_v48 = vmul.f32 %v5710_v26, %v5811_v34  ;;  %v5887_v31 = vadd.f32 %v1740_v27, %v1714_v62  ;;  %v1743_v32 = vmul.f32 %v5800_v46, %v5863_v63 }
  0x88   : > { %v1658_v55 = vmul.f32 %v5744_v18, %v5808_v54  ;;  %v1502_v1 = vmul.f32 %v5761_v36, %v5875_v59  ;;  %v1337_v53 = vmul.f32 %v5693_v47, %v5712_v58  ;;  %v1700_v62 = vmul.f32 %v5766_v20, %v5828_v14 }
  0x89   : > { %2199 = vperm.xlu1 %4835, %v4640_v51   ;;  %2194 = vperm.xlu0 %4834, %v4639_v49   ;;  %8427 = vst [vmem:[#allocation27_spill] sm:$0xff] %v5887_v31  ;;  %v1616_v51 = vmul.f32 %v5737_v57, %v5795_v9  ;;  %v1477_v49 = vadd.f32 %v1461_v43, %v1435_v38  ;;  %v5903_v31 = vld [vmem:[#allocation2 + $0x70] sm:$0xff] }
  0x8a   : > { %v1434_v60 = vadd.f32 %v1418_v24, %v1392_v15  ;;  %v1379_v21 = vmul.f32 %v5698_v4, %v5731_v0  ;;  %v1421_v24 = vmul.f32 %v5705_v13, %v5772_v37  ;;  %v1717_v43 = vadd.f32 %v1701_v6, %v1675_v8  ;;  %v4643_v15 = vld [vmem:[%s8397_s3 + $0x270] sm:$0xff] }
  0x8b   : > { %v1632_v27 = vadd.f32 %v1616_v51, %v1574_v42  ;;  %v1463_v58 = vmul.f32 %v5710_v26, %v5846_v61  ;;  %v4644_v42 = vld [vmem:[%s8397_s3 + $0x278] sm:$0xff]  ;;  %v1619_v6 = vmul.f32 %v5737_v57, %v5770_v33  ;;  %v5921_v8 = vadd.f32 %v1503_v7, %v1477_v49  ;;  %v5935_v49 = vld [vmem:[#allocation2 + $0x68] sm:$0xff] }
  0x8c   : > { %v1476_v38 = vadd.f32 %v1460_v48, %v1434_v60  ;;  %v1395_v12 = vadd.f32 %v1379_v21, %v1337_v53  ;;  %v1742_v48 = vmul.f32 %v5800_v46, %v5899_v45  ;;  %v5929_v21 = vld [vmem:[#allocation2 + $0x71] sm:$0xff]  ;;  %v1703_v7 = vmul.f32 %v5766_v20, %v5863_v63 }
  0x8d   : > { %2209 = vperm.xlu1 %4835, %v4642_v28   ;;  %2204 = vperm.xlu0 %4834, %v4641_v25   ;;  %v1674_v51 = vadd.f32 %v1658_v55, %v1632_v27  ;;  %8428 = vst [vmem:[#allocation28_spill] sm:$0xff] %v5921_v8  ;;  %v1505_v28 = vmul.f32 %v5761_v36, %v5903_v31 }
  0x8e   : > { %v1661_v25 = vmul.f32 %v5744_v18, %v5804_v23  ;;  %v1437_v55 = vadd.f32 %v1421_v24, %v1395_v12  ;;  %v1635_v53 = vadd.f32 %v1619_v6, %v1577_v39  ;;  %v1378_v27 = vmul.f32 %v5698_v4, %v5783_v35 }
  0x8f   : > { %v1716_v60 = vadd.f32 %v1700_v62, %v1674_v51  ;;  %v1420_v62 = vmul.f32 %v5705_v13, %v5811_v34  ;;  %v5941_v12 = vadd.f32 %v1743_v32, %v1717_v43  ;;  %v5943_v24 = vadd.f32 %v1502_v1, %v1476_v38  ;;  %v5957_v43 = vld [vmem:[#allocation2 + $0x69] sm:$0xff] }
  0x90   : > { %v1479_v39 = vadd.f32 %v1463_v58, %v1437_v55  ;;  %v1677_v51 = vadd.f32 %v1661_v25, %v1635_v53  ;;  %v1745_v17 = vmul.f32 %v5800_v46, %v5929_v21  ;;  %v1618_v6 = vmul.f32 %v5737_v57, %v5808_v54  ;;  %v4901_v58 = vld [vmem:[%s8397_s3] sm:$0xff] }
  0x91   : > { %2219 = vperm.xlu1 %4835, %v4644_v42   ;;  %2214 = vperm.xlu0 %4834, %v4643_v15   ;;  %8429 = vst [vmem:[#allocation29_spill] sm:$0xff] %v5941_v12  ;;  %v1394_v42 = vadd.f32 %v1378_v27, %v1336_v19  ;;  %v1576_v15 = vmul.f32 %v5729_v30, %v5795_v9  ;;  %v4900_v9 = vld [vmem:[%s8397_s3 + $0x8] sm:$0xff] }
  0x92   : > { %v5951_v11 = vadd.f32 %v1742_v48, %v1716_v60  ;;  %v1462_v32 = vmul.f32 %v5710_v26, %v5875_v59  ;;  %v1504_v1 = vmul.f32 %v5761_v36, %v5935_v49  ;;  %v1660_v38 = vmul.f32 %v5744_v18, %v5828_v14 }
  0x93   : > { %v5967_v48 = vadd.f32 %v1505_v28, %v1479_v39  ;;  %v1719_v25 = vadd.f32 %v1703_v7, %v1677_v51  ;;  %v1436_v60 = vadd.f32 %v1420_v62, %v1394_v42  ;;  %v1634_v55 = vadd.f32 %v1618_v6, %v1576_v15  ;;  %v5984_v42 = vld [vmem:[#allocation2 + $0x80] sm:$0xff]  ;;  %v4902_v6 = vld [vmem:[%s8397_s3 + $0x18] sm:$0xff] }
  0x94   : > { %v856_v8 = vpop.permute.xlu1 %855  ;;  %v846_v22 = vpop.permute.xlu0 %845  ;;  %8430 = vst [vmem:[#allocation30_spill] sm:$0xff] %v5951_v11  ;;  %v1702_v53 = vmul.f32 %v5766_v20, %v5899_v45  ;;  %v1339_v19 = vmul.f32 %v5693_v47, %v5731_v0  ;;  %v1381_v27 = vmul.f32 %v5698_v4, %v5772_v37  ;;  %v1423_v28 = vmul.f32 %v5705_v13, %v5846_v61  ;;  %v6001_v11 = vld [vmem:[#allocation2 + $0x81] sm:$0xff] }
  0x95   : > { %2636 = vperm.xlu1 %4835, %v4900_v9   ;;  %2631 = vperm.xlu0 %4834, %v4901_v58   ;;  %v5976_v9 = vmul.f32 %v856_v8, %v5259_v44  ;;  %v1744_v58 = vmul.f32 %v5800_v46, %v5957_v43  ;;  %v1465_v7 = vmul.f32 %v5710_v26, %v5903_v31 }
  0x96   : > { %v1676_v51 = vadd.f32 %v1660_v38, %v1634_v55  ;;  %v1397_v0 = vadd.f32 %v1381_v27, %v1339_v19  ;;  %v1579_v15 = vmul.f32 %v5729_v30, %v5770_v33  ;;  %v1621_v44 = vmul.f32 %v5737_v57, %v5804_v23  ;;  %v4903_v38 = vld [vmem:[%s8397_s3 + $0x10] sm:$0xff] }
  0x97   : > { %v5991_v8 = vmul.f32 %v846_v22, %v5238_v29  ;;  %v5999_v55 = vadd.f32 %v1745_v17, %v1719_v25  ;;  %v1478_v19 = vadd.f32 %v1462_v32, %v1436_v60  ;;  %v1663_v29 = vmul.f32 %v5744_v18, %v5863_v63 }
  0x98   : > { %v861_v62 = vpop.permute.xlu1 %860  ;;  %v851_v39 = vpop.permute.xlu0 %850  ;;  %v1718_v33 = vadd.f32 %v1702_v53, %v1676_v51  ;;  %v1439_v27 = vadd.f32 %v1423_v28, %v1397_v0  ;;  %v1637_v12 = vadd.f32 %v1621_v44, %v1579_v15  ;;  %v1507_v22 = vmul.f32 %v5761_v36, %v5984_v42 }
  0x99   : > { %2646 = vperm.xlu1 %4835, %v4902_v6   ;;  %2641 = vperm.xlu0 %4834, %v4903_v38   ;;  %8431 = vst [vmem:[#allocation31_spill] sm:$0xff] %v5999_v55  ;;  %v1705_v6 = vmul.f32 %v5766_v20, %v5929_v21  ;;  %v1338_v38 = vmul.f32 %v5693_v47, %v5783_v35  ;;  %v4904_v35 = vld [vmem:[%s8397_s3 + $0x28] sm:$0xff] }
  0x9a   : > { %v1380_v17 = vmul.f32 %v5698_v4, %v5811_v34  ;;  %v6014_v32 = vmul.f32 %v861_v62, %v5288_v2  ;;  %v1481_v53 = vadd.f32 %v1465_v7, %v1439_v27  ;;  %v1679_v28 = vadd.f32 %v1663_v29, %v1637_v12  ;;  %v4905_v2 = vld [vmem:[%s8397_s3 + $0x20] sm:$0xff]  ;;  %v520_v27 = vld [vmem:[%s5123_s20 + $0xa8] sm:$0xff] }
  0x9b   : > { %v1422_v51 = vmul.f32 %v5705_v13, %v5875_v59  ;;  %v6019_v0 = vmul.f32 %v851_v39, %v5290_v52  ;;  %v1747_v7 = vmul.f32 %v5800_v46, %v6001_v11  ;;  %v6029_v62 = vadd.f32 %v1504_v1, %v1478_v19  ;;  %v6033_v39 = vld [vmem:[#allocation2 + $0x78] sm:$0xff]  ;;  %552 = vst [vmem:[#allocation2 + $0xd0] sm:$0xff] %v520_v27 }
  0x9c   : > { %v871_v25 = vpop.permute.xlu1 %870  ;;  %v866_v60 = vpop.permute.xlu0 %865  ;;  %v1396_v12 = vadd.f32 %v1380_v17, %v1338_v38  ;;  %v6031_v15 = vadd.f32 %v1744_v58, %v1718_v33  ;;  %v1721_v52 = vadd.f32 %v1705_v6, %v1679_v28  ;;  %v1464_v44 = vmul.f32 %v5710_v26, %v5935_v49  ;;  %v6050_v38 = vld [vmem:[#allocation2 + $0x79] sm:$0xff] }
  0x9d   : > { %2656 = vperm.xlu1 %4835, %v4904_v35   ;;  %2651 = vperm.xlu0 %4834, %v4905_v2   ;;  %v6039_v29 = vmul.f32 %v871_v25, %v5300_v10  ;;  %v1578_v2 = vmul.f32 %v5729_v30, %v5808_v54  ;;  %v1620_v1 = vmul.f32 %v5737_v57, %v5828_v14  ;;  %v4906_v54 = vld [vmem:[%s8397_s3 + $0x38] sm:$0xff] }
  0x9e   : > { %8432 = vst [vmem:[#allocation32_spill] sm:$0xff] %v6031_v15  ;;  %v1438_v35 = vadd.f32 %v1422_v51, %v1396_v12  ;;  %v6046_v58 = vmul.f32 %v866_v60, %v5340_v40  ;;  %v6048_v6 = vadd.f32 %v1507_v22, %v1481_v53  ;;  %v1662_v10 = vmul.f32 %v5744_v18, %v5899_v45  ;;  %v4907_v40 = vld [vmem:[%s8397_s3 + $0x30] sm:$0xff] }
  0x9f   : > { %v1341_v17 = vmul.f32 %v5693_v47, %v5772_v37  ;;  %v6062_v22 = vadd.f32 %v1747_v7, %v1721_v52  ;;  %v1506_v25 = vmul.f32 %v5761_v36, %v6033_v39  ;;  %v1704_v60 = vmul.f32 %v5766_v20, %v5957_v43 }
  0xa0   : > { %v881_v19 = vpop.permute.xlu1 %880  ;;  %v876_v33 = vpop.permute.xlu0 %875  ;;  %8433 = vst [vmem:[#allocation33_spill] sm:$0xff] %v6048_v6  ;;  %v1480_v53 = vadd.f32 %v1464_v44, %v1438_v35  ;;  %v1636_v37 = vadd.f32 %v1620_v1, %v1578_v2  ;;  %v1383_v28 = vmul.f32 %v5698_v4, %v5846_v61  ;;  %v1425_v51 = vmul.f32 %v5705_v13, %v5903_v31  ;;  %v6081_v1 = vld [vmem:[#allocation2 + $0x90] sm:$0xff] }
  0xa1   : > { %2666 = vperm.xlu1 %4835, %v4906_v54   ;;  %2661 = vperm.xlu0 %4834, %v4907_v40   ;;  %8434 = vst [vmem:[#allocation34_spill] sm:$0xff] %v6062_v22  ;;  %v6073_v12 = vmul.f32 %v881_v19, %v5342_v41  ;;  %v1746_v7 = vmul.f32 %v5800_v46, %v6050_v38 }
  0xa2   : > { %v1581_v52 = vmul.f32 %v5729_v30, %v5804_v23  ;;  %v1623_v27 = vmul.f32 %v5737_v57, %v5863_v63  ;;  %v1678_v2 = vadd.f32 %v1662_v10, %v1636_v37  ;;  %v1399_v54 = vadd.f32 %v1383_v28, %v1341_v17  ;;  %v4908_v23 = vld [vmem:[%s8397_s3 + $0x48] sm:$0xff]  ;;  %v4909_v10 = vld [vmem:[%s8397_s3 + $0x40] sm:$0xff] }
  0xa3   : > { %v1467_v40 = vmul.f32 %v5710_v26, %v5984_v42  ;;  %v1665_v41 = vmul.f32 %v5744_v18, %v5929_v21  ;;  %v6088_v19 = vmul.f32 %v876_v33, %v5350_v50  ;;  %v1707_v37 = vmul.f32 %v5766_v20, %v6001_v11  ;;  %v6100_v33 = vld [vmem:[#allocation2 + $0x91] sm:$0xff] }
  0xa4   : > { %v891_v44 = vpop.permute.xlu1 %890  ;;  %v886_v35 = vpop.permute.xlu0 %885  ;;  %v1639_v17 = vadd.f32 %v1623_v27, %v1581_v52  ;;  %v6098_v28 = vadd.f32 %v1506_v25, %v1480_v53  ;;  %v1720_v22 = vadd.f32 %v1704_v60, %v1678_v2  ;;  %v1441_v50 = vadd.f32 %v1425_v51, %v1399_v54  ;;  %v521_v25 = vld [vmem:[%s5123_s20 + $0xb0] sm:$0xff]  ;;  %v6115_v54 = vld [vmem:[#allocation2 + $0x88] sm:$0xff] }
  0xa5   : > { %2676 = vperm.xlu1 %4835, %v4908_v23   ;;  %2671 = vperm.xlu0 %4834, %v4909_v10   ;;  %v1340_v15 = vmul.f32 %v5693_v47, %v5811_v34  ;;  %v6105_v23 = vmul.f32 %v891_v44, %v5372_v5  ;;  %v1509_v10 = vmul.f32 %v5761_v36, %v6081_v1  ;;  %v522_v44 = vld [vmem:[%s5123_s20 + $0xb8] sm:$0xff] }
  0xa6   : > { %8435 = vst [vmem:[#allocation35_spill] sm:$0xff] %v6098_v28  ;;  %v1681_v52 = vadd.f32 %v1665_v41, %v1639_v17  ;;  %v1382_v27 = vmul.f32 %v5698_v4, %v5875_v59  ;;  %v6113_v60 = vmul.f32 %v886_v35, %v5382_v16  ;;  %v1483_v2 = vadd.f32 %v1467_v40, %v1441_v50  ;;  %v4910_v41 = vld [vmem:[%s8397_s3 + $0x58] sm:$0xff]  ;;  %v4911_v16 = vld [vmem:[%s8397_s3 + $0x50] sm:$0xff]  ;;  %v8447_v28 = vld [vmem:[#allocation6_spill] sm:$0xff] }
  0xa7   : > { %v1424_v5 = vmul.f32 %v5705_v13, %v5935_v49  ;;  %v1580_v34 = vmul.f32 %v5729_v30, %v5828_v14  ;;  %553 = vst [vmem:[#allocation2 + $0xd8] sm:$0xff] %v521_v25  ;;  %v1749_v40 = vmul.f32 %v5800_v46, %v6100_v33  ;;  %v1466_v17 = vmul.f32 %v5710_v26, %v6033_v39 }
  0xa8   : > { %8436 = vst [vmem:[#allocation36_spill] sm:$0xff] %v6113_v60  ;;  %v901_v53 = vpop.permute.xlu1 %900  ;;  %v896_v51 = vpop.permute.xlu0 %895  ;;  %v1723_v35 = vadd.f32 %v1707_v37, %v1681_v52  ;;  %554 = vst [vmem:[#allocation2 + $0xe0] sm:$0xff] %v522_v44  ;;  %v6132_v14 = vadd.f32 %v1746_v7, %v1720_v22  ;;  %v1398_v50 = vadd.f32 %v1382_v27, %v1340_v15 }
  0xa9   : > { %2686 = vperm.xlu1 %4835, %v4910_v41   ;;  %2681 = vperm.xlu0 %4834, %v4911_v16   ;;  %v1622_v25 = vmul.f32 %v5737_v57, %v5899_v45  ;;  %v1664_v41 = vmul.f32 %v5744_v18, %v5957_v43  ;;  %v6139_v55 = vmul.f32 %v901_v53, %v5428_v56  ;;  %v6146_v16 = vld [vmem:[#allocation2 + $0x89] sm:$0xff]  ;;  %v4913_v53 = vld [vmem:[%s8397_s3 + $0x60] sm:$0xff] }
  0xaa   : > { %8437 = vst [vmem:[#allocation37_spill] sm:$0xff] %v6132_v14  ;;  %v6142_v37 = vmul.f32 %v896_v51, %v5436_v3  ;;  %v1508_v52 = vmul.f32 %v5761_v36, %v6115_v54  ;;  %v1343_v15 = vmul.f32 %v5693_v47, %v5846_v61  ;;  %v6150_v27 = vadd.f32 %v1509_v10, %v1483_v2  ;;  %v4912_v3 = vld [vmem:[%s8397_s3 + $0x68] sm:$0xff]  ;;  %v6164_v51 = vld [vmem:[#allocation2 + $0xa0] sm:$0xff] }
  0xab   : > { %8438 = vst [vmem:[#allocation38_spill] sm:$0xff] %v6139_v55  ;;  %v1440_v44 = vadd.f32 %v1424_v5, %v1398_v50  ;;  %v1638_v14 = vadd.f32 %v1622_v25, %v1580_v34  ;;  %v1385_v56 = vmul.f32 %v5698_v4, %v5903_v31  ;;  %v6160_v61 = vadd.f32 %v1749_v40, %v1723_v35 }
  0xac   : > { %8439 = vst [vmem:[#allocation39_spill] sm:$0xff] %v6142_v37  ;;  %v911_v22 = vpop.permute.xlu1 %910  ;;  %v906_v7 = vpop.permute.xlu0 %905  ;;  %8440 = vst [vmem:[#allocation40_spill] sm:$0xff] %v6150_v27  ;;  %v1706_v10 = vmul.f32 %v5766_v20, %v6050_v38  ;;  %v1427_v2 = vmul.f32 %v5705_v13, %v5984_v42  ;;  %v6170_v50 = vmul.f32 %v5800_v46, %v6146_v16 }
  0xad   : > { %2696 = vperm.xlu1 %4835, %v4912_v3   ;;  %2691 = vperm.xlu0 %4834, %v4913_v53   ;;  %8441 = vst [vmem:[#allocation41_spill] sm:$0xff] %v6160_v61  ;;  %v1482_v5 = vadd.f32 %v1466_v17, %v1440_v44  ;;  %v1680_v34 = vadd.f32 %v1664_v41, %v1638_v14  ;;  %v8442_v3 = vld [vmem:[#allocation4_spill] sm:$0xff]  ;;  %v6179_v53 = vld [vmem:[#allocation2 + $0xa1] sm:$0xff]  ;;  %v8444_v44 = vld [vmem:[#allocation5_spill] sm:$0xff] }
  0xae   : > { %v1401_v25 = vadd.f32 %v1385_v56, %v1343_v15  ;;  %v6173_v37 = vmul.f32 %v911_v22, %v8442_v3  ;;  %v1583_v35 = vmul.f32 %v5729_v30, %v5863_v63  ;;  %v1625_v40 = vmul.f32 %v5737_v57, %v5929_v21  ;;  %v523_v14 = vld [vmem:[%s5123_s20 + $0xc0] sm:$0xff]  ;;  %v524_v41 = vld [vmem:[%s5123_s20 + $0xc8] sm:$0xff] }
  0xaf   : > { %v1667_v17 = vmul.f32 %v5744_v18, %v6001_v11  ;;  %v6186_v61 = vmul.f32 %v906_v7, %v8444_v44  ;;  %v1469_v22 = vmul.f32 %v5710_v26, %v6081_v1  ;;  %v1511_v63 = vmul.f32 %v5761_v36, %v6164_v51  ;;  %555 = vst [vmem:[#allocation2 + $0xe8] sm:$0xff] %v523_v14  ;;  %v4915_v7 = vld [vmem:[%s8397_s3 + $0x70] sm:$0xff] }
  0xb0   : > { %8443 = vst [vmem:[#allocation4_spill] sm:$0xff] %v6173_v37  ;;  %v921_v15 = vpop.permute.xlu1 %920  ;;  %v916_v56 = vpop.permute.xlu0 %915  ;;  %v1709_v3 = vmul.f32 %v5766_v20, %v6100_v33  ;;  %556 = vst [vmem:[#allocation2 + $0xf0] sm:$0xff] %v524_v41  ;;  %v4914_v37 = vld [vmem:[%s8397_s3 + $0x78] sm:$0xff]  ;;  %v6200_v44 = vadd.f32 %v1508_v52, %v1482_v5  ;;  %v1641_v55 = vadd.f32 %v1625_v40, %v1583_v35 }
  0xb1   : > { %8445 = vst [vmem:[#allocation5_spill] sm:$0xff] %v6186_v61  ;;  %2706 = vperm.xlu1 %4835, %v4914_v37   ;;  %2701 = vperm.xlu0 %4834, %v4915_v7   ;;  %v1443_v61 = vadd.f32 %v1427_v2, %v1401_v25  ;;  %v1722_v27 = vadd.f32 %v1706_v10, %v1680_v34  ;;  %v8449_v7 = vld [vmem:[#allocation7_spill] sm:$0xff]  ;;  %v6216_v35 = vld [vmem:[#allocation2 + $0x98] sm:$0xff] }
  0xb2   : > { %8446 = vst [vmem:[#allocation42_spill] sm:$0xff] %v6200_v44  ;;  %v1751_v14 = vmul.f32 %v5800_v46, %v6179_v53  ;;  %v1342_v41 = vmul.f32 %v5693_v47, %v5875_v59  ;;  %v1384_v37 = vmul.f32 %v5698_v4, %v5935_v49  ;;  %v6209_v6 = vmul.f32 %v921_v15, %v8447_v28  ;;  %v525_v15 = vld [vmem:[%s5123_s20 + $0xd0] sm:$0xff] }
  0xb3   : > { %v6212_v52 = vmul.f32 %v916_v56, %v8449_v7  ;;  %v1683_v2 = vadd.f32 %v1667_v17, %v1641_v55  ;;  %v1426_v10 = vmul.f32 %v5705_v13, %v6033_v39  ;;  %v1468_v59 = vmul.f32 %v5710_v26, %v6115_v54  ;;  %v526_v56 = vld [vmem:[%s5123_s20 + $0xd8] sm:$0xff]  ;;  %v8451_v55 = vld [vmem:[#allocation8_spill] sm:$0xff]  ;;  %557 = vst [vmem:[#allocation2 + $0xf8] sm:$0xff] %v525_v15 }
  0xb4   : > { %8448 = vst [vmem:[#allocation6_spill] sm:$0xff] %v6209_v6  ;;  %v1204_v5 = vpop.permute.xlu1 %1203  ;;  %v1199_v34 = vpop.permute.xlu0 %1198  ;;  %v1400_v25 = vadd.f32 %v1384_v37, %v1342_v41  ;;  %v1582_v40 = vmul.f32 %v5729_v30, %v5899_v45  ;;  %v1624_v28 = vmul.f32 %v5737_v57, %v5957_v43  ;;  %v8452_v7 = vld [vmem:[#allocation9_spill] sm:$0xff]  ;;  %v4916_v41 = vld [vmem:[%s8397_s3 + $0x88] sm:$0xff]  ;;  %v4917_v37 = vld [vmem:[%s8397_s3 + $0x80] sm:$0xff]  ;;  %v1485_v45 = vadd.f32 %v1469_v22, %v1443_v61 }
  0xb5   : > { %8450 = vst [vmem:[#allocation7_spill] sm:$0xff] %v6212_v52  ;;  %v1277_v17 = vmul.f32 %v1204_v5, %v8451_v55  ;;  %v1276_v52 = vmul.f32 %v1199_v34, %v8452_v7  ;;  %2983 = vperm.xlu1 %4835, %v4916_v41   ;;  %2978 = vperm.xlu0 %4834, %v4917_v37   ;;  %558 = vst [vmem:[#allocation2 + $0x100] sm:$0xff] %v526_v56  ;;  %v6240_v41 = vld [vmem:[#allocation2 + $0x99] sm:$0xff] }
  0xb6   : > { %v1725_v6 = vadd.f32 %v1709_v3, %v1683_v2  ;;  %v1442_v44 = vadd.f32 %v1426_v10, %v1400_v25  ;;  %v1640_v60 = vadd.f32 %v1624_v28, %v1582_v40  ;;  %v1666_v5 = vmul.f32 %v5744_v18, %v6050_v38  ;;  %v4918_v25 = vld [vmem:[%s8397_s3 + $0x98] sm:$0xff]  ;;  %v4919_v40 = vld [vmem:[%s8397_s3 + $0x90] sm:$0xff]  ;;  %v527_v37 = vld [vmem:[%s5123_s20 + $0xe0] sm:$0xff] }
  0xb7   : > { %v1293_v34 = vadd.f32 %v1277_v17, %v6019_v0  ;;  %v1292_v55 = vadd.f32 %v1276_v52, %v5991_v8  ;;  %v1510_v7 = vmul.f32 %v5761_v36, %v6216_v35  ;;  %v1708_v61 = vmul.f32 %v5766_v20, %v6146_v16  ;;  %v8453_v0 = vld [vmem:[#allocation10_spill] sm:$0xff]  ;;  %559 = vst [vmem:[#allocation2 + $0x108] sm:$0xff] %v527_v37 }
  0xb8   : > { %v1214_v22 = vpop.permute.xlu1 %1213  ;;  %v1209_v15 = vpop.permute.xlu0 %1208  ;;  %v1484_v3 = vadd.f32 %v1468_v59, %v1442_v44  ;;  %v1682_v2 = vadd.f32 %v1666_v5, %v1640_v60  ;;  %v1345_v10 = vmul.f32 %v5693_v47, %v5903_v31  ;;  %v1387_v8 = vmul.f32 %v5698_v4, %v5984_v42  ;;  %v8454_v31 = vld [vmem:[#allocation11_spill] sm:$0xff] }
  0xb9   : > { %v1279_v52 = vmul.f32 %v1214_v22, %v8453_v0  ;;  %2993 = vperm.xlu1 %4835, %v4918_v25   ;;  %2988 = vperm.xlu0 %4834, %v4919_v40   ;;  %v6256_v60 = vadd.f32 %v6170_v50, %v1722_v27  ;;  %v6258_v44 = vadd.f32 %v1511_v63, %v1485_v45  ;;  %v528_v5 = vld [vmem:[%s5123_s20 + $0xe8] sm:$0xff]  ;;  %v8455_v22 = vld [vmem:[#allocation24_spill] sm:$0xff]  ;;  %v8456_v25 = vld [vmem:[#allocation26_spill] sm:$0xff] }
  0xba   : > { %v1278_v59 = vmul.f32 %v1209_v15, %v8454_v31  ;;  %v6261_v28 = vadd.f32 %v1751_v14, %v1725_v6  ;;  %v1750_v56 = vmul.f32 %v5800_v46, %v6240_v41  ;;  %v1403_v17 = vadd.f32 %v1387_v8, %v1345_v10  ;;  %560 = vst [vmem:[#allocation2 + $0x110] sm:$0xff] %v528_v5  ;;  %v6277_v45 = vld [vmem:[#allocation2 + $0xb0] sm:$0xff]  ;;  %v8458_v8 = vld [vmem:[#allocation13_spill] sm:$0xff] }
  0xbb   : > { %v6268_v0 = vadd.f32 %v8455_v22, %v1293_v34  ;;  %v6271_v40 = vadd.f32 %v8456_v25, %v1292_v55  ;;  %v6273_v27 = vadd.f32 %v1510_v7, %v1484_v3  ;;  %v1429_v50 = vmul.f32 %v5705_v13, %v6081_v1  ;;  %v8457_v3 = vld [vmem:[#allocation12_spill] sm:$0xff] }
  0xbc   : > { %v1224_v6 = vpop.permute.xlu1 %1223  ;;  %v1219_v63 = vpop.permute.xlu0 %1218  ;;  %v1724_v14 = vadd.f32 %v1708_v61, %v1682_v2  ;;  %v1471_v15 = vmul.f32 %v5710_v26, %v6164_v51  ;;  %v1585_v34 = vmul.f32 %v5729_v30, %v5929_v21  ;;  %v1627_v55 = vmul.f32 %v5737_v57, %v6001_v11  ;;  %v4920_v61 = vld [vmem:[%s8397_s3 + $0xa8] sm:$0xff]  ;;  %v4921_v2 = vld [vmem:[%s8397_s3 + $0xa0] sm:$0xff] }
  0xbd   : > { %v1295_v7 = vadd.f32 %v1279_v52, %v6014_v32  ;;  %v1281_v10 = vmul.f32 %v1224_v6, %v8457_v3  ;;  %v1280_v31 = vmul.f32 %v1219_v63, %v8458_v8  ;;  %3003 = vperm.xlu1 %4835, %v4920_v61   ;;  %2998 = vperm.xlu0 %4834, %v4921_v2   ;;  %v6301_v6 = vld [vmem:[#allocation2 + $0xb1] sm:$0xff]  ;;  %v8462_v2 = vld [vmem:[#allocation15_spill] sm:$0xff] }
  0xbe   : > { %v1294_v21 = vadd.f32 %v1278_v59, %v5976_v9  ;;  %v1445_v37 = vadd.f32 %v1429_v50, %v1403_v17  ;;  %v1643_v32 = vadd.f32 %v1627_v55, %v1585_v34  ;;  %v1669_v52 = vmul.f32 %v5744_v18, %v6100_v33  ;;  %v529_v34 = vld [vmem:[%s5123_s20 + $0xf0] sm:$0xff]  ;;  %v8459_v55 = vld [vmem:[#allocation14_spill] sm:$0xff]  ;;  %v4922_v8 = vld [vmem:[%s8397_s3 + $0xb8] sm:$0xff] }
  0xbf   : > { %v1297_v5 = vadd.f32 %v1281_v10, %v6039_v29  ;;  %v1296_v22 = vadd.f32 %v1280_v31, %v6046_v58  ;;  %v1513_v25 = vmul.f32 %v5761_v36, %v6277_v45  ;;  %v1711_v63 = vmul.f32 %v5766_v20, %v6179_v53  ;;  %v530_v58 = vld [vmem:[%s5123_s20 + $0xf8] sm:$0xff]  ;;  %v8460_v31 = vld [vmem:[#allocation28_spill] sm:$0xff]  ;;  %561 = vst [vmem:[#allocation2 + $0x118] sm:$0xff] %v529_v34 }
  0xc0   : > { %v1234_v3 = vpop.permute.xlu1 %1233  ;;  %v1229_v9 = vpop.permute.xlu0 %1228  ;;  %v1487_v59 = vadd.f32 %v1471_v15, %v1445_v37  ;;  %v1685_v17 = vadd.f32 %v1669_v52, %v1643_v32  ;;  %v1344_v50 = vmul.f32 %v5693_v47, %v5935_v49  ;;  %v1386_v29 = vmul.f32 %v5698_v4, %v6033_v39  ;;  %v4923_v15 = vld [vmem:[%s8397_s3 + $0xb0] sm:$0xff]  ;;  %562 = vst [vmem:[#allocation2 + $0x120] sm:$0xff] %v530_v58  ;;  %v4675_v32 = vld [vmem:[%s8397_s3 + $0xc8] sm:$0xff]  ;;  %v4674_v52 = vld [vmem:[%s8397_s3 + $0xc0] sm:$0xff] }
  0xc1   : > { %v1283_v10 = vmul.f32 %v1234_v3, %v8459_v55  ;;  %3013 = vperm.xlu1 %4835, %v4922_v8   ;;  %3008 = vperm.xlu0 %4834, %v4923_v15   ;;  %v6319_v61 = vadd.f32 %v8460_v31, %v1295_v7  ;;  %v6321_v49 = vadd.f32 %v1750_v56, %v1724_v14 }
  0xc2   : > { %v1282_v37 = vmul.f32 %v1229_v9, %v8462_v2  ;;  %v6331_v3 = vadd.f32 %v5943_v24, %v1294_v21  ;;  %v1753_v7 = vmul.f32 %v5800_v46, %v6301_v6  ;;  %v1402_v56 = vadd.f32 %v1386_v29, %v1344_v50  ;;  %v6345_v24 = vld [vmem:[#allocation2 + $0xa8] sm:$0xff]  ;;  %v8465_v2 = vld [vmem:[#allocation36_spill] sm:$0xff] }
  0xc3   : > { %8461 = vst [vmem:[#allocation8_spill] sm:$0xff] %v6321_v49  ;;  %v6336_v14 = vadd.f32 %v5967_v48, %v1297_v5  ;;  %v6339_v9 = vadd.f32 %v6029_v62, %v1296_v22  ;;  %v6341_v34 = vadd.f32 %v1513_v25, %v1487_v59  ;;  %v1428_v58 = vmul.f32 %v5705_v13, %v6115_v54  ;;  %v8463_v22 = vld [vmem:[#allocation16_spill] sm:$0xff]  ;;  %v8464_v59 = vld [vmem:[#allocation17_spill] sm:$0xff] }
  0xc4   : > { %v1244_v55 = vpop.permute.xlu1 %1243  ;;  %v1239_v8 = vpop.permute.xlu0 %1238  ;;  %v1727_v15 = vadd.f32 %v1711_v63, %v1685_v17  ;;  %v1470_v21 = vmul.f32 %v5710_v26, %v6216_v35  ;;  %v1584_v48 = vmul.f32 %v5729_v30, %v5957_v43  ;;  %v1626_v62 = vmul.f32 %v5737_v57, %v6050_v38  ;;  %v4677_v17 = vld [vmem:[%s8397_s3 + $0xd8] sm:$0xff]  ;;  %v4676_v43 = vld [vmem:[%s8397_s3 + $0xd0] sm:$0xff] }
  0xc5   : > { %v1299_v5 = vadd.f32 %v1283_v10, %v6073_v12  ;;  %v1285_v25 = vmul.f32 %v1244_v55, %v8463_v22  ;;  %v1284_v50 = vmul.f32 %v1239_v8, %v8464_v59  ;;  %3023 = vperm.xlu1 %4835, %v4675_v32   ;;  %3018 = vperm.xlu0 %4834, %v4674_v52  }
  0xc6   : > { %v1298_v63 = vadd.f32 %v1282_v37, %v6088_v19  ;;  %v1444_v29 = vadd.f32 %v1428_v58, %v1402_v56  ;;  %v1642_v31 = vadd.f32 %v1626_v62, %v1584_v48  ;;  %v1668_v12 = vmul.f32 %v5744_v18, %v6146_v16  ;;  %v6369_v37 = vld [vmem:[#allocation2 + $0xa9] sm:$0xff]  ;;  %v8466_v48 = vld [vmem:[#allocation18_spill] sm:$0xff] }
  0xc7   : > { %v1301_v10 = vadd.f32 %v1285_v25, %v6105_v23  ;;  %v1300_v32 = vadd.f32 %v1284_v50, %v8465_v2  ;;  %v1512_v19 = vmul.f32 %v5761_v36, %v6345_v24  ;;  %v1710_v52 = vmul.f32 %v5766_v20, %v6240_v41  ;;  %v8467_v25 = vld [vmem:[#allocation33_spill] sm:$0xff]  ;;  %v8468_v2 = vld [vmem:[#allocation19_spill] sm:$0xff] }
  0xc8   : > { %v1254_v55 = vpop.permute.xlu1 %1253  ;;  %v1249_v8 = vpop.permute.xlu0 %1248  ;;  %v1486_v22 = vadd.f32 %v1470_v21, %v1444_v29  ;;  %v1684_v56 = vadd.f32 %v1668_v12, %v1642_v31  ;;  %v1347_v58 = vmul.f32 %v5693_v47, %v5984_v42  ;;  %v1389_v23 = vmul.f32 %v5698_v4, %v6081_v1  ;;  %v4679_v21 = vld [vmem:[%s8397_s3 + $0xe8] sm:$0xff]  ;;  %v4678_v42 = vld [vmem:[%s8397_s3 + $0xe0] sm:$0xff] }
  0xc9   : > { %v1287_v62 = vmul.f32 %v1254_v55, %v8466_v48  ;;  %3033 = vperm.xlu1 %4835, %v4677_v17   ;;  %3028 = vperm.xlu0 %4834, %v4676_v43   ;;  %v6379_v59 = vadd.f32 %v8467_v25, %v1299_v5  ;;  %v6381_v50 = vadd.f32 %v1753_v7, %v1727_v15  ;;  %v8469_v1 = vld [vmem:[#allocation35_spill] sm:$0xff]  ;;  %v8470_v43 = vld [vmem:[#allocation40_spill] sm:$0xff]  ;;  %v8471_v15 = vld [vmem:[#allocation42_spill] sm:$0xff] }
  0xca   : > { %v1286_v49 = vmul.f32 %v1249_v8, %v8468_v2  ;;  %v6391_v29 = vadd.f32 %v8469_v1, %v1298_v63  ;;  %v1752_v17 = vmul.f32 %v5800_v46, %v6369_v37  ;;  %v1405_v5 = vadd.f32 %v1389_v23, %v1347_v58  ;;  %v1491_v2 = vld [vmem:[#allocation2 + $0xc0] sm:$0xff]  ;;  %v8473_v1 = vld [vmem:[#allocation20_spill] sm:$0xff] }
  0xcb   : > { %v6396_v7 = vadd.f32 %v8470_v43, %v1301_v10  ;;  %v6399_v31 = vadd.f32 %v8471_v15, %v1300_v32  ;;  %v1528_v12 = vadd.f32 %v1512_v19, %v1486_v22  ;;  %v1431_v55 = vmul.f32 %v5705_v13, %v6164_v51  ;;  %v8472_v23 = vld [vmem:[#allocation38_spill] sm:$0xff]  ;;  %v8474_v22 = vld [vmem:[#allocation21_spill] sm:$0xff]  ;;  %v8475_v13 = vld [vmem:[#allocation39_spill] sm:$0xff] }
  0xcc   : > { %v1264_v8 = vpop.permute.xlu1 %1263  ;;  %v1259_v48 = vpop.permute.xlu0 %1258  ;;  %v1726_v25 = vadd.f32 %v1710_v52, %v1684_v56  ;;  %v1473_v63 = vmul.f32 %v5710_v26, %v6277_v45  ;;  %v1587_v58 = vmul.f32 %v5729_v30, %v6001_v11  ;;  %v1629_v10 = vmul.f32 %v5737_v57, %v6100_v33  ;;  %v4681_v26 = vld [vmem:[%s8397_s3 + $0xf8] sm:$0xff]  ;;  %v4680_v11 = vld [vmem:[%s8397_s3 + $0xf0] sm:$0xff]  ;;  %v1731_v15 = vld [vmem:[#allocation2 + $0xc1] sm:$0xff] }
  0xcd   : > { %v1303_v32 = vadd.f32 %v1287_v62, %v8472_v23  ;;  %v1289_v19 = vmul.f32 %v1264_v8, %v8473_v1  ;;  %v1288_v43 = vmul.f32 %v1259_v48, %v8474_v22  ;;  %3043 = vperm.xlu1 %4835, %v4679_v21   ;;  %3038 = vperm.xlu0 %4834, %v4678_v42   ;;  %v8476_v52 = vld [vmem:[#allocation4_spill] sm:$0xff]  ;;  %v8477_v62 = vld [vmem:[#allocation5_spill] sm:$0xff] }
  0xce   : > { %v1302_v51 = vadd.f32 %v1286_v49, %v8475_v13  ;;  %v1447_v30 = vadd.f32 %v1431_v55, %v1405_v5  ;;  %v1645_v33 = vadd.f32 %v1629_v10, %v1587_v58  ;;  %v1671_v45 = vmul.f32 %v5744_v18, %v6179_v53  ;;  %v8478_v53 = vld [vmem:[#allocation22_spill] sm:$0xff]  ;;  %v4924_v58 = vld [vmem:[%s8398_s4 + $0xc] ss:$0 sm:$0xff] }
  0xcf   : > { %v1305_v56 = vadd.f32 %v1289_v19, %v8476_v52  ;;  %v1304_v21 = vadd.f32 %v1288_v43, %v8477_v62  ;;  %v1515_v42 = vmul.f32 %v5761_v36, %v1491_v2  ;;  %v1713_v49 = vmul.f32 %v5766_v20, %v6301_v6  ;;  %v8479_v20 = vld [vmem:[#allocation23_spill] sm:$0xff]  ;;  %v6486_v52 = vld [vmem:[#allocation2 + $0x32] sm:$0xff] }
  0xd0   : > { %v1274_v8 = vpop.permute.xlu1 %1273  ;;  %v1269_v48 = vpop.permute.xlu0 %1268  ;;  %v1489_v23 = vadd.f32 %v1473_v63, %v1447_v30  ;;  %v1687_v1 = vadd.f32 %v1671_v45, %v1645_v33  ;;  %v1346_v5 = vmul.f32 %v5693_v47, %v6033_v39  ;;  %v1388_v18 = vmul.f32 %v5698_v4, %v6115_v54  ;;  %v4703_v63 = vld [vmem:[%s8397_s3 + $0x188] sm:$0xff]  ;;  %v4702_v47 = vld [vmem:[%s8397_s3 + $0x180] sm:$0xff]  ;;  %v8481_v30 = vld [vmem:[#allocation25_spill] sm:$0xff] }
  0xd1   : > { %v1291_v55 = vmul.f32 %v1274_v8, %v8478_v53  ;;  %3053 = vperm.xlu1 %4835, %v4681_v26   ;;  %3048 = vperm.xlu0 %4834, %v4680_v11   ;;  %v6432_v36 = vadd.f32 %v6258_v44, %v1303_v32  ;;  %v6434_v2 = vadd.f32 %v1752_v17, %v1726_v25  ;;  %v1490_v32 = vld [vmem:[#allocation2 + $0xb8] sm:$0xff]  ;;  %v8480_v26 = vld [vmem:[#allocation6_spill] sm:$0xff]  ;;  %v8482_v45 = vld [vmem:[#allocation27_spill] sm:$0xff] }
  0xd2   : > { %v1290_v6 = vmul.f32 %v1269_v48, %v8479_v20  ;;  %v6444_v4 = vadd.f32 %v6273_v27, %v1302_v51  ;;  %v1755_v39 = vmul.f32 %v5800_v46, %v1731_v15  ;;  %v1404_v54 = vadd.f32 %v1388_v18, %v1346_v5  ;;  %v4925_v46 = vld [vmem:[%s8398_s4 + $0x11] ss:$0 sm:$0xff]  ;;  %v6474_v51 = vld [vmem:[%s8398_s4 + $0x9] ss:$0 sm:$0xff]  ;;  %v4927_v8 = vld [vmem:[%s8398_s4 + $0xd] ss:$0 sm:$0xff] }
  0xd3   : > { %v6448_v44 = vadd.f32 %v6341_v34, %v1305_v56  ;;  %v6450_v17 = vadd.f32 %v1528_v12, %v1304_v21  ;;  %v1729_v25 = vadd.f32 %v1713_v49, %v1687_v1  ;;  %v1430_v10 = vmul.f32 %v4924_v58, %v6216_v35  ;;  %v4926_v12 = vld [vmem:[%s8398_s4 + $0x3] ss:$0 sm:$0xff]  ;;  %v6469_v35 = vld [vmem:[%s8398_s4 + $0x4] ss:$0 sm:$0xff]  ;;  %v8483_v56 = vld [vmem:[#allocation7_spill] sm:$0xff] }
  0xd4   : > { %v1797_v19 = vpop.permute.xlu1 %1796  ;;  %v1792_v22 = vpop.permute.xlu0 %1791  ;;  %v1531_v27 = vadd.f32 %v1515_v42, %v1489_v23  ;;  %v1472_v34 = vmul.f32 %v4925_v46, %v6345_v24  ;;  %v1586_v43 = vmul.f32 %v4926_v12, %v6050_v38  ;;  %v1628_v13 = vmul.f32 %v5737_v57, %v6146_v16  ;;  %v1902_v24 = vld [vmem:[#allocation2 + $0x12] sm:$0xff]  ;;  %v6482_v57 = vld [vmem:[%s8398_s4 + $0xe] ss:$0 sm:$0xff]  ;;  %v6484_v16 = vld [vmem:[#allocation2 + $0x22] sm:$0xff] }
  0xd5   : > { %v1307_v11 = vadd.f32 %v1291_v55, %v8480_v26  ;;  %v1870_v33 = vmul.f32 %v1797_v19, %v8481_v30  ;;  %v1869_v38 = vmul.f32 %v1792_v22, %v8482_v45  ;;  %3565 = vperm.xlu1 %4835, %v4703_v63   ;;  %3560 = vperm.xlu0 %4834, %v4702_v47   ;;  %v4705_v21 = vld [vmem:[%s8397_s3 + $0x198] sm:$0xff]  ;;  %v4704_v42 = vld [vmem:[%s8397_s3 + $0x190] sm:$0xff] }
  0xd6   : > { %v6489_v62 = vadd.f32 %v1290_v6, %v8483_v56  ;;  %v1446_v49 = vadd.f32 %v1430_v10, %v1404_v54  ;;  %v1644_v15 = vadd.f32 %v1628_v13, %v1586_v43  ;;  %v1670_v48 = vmul.f32 %v4927_v8, %v6240_v41  ;;  %v4928_v1 = vld [vmem:[%s8398_s4 + $0x16] ss:$0 sm:$0xff]  ;;  %v4929_v18 = vld [vmem:[%s8398_s4 + $0x12] ss:$0 sm:$0xff]  ;;  %v1730_v55 = vld [vmem:[#allocation2 + $0xb9] sm:$0xff] }
  0xd7   : > { %v6501_v23 = vadd.f32 %v1755_v39, %v1729_v25  ;;  %v1514_v5 = vmul.f32 %v4928_v1, %v1490_v32  ;;  %v1712_v53 = vmul.f32 %v4929_v18, %v6369_v37  ;;  %v1926_v20 = vmul.f32 %v6469_v35, %v1902_v24  ;;  %v1901_v6 = vld [vmem:[#allocation2 + $0xa] sm:$0xff]  ;;  %v6514_v54 = vld [vmem:[%s8398_s4 + $0x13] ss:$0 sm:$0xff]  ;;  %v6516_v25 = vld [vmem:[#allocation2 + $0x42] sm:$0xff] }
  0xd8   : > { %v1807_v63 = vpop.permute.xlu1 %1806  ;;  %v1802_v47 = vpop.permute.xlu0 %1801  ;;  %v1488_v41 = vadd.f32 %v1472_v34, %v1446_v49  ;;  %v1686_v39 = vadd.f32 %v1670_v48, %v1644_v15  ;;  %v1968_v58 = vmul.f32 %v6474_v51, %v6484_v16  ;;  %v2010_v37 = vmul.f32 %v6482_v57, %v6486_v52  ;;  %v1903_v10 = vld [vmem:[#allocation2 + $0x1a] sm:$0xff]  ;;  %v6533_v46 = vld [vmem:[%s8398_s4 + $0x18] ss:$0 sm:$0xff]  ;;  %v6537_v12 = vld [vmem:[#allocation2 + $0x2a] sm:$0xff] }
  0xd9   : > { %v6523_v32 = vadd.f32 %v1870_v33, %v6268_v0  ;;  %v6526_v19 = vadd.f32 %v1869_v38, %v6271_v40  ;;  %3575 = vperm.xlu1 %4835, %v4705_v21   ;;  %3570 = vperm.xlu0 %4834, %v4704_v42   ;;  %v6528_v22 = vadd.f32 %v1531_v27, %v1307_v11  ;;  %v6535_v34 = vld [vmem:[#allocation2 + $0x52] sm:$0xff]  ;;  %v8485_v0 = vld [vmem:[#allocation30_spill] sm:$0xff]  ;;  %v4707_v40 = vld [vmem:[%s8397_s3 + $0x1a8] sm:$0xff] }
  0xda   : > { %v8484_v43 = vld [vmem:[#allocation29_spill] sm:$0xff]  ;;  %v1871_v24 = vmul.f32 %v1802_v47, %v8485_v0  ;;  %v4706_v27 = vld [vmem:[%s8397_s3 + $0x1a0] sm:$0xff]  ;;  %v4930_v26 = vld [vmem:[%s8398_s4 + $0x17] ss:$0 sm:$0xff]  ;;  %v1984_v30 = vadd.f32 %v1968_v58, %v1926_v20  ;;  %v1728_v33 = vadd.f32 %v1712_v53, %v1686_v39  ;;  %v2052_v45 = vmul.f32 %v6514_v54, %v6516_v25 }
  0xdb   : > { %v1872_v13 = vmul.f32 %v1807_v63, %v8484_v43  ;;  %v1754_v11 = vmul.f32 %v4930_v26, %v1730_v55  ;;  %v6552_v38 = vld [vmem:[#allocation2 + $0x3a] sm:$0xff]  ;;  %v1925_v56 = vmul.f32 %v6469_v35, %v1901_v6  ;;  %v1967_v21 = vmul.f32 %v6474_v51, %v1903_v10  ;;  %v8486_v18 = vld [vmem:[#allocation31_spill] sm:$0xff]  ;;  %v8487_v55 = vld [vmem:[#allocation32_spill] sm:$0xff] }
  0xdc   : > { %v1817_v42 = vpop.permute.xlu1 %1816  ;;  %v1812_v49 = vpop.permute.xlu0 %1811  ;;  %v6556_v15 = vadd.f32 %v1514_v5, %v1488_v41  ;;  %v2026_v8 = vadd.f32 %v2010_v37, %v1984_v30  ;;  %v2094_v48 = vmul.f32 %v6533_v46, %v6535_v34  ;;  %v2009_v1 = vmul.f32 %v6482_v57, %v6537_v12  ;;  %v6564_v6 = vld [vmem:[#allocation2 + $0x4a] sm:$0xff]  ;;  %v4709_v41 = vld [vmem:[%s8397_s3 + $0x1b8] sm:$0xff]  ;;  %v6594_v30 = vld [vmem:[#allocation2 + $0x62] sm:$0xff] }
  0xdd   : > { %v1874_v53 = vmul.f32 %v1817_v42, %v8486_v18  ;;  %v1873_v20 = vmul.f32 %v1812_v49, %v8487_v55  ;;  %3585 = vperm.xlu1 %4835, %v4707_v40   ;;  %3580 = vperm.xlu0 %4834, %v4706_v27   ;;  %v1983_v63 = vadd.f32 %v1967_v21, %v1925_v56  ;;  %v4708_v39 = vld [vmem:[%s8397_s3 + $0x1b0] sm:$0xff]  ;;  %v4710_v21 = vld [vmem:[%s8397_s3 + $0x1c0] sm:$0xff] }
  0xde   : > { %v6567_v47 = vadd.f32 %v1872_v13, %v6319_v61  ;;  %v6570_v5 = vadd.f32 %v1871_v24, %v6331_v3  ;;  %v2051_v58 = vmul.f32 %v6514_v54, %v6552_v38  ;;  %v1928_v37 = vmul.f32 %v6469_v35, %v6484_v16 }
  0xdf   : > { %v6582_v43 = vadd.f32 %v1754_v11, %v1728_v33  ;;  %v2068_v61 = vadd.f32 %v2052_v45, %v2026_v8  ;;  %v2025_v13 = vadd.f32 %v2009_v1, %v1983_v63  ;;  %v1970_v3 = vmul.f32 %v6474_v51, %v6486_v52  ;;  %v8488_v11 = vld [vmem:[#allocation34_spill] sm:$0xff]  ;;  %v8489_v45 = vld [vmem:[#allocation37_spill] sm:$0xff] }
  0xe0   : > { %v6587_v0 = vadd.f32 %v1874_v53, %v6336_v14  ;;  %v6590_v24 = vadd.f32 %v1873_v20, %v6339_v9  ;;  %v1827_v40 = vpop.permute.xlu1 %1826  ;;  %v1822_v27 = vpop.permute.xlu0 %1821  ;;  %v2093_v26 = vmul.f32 %v6533_v46, %v6564_v6  ;;  %v2012_v16 = vmul.f32 %v6482_v57, %v6516_v25  ;;  %v4711_v9 = vld [vmem:[%s8397_s3 + $0x1c8] sm:$0xff] }
  0xe1   : > { %v1876_v33 = vmul.f32 %v1827_v40, %v8488_v11  ;;  %v1875_v56 = vmul.f32 %v1822_v27, %v8489_v45  ;;  %3595 = vperm.xlu1 %4835, %v4709_v41   ;;  %3590 = vperm.xlu0 %4834, %v4708_v39   ;;  %v2067_v14 = vadd.f32 %v2051_v58, %v2025_v13  ;;  %v6620_v39 = vld [vmem:[#allocation2 + $0x5a] sm:$0xff] }
  0xe2   : > { %v1986_v42 = vadd.f32 %v1970_v3, %v1928_v37  ;;  %v1927_v49 = vmul.f32 %v6469_v35, %v1903_v10  ;;  %v1969_v8 = vmul.f32 %v6474_v51, %v6537_v12  ;;  %v2011_v1 = vmul.f32 %v6482_v57, %v6552_v38  ;;  %v4713_v27 = vld [vmem:[%s8397_s3 + $0x1d8] sm:$0xff] }
  0xe3   : > { %v6612_v18 = vadd.f32 %v1876_v33, %v6379_v59  ;;  %v6614_v53 = vadd.f32 %v2094_v48, %v2068_v61  ;;  %v2054_v55 = vmul.f32 %v6514_v54, %v6535_v34  ;;  %v2096_v20 = vmul.f32 %v6533_v46, %v6594_v30  ;;  %v8490_v61 = vld [vmem:[#allocation41_spill] sm:$0xff] }
  0xe4   : > { %v1837_v63 = vpop.permute.xlu1 %1836  ;;  %v1832_v41 = vpop.permute.xlu0 %1831  ;;  %v2028_v10 = vadd.f32 %v2012_v16, %v1986_v42  ;;  %v1985_v58 = vadd.f32 %v1969_v8, %v1927_v49  ;;  %v2053_v37 = vmul.f32 %v6514_v54, %v6564_v6  ;;  %v1930_v59 = vmul.f32 %v6469_v35, %v6486_v52  ;;  %v4712_v52 = vld [vmem:[%s8397_s3 + $0x1d0] sm:$0xff] }
  0xe5   : > { %v6627_v48 = vadd.f32 %v1875_v56, %v6391_v29  ;;  %v1878_v13 = vmul.f32 %v1837_v63, %v8490_v61  ;;  %3605 = vperm.xlu1 %4835, %v4711_v9   ;;  %3600 = vperm.xlu0 %4834, %v4710_v21   ;;  %v1972_v3 = vmul.f32 %v6474_v51, %v6516_v25  ;;  %v6645_v56 = vld [vmem:[#allocation2 + $0x72] sm:$0xff] }
  0xe6   : > { %v1877_v40 = vmul.f32 %v1832_v41, %v6256_v60  ;;  %v6639_v16 = vadd.f32 %v2093_v26, %v2067_v14  ;;  %v2027_v29 = vadd.f32 %v2011_v1, %v1985_v58  ;;  %v2014_v11 = vmul.f32 %v6482_v57, %v6535_v34 }
  0xe7   : > { %v2070_v33 = vadd.f32 %v2054_v55, %v2028_v10  ;;  %v2095_v45 = vmul.f32 %v6533_v46, %v6620_v39  ;;  %v1988_v60 = vadd.f32 %v1972_v3, %v1930_v59  ;;  %v2056_v9 = vmul.f32 %v6514_v54, %v6594_v30  ;;  %v8491_v55 = vld [vmem:[#allocation8_spill] sm:$0xff] }
  0xe8   : > { %v6650_v21 = vadd.f32 %v1878_v13, %v6396_v7  ;;  %v1847_v42 = vpop.permute.xlu1 %1846  ;;  %v1842_v26 = vpop.permute.xlu0 %1841  ;;  %v2069_v14 = vadd.f32 %v2053_v37, %v2027_v29  ;;  %v1929_v49 = vmul.f32 %v6469_v35, %v6537_v12  ;;  %v1971_v8 = vmul.f32 %v6474_v51, %v6552_v38  ;;  %v4715_v7 = vld [vmem:[%s8397_s3 + $0x1e8] sm:$0xff]  ;;  %v4714_v12 = vld [vmem:[%s8397_s3 + $0x1e0] sm:$0xff] }
  0xe9   : > { %v1880_v1 = vmul.f32 %v1847_v42, %v6261_v28  ;;  %v1879_v63 = vmul.f32 %v1842_v26, %v8491_v55  ;;  %3615 = vperm.xlu1 %4835, %v4713_v27   ;;  %3610 = vperm.xlu0 %4834, %v4712_v52   ;;  %v2030_v41 = vadd.f32 %v2014_v11, %v1988_v60  ;;  %v6675_v13 = vld [vmem:[#allocation2 + $0x6a] sm:$0xff]  ;;  %v4717_v42 = vld [vmem:[%s8397_s3 + $0x1f8] sm:$0xff] }
  0xea   : > { %v6659_v10 = vadd.f32 %v1877_v40, %v6399_v31  ;;  %v2098_v58 = vmul.f32 %v6533_v46, %v6645_v56  ;;  %v1987_v28 = vadd.f32 %v1971_v8, %v1929_v49  ;;  %v2013_v37 = vmul.f32 %v6482_v57, %v6564_v6 }
  0xeb   : > { %v6671_v59 = vadd.f32 %v2096_v20, %v2070_v33  ;;  %v6673_v61 = vadd.f32 %v2095_v45, %v2069_v14  ;;  %v2072_v31 = vadd.f32 %v2056_v9, %v2030_v41  ;;  %v2055_v3 = vmul.f32 %v6514_v54, %v6620_v39  ;;  %v6692_v9 = vld [vmem:[#allocation2 + $0x82] sm:$0xff] }
  0xec   : > { %v1857_v40 = vpop.permute.xlu1 %1856  ;;  %v1852_v27 = vpop.permute.xlu0 %1851  ;;  %v2029_v52 = vadd.f32 %v2013_v37, %v1987_v28  ;;  %v1932_v29 = vmul.f32 %v6469_v35, %v6516_v25  ;;  %v1974_v11 = vmul.f32 %v6474_v51, %v6535_v34  ;;  %v2016_v20 = vmul.f32 %v6482_v57, %v6594_v30 }
  0xed   : > { %v6686_v33 = vadd.f32 %v1880_v1, %v6432_v36  ;;  %v6689_v45 = vadd.f32 %v1879_v63, %v6444_v4  ;;  %v1882_v60 = vmul.f32 %v1857_v40, %v6381_v50  ;;  %3625 = vperm.xlu1 %4835, %v4715_v7   ;;  %3620 = vperm.xlu0 %4834, %v4714_v12   ;;  %v4716_v36 = vld [vmem:[%s8397_s3 + $0x1f0] sm:$0xff]  ;;  %v6718_v12 = vld [vmem:[#allocation2 + $0x7a] sm:$0xff] }
  0xee   : > { %v1881_v25 = vmul.f32 %v1852_v27, %v6434_v2  ;;  %v2097_v4 = vmul.f32 %v6533_v46, %v6675_v13  ;;  %v1990_v26 = vadd.f32 %v1974_v11, %v1932_v29  ;;  %v2058_v50 = vmul.f32 %v6514_v54, %v6645_v56 }
  0xef   : > { %v6705_v14 = vadd.f32 %v2098_v58, %v2072_v31  ;;  %v2071_v49 = vadd.f32 %v2055_v3, %v2029_v52  ;;  %v1931_v2 = vmul.f32 %v6469_v35, %v6552_v38  ;;  %v1973_v8 = vmul.f32 %v6474_v51, %v6564_v6  ;;  %v4729_v31 = vld [vmem:[%s8397_s3 + $0x208] sm:$0xff]  ;;  %v4728_v3 = vld [vmem:[%s8397_s3 + $0x200] sm:$0xff] }
  0xf0   : > { %v6712_v1 = vadd.f32 %v1882_v60, %v6448_v44  ;;  %v1867_v55 = vpop.permute.xlu1 %1866  ;;  %v6714_v63 = vpop.permute.xlu0 %1861  ;;  %v2032_v41 = vadd.f32 %v2016_v20, %v1990_v26  ;;  %v2100_v7 = vmul.f32 %v6533_v46, %v6692_v9  ;;  %v2015_v58 = vmul.f32 %v6482_v57, %v6620_v39 }
  0xf1   : > { %v1884_v38 = vmul.f32 %v1867_v55, %v6501_v23  ;;  %3635 = vperm.xlu1 %4835, %v4717_v42   ;;  %3630 = vperm.xlu0 %4834, %v4716_v36   ;;  %v1989_v28 = vadd.f32 %v1973_v8, %v1931_v2  ;;  %v2057_v44 = vmul.f32 %v6514_v54, %v6675_v13  ;;  %v4731_v2 = vld [vmem:[%s8397_s3 + $0x218] sm:$0xff] }
  0xf2   : > { %v6726_v37 = vadd.f32 %v1881_v25, %v6450_v17  ;;  %v2074_v40 = vadd.f32 %v2058_v50, %v2032_v41  ;;  %v1934_v23 = vmul.f32 %v6469_v35, %v6535_v34  ;;  %v1976_v27 = vmul.f32 %v6474_v51, %v6594_v30  ;;  %v6749_v34 = vld [vmem:[#allocation2 + $0x92] sm:$0xff] }
  0xf3   : > { %v6738_v52 = vadd.f32 %v2097_v4, %v2071_v49  ;;  %v2031_v29 = vadd.f32 %v2015_v58, %v1989_v28  ;;  %v2099_v17 = vmul.f32 %v6533_v46, %v6718_v12  ;;  %v2018_v11 = vmul.f32 %v6482_v57, %v6645_v56  ;;  %v4730_v58 = vld [vmem:[%s8397_s3 + $0x210] sm:$0xff] }
  0xf4   : > { %v6745_v20 = vadd.f32 %v1884_v38, %v6528_v22  ;;  %v2150_v60 = vpop.permute.xlu1 %2149  ;;  %v2145_v25 = vpop.permute.xlu0 %2144  ;;  %v6747_v42 = vadd.f32 %v2100_v7, %v2074_v40  ;;  %v1992_v36 = vadd.f32 %v1976_v27, %v1934_v23  ;;  %v2060_v4 = vmul.f32 %v6514_v54, %v6692_v9  ;;  %v6758_v22 = vld [vmem:[%s8399_s5] ss:$0 sm:$0xff] }
  0xf5   : > { %v2223_v26 = vmul.f32 %v2150_v60, %v6614_v53  ;;  %v2222_v50 = vmul.f32 %v2145_v25, %v6639_v16  ;;  %3912 = vperm.xlu1 %4835, %v4729_v31   ;;  %3907 = vperm.xlu0 %4834, %v4728_v3   ;;  %v2073_v49 = vadd.f32 %v2057_v44, %v2031_v29  ;;  %v6776_v44 = vld [vmem:[#allocation2 + $0x8a] sm:$0xff] }
  0xf6   : > { %v2034_v8 = vadd.f32 %v2018_v11, %v1992_v36  ;;  %v1933_v55 = vmul.f32 %v6469_v35, %v6564_v6  ;;  %v1975_v53 = vmul.f32 %v6474_v51, %v6620_v39  ;;  %v2017_v16 = vmul.f32 %v6482_v57, %v6675_v13  ;;  %v6781_v6 = vld [vmem:[%s8400_s6] ss:$0 sm:$0xff]  ;;  %v4733_v60 = vld [vmem:[%s8397_s3 + $0x228] sm:$0xff] }
  0xf7   : > { %v2239_v41 = vadd.f32 %v2223_v26, %v6523_v32  ;;  %v2238_v7 = vadd.f32 %v2222_v50, %v6526_v19  ;;  %v2115_v38 = vadd.f32 %v2099_v17, %v2073_v49  ;;  %v2102_v28 = vmul.f32 %v6533_v46, %v6749_v34 }
  0xf8   : > { %v2160_v31 = vpop.permute.xlu1 %2159  ;;  %v2155_v3 = vpop.permute.xlu0 %2154  ;;  %v2076_v32 = vadd.f32 %v2060_v4, %v2034_v8  ;;  %v1991_v40 = vadd.f32 %v1975_v53, %v1933_v55  ;;  %v2059_v19 = vmul.f32 %v6514_v54, %v6718_v12  ;;  %v1936_v23 = vmul.f32 %v6469_v35, %v6594_v30  ;;  %v6798_v4 = vld [vmem:[#allocation2 + $0xa2] sm:$0xff] }
  0xf9   : > { %v2261_v27 = vmul.f32 %v6758_v22, %v2239_v41  ;;  %v2260_v29 = vmul.f32 %v6758_v22, %v2238_v7  ;;  %v2225_v17 = vmul.f32 %v2160_v31, %v6671_v59  ;;  %v2224_v11 = vmul.f32 %v2155_v3, %v6673_v61  ;;  %3922 = vperm.xlu1 %4835, %v4731_v2   ;;  %v4732_v2 = vld [vmem:[%s8397_s3 + $0x220] sm:$0xff] }
  0xfa   : > { %3917 = vperm.xlu0 %4834, %v4730_v58   ;;  %v2033_v25 = vadd.f32 %v2017_v16, %v1991_v40  ;;  %v2101_v36 = vmul.f32 %v6533_v46, %v6776_v44  ;;  %v1978_v30 = vmul.f32 %v6474_v51, %v6645_v56  ;;  %v2020_v59 = vmul.f32 %v6482_v57, %v6692_v9 }
  0xfb   : > { %v2283_v61 = vadd.f32 %v6781_v6, %v2261_v27  ;;  %v2282_v26 = vadd.f32 %v6781_v6, %v2260_v29  ;;  %v2241_v50 = vadd.f32 %v2225_v17, %v6567_v47  ;;  %v2240_v49 = vadd.f32 %v2224_v11, %v6570_v5 }
  0xfc   : > { %v2170_v8 = vpop.permute.xlu1 %2169  ;;  %v2165_v55 = vpop.permute.xlu0 %2164  ;;  %v2118_v53 = vadd.f32 %v2102_v28, %v2076_v32  ;;  %v2075_v16 = vadd.f32 %v2059_v19, %v2033_v25  ;;  %v1994_v41 = vadd.f32 %v1978_v30, %v1936_v23  ;;  %v2062_v7 = vmul.f32 %v6514_v54, %v6749_v34  ;;  %v4735_v32 = vld [vmem:[%s8397_s3 + $0x238] sm:$0xff]  ;;  %v4734_v23 = vld [vmem:[%s8397_s3 + $0x230] sm:$0xff] }
  0xfd   : > { %v6811_v58 = vmul.f32 0.5, %v2283_v61  ;;  %v2315_v31 = vmul.f32 0.70710677, %v2283_v61  ;;  %v2314_v3 = vmul.f32 0.70710677, %v2282_v26  ;;  %3932 = vperm.xlu1 %4835, %v4733_v60   ;;  %v2104_v47 = vmul.f32 %v6533_v46, %v6798_v4 }
  0xfe   : > { %v2263_v5 = vmul.f32 %v6758_v22, %v2241_v50  ;;  %v2262_v40 = vmul.f32 %v6758_v22, %v2240_v49  ;;  %v2227_v27 = vmul.f32 %v2170_v8, %v6705_v14  ;;  %v2226_v28 = vmul.f32 %v2165_v55, %v6738_v52  ;;  %3927 = vperm.xlu0 %4834, %v4732_v2   ;;  %v4737_v2 = vld [vmem:[%s8397_s3 + $0x248] sm:$0xff]  ;;  %v4736_v55 = vld [vmem:[%s8397_s3 + $0x240] sm:$0xff] }
  0xff   : > { %4836 = verf.f32 %v2315_v31  ;;  %v6822_v19 = vmul.f32 0.5, %v2282_v26  ;;  %v2117_v29 = vadd.f32 %v2101_v36, %v2075_v16  ;;  %v2036_v17 = vadd.f32 %v2020_v59, %v1994_v41 }
 0x100   : > { %4838 = verf.f32 %v2314_v3  ;;  %v2285_v11 = vadd.f32 %v6781_v6, %v2263_v5  ;;  %v2284_v14 = vadd.f32 %v6781_v6, %v2262_v40  ;;  %v2243_v52 = vadd.f32 %v2227_v27, %v6587_v0  ;;  %v2180_v60 = vpop.permute.xlu1 %2179  ;;  %v2175_v25 = vpop.permute.xlu0 %2174 }
 0x101   : > { %v2242_v30 = vadd.f32 %v2226_v28, %v6590_v24  ;;  %v2229_v61 = vmul.f32 %v2180_v60, %v6747_v42  ;;  %v2228_v26 = vmul.f32 %v2175_v25, %v2115_v38  ;;  %3942 = vperm.xlu1 %4835, %v4735_v32   ;;  %v2078_v50 = vadd.f32 %v2062_v7, %v2036_v17  ;;  %v4739_v28 = vld [vmem:[%s8397_s3 + $0x258] sm:$0xff]  ;;  %v4738_v32 = vld [vmem:[%s8397_s3 + $0x250] sm:$0xff] }
 0x102   : > { %v6832_v49 = vmul.f32 0.5, %v2285_v11  ;;  %v2317_v36 = vmul.f32 0.70710677, %v2285_v11  ;;  %v2316_v59 = vmul.f32 0.70710677, %v2284_v14  ;;  %3937 = vperm.xlu0 %4834, %v4734_v23   ;;  %v1935_v0 = vmul.f32 %v6469_v35, %v6620_v39 }
 0x103   : > { %v2265_v24 = vmul.f32 %v6758_v22, %v2243_v52  ;;  %v2264_v42 = vmul.f32 %v6758_v22, %v2242_v30  ;;  %v2245_v38 = vadd.f32 %v2229_v61, %v6612_v18  ;;  %v2244_v8 = vadd.f32 %v2228_v26, %v6627_v48 }
 0x104   : > { %4840 = verf.f32 %v2317_v36  ;;  %v2190_v16 = vpop.permute.xlu1 %2189  ;;  %v2185_v41 = vpop.permute.xlu0 %2184  ;;  %v2120_v7 = vadd.f32 %v2104_v47, %v2078_v50  ;;  %v1977_v39 = vmul.f32 %v6474_v51, %v6675_v13  ;;  %v2019_v31 = vmul.f32 %v6482_v57, %v6718_v12 }
 0x105   : > { %4842 = verf.f32 %v2316_v59  ;;  %v2287_v3 = vadd.f32 %v6781_v6, %v2265_v24  ;;  %v2286_v18 = vadd.f32 %v6781_v6, %v2264_v42  ;;  %v2267_v48 = vmul.f32 %v6758_v22, %v2245_v38  ;;  %3952 = vperm.xlu1 %4835, %v4737_v2  }
 0x106   : > { %v2266_v5 = vmul.f32 %v6758_v22, %v2244_v8  ;;  %v2231_v40 = vmul.f32 %v2190_v16, %v2118_v53  ;;  %v2230_v47 = vmul.f32 %v2185_v41, %v2117_v29  ;;  %3947 = vperm.xlu0 %4834, %v4736_v55   ;;  %v1993_v27 = vadd.f32 %v1977_v39, %v1935_v0  ;;  %v6881_v8 = vld [vmem:[#allocation2 + $0x9a] sm:$0xff] }
 0x107   : > { %v6863_v23 = vmul.f32 0.5, %v2284_v14  ;;  %v6865_v17 = vmul.f32 0.5, %v2287_v3  ;;  %v2319_v11 = vmul.f32 0.70710677, %v2287_v3  ;;  %v2318_v52 = vmul.f32 0.70710677, %v2286_v18 }
 0x108   : > { %v2289_v60 = vadd.f32 %v6781_v6, %v2267_v48  ;;  %v2288_v53 = vadd.f32 %v6781_v6, %v2266_v5  ;;  %v2247_v29 = vadd.f32 %v2231_v40, %v6650_v21  ;;  %v2246_v25 = vadd.f32 %v2230_v47, %v6659_v10  ;;  %v2200_v30 = vpop.permute.xlu1 %2199  ;;  %v4741_v21 = vld [vmem:[%s8397_s3 + $0x268] sm:$0xff]  ;;  %v4740_v55 = vld [vmem:[%s8397_s3 + $0x260] sm:$0xff]  ;;  %v4743_v5 = vld [vmem:[%s8397_s3 + $0x278] sm:$0xff] }
 0x109   : > { %v4837_v61 = vpop.eup %4836  ;;  %4844 = verf.f32 %v2319_v11  ;;  %v2233_v26 = vmul.f32 %v2200_v30, %v2120_v7  ;;  %v2035_v50 = vadd.f32 %v2019_v31, %v1993_v27  ;;  %v2061_v14 = vmul.f32 %v6514_v54, %v6776_v44  ;;  %3962 = vperm.xlu1 %4835, %v4739_v28   ;;  %v4742_v11 = vld [vmem:[%s8397_s3 + $0x270] sm:$0xff] }
 0x10a   : > { %v4839_v36 = vpop.eup %4838  ;;  %v2347_v59 = vadd.f32 1.0, %v4837_v61  ;;  %v6873_v2 = vmul.f32 0.5, %v2286_v18  ;;  %4846 = verf.f32 %v2318_v52  ;;  %v2321_v0 = vmul.f32 0.70710677, %v2289_v60  ;;  %3957 = vperm.xlu0 %4834, %v4738_v32   ;;  %v2042_v30 = vld [vmem:[#allocation2 + $0xb2] sm:$0xff] }
 0x10b   : > { %v2346_v10 = vadd.f32 1.0, %v4839_v36  ;;  %v6878_v24 = vmul.f32 0.5, %v2289_v60  ;;  %v2320_v42 = vmul.f32 0.70710677, %v2288_v53  ;;  %v2269_v38 = vmul.f32 %v6758_v22, %v2247_v29 }
 0x10c   : > { %v2363_v16 = vmul.f32 %v2347_v59, %v6811_v58  ;;  %4848 = verf.f32 %v2321_v0  ;;  %v2268_v41 = vmul.f32 %v6758_v22, %v2246_v25  ;;  %v2249_v7 = vadd.f32 %v2233_v26, %v6686_v33  ;;  %v2195_v25 = vpop.permute.xlu0 %2194 }
 0x10d   : > { %v2362_v39 = vmul.f32 %v2346_v10, %v6822_v19  ;;  %4850 = verf.f32 %v2320_v42  ;;  %v2291_v31 = vadd.f32 %v6781_v6, %v2269_v38  ;;  %v2077_v3 = vadd.f32 %v2061_v14, %v2035_v50  ;;  %3972 = vperm.xlu1 %4835, %v4741_v21   ;;  %v6923_v42 = vld [vmem:[#allocation2 + $0xaa] sm:$0xff] }
 0x10e   : > { %v4841_v18 = vpop.eup %4840  ;;  %2379 = vst [vmem:[%s6892_s7 + $0x8] sm:$0xff] %v2363_v16  ;;  %v2290_v58 = vadd.f32 %v6781_v6, %v2268_v41  ;;  %v2271_v48 = vmul.f32 %v6758_v22, %v2249_v7  ;;  %v2103_v33 = vmul.f32 %v6533_v46, %v6881_v8  ;;  %v1938_v19 = vmul.f32 %v6469_v35, %v6645_v56 }
 0x10f   : > { %3967 = vperm.xlu0 %4834, %v4740_v55   ;;  %v4843_v40 = vpop.eup %4842  ;;  %2378 = vst [vmem:[%s6892_s7] sm:$0xff] %v2362_v39  ;;  %v2349_v47 = vadd.f32 1.0, %v4841_v18  ;;  %v2304_v27 = vmul.f32 0.5, %v2288_v53  ;;  %v2323_v28 = vmul.f32 0.70710677, %v2291_v31  ;;  %v1980_v32 = vmul.f32 %v6474_v51, %v6692_v9 }
 0x110   : > { %v2348_v52 = vadd.f32 1.0, %v4843_v40  ;;  %v6910_v60 = vmul.f32 0.5, %v2291_v31  ;;  %v2322_v56 = vmul.f32 0.70710677, %v2290_v58  ;;  %v2293_v29 = vadd.f32 %v6781_v6, %v2271_v48  ;;  %v2210_v40 = vpop.permute.xlu1 %2209 }
 0x111   : > { %v2365_v61 = vmul.f32 %v2349_v47, %v6832_v49  ;;  %4852 = verf.f32 %v2323_v28  ;;  %v2119_v53 = vadd.f32 %v2103_v33, %v2077_v3  ;;  %v1996_v26 = vadd.f32 %v1980_v32, %v1938_v19  ;;  %3982 = vperm.xlu1 %4835, %v4743_v5  }
 0x112   : > { %v2364_v50 = vmul.f32 %v2348_v52, %v6863_v23  ;;  %v6915_v14 = vmul.f32 0.5, %v2290_v58  ;;  %4854 = verf.f32 %v2322_v56  ;;  %v2325_v36 = vmul.f32 0.70710677, %v2293_v29  ;;  %v2084_v52 = vld [vmem:[#allocation2 + $0xc2] sm:$0xff] }
 0x113   : > { %3977 = vperm.xlu0 %4834, %v4742_v11   ;;  %v4845_v59 = vpop.eup %4844  ;;  %2381 = vst [vmem:[%s6892_s7 + $0x18] sm:$0xff] %v2365_v61  ;;  %v2232_v0 = vmul.f32 %v2195_v25, %v2119_v53  ;;  %v2022_v21 = vmul.f32 %v6482_v57, %v6749_v34  ;;  %v2064_v49 = vmul.f32 %v6514_v54, %v6798_v4  ;;  %v2205_v61 = vpop.permute.xlu0 %2204 }
 0x114   : > { %v2106_v10 = vmul.f32 %v6533_v46, %v2042_v30  ;;  %v4847_v38 = vpop.eup %4846  ;;  %2380 = vst [vmem:[%s6892_s7 + $0x10] sm:$0xff] %v2364_v50  ;;  %v2351_v23 = vadd.f32 1.0, %v4845_v59  ;;  %4856 = verf.f32 %v2325_v36  ;;  %v1937_v55 = vmul.f32 %v6469_v35, %v6675_v13 }
 0x115   : > { %v1979_v16 = vmul.f32 %v6474_v51, %v6718_v12  ;;  %v2350_v41 = vadd.f32 1.0, %v4847_v38  ;;  %v2248_v7 = vadd.f32 %v2232_v0, %v6689_v45  ;;  %v2038_v39 = vadd.f32 %v2022_v21, %v1996_v26 }
 0x116   : > { %v2021_v31 = vmul.f32 %v6482_v57, %v6776_v44  ;;  %v4849_v3 = vpop.eup %4848  ;;  %v2367_v18 = vmul.f32 %v2351_v23, %v6865_v17  ;;  %v2063_v48 = vmul.f32 %v6514_v54, %v6881_v8  ;;  %v2105_v13 = vmul.f32 %v6533_v46, %v6923_v42 }
 0x117   : > { %v1995_v58 = vadd.f32 %v1979_v16, %v1937_v55  ;;  %v4851_v33 = vpop.eup %4850  ;;  %v2366_v19 = vmul.f32 %v2350_v41, %v6873_v2  ;;  %v2353_v5 = vadd.f32 1.0, %v4849_v3  ;;  %v2270_v45 = vmul.f32 %v6758_v22, %v2248_v7  ;;  %v2220_v55 = vpop.permute.xlu1 %2219  ;;  %v2083_v16 = vld [vmem:[#allocation2 + $0xba] sm:$0xff] }
 0x118   : > { %v2080_v47 = vadd.f32 %v2064_v49, %v2038_v39  ;;  %2383 = vst [vmem:[%s6892_s7 + $0x28] sm:$0xff] %v2367_v18  ;;  %v2352_v28 = vadd.f32 1.0, %v4851_v33  ;;  %v1940_v32 = vmul.f32 %v6469_v35, %v6692_v9  ;;  %v1982_v11 = vmul.f32 %v6474_v51, %v6749_v34  ;;  %v2215_v18 = vpop.permute.xlu0 %2214 }
 0x119   : > { %v2037_v17 = vadd.f32 %v2021_v31, %v1995_v58  ;;  %2382 = vst [vmem:[%s6892_s7 + $0x20] sm:$0xff] %v2366_v19  ;;  %v2369_v56 = vmul.f32 %v2353_v5, %v6878_v24  ;;  %v6948_v2 = vadd.f32 %v6781_v6, %v2270_v45  ;;  %v2024_v53 = vmul.f32 %v6482_v57, %v6798_v4 }
 0x11a   : > { %v2122_v25 = vadd.f32 %v2106_v10, %v2080_v47  ;;  %v2368_v26 = vmul.f32 %v2352_v28, %v2304_v27  ;;  %v1998_v36 = vadd.f32 %v1982_v11, %v1940_v32  ;;  %v2066_v9 = vmul.f32 %v6514_v54, %v2042_v30  ;;  %v2394_v11 = vld [vmem:[#allocation2 + $0x86] sm:$0xff] }
 0x11b   : > { %v2079_v50 = vadd.f32 %v2063_v48, %v2037_v17  ;;  %v4853_v59 = vpop.eup %4852  ;;  %2385 = vst [vmem:[%s6892_s7 + $0x38] sm:$0xff] %v2369_v56  ;;  %v2309_v34 = vmul.f32 0.5, %v2293_v29  ;;  %v2324_v0 = vmul.f32 0.70710677, %v6948_v2  ;;  %v2108_v21 = vmul.f32 %v6533_v46, %v2084_v52  ;;  %v6982_v48 = vld [vmem:[#allocation2 + $0xae] sm:$0xff]  ;;  %v2396_v52 = vld [vmem:[#allocation2 + $0x96] sm:$0xff] }
 0x11c   : > { %v2235_v24 = vmul.f32 %v2210_v40, %v2122_v25  ;;  %v4855_v49 = vpop.eup %4854  ;;  %2384 = vst [vmem:[%s6892_s7 + $0x30] sm:$0xff] %v2368_v26  ;;  %v2355_v10 = vadd.f32 1.0, %v4853_v59  ;;  %v2040_v23 = vadd.f32 %v2024_v53, %v1998_v36  ;;  %v1939_v4 = vmul.f32 %v6469_v35, %v6718_v12  ;;  %v6968_v35 = vld [vmem:[%s8398_s4] ss:$0 sm:$0xff]  ;;  %v7002_v56 = vld [vmem:[%s8398_s4 + $0xf] ss:$0 sm:$0xff]  ;;  %v7004_v25 = vpop.permute.xlu1 %2636 }
 0x11d   : > { %v2121_v38 = vadd.f32 %v2105_v13, %v2079_v50  ;;  %v2354_v27 = vadd.f32 1.0, %v4855_v49  ;;  %4858 = verf.f32 %v2324_v0  ;;  %v1981_v29 = vmul.f32 %v6474_v51, %v6776_v44  ;;  %v6973_v51 = vld [vmem:[%s8398_s4 + $0x5] ss:$0 sm:$0xff]  ;;  %v7012_v36 = vpop.permute.xlu0 %2631 }
 0x11e   : > { %v2251_v30 = vadd.f32 %v2235_v24, %v6712_v1  ;;  %v4857_v41 = vpop.eup %4856  ;;  %v2371_v7 = vmul.f32 %v2355_v10, %v6910_v60  ;;  %v2082_v31 = vadd.f32 %v2066_v9, %v2040_v23  ;;  %v2023_v3 = vmul.f32 %v6482_v57, %v6881_v8  ;;  %v2395_v1 = vld [vmem:[#allocation2 + $0x8e] sm:$0xff]  ;;  %v6980_v57 = vld [vmem:[%s8398_s4 + $0xa] ss:$0 sm:$0xff]  ;;  %v2397_v8 = vld [vmem:[#allocation2 + $0x9e] sm:$0xff] }
 0x11f   : > { %v2234_v39 = vmul.f32 %v2205_v61, %v2121_v38  ;;  %v2370_v12 = vmul.f32 %v2354_v27, %v6915_v14  ;;  %v2357_v44 = vadd.f32 1.0, %v4857_v41  ;;  %v1997_v58 = vadd.f32 %v1981_v29, %v1939_v4  ;;  %v7006_v61 = vld [vmem:[#allocation2 + $0xbe] sm:$0xff]  ;;  %v7022_v10 = vld [vmem:[%s8398_s4 + $0x14] ss:$0 sm:$0xff] }
 0x120   : > { %v2273_v60 = vmul.f32 %v6758_v22, %v2251_v30  ;;  %2387 = vst [vmem:[%s6892_s7 + $0x48] sm:$0xff] %v2371_v7  ;;  %v2124_v33 = vadd.f32 %v2108_v21, %v2082_v31  ;;  %v2065_v14 = vmul.f32 %v6514_v54, %v6923_v42  ;;  %v2107_v19 = vmul.f32 %v6533_v46, %v2083_v16  ;;  %v7024_v38 = vld [vmem:[#allocation2 + $0xce] sm:$0xff]  ;;  %v7031_v41 = vpop.permute.xlu1 %2646 }
 0x121   : > { %v2250_v13 = vadd.f32 %v2234_v39, %v6726_v37  ;;  %2386 = vst [vmem:[%s6892_s7 + $0x40] sm:$0xff] %v2370_v12  ;;  %v2373_v5 = vmul.f32 %v2357_v44, %v2309_v34  ;;  %v2039_v40 = vadd.f32 %v2023_v3, %v1997_v58  ;;  %v2418_v47 = vmul.f32 %v6968_v35, %v2395_v1  ;;  %v7037_v12 = vld [vmem:[#allocation2 + $0xc6] sm:$0xff] }
 0x122   : > { %v2295_v45 = vadd.f32 %v6781_v6, %v2273_v60  ;;  %v2237_v17 = vmul.f32 %v2220_v55, %v2124_v33  ;;  %v2459_v32 = vmul.f32 %v6973_v51, %v2397_v8  ;;  %v2500_v37 = vmul.f32 %v6980_v57, %v6982_v48  ;;  %v7028_v55 = vld [vmem:[#allocation2 + $0xb6] sm:$0xff] }
 0x123   : > { %v2272_v28 = vmul.f32 %v6758_v22, %v2250_v13  ;;  %v1883_v54 = vmul.f32 %v6714_v63, %v6582_v43  ;;  %2389 = vst [vmem:[%s6892_s7 + $0x58] sm:$0xff] %v2373_v5  ;;  %v2081_v42 = vadd.f32 %v2065_v14, %v2039_v40  ;;  %v1546_v53 = vadd.f32 %v6556_v15, %v6489_v62  ;;  %v2398_v15 = vld [vmem:[#allocation2 + $0xa6] sm:$0xff] }
 0x124   : > { %v2327_v46 = vmul.f32 0.70710677, %v2295_v45  ;;  %v2253_v50 = vadd.f32 %v2237_v17, %v6745_v20  ;;  %v2475_v43 = vadd.f32 %v2459_v32, %v2418_v47  ;;  %v2417_v9 = vmul.f32 %v6968_v35, %v2394_v11  ;;  %v7055_v32 = vld [vmem:[#allocation2 + $0xde] sm:$0xff] }
 0x125   : > { %v2294_v26 = vadd.f32 %v6781_v6, %v2272_v28  ;;  %v2123_v63 = vadd.f32 %v2107_v19, %v2081_v42  ;;  %v2458_v59 = vmul.f32 %v6973_v51, %v2396_v52  ;;  %v2541_v62 = vmul.f32 %v7002_v56, %v7006_v61 }
 0x126   : > { %4860 = verf.f32 %v2327_v46  ;;  %v2275_v0 = vmul.f32 %v6758_v22, %v2253_v50  ;;  %v2516_v24 = vadd.f32 %v2500_v37, %v2475_v43  ;;  %v1899_v49 = vadd.f32 %v1883_v54, %v1546_v53  ;;  %v7067_v43 = vld [vmem:[#allocation2 + $0xd6] sm:$0xff] }
 0x127   : > { %v2326_v34 = vmul.f32 0.70710677, %v2294_v26  ;;  %v4859_v21 = vpop.eup %4858  ;;  %v2236_v20 = vmul.f32 %v2215_v18, %v2123_v63  ;;  %v2308_v23 = vmul.f32 0.5, %v6948_v2  ;;  %v2474_v29 = vadd.f32 %v2458_v59, %v2417_v9  ;;  %v7043_v18 = vpop.permute.xlu0 %2641 }
 0x128   : > { %v2356_v4 = vadd.f32 1.0, %v4859_v21  ;;  %v2297_v27 = vadd.f32 %v6781_v6, %v2275_v0  ;;  %v2499_v16 = vmul.f32 %v6980_v57, %v2398_v15  ;;  %v2420_v7 = vmul.f32 %v6968_v35, %v2397_v8 }
 0x129   : > { %4862 = verf.f32 %v2326_v34  ;;  %v2252_v30 = vadd.f32 %v2236_v20, %v1899_v49  ;;  %v2557_v3 = vadd.f32 %v2541_v62, %v2516_v24  ;;  %v2582_v2 = vmul.f32 %v7022_v10, %v7024_v38 }
 0x12a   : > { %v2372_v39 = vmul.f32 %v2356_v4, %v2308_v23  ;;  %v2329_v31 = vmul.f32 0.70710677, %v2297_v27  ;;  %v2461_v44 = vmul.f32 %v6973_v51, %v6982_v48  ;;  %v2502_v60 = vmul.f32 %v6980_v57, %v7006_v61 }
 0x12b   : > { %v2274_v1 = vmul.f32 %v6758_v22, %v2252_v30  ;;  %v2311_v58 = vmul.f32 0.5, %v2295_v45  ;;  %v2310_v8 = vmul.f32 0.5, %v2294_v26  ;;  %v2540_v13 = vmul.f32 %v7002_v56, %v7028_v55  ;;  %v7071_v9 = vpop.permute.xlu0 %2651 }
 0x12c   : > { %2388 = vst [vmem:[%s6892_s7 + $0x50] sm:$0xff] %v2372_v39  ;;  %4864 = verf.f32 %v2329_v31  ;;  %v2515_v22 = vadd.f32 %v2499_v16, %v2474_v29  ;;  %v2477_v14 = vadd.f32 %v2461_v44, %v2420_v7  ;;  %v2419_v19 = vmul.f32 %v6968_v35, %v2396_v52  ;;  %v7061_v52 = vpop.permute.xlu1 %2656  ;;  %v7086_v16 = vld [vmem:[#allocation2 + $0xee] sm:$0xff] }
 0x12d   : > { %v2296_v33 = vadd.f32 %v6781_v6, %v2274_v1  ;;  %v2598_v5 = vadd.f32 %v2582_v2, %v2557_v3  ;;  %v2581_v40 = vmul.f32 %v7022_v10, %v7037_v12  ;;  %v2460_v47 = vmul.f32 %v6973_v51, %v2398_v15 }
 0x12e   : > { %v2501_v45 = vmul.f32 %v6980_v57, %v7028_v55  ;;  %v2518_v37 = vadd.f32 %v2502_v60, %v2477_v14  ;;  %v2543_v6 = vmul.f32 %v7002_v56, %v7024_v38  ;;  %v2542_v11 = vmul.f32 %v7002_v56, %v7037_v12 }
 0x12f   : > { %v2328_v17 = vmul.f32 0.70710677, %v2296_v33  ;;  %v2476_v46 = vadd.f32 %v2460_v47, %v2419_v19  ;;  %v2422_v42 = vmul.f32 %v6968_v35, %v6982_v48  ;;  %v2463_v53 = vmul.f32 %v6973_v51, %v7006_v61  ;;  %v7101_v14 = vpop.permute.xlu0 %2661 }
 0x130   : > { %v4861_v28 = vpop.eup %4860  ;;  %v2313_v26 = vmul.f32 0.5, %v2297_v27  ;;  %v2556_v50 = vadd.f32 %v2540_v13, %v2515_v22  ;;  %v2504_v63 = vmul.f32 %v6980_v57, %v7024_v38  ;;  %v2584_v0 = vmul.f32 %v7022_v10, %v7055_v32  ;;  %v7090_v31 = vpop.permute.xlu1 %2666  ;;  %v7099_v13 = vld [vmem:[#allocation2 + $0xe6] sm:$0xff] }
 0x131   : > { %v2359_v54 = vadd.f32 1.0, %v4861_v28  ;;  %4866 = verf.f32 %v2328_v17  ;;  %v2517_v48 = vadd.f32 %v2501_v45, %v2476_v46  ;;  %v2479_v24 = vadd.f32 %v2463_v53, %v2422_v42 }
 0x132   : > { %v2559_v21 = vadd.f32 %v2543_v6, %v2518_v37  ;;  %v2421_v49 = vmul.f32 %v6968_v35, %v2398_v15  ;;  %v2462_v20 = vmul.f32 %v6973_v51, %v7028_v55  ;;  %v7080_v23 = vmul.f32 %v7004_v25, %v2598_v5 }
 0x133   : > { %v4863_v59 = vpop.eup %4862  ;;  %v2375_v34 = vmul.f32 %v2359_v54, %v2311_v58  ;;  %v2558_v4 = vadd.f32 %v2542_v11, %v2517_v48  ;;  %v2583_v27 = vmul.f32 %v7022_v10, %v7067_v43  ;;  %v2503_v30 = vmul.f32 %v6980_v57, %v7037_v12 }
 0x134   : > { %v2358_v62 = vadd.f32 1.0, %v4863_v59  ;;  %v2520_v7 = vadd.f32 %v2504_v63, %v2479_v24  ;;  %v2545_v15 = vmul.f32 %v7002_v56, %v7055_v32  ;;  %v2478_v39 = vadd.f32 %v2462_v20, %v2421_v49  ;;  %v7124_v53 = vpop.permute.xlu1 %2676  ;;  %v7130_v59 = vld [vmem:[#allocation2 + $0xf6] sm:$0xff] }
 0x135   : > { %2391 = vst [vmem:[%s6892_s7 + $0x68] sm:$0xff] %v2375_v34  ;;  %v2597_v25 = vadd.f32 %v2581_v40, %v2556_v50  ;;  %v2544_v2 = vmul.f32 %v7002_v56, %v7067_v43  ;;  %v2424_v1 = vmul.f32 %v6968_v35, %v7006_v61  ;;  %v2465_v44 = vmul.f32 %v6973_v51, %v7024_v38  ;;  %v7128_v50 = vld [vmem:[#allocation2 + $0xfe] sm:$0xff] }
 0x136   : > { %v2374_v29 = vmul.f32 %v2358_v62, %v2310_v8  ;;  %v4865_v3 = vpop.eup %4864  ;;  %v2312_v58 = vmul.f32 0.5, %v2296_v33  ;;  %v2600_v8 = vadd.f32 %v2584_v0, %v2559_v21  ;;  %v2519_v22 = vadd.f32 %v2503_v30, %v2478_v39  ;;  %v7141_v62 = vpop.permute.xlu0 %2671 }
 0x137   : > { %v2361_v60 = vadd.f32 1.0, %v4865_v3  ;;  %v2599_v19 = vadd.f32 %v2583_v27, %v2558_v4  ;;  %v2586_v5 = vmul.f32 %v7022_v10, %v7086_v16  ;;  %v2481_v40 = vadd.f32 %v2465_v44, %v2424_v1 }
 0x138   : > { %2390 = vst [vmem:[%s6892_s7 + $0x60] sm:$0xff] %v2374_v29  ;;  %v2506_v61 = vmul.f32 %v6980_v57, %v7055_v32  ;;  %v2561_v45 = vadd.f32 %v2545_v15, %v2520_v7  ;;  %v2423_v33 = vmul.f32 %v6968_v35, %v7028_v55  ;;  %v2464_v28 = vmul.f32 %v6973_v51, %v7037_v12  ;;  %v7158_v1 = vpop.permute.xlu1 %2686 }
 0x139   : > { %v2377_v47 = vmul.f32 %v2361_v60, %v2313_v26  ;;  %v7112_v17 = vmul.f32 %v7012_v36, %v2597_v25  ;;  %v2560_v37 = vadd.f32 %v2544_v2, %v2519_v22  ;;  %v2585_v6 = vmul.f32 %v7022_v10, %v7099_v13  ;;  %v2450_v25 = vld [vmem:[#allocation2 + $0x10e] sm:$0xff] }
 0x13a   : > { %v2505_v11 = vmul.f32 %v6980_v57, %v7067_v43  ;;  %v7120_v46 = vmul.f32 %v7031_v41, %v2600_v8  ;;  %v2547_v55 = vmul.f32 %v7002_v56, %v7086_v16  ;;  %v2480_v42 = vadd.f32 %v2464_v28, %v2423_v33 }
 0x13b   : > { %v4867_v54 = vpop.eup %4866  ;;  %2393 = vst [vmem:[%s6892_s7 + $0x78] sm:$0xff] %v2377_v47  ;;  %v2426_v36 = vmul.f32 %v6968_v35, %v7024_v38  ;;  %v2522_v63 = vadd.f32 %v2506_v61, %v2481_v40  ;;  %v2467_v41 = vmul.f32 %v6973_v51, %v7055_v32  ;;  %v2508_v34 = vmul.f32 %v6980_v57, %v7086_v16  ;;  %v2491_v61 = vld [vmem:[#allocation2 + $0x11e] sm:$0xff] }
 0x13c   : > { %v2360_v26 = vadd.f32 1.0, %v4867_v54  ;;  %v7137_v0 = vmul.f32 %v7043_v18, %v2599_v19  ;;  %v2602_v48 = vadd.f32 %v2586_v5, %v2561_v45  ;;  %v2521_v24 = vadd.f32 %v2505_v11, %v2480_v42  ;;  %v2449_v19 = vld [vmem:[#allocation2 + $0x106] sm:$0xff]  ;;  %v7175_v45 = vpop.permute.xlu0 %2681 }
 0x13d   : > { %v2546_v38 = vmul.f32 %v7002_v56, %v7099_v13  ;;  %v2601_v49 = vadd.f32 %v2585_v6, %v2560_v37  ;;  %v2483_v20 = vadd.f32 %v2467_v41, %v2426_v36  ;;  %v2425_v4 = vmul.f32 %v6968_v35, %v7037_v12 }
 0x13e   : > { %v2376_v21 = vmul.f32 %v2360_v26, %v2312_v58  ;;  %v2588_v27 = vmul.f32 %v7022_v10, %v7128_v50  ;;  %v2587_v18 = vmul.f32 %v7022_v10, %v7130_v59  ;;  %v2466_v30 = vmul.f32 %v6973_v51, %v7067_v43  ;;  %v2490_v26 = vld [vmem:[#allocation2 + $0x116] sm:$0xff] }
 0x13f   : > { %v2507_v29 = vmul.f32 %v6980_v57, %v7099_v13  ;;  %v2563_v7 = vadd.f32 %v2547_v55, %v2522_v63  ;;  %v2524_v15 = vadd.f32 %v2508_v34, %v2483_v20  ;;  %v2549_v39 = vmul.f32 %v7002_v56, %v7128_v50 }
 0x140   : > { %2392 = vst [vmem:[%s6892_s7 + $0x70] sm:$0xff] %v2376_v21  ;;  %v2428_v12 = vmul.f32 %v6968_v35, %v7055_v32  ;;  %v2562_v3 = vadd.f32 %v2546_v38, %v2521_v24  ;;  %v2482_v2 = vadd.f32 %v2466_v30, %v2425_v4  ;;  %v2469_v44 = vmul.f32 %v6973_v51, %v7086_v16  ;;  %v7189_v24 = vpop.permute.xlu1 %2696  ;;  %v2532_v30 = vld [vmem:[#allocation2 + $0x12e] sm:$0xff] }
 0x141   : > { %v2510_v60 = vmul.f32 %v6980_v57, %v7128_v50  ;;  %v7165_v58 = vmul.f32 %v7061_v52, %v2602_v48  ;;  %v7168_v8 = vmul.f32 %v7071_v9, %v2601_v49  ;;  %v2548_v32 = vmul.f32 %v7002_v56, %v7130_v59 }
 0x142   : > { %v2427_v22 = vmul.f32 %v6968_v35, %v7067_v43  ;;  %v2523_v5 = vadd.f32 %v2507_v29, %v2482_v2  ;;  %v2485_v40 = vadd.f32 %v2469_v44, %v2428_v12  ;;  %v2551_v47 = vmul.f32 %v7002_v56, %v2450_v25  ;;  %v7203_v29 = vpop.permute.xlu0 %2691  ;;  %v2531_v44 = vld [vmem:[#allocation2 + $0x126] sm:$0xff] }
 0x143   : > { %v2468_v52 = vmul.f32 %v6973_v51, %v7099_v13  ;;  %v2604_v33 = vadd.f32 %v2588_v27, %v2563_v7  ;;  %v2565_v9 = vadd.f32 %v2549_v39, %v2524_v15  ;;  %v2590_v28 = vmul.f32 %v7022_v10, %v2450_v25 }
 0x144   : > { %v2509_v37 = vmul.f32 %v6980_v57, %v7130_v59  ;;  %v2603_v6 = vadd.f32 %v2587_v18, %v2562_v3  ;;  %v2526_v43 = vadd.f32 %v2510_v60, %v2485_v40  ;;  %v2430_v54 = vmul.f32 %v6968_v35, %v7086_v16  ;;  %v7213_v60 = vld [vmem:[%s8398_s4 + $0x1] ss:$0 sm:$0xff] }
 0x145   : > { %v2484_v11 = vadd.f32 %v2468_v52, %v2427_v22  ;;  %v2564_v55 = vadd.f32 %v2548_v32, %v2523_v5  ;;  %v2589_v42 = vmul.f32 %v7022_v10, %v2449_v19  ;;  %v2592_v36 = vmul.f32 %v7022_v10, %v2491_v61  ;;  %v2573_v40 = vld [vmem:[#allocation2 + $0x13e] sm:$0xff] }
 0x146   : > { %v2471_v63 = vmul.f32 %v6973_v51, %v7128_v50  ;;  %v2567_v41 = vadd.f32 %v2551_v47, %v2526_v43  ;;  %v2550_v48 = vmul.f32 %v7002_v56, %v2449_v19  ;;  %v2512_v38 = vmul.f32 %v6980_v57, %v2450_v25  ;;  %v7224_v47 = vld [vmem:[%s8398_s4 + $0x6] ss:$0 sm:$0xff] }
 0x147   : > { %v2525_v34 = vadd.f32 %v2509_v37, %v2484_v11  ;;  %v2606_v21 = vadd.f32 %v2590_v28, %v2565_v9  ;;  %v2429_v16 = vmul.f32 %v6968_v35, %v7099_v13  ;;  %v2470_v20 = vmul.f32 %v6973_v51, %v7130_v59  ;;  %v2744_v37 = vld [vmem:[#allocation2 + $0x9f] sm:$0xff] }
 0x148   : > { %v2487_v49 = vadd.f32 %v2471_v63, %v2430_v54  ;;  %v7197_v4 = vmul.f32 %v7090_v31, %v2604_v33  ;;  %v7200_v27 = vmul.f32 %v7101_v14, %v2603_v6  ;;  %v2591_v18 = vmul.f32 %v7022_v10, %v2490_v26  ;;  %v7226_v33 = vpop.permute.xlu1 %2706  ;;  %v7236_v6 = vld [vmem:[#allocation2 + $0xaf] sm:$0xff] }
 0x149   : > { %v2511_v7 = vmul.f32 %v6980_v57, %v2449_v19  ;;  %v2605_v15 = vadd.f32 %v2589_v42, %v2564_v55  ;;  %v2608_v39 = vadd.f32 %v2592_v36, %v2567_v41  ;;  %v2486_v12 = vadd.f32 %v2470_v20, %v2429_v16  ;;  %v7246_v42 = vpop.permute.xlu0 %2701  ;;  %v7251_v63 = vld [vmem:[%s8398_s4 + $0x10] ss:$0 sm:$0xff]  ;;  %v2743_v41 = vld [vmem:[#allocation2 + $0x97] sm:$0xff] }
 0x14a   : > { %v2432_v13 = vmul.f32 %v6968_v35, %v7128_v50  ;;  %v2566_v3 = vadd.f32 %v2550_v48, %v2525_v34  ;;  %v2528_v2 = vadd.f32 %v2512_v38, %v2487_v49  ;;  %v2553_v31 = vmul.f32 %v7002_v56, %v2491_v61  ;;  %v7263_v48 = vld [vmem:[#allocation2 + $0xcf] sm:$0xff]  ;;  %v7268_v49 = vld [vmem:[#allocation2 + $0xa7] sm:$0xff] }
 0x14b   : > { %v2473_v14 = vmul.f32 %v6973_v51, %v2450_v25  ;;  %v7216_v32 = vmul.f32 %v7124_v53, %v2606_v21  ;;  %v2594_v22 = vmul.f32 %v7022_v10, %v2532_v30  ;;  %v2552_v5 = vmul.f32 %v7002_v56, %v2490_v26  ;;  %v2742_v25 = vld [vmem:[#allocation2 + $0x8f] sm:$0xff] }
 0x14c   : > { %v2514_v50 = vmul.f32 %v6980_v57, %v2491_v61  ;;  %v2527_v52 = vadd.f32 %v2511_v7, %v2486_v12  ;;  %v2431_v53 = vmul.f32 %v6968_v35, %v7130_v59  ;;  %v2472_v28 = vmul.f32 %v6973_v51, %v2449_v19  ;;  %v7234_v61 = vld [vmem:[%s8398_s4 + $0xb] ss:$0 sm:$0xff]  ;;  %v2572_v59 = vld [vmem:[#allocation2 + $0x136] sm:$0xff] }
 0x14d   : > { %v2489_v9 = vadd.f32 %v2473_v14, %v2432_v13  ;;  %v7239_v43 = vmul.f32 %v7141_v62, %v2605_v15  ;;  %v7242_v11 = vmul.f32 %v7158_v1, %v2608_v39  ;;  %v2593_v54 = vmul.f32 %v7022_v10, %v2531_v44  ;;  %v2741_v51 = vld [vmem:[#allocation2 + $0x87] sm:$0xff]  ;;  %v7253_v62 = vld [vmem:[#allocation2 + $0xbf] sm:$0xff]  ;;  %v7271_v7 = vld [vmem:[#allocation2 + $0xb7] sm:$0xff] }
 0x14e   : > { %v2513_v35 = vmul.f32 %v6980_v57, %v2490_v26  ;;  %v2607_v19 = vadd.f32 %v2591_v18, %v2566_v3  ;;  %v2569_v55 = vadd.f32 %v2553_v31, %v2528_v2  ;;  %v2488_v36 = vadd.f32 %v2472_v28, %v2431_v53  ;;  %v7261_v26 = vld [vmem:[%s8398_s4 + $0x15] ss:$0 sm:$0xff]  ;;  %v2984_v31 = vpop.permute.xlu1 %2983 }
 0x14f   : > { %v2765_v1 = vmul.f32 %v7213_v60, %v2742_v25  ;;  %v2555_v34 = vmul.f32 %v7002_v56, %v2532_v30  ;;  %v2596_v57 = vmul.f32 %v7022_v10, %v2573_v40  ;;  %v2806_v38 = vmul.f32 %v7224_v47, %v2744_v37 }
 0x150   : > { %v2847_v21 = vmul.f32 %v7234_v61, %v7236_v6  ;;  %v2568_v16 = vadd.f32 %v2552_v5, %v2527_v52  ;;  %v2530_v20 = vadd.f32 %v2514_v50, %v2489_v9  ;;  %v2529_v18 = vadd.f32 %v2513_v35, %v2488_v36  ;;  %v7280_v5 = vld [vmem:[#allocation2 + $0xc7] sm:$0xff]  ;;  %v2979_v9 = vpop.permute.xlu0 %2978 }
 0x151   : > { %v2554_v30 = vmul.f32 %v7002_v56, %v2531_v44  ;;  %v2822_v15 = vadd.f32 %v2806_v38, %v2765_v1  ;;  %v2888_v39 = vmul.f32 %v7251_v63, %v7253_v62  ;;  %v2764_v12 = vmul.f32 %v7213_v60, %v2741_v51 }
 0x152   : > { %v2805_v13 = vmul.f32 %v7224_v47, %v2743_v41  ;;  %v2610_v3 = vadd.f32 %v2594_v22, %v2569_v55  ;;  %v2595_v2 = vmul.f32 %v7022_v10, %v2572_v59  ;;  %v2929_v14 = vmul.f32 %v7261_v26, %v7263_v48  ;;  %v7287_v10 = vld [vmem:[#allocation2 + $0xdf] sm:$0xff] }
 0x153   : > { %v2846_v56 = vmul.f32 %v7234_v61, %v7268_v49  ;;  %v2863_v44 = vadd.f32 %v2847_v21, %v2822_v15  ;;  %v2887_v40 = vmul.f32 %v7251_v63, %v7271_v7  ;;  %v2767_v25 = vmul.f32 %v7213_v60, %v2744_v37 }
 0x154   : > { %v2821_v50 = vadd.f32 %v2805_v13, %v2764_v12  ;;  %v2609_v52 = vadd.f32 %v2593_v54, %v2568_v16  ;;  %v2571_v22 = vadd.f32 %v2555_v34, %v2530_v20  ;;  %v2808_v53 = vmul.f32 %v7224_v47, %v7236_v6  ;;  %v2994_v20 = vpop.permute.xlu1 %2993 }
 0x155   : > { %v2849_v28 = vmul.f32 %v7234_v61, %v7253_v62  ;;  %v2570_v35 = vadd.f32 %v2554_v30, %v2529_v18  ;;  %v2904_v59 = vadd.f32 %v2888_v39, %v2863_v44  ;;  %v2928_v55 = vmul.f32 %v7261_v26, %v7280_v5 }
 0x156   : > { %v2862_v51 = vadd.f32 %v2846_v56, %v2821_v50  ;;  %v2824_v36 = vadd.f32 %v2808_v53, %v2767_v25  ;;  %v2890_v37 = vmul.f32 %v7251_v63, %v7263_v48  ;;  %v2766_v54 = vmul.f32 %v7213_v60, %v2743_v41  ;;  %v7315_v53 = vld [vmem:[#allocation2 + $0xef] sm:$0xff] }
 0x157   : > { %v2807_v1 = vmul.f32 %v7224_v47, %v7268_v49  ;;  %v2945_v34 = vadd.f32 %v2929_v14, %v2904_v59  ;;  %v2931_v21 = vmul.f32 %v7261_v26, %v7287_v10  ;;  %v2848_v16 = vmul.f32 %v7234_v61, %v7271_v7  ;;  %v7308_v14 = vld [vmem:[#allocation2 + $0xd7] sm:$0xff] }
 0x158   : > { %v2903_v38 = vadd.f32 %v2887_v40, %v2862_v51  ;;  %v2865_v18 = vadd.f32 %v2849_v28, %v2824_v36  ;;  %v2889_v15 = vmul.f32 %v7251_v63, %v7280_v5  ;;  %v2769_v41 = vmul.f32 %v7213_v60, %v7236_v6  ;;  %v2989_v40 = vpop.permute.xlu0 %2988  ;;  %v7348_v36 = vld [vmem:[#allocation2 + $0xe7] sm:$0xff] }
 0x159   : > { %v2823_v30 = vadd.f32 %v2807_v1, %v2766_v54  ;;  %v2612_v39 = vadd.f32 %v2596_v57, %v2571_v22  ;;  %v2611_v12 = vadd.f32 %v2595_v2, %v2570_v35  ;;  %v2810_v56 = vmul.f32 %v7224_v47, %v7253_v62 }
 0x15a   : > { %v2944_v13 = vadd.f32 %v2928_v55, %v2903_v38  ;;  %v7313_v44 = vmul.f32 %v7175_v45, %v2607_v19  ;;  %v2906_v50 = vadd.f32 %v2890_v37, %v2865_v18  ;;  %v2851_v28 = vmul.f32 %v7234_v61, %v7263_v48 }
 0x15b   : > { %v2864_v25 = vadd.f32 %v2848_v16, %v2823_v30  ;;  %v7320_v6 = vmul.f32 %v7189_v24, %v2610_v3  ;;  %v7323_v57 = vmul.f32 %v7203_v29, %v2609_v52  ;;  %v3057_v2 = vmul.f32 %v2984_v31, %v2945_v34  ;;  %v7337_v3 = vpop.permute.xlu1 %3003 }
 0x15c   : > { %v2826_v22 = vadd.f32 %v2810_v56, %v2769_v41  ;;  %v3056_v35 = vmul.f32 %v2979_v9, %v2944_v13  ;;  %v2947_v59 = vadd.f32 %v2931_v21, %v2906_v50  ;;  %v2930_v19 = vmul.f32 %v7261_v26, %v7308_v14  ;;  %v7365_v21 = vld [vmem:[#allocation2 + $0xff] sm:$0xff] }
 0x15d   : > { %v2905_v45 = vadd.f32 %v2889_v15, %v2864_v25  ;;  %v7328_v51 = vmul.f32 %v7226_v33, %v2612_v39  ;;  %v7331_v55 = vmul.f32 %v7246_v42, %v2611_v12  ;;  %v2892_v24 = vmul.f32 %v7251_v63, %v7287_v10  ;;  %v7377_v39 = vld [vmem:[#allocation2 + $0xf7] sm:$0xff] }
 0x15e   : > { %v2933_v29 = vmul.f32 %v7261_v26, %v7315_v53  ;;  %v2867_v31 = vadd.f32 %v2851_v28, %v2826_v22  ;;  %v2768_v52 = vmul.f32 %v7213_v60, %v7268_v49  ;;  %v2809_v9 = vmul.f32 %v7224_v47, %v7271_v7 }
 0x15f   : > { %v2771_v33 = vmul.f32 %v7213_v60, %v7253_v62  ;;  %v7346_v42 = vadd.f32 %v3057_v2, %v7080_v23  ;;  %v2850_v37 = vmul.f32 %v7234_v61, %v7280_v5  ;;  %v2812_v54 = vmul.f32 %v7224_v47, %v7263_v48  ;;  %v7359_v62 = vpop.permute.xlu0 %2998  ;;  %v3014_v28 = vpop.permute.xlu1 %3013 }
 0x160   : > { %v2853_v49 = vmul.f32 %v7234_v61, %v7287_v10  ;;  %v7357_v1 = vadd.f32 %v3056_v35, %v7112_v17  ;;  %v3059_v34 = vmul.f32 %v2994_v20, %v2947_v59  ;;  %v2946_v38 = vadd.f32 %v2930_v19, %v2905_v45 }
 0x161   : > { %v7363_v23 = vmul.f32 %v7251_v63, %v7308_v14  ;;  %v2828_v16 = vadd.f32 %v2812_v54, %v2771_v33  ;;  %v2894_v18 = vmul.f32 %v7251_v63, %v7315_v53  ;;  %v2770_v30 = vmul.f32 %v7213_v60, %v7271_v7 }
 0x162   : > { %v2811_v17 = vmul.f32 %v7224_v47, %v7280_v5  ;;  %v2908_v20 = vadd.f32 %v2892_v24, %v2867_v31  ;;  %v2825_v15 = vadd.f32 %v2809_v9, %v2768_v52  ;;  %v7375_v41 = vmul.f32 %v7261_v26, %v7348_v36  ;;  %v7398_v31 = vld [vmem:[#allocation2 + $0x10f] sm:$0xff] }
 0x163   : > { %v2852_v12 = vmul.f32 %v7234_v61, %v7308_v14  ;;  %v2869_v13 = vadd.f32 %v2853_v49, %v2828_v16  ;;  %v2935_v56 = vmul.f32 %v7261_v26, %v7365_v21  ;;  %v2893_v7 = vmul.f32 %v7251_v63, %v7348_v36  ;;  %v3009_v52 = vpop.permute.xlu0 %3008  ;;  %v7406_v49 = vld [vmem:[#allocation2 + $0x107] sm:$0xff] }
 0x164   : > { %v2827_v50 = vadd.f32 %v2811_v17, %v2770_v30  ;;  %v7386_v25 = vadd.f32 %v3059_v34, %v7120_v46  ;;  %v2773_v2 = vmul.f32 %v7213_v60, %v7263_v48  ;;  %v2814_v22 = vmul.f32 %v7224_v47, %v7287_v10 }
 0x165   : > { %v2855_v35 = vmul.f32 %v7234_v61, %v7315_v53  ;;  %v7394_v59 = vmul.f32 %v2989_v40, %v2946_v38  ;;  %v2910_v45 = vadd.f32 %v2894_v18, %v2869_v13  ;;  %v2934_v24 = vmul.f32 %v7261_v26, %v7377_v39  ;;  %v3024_v13 = vpop.permute.xlu1 %3023 }
 0x166   : > { %v2868_v19 = vadd.f32 %v2852_v12, %v2827_v50  ;;  %v7400_v46 = vadd.f32 %v2850_v37, %v2825_v15  ;;  %v2830_v9 = vadd.f32 %v2814_v22, %v2773_v2  ;;  %v2896_v48 = vmul.f32 %v7251_v63, %v7365_v21 }
 0x167   : > { %v2772_v33 = vmul.f32 %v7213_v60, %v7280_v5  ;;  %v2951_v54 = vadd.f32 %v2935_v56, %v2910_v45  ;;  %v2813_v34 = vmul.f32 %v7224_v47, %v7308_v14  ;;  %v2854_v38 = vmul.f32 %v7234_v61, %v7348_v36  ;;  %v3019_v45 = vpop.permute.xlu0 %3018 }
 0x168   : > { %v2909_v40 = vadd.f32 %v2893_v7, %v2868_v19  ;;  %v7412_v37 = vadd.f32 %v2933_v29, %v2908_v20  ;;  %v2871_v16 = vadd.f32 %v2855_v35, %v2830_v9  ;;  %v2937_v18 = vmul.f32 %v7261_v26, %v7398_v31  ;;  %v2838_v20 = vld [vmem:[#allocation2 + $0x11f] sm:$0xff] }
 0x169   : > { %v2895_v30 = vmul.f32 %v7251_v63, %v7377_v39  ;;  %v3063_v5 = vmul.f32 %v3014_v28, %v2951_v54  ;;  %v2829_v15 = vadd.f32 %v2813_v34, %v2772_v33  ;;  %v2775_v12 = vmul.f32 %v7213_v60, %v7287_v10 }
 0x16a   : > { %v2950_v17 = vadd.f32 %v2934_v24, %v2909_v40  ;;  %v2912_v56 = vadd.f32 %v2896_v48, %v2871_v16  ;;  %v2936_v50 = vmul.f32 %v7261_v26, %v7406_v49  ;;  %v2816_v29 = vmul.f32 %v7224_v47, %v7315_v53 }
 0x16b   : > { %v2857_v7 = vmul.f32 %v7234_v61, %v7365_v21  ;;  %v7427_v2 = vadd.f32 %v3063_v5, %v7197_v4  ;;  %v2870_v22 = vadd.f32 %v2854_v38, %v2829_v15  ;;  %v2898_v10 = vmul.f32 %v7251_v63, %v7398_v31 }
 0x16c   : > { %v3062_v28 = vmul.f32 %v3009_v52, %v2950_v17  ;;  %v2953_v35 = vadd.f32 %v2937_v18, %v2912_v56  ;;  %v2832_v19 = vadd.f32 %v2816_v29, %v2775_v12  ;;  %v2774_v24 = vmul.f32 %v7213_v60, %v7308_v14  ;;  %v2837_v52 = vld [vmem:[#allocation2 + $0x117] sm:$0xff]  ;;  %v3034_v17 = vpop.permute.xlu1 %3033  ;;  %v2879_v56 = vld [vmem:[#allocation2 + $0x12f] sm:$0xff] }
 0x16d   : > { %v2815_v9 = vmul.f32 %v7224_v47, %v7348_v36  ;;  %v2911_v33 = vadd.f32 %v2895_v30, %v2870_v22  ;;  %v2939_v4 = vmul.f32 %v7261_v26, %v2838_v20  ;;  %v2856_v54 = vmul.f32 %v7234_v61, %v7377_v39  ;;  %v3029_v22 = vpop.permute.xlu0 %3028 }
 0x16e   : > { %v7436_v48 = vadd.f32 %v3062_v28, %v7200_v27  ;;  %v3065_v40 = vmul.f32 %v3024_v13, %v2953_v35  ;;  %v2873_v34 = vadd.f32 %v2857_v7, %v2832_v19  ;;  %v2897_v16 = vmul.f32 %v7251_v63, %v7406_v49  ;;  %v2878_v19 = vld [vmem:[#allocation2 + $0x127] sm:$0xff] }
 0x16f   : > { %v2831_v38 = vadd.f32 %v2815_v9, %v2774_v24  ;;  %v2952_v14 = vadd.f32 %v2936_v50, %v2911_v33  ;;  %v2777_v18 = vmul.f32 %v7213_v60, %v7315_v53  ;;  %v2818_v27 = vmul.f32 %v7224_v47, %v7365_v21 }
 0x170   : > { %v2859_v30 = vmul.f32 %v7234_v61, %v7398_v31  ;;  %v7450_v5 = vadd.f32 %v3065_v40, %v7216_v32  ;;  %v2914_v15 = vadd.f32 %v2898_v10, %v2873_v34  ;;  %v2938_v13 = vmul.f32 %v7261_v26, %v2837_v52 }
 0x171   : > { %v2872_v12 = vadd.f32 %v2856_v54, %v2831_v38  ;;  %v3064_v29 = vmul.f32 %v3019_v45, %v2952_v14  ;;  %v2834_v50 = vadd.f32 %v2818_v27, %v2777_v18  ;;  %v2900_v7 = vmul.f32 %v7251_v63, %v2838_v20  ;;  %v2920_v14 = vld [vmem:[#allocation2 + $0x13f] sm:$0xff] }
 0x172   : > { %v2776_v53 = vmul.f32 %v7213_v60, %v7348_v36  ;;  %v2955_v28 = vadd.f32 %v2939_v4, %v2914_v15  ;;  %v2817_v32 = vmul.f32 %v7224_v47, %v7377_v39  ;;  %v2858_v10 = vmul.f32 %v7234_v61, %v7406_v49 }
 0x173   : > { %v2913_v35 = vadd.f32 %v2897_v16, %v2872_v12  ;;  %v7461_v24 = vadd.f32 %v3064_v29, %v7239_v43  ;;  %v2875_v45 = vadd.f32 %v2859_v30, %v2834_v50  ;;  %v2941_v9 = vmul.f32 %v7261_v26, %v2879_v56  ;;  %v3044_v30 = vpop.permute.xlu1 %3043  ;;  %v7494_v50 = vld [vmem:[#allocation2 + $0xa0] sm:$0xff] }
 0x174   : > { %v2899_v33 = vmul.f32 %v7251_v63, %v2837_v52  ;;  %v3067_v54 = vmul.f32 %v3034_v17, %v2955_v28  ;;  %v2833_v4 = vadd.f32 %v2817_v32, %v2776_v53  ;;  %v2779_v40 = vmul.f32 %v7213_v60, %v7365_v21  ;;  %v7478_v21 = vld [vmem:[%s8398_s4 + $0x2] ss:$0 sm:$0xff]  ;;  %v3039_v28 = vpop.permute.xlu0 %3038 }
 0x175   : > { %v2954_v36 = vadd.f32 %v2938_v13, %v2913_v35  ;;  %v2916_v34 = vadd.f32 %v2900_v7, %v2875_v45  ;;  %v2940_v38 = vmul.f32 %v7261_v26, %v2878_v19  ;;  %v2820_v16 = vmul.f32 %v7224_v47, %v7398_v31  ;;  %v7483_v31 = vld [vmem:[%s8398_s4 + $0x7] ss:$0 sm:$0xff]  ;;  %v7496_v7 = vld [vmem:[#allocation2 + $0xb0] sm:$0xff] }
 0x176   : > { %v2861_v43 = vmul.f32 %v7234_v61, %v2838_v20  ;;  %v7472_v18 = vadd.f32 %v3067_v54, %v7242_v11  ;;  %v2874_v17 = vadd.f32 %v2858_v10, %v2833_v4  ;;  %v2902_v15 = vmul.f32 %v7251_v63, %v2879_v56  ;;  %v3089_v20 = vld [vmem:[#allocation2 + $0x90] sm:$0xff]  ;;  %v7492_v56 = vld [vmem:[%s8398_s4 + $0xc] ss:$0 sm:$0xff] }
 0x177   : > { %v3066_v27 = vmul.f32 %v3029_v22, %v2954_v36  ;;  %v2957_v12 = vadd.f32 %v2941_v9, %v2916_v34  ;;  %v2836_v13 = vadd.f32 %v2820_v16, %v2779_v40  ;;  %v2778_v11 = vmul.f32 %v7213_v60, %v7377_v39  ;;  %v2919_v39 = vld [vmem:[#allocation2 + $0x137] sm:$0xff]  ;;  %v7507_v45 = vld [vmem:[%s8398_s4 + $0x11] ss:$0 sm:$0xff]  ;;  %v7529_v36 = vld [vmem:[#allocation2 + $0xa1] sm:$0xff] }
 0x178   : > { %v2819_v29 = vmul.f32 %v7224_v47, %v7406_v49  ;;  %v2915_v22 = vadd.f32 %v2899_v33, %v2874_v17  ;;  %v2943_v35 = vmul.f32 %v7261_v26, %v2920_v14  ;;  %v2860_v60 = vmul.f32 %v7234_v61, %v2837_v52  ;;  %v7517_v61 = vld [vmem:[%s8398_s4 + $0x8] ss:$0 sm:$0xff]  ;;  %v3324_v52 = vld [vmem:[#allocation2 + $0x91] sm:$0xff]  ;;  %v7542_v14 = vld [vmem:[#allocation2 + $0xc0] sm:$0xff] }
 0x179   : > { %v7499_v53 = vadd.f32 %v3066_v27, %v7313_v44  ;;  %v3069_v47 = vmul.f32 %v3044_v30, %v2957_v12  ;;  %v2877_v49 = vadd.f32 %v2861_v43, %v2836_v13  ;;  %v2901_v10 = vmul.f32 %v7251_v63, %v2878_v19  ;;  %v7512_v44 = vld [vmem:[%s8398_s4 + $0x3] ss:$0 sm:$0xff]  ;;  %v7522_v63 = vld [vmem:[%s8398_s4 + $0xd] ss:$0 sm:$0xff]  ;;  %v7531_v4 = vld [vmem:[#allocation2 + $0xb1] sm:$0xff] }
 0x17a   : > { %v2835_v32 = vadd.f32 %v2819_v29, %v2778_v11  ;;  %v2956_v9 = vadd.f32 %v2940_v38, %v2915_v22  ;;  %v3112_v19 = vmul.f32 %v7478_v21, %v3089_v20  ;;  %v3153_v33 = vmul.f32 %v7483_v31, %v7494_v50  ;;  %v7540_v43 = vld [vmem:[%s8398_s4 + $0x12] ss:$0 sm:$0xff]  ;;  %v7544_v27 = vld [vmem:[#allocation2 + $0xc1] sm:$0xff]  ;;  %v7559_v29 = vld [vmem:[%s8398_s4 + $0x17] ss:$0 sm:$0xff] }
 0x17b   : > { %8492 = vst [vmem:[#allocation9_spill] sm:$0xff] %v7499_v53  ;;  %v3194_v54 = vmul.f32 %v7492_v56, %v7496_v7  ;;  %v7534_v40 = vadd.f32 %v3069_v47, %v7320_v6  ;;  %v2918_v34 = vadd.f32 %v2902_v15, %v2877_v49  ;;  %v2942_v16 = vmul.f32 %v7261_v26, %v2919_v39  ;;  %v3054_v6 = vpop.permute.xlu1 %3053  ;;  %v7553_v15 = vld [vmem:[%s8398_s4 + $0x16] ss:$0 sm:$0xff]  ;;  %v3088_v12 = vld [vmem:[#allocation2 + $0x88] sm:$0xff]  ;;  %v7567_v22 = vld [vmem:[#allocation2 + $0x98] sm:$0xff] }
 0x17c   : > { %v2876_v38 = vadd.f32 %v2860_v60, %v2835_v32  ;;  %v7548_v30 = vadd.f32 %v7394_v59, %v7137_v0  ;;  %v3068_v17 = vmul.f32 %v3039_v28, %v2956_v9  ;;  %v3169_v26 = vadd.f32 %v3153_v33, %v3112_v19  ;;  %v7561_v0 = vld [vmem:[#allocation2 + $0xd1] sm:$0xff]  ;;  %v7576_v32 = vld [vmem:[#allocation2 + $0xa8] sm:$0xff] }
 0x17d   : > { %8493 = vst [vmem:[#allocation10_spill] sm:$0xff] %v7534_v40  ;;  %v3347_v20 = vmul.f32 %v7512_v44, %v3324_v52  ;;  %v2959_v13 = vadd.f32 %v2943_v35, %v2918_v34  ;;  %v3388_v59 = vmul.f32 %v7517_v61, %v7529_v36  ;;  %v3429_v28 = vmul.f32 %v7522_v63, %v7531_v4  ;;  %v3049_v35 = vpop.permute.xlu0 %3048  ;;  %v3323_v33 = vld [vmem:[#allocation2 + $0x89] sm:$0xff]  ;;  %v3325_v34 = vld [vmem:[#allocation2 + $0x99] sm:$0xff] }
 0x17e   : > { %v2917_v11 = vadd.f32 %v2901_v10, %v2876_v38  ;;  %v7570_v60 = vadd.f32 %v3068_v17, %v7323_v57  ;;  %v3210_v39 = vadd.f32 %v3194_v54, %v3169_v26  ;;  %v3235_v47 = vmul.f32 %v7507_v45, %v7542_v14  ;;  %v7581_v38 = vld [vmem:[#allocation2 + $0xd0] sm:$0xff] }
 0x17f   : > { %v3470_v49 = vmul.f32 %v7540_v43, %v7544_v27  ;;  %v3071_v10 = vmul.f32 %v3054_v6, %v2959_v13  ;;  %v3404_v9 = vadd.f32 %v3388_v59, %v3347_v20  ;;  %v3111_v19 = vmul.f32 %v7478_v21, %v3088_v12  ;;  %v7594_v13 = vld [vmem:[#allocation2 + $0xb8] sm:$0xff] }
 0x180   : > { %8494 = vst [vmem:[#allocation11_spill] sm:$0xff] %v7570_v60  ;;  %v2958_v52 = vadd.f32 %v2942_v16, %v2917_v11  ;;  %v2907_v57 = vadd.f32 %v7363_v23, %v7400_v46  ;;  %v3276_v54 = vmul.f32 %v7581_v38, %v7553_v15  ;;  %v3511_v17 = vmul.f32 %v7559_v29, %v7561_v0  ;;  %v7589_v16 = vld [vmem:[#allocation2 + $0xa9] sm:$0xff]  ;;  %v7598_v46 = vld [vmem:[#allocation2 + $0xb9] sm:$0xff] }
 0x181   : > { %v3152_v6 = vmul.f32 %v7483_v31, %v7567_v22  ;;  %v7592_v26 = vadd.f32 %v3071_v10, %v7328_v51  ;;  %v3445_v12 = vadd.f32 %v3429_v28, %v3404_v9  ;;  %v3193_v23 = vmul.f32 %v7492_v56, %v7576_v32 }
 0x182   : > { %v3070_v20 = vmul.f32 %v3049_v35, %v2958_v52  ;;  %v3251_v11 = vadd.f32 %v3235_v47, %v3210_v39  ;;  %v3346_v60 = vmul.f32 %v7512_v44, %v3323_v33  ;;  %v3387_v40 = vmul.f32 %v7517_v61, %v3325_v34  ;;  %v7607_v35 = vld [vmem:[#allocation2 + $0xc9] sm:$0xff] }
 0x183   : > { %v3168_v59 = vadd.f32 %v3152_v6, %v3111_v19  ;;  %v3061_v53 = vmul.f32 %v7337_v3, %v7412_v37  ;;  %v3486_v28 = vadd.f32 %v3470_v49, %v3445_v12  ;;  %v3428_v10 = vmul.f32 %v7522_v63, %v7589_v16  ;;  %v7616_v19 = vld [vmem:[#allocation2 + $0xc8] sm:$0xff] }
 0x184   : > { %v7605_v51 = vadd.f32 %v3070_v20, %v7331_v55  ;;  %v2948_v52 = vadd.f32 %v7375_v41, %v2907_v57  ;;  %v3234_v39 = vmul.f32 %v7507_v45, %v7594_v13  ;;  %v3403_v47 = vadd.f32 %v3387_v40, %v3346_v60  ;;  %v3566_v60 = vpop.permute.xlu1 %3565 }
 0x185   : > { %v3469_v9 = vmul.f32 %v7540_v43, %v7598_v46  ;;  %v3209_v3 = vadd.f32 %v3193_v23, %v3168_v59  ;;  %v3114_v55 = vmul.f32 %v7478_v21, %v7494_v50  ;;  %v3155_v37 = vmul.f32 %v7483_v31, %v7496_v7 }
 0x186   : > { %8495 = vst [vmem:[#allocation24_spill] sm:$0xff] %v7605_v51  ;;  %v3196_v49 = vmul.f32 %v7492_v56, %v7542_v14  ;;  %v3292_v41 = vadd.f32 %v3276_v54, %v3251_v11  ;;  %v3527_v33 = vadd.f32 %v3511_v17, %v3486_v28  ;;  %v3444_v57 = vadd.f32 %v3428_v10, %v3403_v47  ;;  %v7637_v10 = vld [vmem:[#allocation2 + $0xe1] sm:$0xff] }
 0x187   : > { %v3510_v40 = vmul.f32 %v7559_v29, %v7607_v35  ;;  %v3171_v6 = vadd.f32 %v3155_v37, %v3114_v55  ;;  %v3237_v20 = vmul.f32 %v7581_v38, %v7507_v45  ;;  %v3349_v50 = vmul.f32 %v7512_v44, %v7529_v36 }
 0x188   : > { %v3390_v12 = vmul.f32 %v7517_v61, %v7531_v4  ;;  %v3060_v23 = vmul.f32 %v7359_v62, %v2948_v52  ;;  %v3275_v54 = vmul.f32 %v7553_v15, %v7616_v19  ;;  %v3485_v17 = vadd.f32 %v3469_v9, %v3444_v57  ;;  %v3561_v57 = vpop.permute.xlu0 %3560 }
 0x189   : > { %v3431_v11 = vmul.f32 %v7522_v63, %v7544_v27  ;;  %v3250_v59 = vadd.f32 %v3234_v39, %v3209_v3  ;;  %v3212_v28 = vadd.f32 %v3196_v49, %v3171_v6  ;;  %v3472_v36 = vmul.f32 %v7540_v43, %v7561_v0  ;;  %v7646_v39 = vld [vmem:[#allocation2 + $0xe0] sm:$0xff] }
 0x18a   : > { %v3406_v47 = vadd.f32 %v3390_v12, %v3349_v50  ;;  %v3639_v55 = vmul.f32 %v3566_v60, %v3527_v33  ;;  %v3526_v37 = vadd.f32 %v3510_v40, %v3485_v17  ;;  %v3113_v62 = vmul.f32 %v7478_v21, %v7567_v22 }
 0x18b   : > { %v3154_v52 = vmul.f32 %v7483_v31, %v7576_v32  ;;  %v3308_v9 = vadd.f32 %v3292_v41, %v7346_v42  ;;  %v3253_v51 = vadd.f32 %v3237_v20, %v3212_v28  ;;  %v3278_v3 = vmul.f32 %v7646_v39, %v7553_v15 }
 0x18c   : > { %v3447_v49 = vadd.f32 %v3431_v11, %v3406_v47  ;;  %v3513_v33 = vmul.f32 %v7559_v29, %v7637_v10  ;;  %v3195_v22 = vmul.f32 %v7492_v56, %v7594_v13  ;;  %v3348_v60 = vmul.f32 %v7512_v44, %v3325_v34  ;;  %v7667_v47 = vld [vmem:[#allocation2 + $0xd9] sm:$0xff] }
 0x18d   : > { %v3170_v40 = vadd.f32 %v3154_v52, %v3113_v62  ;;  %v3291_v6 = vadd.f32 %v3275_v54, %v3250_v59  ;;  %v3389_v42 = vmul.f32 %v7517_v61, %v7589_v16  ;;  %v3430_v41 = vmul.f32 %v7522_v63, %v7598_v46 }
 0x18e   : > { %v3488_v50 = vadd.f32 %v3472_v36, %v3447_v49  ;;  %v7660_v20 = vadd.f32 %v3061_v53, %v7165_v58  ;;  %v7663_v12 = vadd.f32 %v3060_v23, %v7168_v8  ;;  %v7665_v17 = vadd.f32 %v3639_v55, %v3308_v9  ;;  %v7678_v23 = vld [vmem:[#allocation2 + $0xd8] sm:$0xff] }
 0x18f   : > { %v3638_v11 = vmul.f32 %v3561_v57, %v3526_v37  ;;  %v3294_v28 = vadd.f32 %v3278_v3, %v3253_v51  ;;  %v3405_v34 = vadd.f32 %v3389_v42, %v3348_v60  ;;  %v3471_v54 = vmul.f32 %v7540_v43, %v7607_v35  ;;  %v3576_v51 = vpop.permute.xlu1 %3575  ;;  %v7699_v42 = vld [vmem:[#allocation2 + $0xf0] sm:$0xff] }
 0x190   : > { %v3116_v59 = vmul.f32 %v7478_v21, %v7496_v7  ;;  %v3529_v36 = vadd.f32 %v3513_v33, %v3488_v50  ;;  %v3211_v62 = vadd.f32 %v3195_v22, %v3170_v40  ;;  %v3236_v58 = vmul.f32 %v7507_v45, %v7616_v19 }
 0x191   : > { %v3157_v8 = vmul.f32 %v7483_v31, %v7542_v14  ;;  %v3307_v53 = vadd.f32 %v3291_v6, %v7357_v1  ;;  %v3277_v55 = vmul.f32 %v7678_v23, %v7553_v15  ;;  %v3446_v37 = vadd.f32 %v3430_v41, %v3405_v34 }
 0x192   : > { %v3351_v7 = vmul.f32 %v7512_v44, %v7531_v4  ;;  %v3512_v52 = vmul.f32 %v7559_v29, %v7667_v47  ;;  %v3198_v57 = vmul.f32 %v7581_v38, %v7492_v56  ;;  %v3392_v1 = vmul.f32 %v7517_v61, %v7544_v27 }
 0x193   : > { %v3173_v9 = vadd.f32 %v3157_v8, %v3116_v59  ;;  %v7690_v3 = vadd.f32 %v3638_v11, %v3307_v53  ;;  %v3310_v49 = vadd.f32 %v3294_v28, %v7386_v25  ;;  %v3487_v33 = vadd.f32 %v3471_v54, %v3446_v37  ;;  %v7703_v11 = vld [vmem:[#allocation2 + $0xf1] sm:$0xff]  ;;  %v3571_v37 = vpop.permute.xlu0 %3570 }
 0x194   : > { %v3433_v40 = vmul.f32 %v7522_v63, %v7561_v0  ;;  %v3641_v22 = vmul.f32 %v3576_v51, %v3529_v36  ;;  %v3252_v4 = vadd.f32 %v3236_v58, %v3211_v62  ;;  %v3408_v60 = vadd.f32 %v3392_v1, %v3351_v7  ;;  %v7713_v62 = vld [vmem:[#allocation2 + $0xe8] sm:$0xff] }
 0x195   : > { %v3115_v6 = vmul.f32 %v7478_v21, %v7576_v32  ;;  %v3239_v50 = vmul.f32 %v7646_v39, %v7507_v45  ;;  %v3280_v41 = vmul.f32 %v7699_v42, %v7553_v15  ;;  %v3156_v25 = vmul.f32 %v7483_v31, %v7594_v13 }
 0x196   : > { %v3197_v28 = vmul.f32 %v7492_v56, %v7616_v19  ;;  %v3528_v34 = vadd.f32 %v3512_v52, %v3487_v33  ;;  %v3214_v54 = vadd.f32 %v3198_v57, %v3173_v9  ;;  %v3474_v32 = vmul.f32 %v7540_v43, %v7637_v10  ;;  %v7725_v9 = vld [vmem:[#allocation2 + $0xe9] sm:$0xff] }
 0x197   : > { %v3350_v59 = vmul.f32 %v7512_v44, %v7589_v16  ;;  %v3449_v36 = vadd.f32 %v3433_v40, %v3408_v60  ;;  %v3172_v58 = vadd.f32 %v3156_v25, %v3115_v6  ;;  %v3391_v8 = vmul.f32 %v7517_v61, %v7598_v46 }
 0x198   : > { %v3432_v53 = vmul.f32 %v7522_v63, %v7607_v35  ;;  %v7719_v51 = vadd.f32 %v3641_v22, %v3310_v49  ;;  %v3293_v7 = vadd.f32 %v3277_v55, %v3252_v4  ;;  %v3515_v52 = vmul.f32 %v7559_v29, %v7703_v11 }
 0x199   : > { %v3238_v16 = vmul.f32 %v7678_v23, %v7507_v45  ;;  %v3213_v57 = vadd.f32 %v3197_v28, %v3172_v58  ;;  %v3407_v1 = vadd.f32 %v3391_v8, %v3350_v59  ;;  %v3473_v33 = vmul.f32 %v7540_v43, %v7667_v47 }
 0x19a   : > { %8496 = vst [vmem:[#allocation26_spill] sm:$0xff] %v7719_v51  ;;  %v3118_v40 = vmul.f32 %v7478_v21, %v7542_v14  ;;  %v3255_v49 = vadd.f32 %v3239_v50, %v3214_v54  ;;  %v3279_v55 = vmul.f32 %v7553_v15, %v7713_v62  ;;  %v3159_v22 = vmul.f32 %v7581_v38, %v7483_v31 }
 0x19b   : > { %v3200_v4 = vmul.f32 %v7646_v39, %v7492_v56  ;;  %v3640_v60 = vmul.f32 %v3571_v37, %v3528_v34  ;;  %v3490_v6 = vadd.f32 %v3474_v32, %v3449_v36  ;;  %v3448_v25 = vadd.f32 %v3432_v53, %v3407_v1  ;;  %v7748_v36 = vld [vmem:[#allocation2 + $0x100] sm:$0xff] }
 0x19c   : > { %v3514_v28 = vmul.f32 %v7559_v29, %v7725_v9  ;;  %v3254_v59 = vadd.f32 %v3238_v16, %v3213_v57  ;;  %v3175_v58 = vadd.f32 %v3159_v22, %v3118_v40  ;;  %v3353_v14 = vmul.f32 %v7512_v44, %v7544_v27  ;;  %v7754_v1 = vld [vmem:[#allocation2 + $0x101] sm:$0xff] }
 0x19d   : > { %v3394_v50 = vmul.f32 %v7517_v61, %v7561_v0  ;;  %v3309_v54 = vadd.f32 %v3293_v7, %v7548_v30  ;;  %v3489_v8 = vadd.f32 %v3473_v33, %v3448_v25  ;;  %v3241_v51 = vmul.f32 %v7699_v42, %v7507_v45  ;;  %v3586_v33 = vpop.permute.xlu1 %3585 }
 0x19e   : > { %v3435_v34 = vmul.f32 %v7522_v63, %v7637_v10  ;;  %v3296_v32 = vadd.f32 %v3280_v41, %v3255_v49  ;;  %v3216_v53 = vadd.f32 %v3200_v4, %v3175_v58  ;;  %v3476_v27 = vmul.f32 %v7540_v43, %v7703_v11  ;;  %v3581_v4 = vpop.permute.xlu0 %3580 }
 0x19f   : > { %v3410_v37 = vadd.f32 %v3394_v50, %v3353_v14  ;;  %v7752_v16 = vadd.f32 %v3640_v60, %v3309_v54  ;;  %v3531_v57 = vadd.f32 %v3515_v52, %v3490_v6  ;;  %v3117_v30 = vmul.f32 %v7478_v21, %v7594_v13  ;;  %v7768_v14 = vld [vmem:[#allocation2 + $0xf8] sm:$0xff] }
 0x1a0   : > { %v3158_v7 = vmul.f32 %v7483_v31, %v7616_v19  ;;  %v3295_v41 = vadd.f32 %v3279_v55, %v3254_v59  ;;  %v3530_v40 = vadd.f32 %v3514_v28, %v3489_v8  ;;  %v3199_v22 = vmul.f32 %v7678_v23, %v7492_v56 }
 0x1a1   : > { %v3451_v49 = vadd.f32 %v3435_v34, %v3410_v37  ;;  %v3257_v25 = vadd.f32 %v3241_v51, %v3216_v53  ;;  %v3282_v52 = vmul.f32 %v7553_v15, %v7748_v36  ;;  %v3352_v6 = vmul.f32 %v7512_v44, %v7598_v46 }
 0x1a2   : > { %v3174_v60 = vadd.f32 %v3158_v7, %v3117_v30  ;;  %v3517_v58 = vmul.f32 %v7559_v29, %v7754_v1  ;;  %v3240_v55 = vmul.f32 %v7507_v45, %v7713_v62  ;;  %v3393_v28 = vmul.f32 %v7517_v61, %v7607_v35  ;;  %v7782_v30 = vld [vmem:[#allocation2 + $0xf9] sm:$0xff] }
 0x1a3   : > { %v3492_v13 = vadd.f32 %v3476_v27, %v3451_v49  ;;  %v3312_v51 = vadd.f32 %v3296_v32, %v7660_v20  ;;  %v3643_v59 = vmul.f32 %v3586_v33, %v3531_v57  ;;  %v3434_v54 = vmul.f32 %v7522_v63, %v7667_v47  ;;  %v3596_v33 = vpop.permute.xlu1 %3595 }
 0x1a4   : > { %v3215_v50 = vadd.f32 %v3199_v22, %v3174_v60  ;;  %v3311_v46 = vadd.f32 %v3295_v41, %v7663_v12  ;;  %v3642_v8 = vmul.f32 %v3581_v4, %v3530_v40  ;;  %v3409_v34 = vadd.f32 %v3393_v28, %v3352_v6  ;;  %v7804_v6 = vld [vmem:[#allocation2 + $0x111] sm:$0xff] }
 0x1a5   : > { %v3120_v53 = vmul.f32 %v7581_v38, %v7478_v21  ;;  %v3298_v37 = vadd.f32 %v3282_v52, %v3257_v25  ;;  %v3281_v27 = vmul.f32 %v7553_v15, %v7768_v14  ;;  %v3161_v20 = vmul.f32 %v7646_v39, %v7483_v31 }
 0x1a6   : > { %v3202_v32 = vmul.f32 %v7699_v42, %v7492_v56  ;;  %v3533_v57 = vadd.f32 %v3517_v58, %v3492_v13  ;;  %v3256_v7 = vadd.f32 %v3240_v55, %v3215_v50  ;;  %v3475_v12 = vmul.f32 %v7540_v43, %v7725_v9 }
 0x1a7   : > { %v3355_v38 = vmul.f32 %v7512_v44, %v7561_v0  ;;  %v3450_v41 = vadd.f32 %v3434_v54, %v3409_v34  ;;  %v3177_v40 = vadd.f32 %v3161_v20, %v3120_v53  ;;  %v3396_v49 = vmul.f32 %v7517_v61, %v7637_v10 }
 0x1a8   : > { %v3437_v22 = vmul.f32 %v7522_v63, %v7703_v11  ;;  %v7796_v4 = vadd.f32 %v3643_v59, %v3312_v51  ;;  %v7798_v25 = vadd.f32 %v3642_v8, %v3311_v46  ;;  %v3516_v52 = vmul.f32 %v7559_v29, %v7782_v30  ;;  %v7811_v59 = vld [vmem:[#allocation2 + $0x110] sm:$0xff] }
 0x1a9   : > { %v3243_v60 = vmul.f32 %v7507_v45, %v7748_v36  ;;  %v3218_v0 = vadd.f32 %v3202_v32, %v3177_v40  ;;  %v3412_v13 = vadd.f32 %v3396_v49, %v3355_v38  ;;  %v3478_v58 = vmul.f32 %v7540_v43, %v7754_v1 }
 0x1aa   : > { %v3119_v55 = vmul.f32 %v7478_v21, %v7616_v19  ;;  %v3314_v28 = vadd.f32 %v3298_v37, %v7427_v2  ;;  %v3645_v51 = vmul.f32 %v3596_v33, %v3533_v57  ;;  %v3160_v50 = vmul.f32 %v7678_v23, %v7483_v31 }
 0x1ab   : > { %v3201_v54 = vmul.f32 %v7492_v56, %v7713_v62  ;;  %v3297_v46 = vadd.f32 %v3281_v27, %v3256_v7  ;;  %v3491_v8 = vadd.f32 %v3475_v12, %v3450_v41  ;;  %v3453_v34 = vadd.f32 %v3437_v22, %v3412_v13  ;;  %v7827_v7 = vld [vmem:[#allocation2 + $0x108] sm:$0xff]  ;;  %v3591_v13 = vpop.permute.xlu0 %3590 }
 0x1ac   : > { %v3354_v53 = vmul.f32 %v7512_v44, %v7607_v35  ;;  %v3519_v19 = vmul.f32 %v7559_v29, %v7804_v6  ;;  %v3176_v20 = vadd.f32 %v3160_v50, %v3119_v55  ;;  %v3395_v2 = vmul.f32 %v7517_v61, %v7667_v47 }
 0x1ad   : > { %v3436_v37 = vmul.f32 %v7522_v63, %v7725_v9  ;;  %v3259_v32 = vadd.f32 %v3243_v60, %v3218_v0  ;;  %v3284_v57 = vmul.f32 %v7553_v15, %v7811_v59  ;;  %v3494_v27 = vadd.f32 %v3478_v58, %v3453_v34  ;;  %v7838_v60 = vld [vmem:[#allocation2 + $0x109] sm:$0xff] }
 0x1ae   : > { %v3242_v35 = vmul.f32 %v7507_v45, %v7768_v14  ;;  %v3217_v12 = vadd.f32 %v3201_v54, %v3176_v20  ;;  %v3411_v38 = vadd.f32 %v3395_v2, %v3354_v53  ;;  %v3477_v33 = vmul.f32 %v7540_v43, %v7782_v30  ;;  %v7852_v53 = vld [vmem:[#allocation2 + $0x121] sm:$0xff] }
 0x1af   : > { %v3122_v41 = vmul.f32 %v7646_v39, %v7478_v21  ;;  %v7835_v40 = vadd.f32 %v3645_v51, %v3314_v28  ;;  %v3313_v49 = vadd.f32 %v3297_v46, %v7436_v48  ;;  %v3532_v22 = vadd.f32 %v3516_v52, %v3491_v8  ;;  %v3606_v39 = vpop.permute.xlu1 %3605 }
 0x1b0   : > { %v3163_v0 = vmul.f32 %v7699_v42, %v7483_v31  ;;  %v3535_v58 = vadd.f32 %v3519_v19, %v3494_v27  ;;  %v3283_v55 = vmul.f32 %v7553_v15, %v7827_v7  ;;  %v3452_v50 = vadd.f32 %v3436_v37, %v3411_v38  ;;  %v7865_v38 = vld [vmem:[#allocation2 + $0x120] sm:$0xff] }
 0x1b1   : > { %v3204_v54 = vmul.f32 %v7492_v56, %v7748_v36  ;;  %v3300_v28 = vadd.f32 %v3284_v57, %v3259_v32  ;;  %v3357_v48 = vmul.f32 %v7512_v44, %v7637_v10  ;;  %v3398_v52 = vmul.f32 %v7517_v61, %v7703_v11 }
 0x1b2   : > { %v3179_v51 = vadd.f32 %v3163_v0, %v3122_v41  ;;  %v3258_v46 = vadd.f32 %v3242_v35, %v3217_v12  ;;  %v3493_v8 = vadd.f32 %v3477_v33, %v3452_v50  ;;  %v3518_v34 = vmul.f32 %v7559_v29, %v7838_v60 }
 0x1b3   : > { %v3439_v19 = vmul.f32 %v7522_v63, %v7754_v1  ;;  %v3644_v20 = vmul.f32 %v3591_v13, %v3532_v22  ;;  %v3245_v2 = vmul.f32 %v7507_v45, %v7811_v59  ;;  %v3414_v37 = vadd.f32 %v3398_v52, %v3357_v48  ;;  %v7883_v52 = vld [vmem:[#allocation2 + $0x118] sm:$0xff] }
 0x1b4   : > { %v3480_v10 = vmul.f32 %v7540_v43, %v7804_v6  ;;  %v3647_v32 = vmul.f32 %v3606_v39, %v3535_v58  ;;  %v3220_v57 = vadd.f32 %v3204_v54, %v3179_v51  ;;  %v3121_v27 = vmul.f32 %v7678_v23, %v7478_v21  ;;  %v3601_v54 = vpop.permute.xlu0 %3600 }
 0x1b5   : > { %v3162_v35 = vmul.f32 %v7483_v31, %v7713_v62  ;;  %v3316_v12 = vadd.f32 %v3300_v28, %v7450_v5  ;;  %v3455_v33 = vadd.f32 %v3439_v19, %v3414_v37  ;;  %v3521_v41 = vmul.f32 %v7559_v29, %v7852_v53  ;;  %v3616_v37 = vpop.permute.xlu1 %3615 }
 0x1b6   : > { %v3203_v22 = vmul.f32 %v7492_v56, %v7768_v14  ;;  %v3299_v0 = vadd.f32 %v3283_v55, %v3258_v46  ;;  %v3534_v13 = vadd.f32 %v3518_v34, %v3493_v8  ;;  %v3356_v23 = vmul.f32 %v7512_v44, %v7667_v47 }
 0x1b7   : > { %v3178_v58 = vadd.f32 %v3162_v35, %v3121_v27  ;;  %v7873_v50 = vadd.f32 %v3644_v20, %v3313_v49  ;;  %v3496_v39 = vadd.f32 %v3480_v10, %v3455_v33  ;;  %v3397_v5 = vmul.f32 %v7517_v61, %v7725_v9  ;;  %v7890_v10 = vld [vmem:[#allocation2 + $0x119] sm:$0xff] }
 0x1b8   : > { %v3438_v28 = vmul.f32 %v7522_v63, %v7782_v30  ;;  %v7879_v51 = vadd.f32 %v3647_v32, %v3316_v12  ;;  %v3261_v48 = vadd.f32 %v3245_v2, %v3220_v57  ;;  %v3286_v55 = vmul.f32 %v7553_v15, %v7865_v38 }
 0x1b9   : > { %v3244_v47 = vmul.f32 %v7507_v45, %v7827_v7  ;;  %v3537_v49 = vadd.f32 %v3521_v41, %v3496_v39  ;;  %v3219_v46 = vadd.f32 %v3203_v22, %v3178_v58  ;;  %v3413_v8 = vadd.f32 %v3397_v5, %v3356_v23  ;;  %v3461_v23 = vld [vmem:[#allocation2 + $0x131] sm:$0xff] }
 0x1ba   : > { %8497 = vst [vmem:[#allocation12_spill] sm:$0xff] %v7879_v51  ;;  %v3124_v34 = vmul.f32 %v7699_v42, %v7478_v21  ;;  %v3315_v19 = vadd.f32 %v3299_v0, %v7461_v24  ;;  %v3646_v20 = vmul.f32 %v3601_v54, %v3534_v13  ;;  %v3165_v2 = vmul.f32 %v7483_v31, %v7748_v36 }
 0x1bb   : > { %v3206_v32 = vmul.f32 %v7492_v56, %v7811_v59  ;;  %v3285_v57 = vmul.f32 %v7553_v15, %v7883_v52  ;;  %v3454_v27 = vadd.f32 %v3438_v28, %v3413_v8  ;;  %v3479_v35 = vmul.f32 %v7540_v43, %v7838_v60 }
 0x1bc   : > { %v3359_v24 = vmul.f32 %v7512_v44, %v7703_v11  ;;  %v3302_v42 = vadd.f32 %v3286_v55, %v3261_v48  ;;  %v3181_v12 = vadd.f32 %v3165_v2, %v3124_v34  ;;  %v3400_v33 = vmul.f32 %v7517_v61, %v7754_v1  ;;  %v4935_v48 = vld [vmem:[#allocation2 + $0x10] sm:$0xff] }
 0x1bd   : > { %v3441_v41 = vmul.f32 %v7522_v63, %v7804_v6  ;;  %v3649_v22 = vmul.f32 %v3616_v37, %v3537_v49  ;;  %v3260_v0 = vadd.f32 %v3244_v47, %v3219_v46  ;;  %v3520_v13 = vmul.f32 %v7559_v29, %v7890_v10 }
 0x1be   : > { %v3247_v58 = vmul.f32 %v7507_v45, %v7865_v38  ;;  %v3222_v54 = vadd.f32 %v3206_v32, %v3181_v12  ;;  %v3416_v39 = vadd.f32 %v3400_v33, %v3359_v24  ;;  %v3482_v11 = vmul.f32 %v7540_v43, %v7852_v53 }
 0x1bf   : > { %v3123_v5 = vmul.f32 %v7478_v21, %v7713_v62  ;;  %v3495_v28 = vadd.f32 %v3479_v35, %v3454_v27  ;;  %v7915_v55 = vmul.f32 %v4935_v48, %v7553_v15  ;;  %v3164_v47 = vmul.f32 %v7483_v31, %v7768_v14  ;;  %v7930_v27 = vld [vmem:[#allocation2 + $0x129] sm:$0xff] }
 0x1c0   : > { %v3205_v49 = vmul.f32 %v7492_v56, %v7827_v7  ;;  %v3457_v46 = vadd.f32 %v3441_v41, %v3416_v39  ;;  %v3523_v8 = vmul.f32 %v7559_v29, %v3461_v23  ;;  %v3358_v34 = vmul.f32 %v7512_v44, %v7725_v9  ;;  %v3611_v9 = vpop.permute.xlu0 %3610 }
 0x1c1   : > { %v3399_v62 = vmul.f32 %v7517_v61, %v7782_v30  ;;  %v3301_v37 = vadd.f32 %v3285_v57, %v3260_v0  ;;  %v3180_v2 = vadd.f32 %v3164_v47, %v3123_v5  ;;  %v3246_v15 = vmul.f32 %v7507_v45, %v7883_v52 }
 0x1c2   : > { %v3440_v32 = vmul.f32 %v7522_v63, %v7838_v60  ;;  %v3263_v35 = vadd.f32 %v3247_v58, %v3222_v54  ;;  %v3498_v24 = vadd.f32 %v3482_v11, %v3457_v46  ;;  %v3481_v33 = vmul.f32 %v7540_v43, %v7890_v10  ;;  %v3626_v54 = vpop.permute.xlu1 %3625 }
 0x1c3   : > { %v3415_v12 = vadd.f32 %v3399_v62, %v3358_v34  ;;  %v3536_v41 = vadd.f32 %v3520_v13, %v3495_v28  ;;  %v3221_v39 = vadd.f32 %v3205_v49, %v3180_v2  ;;  %v3126_v57 = vmul.f32 %v7478_v21, %v7748_v36 }
 0x1c4   : > { %v3167_v0 = vmul.f32 %v7483_v31, %v7811_v59  ;;  %v3539_v5 = vadd.f32 %v3523_v8, %v3498_v24  ;;  %v3522_v51 = vmul.f32 %v7559_v29, %v7930_v27  ;;  %v3208_v58 = vmul.f32 %v7492_v56, %v7865_v38 }
 0x1c5   : > { %v3456_v47 = vadd.f32 %v3440_v32, %v3415_v12  ;;  %v3262_v11 = vadd.f32 %v3246_v15, %v3221_v39  ;;  %v7943_v13 = vmul.f32 %v4935_v48, %v7507_v45  ;;  %v3361_v36 = vmul.f32 %v7512_v44, %v7754_v1  ;;  %v3502_v32 = vld [vmem:[#allocation2 + $0x141] sm:$0xff]  ;;  %v3621_v12 = vpop.permute.xlu0 %3620  ;;  %v7988_v39 = vld [vmem:[#allocation2 + $0xb2] sm:$0xff] }
 0x1c6   : > { %v3183_v46 = vadd.f32 %v3167_v0, %v3126_v57  ;;  %v3304_v28 = vadd.f32 %v7915_v55, %v3263_v35  ;;  %v3402_v49 = vmul.f32 %v7517_v61, %v7804_v6  ;;  %v3443_v8 = vmul.f32 %v7522_v63, %v7852_v53  ;;  %v8498_v35 = vld [vmem:[#allocation9_spill] sm:$0xff] }
 0x1c7   : > { %v3497_v59 = vadd.f32 %v3481_v33, %v3456_v47  ;;  %v7952_v34 = vadd.f32 %v3646_v20, %v3315_v19  ;;  %v3318_v38 = vadd.f32 %v3302_v42, %v7472_v18  ;;  %v3648_v62 = vmul.f32 %v3611_v9, %v3536_v41  ;;  %v7965_v18 = vld [vmem:[%s8398_s4 + $0x4] ss:$0 sm:$0xff]  ;;  %v3671_v33 = vld [vmem:[#allocation2 + $0x92] sm:$0xff] }
 0x1c8   : > { %v3224_v2 = vadd.f32 %v3208_v58, %v3183_v46  ;;  %v3651_v45 = vmul.f32 %v3626_v54, %v3539_v5  ;;  %v3418_v15 = vadd.f32 %v3402_v49, %v3361_v36  ;;  %v3125_v1 = vmul.f32 %v7478_v21, %v7768_v14  ;;  %v8499_v20 = vld [vmem:[#allocation10_spill] sm:$0xff]  ;;  %v3636_v54 = vpop.permute.xlu1 %3635 }
 0x1c9   : > { %v3538_v48 = vadd.f32 %v3522_v51, %v3497_v59  ;;  %v3317_v24 = vadd.f32 %v3301_v37, %v8498_v35  ;;  %v3303_v6 = vadd.f32 %v7915_v55, %v3262_v11  ;;  %v3166_v19 = vmul.f32 %v7483_v31, %v7827_v7  ;;  %v7974_v37 = vld [vmem:[%s8398_s4 + $0x9] ss:$0 sm:$0xff]  ;;  %v8005_v59 = vld [vmem:[#allocation2 + $0xaa] sm:$0xff] }
 0x1ca   : > { %v3265_v53 = vadd.f32 %v7943_v13, %v3224_v2  ;;  %v7967_v51 = vadd.f32 %v3649_v22, %v3318_v38  ;;  %v3320_v42 = vadd.f32 %v3304_v28, %v8499_v20  ;;  %v3459_v21 = vadd.f32 %v3443_v8, %v3418_v15  ;;  %v3673_v9 = vld [vmem:[#allocation2 + $0xa2] sm:$0xff]  ;;  %v3672_v28 = vld [vmem:[#allocation2 + $0x9a] sm:$0xff]  ;;  %v8016_v38 = vld [vmem:[%s8398_s4 + $0x18] ss:$0 sm:$0xff]  ;;  %v8029_v15 = vpop.permute.xlu0 %3630 }
 0x1cb   : > { %v3484_v14 = vmul.f32 %v7540_v43, %v3461_v23  ;;  %v7976_v31 = vadd.f32 %v3648_v62, %v3317_v24  ;;  %v3525_v7 = vmul.f32 %v7559_v29, %v3502_v32  ;;  %v3360_v22 = vmul.f32 %v7512_v44, %v7782_v30  ;;  %v7986_v23 = vld [vmem:[%s8398_s4 + $0xe] ss:$0 sm:$0xff]  ;;  %v7997_v44 = vld [vmem:[%s8398_s4 + $0x13] ss:$0 sm:$0xff]  ;;  %v3501_v8 = vld [vmem:[#allocation2 + $0x139] sm:$0xff] }
 0x1cc   : > { %v3401_v41 = vmul.f32 %v7517_v61, %v7838_v60  ;;  %v7990_v57 = vadd.f32 %v3651_v45, %v3320_v42  ;;  %v3650_v0 = vmul.f32 %v3621_v12, %v3538_v48  ;;  %v3182_v5 = vadd.f32 %v3166_v19, %v3125_v1  ;;  %v7999_v61 = vld [vmem:[#allocation2 + $0xc2] sm:$0xff]  ;;  %v3670_v30 = vld [vmem:[#allocation2 + $0x8a] sm:$0xff]  ;;  %v8018_v62 = vld [vmem:[#allocation2 + $0xd2] sm:$0xff] }
 0x1cd   : > { %v3207_v47 = vmul.f32 %v7492_v56, %v7883_v52  ;;  %v8500_v60 = vld [vmem:[#allocation11_spill] sm:$0xff]  ;;  %v3306_v11 = vadd.f32 %v7915_v55, %v3265_v53  ;;  %v3694_v46 = vmul.f32 %v7965_v18, %v3671_v33  ;;  %v3735_v36 = vmul.f32 %v7974_v37, %v3673_v9 }
 0x1ce   : > { %v3319_v58 = vadd.f32 %v3303_v6, %v8500_v60  ;;  %v3500_v56 = vadd.f32 %v3484_v14, %v3459_v21  ;;  %v3442_v52 = vmul.f32 %v7522_v63, %v7890_v10  ;;  %v8011_v49 = vmul.f32 %v7540_v43, %v7930_v27  ;;  %v8024_v10 = vld [vmem:[#allocation2 + $0xba] sm:$0xff]  ;;  %v8042_v19 = vld [vmem:[#allocation2 + $0xca] sm:$0xff] }
 0x1cf   : > { %v3776_v2 = vmul.f32 %v7986_v23, %v7988_v39  ;;  %v3417_v45 = vadd.f32 %v3401_v41, %v3360_v22  ;;  %v3751_v48 = vadd.f32 %v3735_v36, %v3694_v46  ;;  %v3817_v63 = vmul.f32 %v7997_v44, %v7999_v61  ;;  %v8049_v41 = vld [vmem:[#allocation2 + $0xe2] sm:$0xff]  ;;  %v3908_v36 = vpop.permute.xlu0 %3907 }
 0x1d0   : > { %v3693_v43 = vmul.f32 %v7965_v18, %v3670_v30  ;;  %v8027_v27 = vadd.f32 %v3650_v0, %v3319_v58  ;;  %v3223_v32 = vadd.f32 %v3207_v47, %v3182_v5  ;;  %v3734_v1 = vmul.f32 %v7974_v37, %v3672_v28 }
 0x1d1   : > { %v3775_v35 = vmul.f32 %v7986_v23, %v8005_v59  ;;  %v8035_v24 = vadd.f32 %v3306_v11, %v7592_v26  ;;  %v8038_v12 = vmul.f32 %v7559_v29, %v3501_v8  ;;  %v3792_v6 = vadd.f32 %v3776_v2, %v3751_v48  ;;  %v3913_v26 = vpop.permute.xlu1 %3912 }
 0x1d2   : > { %v3858_v53 = vmul.f32 %v8016_v38, %v8018_v62  ;;  %v3541_v20 = vadd.f32 %v3525_v7, %v3500_v56  ;;  %v3750_v42 = vadd.f32 %v3734_v1, %v3693_v43  ;;  %v3816_v21 = vmul.f32 %v7997_v44, %v8024_v10 }
 0x1d3   : > { %v3696_v14 = vmul.f32 %v7965_v18, %v3673_v9  ;;  %v8047_v33 = vadd.f32 %v3442_v52, %v3417_v45  ;;  %v3833_v22 = vadd.f32 %v3817_v63, %v3792_v6  ;;  %v3737_v29 = vmul.f32 %v7974_v37, %v7988_v39  ;;  %v8069_v52 = vld [vmem:[#allocation2 + $0xda] sm:$0xff] }
 0x1d4   : > { %v3778_v0 = vmul.f32 %v7986_v23, %v7999_v61  ;;  %v8056_v7 = vadd.f32 %v7943_v13, %v3223_v32  ;;  %v3791_v5 = vadd.f32 %v3775_v35, %v3750_v42  ;;  %v3857_v47 = vmul.f32 %v8016_v38, %v8042_v19  ;;  %v8084_v42 = vld [vmem:[#allocation2 + $0xf2] sm:$0xff] }
 0x1d5   : > { %v3819_v9 = vmul.f32 %v7997_v44, %v8018_v62  ;;  %v3874_v30 = vadd.f32 %v3858_v53, %v3833_v22  ;;  %v3753_v60 = vadd.f32 %v3737_v29, %v3696_v14  ;;  %v3695_v58 = vmul.f32 %v7965_v18, %v3672_v28  ;;  %v3923_v35 = vpop.permute.xlu1 %3922 }
 0x1d6   : > { %v3736_v11 = vmul.f32 %v7974_v37, %v8005_v59  ;;  %v8065_v46 = vmul.f32 %v3636_v54, %v3541_v20  ;;  %v3832_v56 = vadd.f32 %v3816_v21, %v3791_v5  ;;  %v3860_v13 = vmul.f32 %v8016_v38, %v8049_v41  ;;  %v8096_v5 = vld [vmem:[#allocation2 + $0xea] sm:$0xff] }
 0x1d7   : > { %v3777_v8 = vmul.f32 %v7986_v23, %v8024_v10  ;;  %v3986_v2 = vmul.f32 %v3913_v26, %v3874_v30  ;;  %v3794_v45 = vadd.f32 %v3778_v0, %v3753_v60  ;;  %v3818_v28 = vmul.f32 %v7997_v44, %v8042_v19  ;;  %v3918_v30 = vpop.permute.xlu0 %3917 }
 0x1d8   : > { %v3752_v48 = vadd.f32 %v3736_v11, %v3695_v58  ;;  %v3873_v63 = vadd.f32 %v3857_v47, %v3832_v56  ;;  %v3698_v54 = vmul.f32 %v7965_v18, %v7988_v39  ;;  %v3739_v43 = vmul.f32 %v7974_v37, %v7999_v61  ;;  %v8108_v11 = vld [vmem:[%s8400_s6] ss:$0 sm:$0xff] }
 0x1d9   : > { %v3780_v32 = vmul.f32 %v7986_v23, %v8018_v62  ;;  %v4002_v1 = vadd.f32 %v3986_v2, %v7665_v17  ;;  %v3835_v6 = vadd.f32 %v3819_v9, %v3794_v45  ;;  %v3859_v20 = vmul.f32 %v8016_v38, %v8069_v52  ;;  %v8093_v17 = vld [vmem:[%s8399_s5] ss:$0 sm:$0xff] }
 0x1da   : > { %v3793_v53 = vadd.f32 %v3777_v8, %v3752_v48  ;;  %v3985_v21 = vmul.f32 %v3908_v36, %v3873_v63  ;;  %v3755_v14 = vadd.f32 %v3739_v43, %v3698_v54  ;;  %v3821_v39 = vmul.f32 %v7997_v44, %v8049_v41  ;;  %v8501_v63 = vld [vmem:[#allocation26_spill] sm:$0xff] }
 0x1db   : > { %v3697_v26 = vmul.f32 %v7965_v18, %v8005_v59  ;;  %v4018_v22 = vmul.f32 %v8093_v17, %v4002_v1  ;;  %v3876_v29 = vadd.f32 %v3860_v13, %v3835_v6  ;;  %v3738_v47 = vmul.f32 %v7974_v37, %v8024_v10 }
 0x1dc   : > { %v3834_v0 = vadd.f32 %v3818_v28, %v3793_v53  ;;  %v4001_v9 = vadd.f32 %v3985_v21, %v7690_v3  ;;  %v3796_v60 = vadd.f32 %v3780_v32, %v3755_v14  ;;  %v3862_v59 = vmul.f32 %v8016_v38, %v8084_v42  ;;  %v3933_v32 = vpop.permute.xlu1 %3932 }
 0x1dd   : > { %v3779_v58 = vmul.f32 %v7986_v23, %v8042_v19  ;;  %v4034_v36 = vadd.f32 %v8108_v11, %v4018_v22  ;;  %v3988_v56 = vmul.f32 %v3923_v35, %v3876_v29  ;;  %v3754_v8 = vadd.f32 %v3738_v47, %v3697_v26 }
 0x1de   : > { %v3875_v13 = vadd.f32 %v3859_v20, %v3834_v0  ;;  %v4017_v3 = vmul.f32 %v8093_v17, %v4001_v9  ;;  %v3837_v2 = vadd.f32 %v3821_v39, %v3796_v60  ;;  %v3820_v45 = vmul.f32 %v7997_v44, %v8069_v52  ;;  %v8130_v0 = vld [vmem:[#allocation2 + $0x102] sm:$0xff] }
 0x1df   : > { %v3861_v48 = vmul.f32 %v8016_v38, %v8096_v5  ;;  %v4066_v28 = vmul.f32 0.70710677, %v4034_v36  ;;  %v4004_v54 = vadd.f32 %v3988_v56, %v8501_v63  ;;  %v3700_v1 = vmul.f32 %v7965_v18, %v7999_v61  ;;  %v8145_v63 = vld [vmem:[#allocation2 + $0xfa] sm:$0xff] }
 0x1e0   : > { %v3987_v43 = vmul.f32 %v3918_v30, %v3875_v13  ;;  %v4033_v35 = vadd.f32 %v8108_v11, %v4017_v3  ;;  %v3878_v6 = vadd.f32 %v3862_v59, %v3837_v2  ;;  %v3795_v53 = vadd.f32 %v3779_v58, %v3754_v8  ;;  %v3928_v30 = vpop.permute.xlu0 %3927 }
 0x1e1   : > { %v3741_v20 = vmul.f32 %v7974_v37, %v8018_v62  ;;  %4868 = verf.f32 %v4066_v28  ;;  %v4020_v21 = vmul.f32 %v8093_v17, %v4004_v54  ;;  %v3782_v39 = vmul.f32 %v7986_v23, %v8049_v41 }
 0x1e2   : > { %v4003_v14 = vadd.f32 %v3987_v43, %v7752_v16  ;;  %v8128_v26 = vadd.f32 %v8011_v49, %v8047_v33  ;;  %v4065_v61 = vmul.f32 0.70710677, %v4033_v35  ;;  %v3990_v22 = vmul.f32 %v3933_v32, %v3878_v6  ;;  %v3943_v32 = vpop.permute.xlu1 %3942 }
 0x1e3   : > { %v3836_v29 = vadd.f32 %v3820_v45, %v3795_v53  ;;  %v4036_v47 = vadd.f32 %v8108_v11, %v4020_v21  ;;  %v3757_v60 = vadd.f32 %v3741_v20, %v3700_v1  ;;  %v3823_v16 = vmul.f32 %v7997_v44, %v8084_v42 }
 0x1e4   : > { %v4019_v9 = vmul.f32 %v8093_v17, %v4003_v14  ;;  %v4050_v59 = vmul.f32 0.5, %v4034_v36  ;;  %4870 = verf.f32 %v4065_v61  ;;  %v4006_v58 = vadd.f32 %v3990_v22, %v7796_v4 }
 0x1e5   : > { %v3877_v49 = vadd.f32 %v3861_v48, %v3836_v29  ;;  %v4068_v33 = vmul.f32 0.70710677, %v4036_v47  ;;  %v3798_v13 = vadd.f32 %v3782_v39, %v3757_v60  ;;  %v3864_v8 = vmul.f32 %v8016_v38, %v8130_v0  ;;  %v8158_v29 = vld [vmem:[#allocation2 + $0x112] sm:$0xff] }
 0x1e6   : > { %v4035_v56 = vadd.f32 %v8108_v11, %v4019_v9  ;;  %v4022_v3 = vmul.f32 %v8093_v17, %v4006_v58  ;;  %v3699_v45 = vmul.f32 %v7965_v18, %v8024_v10  ;;  %v3740_v36 = vmul.f32 %v7974_v37, %v8042_v19 }
 0x1e7   : > { %v3989_v2 = vmul.f32 %v3928_v30, %v3877_v49  ;;  %v4049_v28 = vmul.f32 0.5, %v4033_v35  ;;  %4872 = verf.f32 %v4068_v33  ;;  %v3839_v48 = vadd.f32 %v3823_v16, %v3798_v13  ;;  %v3938_v33 = vpop.permute.xlu0 %3937 }
 0x1e8   : > { %v4067_v4 = vmul.f32 0.70710677, %v4035_v56  ;;  %v4038_v54 = vadd.f32 %v8108_v11, %v4022_v3  ;;  %v3756_v1 = vadd.f32 %v3740_v36, %v3699_v45  ;;  %v3781_v6 = vmul.f32 %v7986_v23, %v8069_v52 }
 0x1e9   : > { %v4005_v43 = vadd.f32 %v3989_v2, %v7798_v25  ;;  %v4052_v53 = vmul.f32 0.5, %v4036_v47  ;;  %v3880_v10 = vadd.f32 %v3864_v8, %v3839_v48  ;;  %v3822_v35 = vmul.f32 %v7997_v44, %v8096_v5 }
 0x1ea   : > { %4874 = verf.f32 %v4067_v4  ;;  %v4070_v20 = vmul.f32 0.70710677, %v4038_v54  ;;  %v3797_v14 = vadd.f32 %v3781_v6, %v3756_v1  ;;  %v3863_v39 = vmul.f32 %v8016_v38, %v8145_v63 }
 0x1eb   : > { %v4021_v21 = vmul.f32 %v8093_v17, %v4005_v43  ;;  %v4869_v61 = vpop.eup %4868  ;;  %v3992_v25 = vmul.f32 %v3943_v32, %v3880_v10  ;;  %v3702_v22 = vmul.f32 %v7965_v18, %v8018_v62  ;;  %v3743_v47 = vmul.f32 %v7974_v37, %v8049_v41  ;;  %v8174_v32 = vld [vmem:[#allocation2 + $0x10a] sm:$0xff] }
 0x1ec   : > { %v3784_v9 = vmul.f32 %v7986_v23, %v8084_v42  ;;  %v4098_v30 = vadd.f32 1.0, %v4869_v61  ;;  %4876 = verf.f32 %v4070_v20  ;;  %v3838_v16 = vadd.f32 %v3822_v35, %v3797_v14 }
 0x1ed   : > { %v4037_v60 = vadd.f32 %v8108_v11, %v4021_v21  ;;  %v4051_v58 = vmul.f32 0.5, %v4035_v56  ;;  %v4008_v49 = vadd.f32 %v3992_v25, %v7835_v40  ;;  %v3759_v13 = vadd.f32 %v3743_v47, %v3702_v22 }
 0x1ee   : > { %v3825_v62 = vmul.f32 %v7997_v44, %v8130_v0  ;;  %v4871_v8 = vpop.eup %4870  ;;  %v4114_v3 = vmul.f32 %v4098_v30, %v4050_v59  ;;  %v3879_v45 = vadd.f32 %v3863_v39, %v3838_v16  ;;  %v3866_v36 = vmul.f32 %v8016_v38, %v8158_v29  ;;  %v3953_v39 = vpop.permute.xlu1 %3952 }
 0x1ef   : > { %v4069_v2 = vmul.f32 0.70710677, %v4037_v60  ;;  %v4097_v4 = vadd.f32 1.0, %v4871_v8  ;;  %v4024_v48 = vmul.f32 %v8093_v17, %v4008_v49  ;;  %v3800_v43 = vadd.f32 %v3784_v9, %v3759_v13 }
 0x1f0   : > { %v3701_v56 = vmul.f32 %v7965_v18, %v8042_v19  ;;  %4130 = vst [vmem:[%s6892_s7 + $0x88] sm:$0xff] %v4114_v3  ;;  %v3991_v40 = vmul.f32 %v3938_v33, %v3879_v45  ;;  %v3742_v59 = vmul.f32 %v7974_v37, %v8069_v52  ;;  %v3783_v1 = vmul.f32 %v7986_v23, %v8096_v5 }
 0x1f1   : > { %4878 = verf.f32 %v4069_v2  ;;  %v4873_v6 = vpop.eup %4872  ;;  %v4113_v10 = vmul.f32 %v4097_v4, %v4049_v28  ;;  %v4054_v35 = vmul.f32 0.5, %v4038_v54  ;;  %v4040_v20 = vadd.f32 %v8108_v11, %v4024_v48  ;;  %v8502_v4 = vld [vmem:[#allocation12_spill] sm:$0xff] }
 0x1f2   : > { %v3841_v21 = vadd.f32 %v3825_v62, %v3800_v43  ;;  %v4100_v14 = vadd.f32 1.0, %v4873_v6  ;;  %v4007_v19 = vadd.f32 %v3991_v40, %v7873_v50  ;;  %v3758_v61 = vadd.f32 %v3742_v59, %v3701_v56  ;;  %v8192_v62 = vld [vmem:[#allocation2 + $0x122] sm:$0xff]  ;;  %v3948_v43 = vpop.permute.xlu0 %3947 }
 0x1f3   : > { %v3824_v25 = vmul.f32 %v7997_v44, %v8145_v63  ;;  %4129 = vst [vmem:[%s6892_s7 + $0x80] sm:$0xff] %v4113_v10  ;;  %v4072_v47 = vmul.f32 0.70710677, %v4040_v20  ;;  %v3865_v28 = vmul.f32 %v8016_v38, %v8174_v32  ;;  %v3704_v54 = vmul.f32 %v7965_v18, %v8049_v41 }
 0x1f4   : > { %v4875_v22 = vpop.eup %4874  ;;  %v3882_v9 = vadd.f32 %v3866_v36, %v3841_v21  ;;  %v4116_v30 = vmul.f32 %v4100_v14, %v4052_v53  ;;  %v4023_v50 = vmul.f32 %v8093_v17, %v4007_v19  ;;  %v3799_v49 = vadd.f32 %v3783_v1, %v3758_v61 }
 0x1f5   : > { %v4099_v16 = vadd.f32 1.0, %v4875_v22  ;;  %4880 = verf.f32 %v4072_v47  ;;  %v3745_v13 = vmul.f32 %v7974_v37, %v8084_v42  ;;  %v3786_v8 = vmul.f32 %v7986_v23, %v8130_v0 }
 0x1f6   : > { %v3994_v33 = vmul.f32 %v3953_v39, %v3882_v9  ;;  %v4877_v3 = vpop.eup %4876  ;;  %4132 = vst [vmem:[%s6892_s7 + $0x98] sm:$0xff] %v4116_v30  ;;  %v4053_v41 = vmul.f32 0.5, %v4037_v60  ;;  %v4039_v53 = vadd.f32 %v8108_v11, %v4023_v50  ;;  %v3840_v45 = vadd.f32 %v3824_v25, %v3799_v49  ;;  %v8209_v25 = vld [vmem:[#allocation2 + $0x11a] sm:$0xff]  ;;  %v3808_v50 = vld [vmem:[#allocation2 + $0x132] sm:$0xff] }
 0x1f7   : > { %v4115_v2 = vmul.f32 %v4099_v16, %v4051_v58  ;;  %v4102_v36 = vadd.f32 1.0, %v4877_v3  ;;  %v3761_v56 = vadd.f32 %v3745_v13, %v3704_v54  ;;  %v3827_v40 = vmul.f32 %v7997_v44, %v8158_v29  ;;  %v3963_v54 = vpop.permute.xlu1 %3962 }
 0x1f8   : > { %v4010_v48 = vadd.f32 %v3994_v33, %v8502_v4  ;;  %v4071_v59 = vmul.f32 0.70710677, %v4039_v53  ;;  %v3881_v1 = vadd.f32 %v3865_v28, %v3840_v45  ;;  %v3868_v6 = vmul.f32 %v8016_v38, %v8192_v62 }
 0x1f9   : > { %4131 = vst [vmem:[%s6892_s7 + $0x90] sm:$0xff] %v4115_v2  ;;  %v3703_v60 = vmul.f32 %v7965_v18, %v8069_v52  ;;  %v4118_v58 = vmul.f32 %v4102_v36, %v4054_v35  ;;  %v3802_v21 = vadd.f32 %v3786_v8, %v3761_v56  ;;  %v3744_v14 = vmul.f32 %v7974_v37, %v8096_v5 }
 0x1fa   : > { %v4026_v10 = vmul.f32 %v8093_v17, %v4010_v48  ;;  %v4056_v39 = vmul.f32 0.5, %v4040_v20  ;;  %4882 = verf.f32 %v4071_v59  ;;  %v3993_v61 = vmul.f32 %v3948_v43, %v3881_v1  ;;  %v3958_v1 = vpop.permute.xlu0 %3957 }
 0x1fb   : > { %v4879_v19 = vpop.eup %4878  ;;  %v3785_v22 = vmul.f32 %v7986_v23, %v8145_v63  ;;  %4134 = vst [vmem:[%s6892_s7 + $0xa8] sm:$0xff] %v4118_v58  ;;  %v3843_v35 = vadd.f32 %v3827_v40, %v3802_v21  ;;  %v3760_v9 = vadd.f32 %v3744_v14, %v3703_v60  ;;  %v3826_v20 = vmul.f32 %v7997_v44, %v8174_v32 }
 0x1fc   : > { %v4101_v47 = vadd.f32 1.0, %v4879_v19  ;;  %v4042_v52 = vadd.f32 %v8108_v11, %v4026_v10  ;;  %v4009_v28 = vadd.f32 %v3993_v61, %v7952_v34  ;;  %v3706_v30 = vmul.f32 %v7965_v18, %v8084_v42 }
 0x1fd   : > { %v3747_v16 = vmul.f32 %v7974_v37, %v8130_v0  ;;  %v3884_v13 = vadd.f32 %v3868_v6, %v3843_v35  ;;  %v3867_v8 = vmul.f32 %v8016_v38, %v8209_v25  ;;  %v3801_v34 = vadd.f32 %v3785_v22, %v3760_v9  ;;  %v3807_v35 = vld [vmem:[#allocation2 + $0x12a] sm:$0xff] }
 0x1fe   : > { %v4117_v49 = vmul.f32 %v4101_v47, %v4053_v41  ;;  %v4074_v33 = vmul.f32 0.70710677, %v4042_v52  ;;  %v4025_v3 = vmul.f32 %v8093_v17, %v4009_v28  ;;  %v3788_v45 = vmul.f32 %v7986_v23, %v8158_v29  ;;  %v3973_v28 = vpop.permute.xlu1 %3972 }
 0x1ff   : > { %v3763_v2 = vadd.f32 %v3747_v16, %v3706_v30  ;;  %v4881_v36 = vpop.eup %4880  ;;  %v3996_v42 = vmul.f32 %v3963_v54, %v3884_v13  ;;  %v3829_v4 = vmul.f32 %v7997_v44, %v8192_v62  ;;  %v3870_v41 = vmul.f32 %v8016_v38, %v3808_v50 }
 0x200   : > { %4133 = vst [vmem:[%s6892_s7 + $0xa0] sm:$0xff] %v4117_v49  ;;  %4884 = verf.f32 %v4074_v33  ;;  %v4104_v48 = vadd.f32 1.0, %v4881_v36  ;;  %v8232_v43 = vadd.f32 %v8108_v11, %v4025_v3  ;;  %v3842_v56 = vadd.f32 %v3826_v20, %v3801_v34 }
 0x201   : > { %v3804_v40 = vadd.f32 %v3788_v45, %v3763_v2  ;;  %v4012_v59 = vadd.f32 %v3996_v42, %v7967_v51  ;;  %v3705_v6 = vmul.f32 %v7965_v18, %v8096_v5  ;;  %v3746_v60 = vmul.f32 %v7974_v37, %v8145_v63 }
 0x202   : > { %v3787_v58 = vmul.f32 %v7986_v23, %v8174_v32  ;;  %v3540_v10 = vadd.f32 %v8038_v12, %v8128_v26  ;;  %v4120_v21 = vmul.f32 %v4104_v48, %v4056_v39  ;;  %v4073_v14 = vmul.f32 0.70710677, %v8232_v43 }
 0x203   : > { %v3883_v19 = vadd.f32 %v3867_v8, %v3842_v56  ;;  %v4055_v61 = vmul.f32 0.5, %v4039_v53  ;;  %v4028_v51 = vmul.f32 %v8093_v17, %v4012_v59  ;;  %v3845_v22 = vadd.f32 %v3829_v4, %v3804_v40  ;;  %v3968_v4 = vpop.permute.xlu0 %3967 }
 0x204   : > { %v3762_v47 = vadd.f32 %v3746_v60, %v3705_v6  ;;  %v4883_v5 = vpop.eup %4882  ;;  %4136 = vst [vmem:[%s6892_s7 + $0xb8] sm:$0xff] %v4120_v21  ;;  %4886 = verf.f32 %v4073_v14  ;;  %v3828_v54 = vmul.f32 %v7997_v44, %v8209_v25  ;;  %v3708_v12 = vmul.f32 %v7965_v18, %v8130_v0  ;;  %v3848_v6 = vld [vmem:[#allocation2 + $0x13a] sm:$0xff] }
 0x205   : > { %v3995_v9 = vmul.f32 %v3958_v1, %v3883_v19  ;;  %v4103_v26 = vadd.f32 1.0, %v4883_v5  ;;  %v8251_v39 = vadd.f32 %v8108_v11, %v4028_v51  ;;  %v3886_v53 = vadd.f32 %v3870_v41, %v3845_v22 }
 0x206   : > { %v3803_v20 = vadd.f32 %v3787_v58, %v3762_v47  ;;  %v3869_v16 = vmul.f32 %v8016_v38, %v3807_v35  ;;  %v3749_v49 = vmul.f32 %v7974_v37, %v8158_v29  ;;  %v3790_v33 = vmul.f32 %v7986_v23, %v8192_v62 }
 0x207   : > { %v4011_v30 = vadd.f32 %v3995_v9, %v7976_v31  ;;  %v4119_v13 = vmul.f32 %v4103_v26, %v4055_v61  ;;  %v4058_v8 = vmul.f32 0.5, %v4042_v52  ;;  %v4076_v0 = vmul.f32 0.70710677, %v8251_v39  ;;  %v3849_v31 = vld [vmem:[#allocation2 + $0x142] sm:$0xff] }
 0x208   : > { %v3998_v3 = vmul.f32 %v3973_v28, %v3886_v53  ;;  %v3844_v2 = vadd.f32 %v3828_v54, %v3803_v20  ;;  %v3765_v45 = vadd.f32 %v3749_v49, %v3708_v12  ;;  %v3831_v36 = vmul.f32 %v7997_v44, %v3808_v50  ;;  %v3978_v28 = vpop.permute.xlu0 %3977 }
 0x209   : > { %v4027_v34 = vmul.f32 %v8093_v17, %v4011_v30  ;;  %4135 = vst [vmem:[%s6892_s7 + $0xb0] sm:$0xff] %v4119_v13  ;;  %4888 = verf.f32 %v4076_v0  ;;  %v3707_v62 = vmul.f32 %v7965_v18, %v8145_v63  ;;  %v3748_v52 = vmul.f32 %v7974_v37, %v8174_v32 }
 0x20a   : > { %v4885_v42 = vpop.eup %4884  ;;  %v4014_v29 = vadd.f32 %v3998_v3, %v7990_v57  ;;  %v3885_v56 = vadd.f32 %v3869_v16, %v3844_v2  ;;  %v3806_v40 = vadd.f32 %v3790_v33, %v3765_v45  ;;  %v3872_v59 = vmul.f32 %v8016_v38, %v3849_v31 }
 0x20b   : > { %v4106_v41 = vadd.f32 1.0, %v4885_v42  ;;  %v4043_v48 = vadd.f32 %v8108_v11, %v4027_v34  ;;  %v3764_v1 = vadd.f32 %v3748_v52, %v3707_v62  ;;  %v3789_v57 = vmul.f32 %v7986_v23, %v8209_v25  ;;  %v3983_v25 = vpop.permute.xlu1 %3982 }
 0x20c   : > { %v4030_v50 = vmul.f32 %v8093_v17, %v4014_v29  ;;  %v3997_v63 = vmul.f32 %v3968_v4, %v3885_v56  ;;  %v3830_v37 = vmul.f32 %v7997_v44, %v3807_v35  ;;  %v3305_v32 = vadd.f32 %v7915_v55, %v8056_v7 }
 0x20d   : > { %v4122_v60 = vmul.f32 %v4106_v41, %v4058_v8  ;;  %v4075_v18 = vmul.f32 0.70710677, %v4043_v48  ;;  %v3847_v21 = vadd.f32 %v3831_v36, %v3806_v40  ;;  %v3805_v14 = vadd.f32 %v3789_v57, %v3764_v1 }
 0x20e   : > { %v4046_v58 = vadd.f32 %v8108_v11, %v4030_v50  ;;  %v4887_v19 = vpop.eup %4886  ;;  %v3652_v61 = vmul.f32 %v8029_v15, %v3540_v10  ;;  %v4013_v23 = vadd.f32 %v3997_v63, %v8027_v27  ;;  %v3871_v51 = vmul.f32 %v8016_v38, %v3848_v6  ;;  %v8503_v15 = vld [vmem:[#allocation24_spill] sm:$0xff] }
 0x20f   : > { %4138 = vst [vmem:[%s6892_s7 + $0xc8] sm:$0xff] %v4122_v60  ;;  %4890 = verf.f32 %v4075_v18  ;;  %v4057_v22 = vmul.f32 0.5, %v8232_v43  ;;  %v4105_v44 = vadd.f32 1.0, %v4887_v19  ;;  %v3888_v55 = vadd.f32 %v3872_v59, %v3847_v21 }
 0x210   : > { %v4078_v47 = vmul.f32 0.70710677, %v4046_v58  ;;  %v3669_v7 = vadd.f32 %v8065_v46, %v8035_v24  ;;  %v4029_v35 = vmul.f32 %v8093_v17, %v4013_v23  ;;  %v3846_v5 = vadd.f32 %v3830_v37, %v3805_v14 }
 0x211   : > { %v3321_v10 = vadd.f32 %v3305_v32, %v8503_v15  ;;  %v4121_v9 = vmul.f32 %v4105_v44, %v4057_v22  ;;  %v4000_v27 = vmul.f32 %v3983_v25, %v3888_v55  ;;  %v4060_v53 = vmul.f32 0.5, %v8251_v39 }
 0x212   : > { %4892 = verf.f32 %v4078_v47  ;;  %v4045_v38 = vadd.f32 %v8108_v11, %v4029_v35  ;;  %v3887_v43 = vadd.f32 %v3871_v51, %v3846_v5  ;;  %v4059_v0 = vmul.f32 0.5, %v4043_v48 }
 0x213   : > { %v4889_v54 = vpop.eup %4888  ;;  %v3668_v12 = vadd.f32 %v3652_v61, %v3321_v10  ;;  %4137 = vst [vmem:[%s6892_s7 + $0xc0] sm:$0xff] %v4121_v9  ;;  %v4016_v26 = vadd.f32 %v4000_v27, %v3669_v7  ;;  %v4062_v36 = vmul.f32 0.5, %v4046_v58 }
 0x214   : > { %v4108_v24 = vadd.f32 1.0, %v4889_v54  ;;  %v4077_v46 = vmul.f32 0.70710677, %v4045_v38  ;;  %v3999_v20 = vmul.f32 %v3978_v28, %v3887_v43 }
 0x215   : > { %v4032_v30 = vmul.f32 %v8093_v17, %v4016_v26 }
 0x216   : > { %v4124_v16 = vmul.f32 %v4108_v24, %v4060_v53  ;;  %4894 = verf.f32 %v4077_v46  ;;  %v4015_v49 = vadd.f32 %v3999_v20, %v3668_v12 }
 0x217   : > { %v4048_v33 = vadd.f32 %v8108_v11, %v4032_v30 }
 0x218   : > { %4140 = vst [vmem:[%s6892_s7 + $0xd8] sm:$0xff] %v4124_v16  ;;  %v4031_v8 = vmul.f32 %v8093_v17, %v4015_v49  ;;  %v4061_v17 = vmul.f32 0.5, %v4045_v38 }
 0x219   : > { %v4891_v13 = vpop.eup %4890  ;;  %v4080_v34 = vmul.f32 0.70710677, %v4048_v33 }
 0x21a   : > { %v4107_v3 = vadd.f32 1.0, %v4891_v13  ;;  %v4047_v39 = vadd.f32 %v8108_v11, %v4031_v8  ;;  %v4064_v11 = vmul.f32 0.5, %v4048_v33 }
 0x21b   : > { %4896 = verf.f32 %v4080_v34 }
 0x21c   : > { %v4893_v2 = vpop.eup %4892  ;;  %v4123_v45 = vmul.f32 %v4107_v3, %v4059_v0  ;;  %v4079_v42 = vmul.f32 0.70710677, %v4047_v39  ;;  %v4063_v50 = vmul.f32 0.5, %v4047_v39 }
 0x21d   : > { %v4110_v31 = vadd.f32 1.0, %v4893_v2 }
 0x21e   : > { %4139 = vst [vmem:[%s6892_s7 + $0xd0] sm:$0xff] %v4123_v45  ;;  %4898 = verf.f32 %v4079_v42 }
 0x21f   : > { %v4126_v29 = vmul.f32 %v4110_v31, %v4062_v36 }
 0x220   : > { %v4895_v4 = vpop.eup %4894 }
 0x221   : > { %4142 = vst [vmem:[%s6892_s7 + $0xe8] sm:$0xff] %v4126_v29  ;;  %v4109_v62 = vadd.f32 1.0, %v4895_v4 }
 0x223   : > { %v4125_v52 = vmul.f32 %v4109_v62, %v4061_v17 }
 0x225   : > { %v4897_v41 = vpop.eup %4896  ;;  %4141 = vst [vmem:[%s6892_s7 + $0xe0] sm:$0xff] %v4125_v52 }
 0x226   : > { %v4112_v48 = vadd.f32 1.0, %v4897_v41 }
 0x227   : > { %4151 = sbr.rel (!%p5077_p3) target bundleno = 575 (0x23f), region = 68 }
 0x228   : > { %v4899_v56 = vpop.eup %4898  ;;  %v4128_v40 = vmul.f32 %v4112_v48, %v4064_v11 }
 0x229   : > { %v4111_v59 = vadd.f32 1.0, %v4899_v56 }
 0x22a   : > { %4144 = vst [vmem:[%s6892_s7 + $0xf8] sm:$0xff] %v4128_v40 }
 0x22b   : > { %v4127_v1 = vmul.f32 %v4111_v59, %v4063_v50 }
 0x22d   : > { %4143 = vst [vmem:[%s6892_s7 + $0xf0] sm:$0xff] %v4127_v1 }
 0x22e LB: >> { %v4288_v57 = vld [vmem:[%s6892_s7] sm:$0xff]  ;;  %v4290_v6 = vld [vmem:[%s6892_s7 + $0x8] sm:$0xff]  ;;  %v4292_v60 = vld [vmem:[%s6892_s7 + $0x10] sm:$0xff]  ;;  %s4282_s22 = sadd.s32 1, %s4996_s22   ;;  %s4996_s22 = sphi %s8307_s22, %s4282_s22  }
 0x22f   : >> { %4289 = vst [vmem:[%s8305_s21] sm:$0xff] %v4288_v57  ;;  %4291 = vst [vmem:[%s8305_s21 + $0x8] sm:$0xff] %v4290_v6  ;;  %v4294_v18 = vld [vmem:[%s6892_s7 + $0x18] sm:$0xff]  ;;  %v4296_v63 = vld [vmem:[%s6892_s7 + $0x20] sm:$0xff]  ;;  %p4281_p9 = scmp.ge.s32.totalorder %s4282_s22, 1 }
 0x230   : >> { %4293 = vst [vmem:[%s8305_s21 + $0x10] sm:$0xff] %v4292_v60  ;;  %v4298_v37 = vld [vmem:[%s6892_s7 + $0x28] sm:$0xff]  ;;  %4295 = vst [vmem:[%s8305_s21 + $0x18] sm:$0xff] %v4294_v18  ;;  %v4300_v32 = vld [vmem:[%s6892_s7 + $0x30] sm:$0xff] }
 0x231   : >> { %4297 = vst [vmem:[%s8305_s21 + $0x20] sm:$0xff] %v4296_v63  ;;  %4299 = vst [vmem:[%s8305_s21 + $0x28] sm:$0xff] %v4298_v37  ;;  %v4302_v58 = vld [vmem:[%s6892_s7 + $0x38] sm:$0xff]  ;;  %v4304_v21 = vld [vmem:[%s6892_s7 + $0x40] sm:$0xff] }
 0x232   : >> { %4301 = vst [vmem:[%s8305_s21 + $0x30] sm:$0xff] %v4300_v32  ;;  %4303 = vst [vmem:[%s8305_s21 + $0x38] sm:$0xff] %v4302_v58  ;;  %v4306_v14 = vld [vmem:[%s6892_s7 + $0x48] sm:$0xff]  ;;  %v4308_v19 = vld [vmem:[%s6892_s7 + $0x50] sm:$0xff] }
 0x233   : >> { %4305 = vst [vmem:[%s8305_s21 + $0x40] sm:$0xff] %v4304_v21  ;;  %v4310_v61 = vld [vmem:[%s6892_s7 + $0x58] sm:$0xff]  ;;  %4307 = vst [vmem:[%s8305_s21 + $0x48] sm:$0xff] %v4306_v14  ;;  %v4312_v23 = vld [vmem:[%s6892_s7 + $0x60] sm:$0xff] }
 0x234   : >> { %4309 = vst [vmem:[%s8305_s21 + $0x50] sm:$0xff] %v4308_v19  ;;  %4311 = vst [vmem:[%s8305_s21 + $0x58] sm:$0xff] %v4310_v61  ;;  %v4314_v25 = vld [vmem:[%s6892_s7 + $0x68] sm:$0xff]  ;;  %v4316_v51 = vld [vmem:[%s6892_s7 + $0x70] sm:$0xff] }
 0x235   : >> { %4313 = vst [vmem:[%s8305_s21 + $0x60] sm:$0xff] %v4312_v23  ;;  %4315 = vst [vmem:[%s8305_s21 + $0x68] sm:$0xff] %v4314_v25  ;;  %v4318_v22 = vld [vmem:[%s6892_s7 + $0x78] sm:$0xff]  ;;  %v4320_v44 = vld [vmem:[%s6892_s7 + $0x80] sm:$0xff] }
 0x236   : >> { %4317 = vst [vmem:[%s8305_s21 + $0x70] sm:$0xff] %v4316_v51  ;;  %v4322_v47 = vld [vmem:[%s6892_s7 + $0x88] sm:$0xff]  ;;  %4319 = vst [vmem:[%s8305_s21 + $0x78] sm:$0xff] %v4318_v22  ;;  %v4324_v55 = vld [vmem:[%s6892_s7 + $0x90] sm:$0xff] }
 0x237   : >> { %4321 = vst [vmem:[%s8305_s21 + $0x80] sm:$0xff] %v4320_v44  ;;  %4323 = vst [vmem:[%s8305_s21 + $0x88] sm:$0xff] %v4322_v47  ;;  %v4326_v7 = vld [vmem:[%s6892_s7 + $0x98] sm:$0xff]  ;;  %v4328_v35 = vld [vmem:[%s6892_s7 + $0xa0] sm:$0xff] }
 0x238   : >> { %4325 = vst [vmem:[%s8305_s21 + $0x90] sm:$0xff] %v4324_v55  ;;  %4327 = vst [vmem:[%s8305_s21 + $0x98] sm:$0xff] %v4326_v7  ;;  %v4330_v5 = vld [vmem:[%s6892_s7 + $0xa8] sm:$0xff]  ;;  %v4332_v15 = vld [vmem:[%s6892_s7 + $0xb0] sm:$0xff]  ;;  %4284 = sbr.rel (!%p4281_p9) target bundleno = 558 (0x22e), region = 187 }
 0x239   : >> { %4329 = vst [vmem:[%s8305_s21 + $0xa0] sm:$0xff] %v4328_v35  ;;  %v4334_v10 = vld [vmem:[%s6892_s7 + $0xb8] sm:$0xff]  ;;  %4331 = vst [vmem:[%s8305_s21 + $0xa8] sm:$0xff] %v4330_v5  ;;  %v4336_v9 = vld [vmem:[%s6892_s7 + $0xc0] sm:$0xff] }
 0x23a   : >> { %4333 = vst [vmem:[%s8305_s21 + $0xb0] sm:$0xff] %v4332_v15  ;;  %4335 = vst [vmem:[%s8305_s21 + $0xb8] sm:$0xff] %v4334_v10  ;;  %v4338_v27 = vld [vmem:[%s6892_s7 + $0xc8] sm:$0xff]  ;;  %v4340_v28 = vld [vmem:[%s6892_s7 + $0xd0] sm:$0xff] }
 0x23b   : >> { %4337 = vst [vmem:[%s8305_s21 + $0xc0] sm:$0xff] %v4336_v9  ;;  %4339 = vst [vmem:[%s8305_s21 + $0xc8] sm:$0xff] %v4338_v27  ;;  %v4342_v38 = vld [vmem:[%s6892_s7 + $0xd8] sm:$0xff]  ;;  %v4344_v43 = vld [vmem:[%s6892_s7 + $0xe0] sm:$0xff] }
 0x23c   : >> { %4341 = vst [vmem:[%s8305_s21 + $0xd0] sm:$0xff] %v4340_v28  ;;  %v4346_v54 = vld [vmem:[%s6892_s7 + $0xe8] sm:$0xff]  ;;  %4343 = vst [vmem:[%s8305_s21 + $0xd8] sm:$0xff] %v4342_v38  ;;  %v4348_v12 = vld [vmem:[%s6892_s7 + $0xf0] sm:$0xff] }
 0x23d   : >> { %4345 = vst [vmem:[%s8305_s21 + $0xe0] sm:$0xff] %v4344_v43  ;;  %4347 = vst [vmem:[%s8305_s21 + $0xe8] sm:$0xff] %v4346_v54  ;;  %v4350_v26 = vld [vmem:[%s6892_s7 + $0xf8] sm:$0xff] }
 0x23e   : >> { %4349 = vst [vmem:[%s8305_s21 + $0xf0] sm:$0xff] %v4348_v12  ;;  %4351 = vst [vmem:[%s8305_s21 + $0xf8] sm:$0xff] %v4350_v26 }
 0x23f PF: > { %s18_s29 = sadd.s32 1, %s4992_s29   ;;  %s8504_s26 = smov %s4980_s2 }
 0x240   : > { %p15_p10 = scmp.ge.s32.totalorder %s18_s29, 4   ;;  %s8505_s2 = smov %s5086_s12 }
 0x241   : > { %s8506_s27 = smov %s4988_s28  ;;  %s8507_s28 = smov %s8509_s30 }
 0x242   :  { %17 = sbr.rel (!%p15_p10) target bundleno = 3 (0x3), region = 209 }

</bundles_post_ra>
